<compile_context>
chip_gen: v7x
topology: tpu7x:2x2x1
jax: 0.10.0
libtpu: 0.0.40
codegen_flags: <defaults>
</compile_context>

<pallas_src>
import functools

import jax
import jax.numpy as jnp
from jax.experimental import pallas as pl
from jax.experimental.pallas import tpu as pltpu

# ----------------------------- small config ---------------------------------
L1, L2, L3 = 8, 16, 32          # short / middle / long kernel sizes
S = L1 // 2                     # encoder stride
N_ENC = 16                      # encoder_out_channels
STEM = [16, 32]                 # stem_channels
SPK = 16                        # speaker_channels
NSPK = 10                       # num_speakers
TCN_K = 3                       # tcn_kernel_size
TCN_BLOCKS = 2                  # tcn_num_blocks (scaled down from 8)
NUM_STACKS = 4                  # fixed by the module
EPS = 1e-5


def _round_up(x, m):
    return (x + m - 1) // m * m


def _row_grid(M):
    """Single row tile up to 1024 rows; split only beyond that."""
    Mp8 = _round_up(max(M, 1), 8)
    tm = min(1024, Mp8)
    Mp = _round_up(Mp8, tm)
    return Mp, tm


def _mosaic_params(sem, footprint_bytes):
    limit = int(min(48 * 2**20, max(32 * 2**20, 4 * footprint_bytes)))
    return pltpu.CompilerParams(dimension_semantics=sem,
                                vmem_limit_bytes=limit)


# ----------------------------- Pallas kernels -------------------------------
def _matmul_kernel(*refs, act, has_bias):
    """o = act(x @ w [+ b]); act in {none, relu, prelu(channel-row alpha)}."""
    x_ref, w_ref = refs[0], refs[1]
    o_ref = refs[-1]
    y = jnp.dot(x_ref[...], w_ref[...], preferred_element_type=jnp.float32)
    idx = 2
    if has_bias:
        y = y + refs[idx][...]
        idx += 1
    if act == "relu":
        y = jnp.maximum(y, 0.0)
    elif act == "prelu":
        y = jnp.where(y >= 0.0, y, refs[idx][...] * y)
    o_ref[...] = y


def pl_matmul(x, w, b=None, act="none", alpha=None):
    """y = act(x @ w + b); x:[M,K], w:[K,N].  Rows tiled, K/N full-extent."""
    M, K = x.shape
    N = w.shape[1]
    Mp, tm = _row_grid(M)
    xp = x if Mp == M else jnp.pad(x, ((0, Mp - M), (0, 0)))
    operands = [xp, w]
    in_specs = [pl.BlockSpec((tm, K), lambda i: (i, 0)),
                pl.BlockSpec((K, N), lambda i: (0, 0))]
    if b is not None:
        operands.append(jnp.reshape(b, (1, N)))
        in_specs.append(pl.BlockSpec((1, N), lambda i: (0, 0)))
    if act == "prelu":
        operands.append(jnp.reshape(alpha, (1, N)))
        in_specs.append(pl.BlockSpec((1, N), lambda i: (0, 0)))
    kernel = functools.partial(_matmul_kernel, act=act, has_bias=b is not None)
    footprint = 4 * (2 * tm * (K + N) + K * N + 2 * N)
    out = pl.pallas_call(
        kernel,
        out_shape=jax.ShapeDtypeStruct((Mp, N), jnp.float32),
        grid_spec=pltpu.PrefetchScalarGridSpec(
            num_scalar_prefetch=0,
            grid=(Mp // tm,),
            in_specs=in_specs,
            out_specs=pl.BlockSpec((tm, N), lambda i: (i, 0)),
        ),
        compiler_params=_mosaic_params(("parallel",), footprint),
        cost_estimate=pl.CostEstimate(
            flops=2 * Mp * K * N, transcendentals=0,
            bytes_accessed=4 * (Mp * K + K * N + Mp * N + 2 * N)),
    )(*operands)
    return out[:M]


def _stem_kernel(x_ref, g_ref, b_ref, w_ref, bias_ref, o_ref):
    """Fused channel-wise LayerNorm (over C per frame) + 1x1 conv."""
    x = x_ref[...]
    mean = jnp.mean(x, axis=-1, keepdims=True)
    var = jnp.mean(jnp.square(x - mean), axis=-1, keepdims=True)
    xn = (x - mean) * jax.lax.rsqrt(var + EPS) * g_ref[...] + b_ref[...]
    o_ref[...] = jnp.dot(xn, w_ref[...],
                         preferred_element_type=jnp.float32) + bias_ref[...]


def pl_stem(x2d, g, b, w, bias):
    R, C = x2d.shape
    N = w.shape[1]
    Mp, tm = _row_grid(R)
    if Mp != R:
        x2d = jnp.pad(x2d, ((0, Mp - R), (0, 0)))
    footprint = 4 * (2 * tm * (C + N) + C * N + 2 * C + N)
    out = pl.pallas_call(
        _stem_kernel,
        out_shape=jax.ShapeDtypeStruct((Mp, N), jnp.float32),
        grid_spec=pltpu.PrefetchScalarGridSpec(
            num_scalar_prefetch=0,
            grid=(Mp // tm,),
            in_specs=[
                pl.BlockSpec((tm, C), lambda i: (i, 0)),
                pl.BlockSpec((1, C), lambda i: (0, 0)),
                pl.BlockSpec((1, C), lambda i: (0, 0)),
                pl.BlockSpec((C, N), lambda i: (0, 0)),
                pl.BlockSpec((1, N), lambda i: (0, 0)),
            ],
            out_specs=pl.BlockSpec((tm, N), lambda i: (i, 0)),
        ),
        compiler_params=_mosaic_params(("parallel",), footprint),
        cost_estimate=pl.CostEstimate(
            flops=2 * Mp * C * N + 8 * Mp * C, transcendentals=Mp,
            bytes_accessed=4 * (Mp * (C + N) + C * N + 3 * C + N)),
    )(x2d, g, b, w, bias)
    return out[:R]


def _mask_decode_kernel(x_ref, e_ref, wm_ref, bm_ref, wd_ref, o_ref):
    """mask = ReLU(x @ Wm + bm);  o = (enc * mask) @ Wd (block-diag decoder)."""
    m = jnp.dot(x_ref[...], wm_ref[...],
                preferred_element_type=jnp.float32) + bm_ref[...]
    m = jnp.maximum(m, 0.0)
    o_ref[...] = jnp.dot(m * e_ref[...], wd_ref[...],
                         preferred_element_type=jnp.float32)


def pl_mask_decode(x2d, enc2d, wm, bm, wd):
    R, C0 = x2d.shape
    CE = enc2d.shape[1]
    NL = wd.shape[1]
    Mp, tm = _row_grid(R)
    if Mp != R:
        x2d = jnp.pad(x2d, ((0, Mp - R), (0, 0)))
        enc2d = jnp.pad(enc2d, ((0, Mp - R), (0, 0)))
    footprint = 4 * (2 * tm * (C0 + CE + NL) + C0 * CE + CE * NL + CE)
    out = pl.pallas_call(
        _mask_decode_kernel,
        out_shape=jax.ShapeDtypeStruct((Mp, NL), jnp.float32),
        grid_spec=pltpu.PrefetchScalarGridSpec(
            num_scalar_prefetch=0,
            grid=(Mp // tm,),
            in_specs=[
                pl.BlockSpec((tm, C0), lambda i: (i, 0)),
                pl.BlockSpec((tm, CE), lambda i: (i, 0)),
                pl.BlockSpec((C0, CE), lambda i: (0, 0)),
                pl.BlockSpec((1, CE), lambda i: (0, 0)),
                pl.BlockSpec((CE, NL), lambda i: (0, 0)),
            ],
            out_specs=pl.BlockSpec((tm, NL), lambda i: (i, 0)),
        ),
        compiler_params=_mosaic_params(("parallel",), footprint),
        cost_estimate=pl.CostEstimate(
            flops=2 * Mp * C0 * CE + 2 * Mp * CE * NL, transcendentals=0,
            bytes_accessed=4 * (Mp * (C0 + CE + NL) + C0 * CE + CE * NL)),
    )(x2d, enc2d, wm, bm, wd)
    return out[:R]


def _resnet_kernel(x_ref, w1_ref, b1_ref, a1_ref, w2_ref, b2_ref, a2_ref,
                   *rest, T_out, has_down):
    """Whole ResnetBlock (convs + folded BN + PReLUs + residual + MaxPool3)."""
    if has_down:
        wd_ref, o_ref, buf_ref = rest
    else:
        o_ref, buf_ref = rest
    x = x_ref[...]                                            # [Tpi, Cin]
    h = jnp.dot(x, w1_ref[...], preferred_element_type=jnp.float32) + b1_ref[...]
    h = jnp.where(h >= 0.0, h, a1_ref[...] * h)               # PReLU
    h = jnp.dot(h, w2_ref[...], preferred_element_type=jnp.float32) + b2_ref[...]
    res = (jnp.dot(x, wd_ref[...], preferred_element_type=jnp.float32)
           if has_down else x)
    y = h + res
    y = jnp.where(y >= 0.0, y, a2_ref[...] * y)               # PReLU
    # MaxPool1d(3): aligned store to scratch, then three stride-3 row loads.
    buf_ref[0:x.shape[0], :] = y
    Tpo = o_ref.shape[0]
    m = jnp.maximum(jnp.maximum(buf_ref[pl.ds(0, Tpo, stride=3), :],
                                buf_ref[pl.ds(1, Tpo, stride=3), :]),
                    buf_ref[pl.ds(2, Tpo, stride=3), :])
    tids = jax.lax.broadcasted_iota(jnp.int32, (Tpo, 1), 0)
    o_ref[...] = jnp.where(tids < T_out, m, 0.0)              # zero pad rows


def pl_resnet_block(x, bp, t_in):
    """x:[B,Tpi,Cin] (pad rows zero, t_in valid) -> ([B,Tpo,Cout], t_in//3)."""
    B, Tpi, Cin = x.shape
    Cout = bp["w2"].shape[1]
    t_out = t_in // 3
    Tpo = _round_up(max(t_out, 1), 8)
    buf_rows = _round_up(max(Tpi, 3 * Tpo), 8)
    has_down = "wd" in bp
    kernel = functools.partial(_resnet_kernel, T_out=t_out, has_down=has_down)
    full2 = lambda b: (0, 0)
    operands = [x, bp["w1"], bp["b1"], bp["a1"], bp["w2"], bp["b2"], bp["a2"]]
    in_specs = [pl.BlockSpec((None, Tpi, Cin), lambda b: (b, 0, 0)),
                pl.BlockSpec((Cin, Cout), full2),
                pl.BlockSpec((1, Cout), full2),
                pl.BlockSpec((1, Cout), full2),
                pl.BlockSpec((Cout, Cout), full2),
                pl.BlockSpec((1, Cout), full2),
                pl.BlockSpec((1, Cout), full2)]
    if has_down:
        operands.append(bp["wd"])
        in_specs.append(pl.BlockSpec((Cin, Cout), full2))
    footprint = 4 * (2 * Tpi * Cin + 2 * Tpo * Cout + buf_rows * Cout
                     + 3 * Cin * Cout + 4 * Cout)
    flops = B * (2 * Tpi * Cin * Cout + 2 * Tpi * Cout * Cout
                 + (2 * Tpi * Cin * Cout if has_down else 0) + 8 * Tpi * Cout)
    out = pl.pallas_call(
        kernel,
        out_shape=jax.ShapeDtypeStruct((B, Tpo, Cout), jnp.float32),
        grid_spec=pltpu.PrefetchScalarGridSpec(
            num_scalar_prefetch=0,
            grid=(B,),
            in_specs=in_specs,
            out_specs=pl.BlockSpec((None, Tpo, Cout), lambda b: (b, 0, 0)),
            scratch_shapes=[pltpu.VMEM((buf_rows, Cout), jnp.float32)],
        ),
        compiler_params=_mosaic_params(("parallel",), footprint),
        cost_estimate=pl.CostEstimate(
            flops=flops, transcendentals=0,
            bytes_accessed=4 * B * (Tpi * Cin + Tpo * Cout)
                           + 4 * (3 * Cin * Cout + 4 * Cout)),
    )(*operands)
    return out, t_out


def _tcn_all_kernel(x_ref, sb_ref, w_in_ref, b_in_ref, a1_ref, g1_ref, be1_ref,
                    w_d_ref, b_d_ref, a2_ref, g2_ref, be2_ref,
                    w_out_ref, b_out_ref, o_ref, *, T, K, dils):
    """All TCN blocks (all stacks) for one batch element, resident on-chip."""
    Tp = x_ref.shape[0]
    H = g1_ref.shape[-1]
    inv = 1.0 / float(T * H)
    tids = jax.lax.broadcasted_iota(jnp.int32, (Tp, 1), 0)
    valid = tids < T                                         # (Tp,1) column
    x = x_ref[...]                                           # [Tp, C0]
    for blk, d in enumerate(dils):
        # 1x1 conv in (speaker concat folded into per-batch bias row) + PReLU
        y = jnp.dot(x, w_in_ref[blk], preferred_element_type=jnp.float32)
        y = y + sb_ref[blk] + b_in_ref[blk]
        y = jnp.where(y >= 0.0, y, a1_ref[blk] * y)
        # gLN, single pass over the valid (T, H) region
        ym = jnp.where(valid, y, 0.0)
        mean = jnp.sum(ym) * inv
        var = jnp.maximum(jnp.sum(ym * ym) * inv - mean * mean, 0.0)
        y = (y - mean) * jax.lax.rsqrt(var + EPS) * g1_ref[blk] + be1_ref[blk]
        y = jnp.where(valid, y, 0.0)          # zero time-pad rows (conv halo)
        # depthwise dilated conv ('same') via XLU sublane rolls + halo masks
        wd = w_d_ref[blk]                                    # [K, H]
        pad = d * (K - 1) // 2
        acc = jnp.zeros_like(y)
        for k in range(K):
            s = k * d - pad
            if s == 0:
                contrib = y
            else:
                contrib = pltpu.roll(y, shift=(-s) % Tp, axis=0)
                keep = jnp.logical_and(tids + s >= 0, tids + s < Tp)
                contrib = jnp.where(keep, contrib, 0.0)
            acc = acc + contrib * wd[k:k + 1, :]
        y = acc + b_d_ref[blk]
        y = jnp.where(y >= 0.0, y, a2_ref[blk] * y)          # PReLU
        # second gLN, single pass
        ym = jnp.where(valid, y, 0.0)
        mean = jnp.sum(ym) * inv
        var = jnp.maximum(jnp.sum(ym * ym) * inv - mean * mean, 0.0)
        y = (y - mean) * jax.lax.rsqrt(var + EPS) * g2_ref[blk] + be2_ref[blk]
        # 1x1 conv out + residual; keep time-pad rows exactly zero
        y = jnp.dot(y, w_out_ref[blk], preferred_element_type=jnp.float32)
        y = y + b_out_ref[blk]
        x = jnp.where(valid, x + y, 0.0)
    o_ref[...] = x


def pl_tcn_all(x, sb, tw, t_valid, dils):
    """x:[B,Tp,C0] (Tp mult of 8, pad rows zero), sb:[B,NBLK,1,H]."""
    B, Tp, C0 = x.shape
    NBLK, _, H = tw["w_in"].shape
    K = tw["w_d"].shape[1]
    kernel = functools.partial(_tcn_all_kernel, T=t_valid, K=K,
                               dils=tuple(dils))
    full3 = lambda b: (0, 0, 0)
    weight_bytes = 4 * NBLK * (C0 * H + H * C0 + K * H + 8 * H + C0)
    footprint = 4 * (4 * Tp * C0 + 8 * Tp * H + 2 * NBLK * H) + weight_bytes
    flops = B * NBLK * (4 * Tp * C0 * H + 2 * K * Tp * H + 30 * Tp * H)
    return pl.pallas_call(
        kernel,
        out_shape=jax.ShapeDtypeStruct((B, Tp, C0), jnp.float32),
        grid_spec=pltpu.PrefetchScalarGridSpec(
            num_scalar_prefetch=0,
            grid=(B,),
            in_specs=[
                pl.BlockSpec((None, Tp, C0), lambda b: (b, 0, 0)),       # x
                pl.BlockSpec((None, NBLK, 1, H), lambda b: (b, 0, 0, 0)),  # spk
                pl.BlockSpec((NBLK, C0, H), full3),                      # w_in
                pl.BlockSpec((NBLK, 1, H), full3),                       # b_in
                pl.BlockSpec((NBLK, 1, H), full3),                       # a1
                pl.BlockSpec((NBLK, 1, H), full3),                       # g1
                pl.BlockSpec((NBLK, 1, H), full3),                       # be1
                pl.BlockSpec((NBLK, K, H), full3),                       # w_d
                pl.BlockSpec((NBLK, 1, H), full3),                       # b_d
                pl.BlockSpec((NBLK, 1, H), full3),                       # a2
                pl.BlockSpec((NBLK, 1, H), full3),                       # g2
                pl.BlockSpec((NBLK, 1, H), full3),                       # be2
                pl.BlockSpec((NBLK, H, C0), full3),                      # w_out
                pl.BlockSpec((NBLK, 1, C0), full3),                      # b_out
            ],
            out_specs=pl.BlockSpec((None, Tp, C0), lambda b: (b, 0, 0)),
        ),
        compiler_params=_mosaic_params(("parallel",), footprint),
        cost_estimate=pl.CostEstimate(
            flops=flops, transcendentals=2 * B * NBLK,
            bytes_accessed=4 * (2 * B * Tp * C0 + B * NBLK * H) + weight_bytes),
    )(x, sb, tw["w_in"], tw["b_in"], tw["a1"], tw["g1"], tw["be1"],
      tw["w_d"], tw["b_d"], tw["a2"], tw["g2"], tw["be2"],
      tw["w_out"], tw["b_out"])


# ----------------------------- model pieces ---------------------------------
def encode(pp, sig):
    """Fused 3-scale strided conv encoder: stride-S slab framing + one matmul."""
    B, T = sig.shape
    T1 = (T - L1) // S + 1
    need = (T1 - 1) * S + L3
    xp = jnp.pad(sig.astype(jnp.float32), ((0, 0), (0, max(0, need - T))))
    # im2col via L3//S stride-S slab reshapes (no XLA gather)
    slabs = [xp[:, j * S: j * S + T1 * S].reshape(B, T1, S)
             for j in range(L3 // S)]
    frames = jnp.concatenate(slabs, axis=-1).reshape(B * T1, L3)
    y = pl_matmul(frames, pp["enc_w"], pp["enc_b"], act="relu")
    return y.reshape(B, T1, 3 * N_ENC)


def _overlap_add(Y, Lk):
    """ConvTranspose1d(stride=S) overlap-add via Lk//S shifted padded adds."""
    B, T1, _ = Y.shape
    T_out = (T1 - 1) * S + Lk
    out = jnp.zeros((B, T_out), jnp.float32)
    for j in range(Lk // S):
        slab = Y[:, :, j * S:(j + 1) * S].reshape(B, T1 * S)
        out = out + jnp.pad(slab, ((0, 0), (j * S, Lk - (j + 1) * S)))
    return out


def spex_plus_forward(pp, mix, reference, reference_length):
    B, T_mix = mix.shape

    enc_mix = encode(pp, mix)                         # [B, T1, 3*N_ENC]
    enc_ref = encode(pp, reference)                   # [B, T1r, 3*N_ENC]
    T1, T1r = enc_mix.shape[1], enc_ref.shape[1]

    # mix stem: fused cLN + 1x1 conv
    x = pl_stem(enc_mix.reshape(B * T1, 3 * N_ENC),
                pp["mix_ln_g"], pp["mix_ln_b"], pp["mix_w"], pp["mix_b"])
    x = x.reshape(B, T1, STEM[0])

    # speaker backbone: fused cLN + 1x1, then 3 fused ResnetBlock kernels
    r = pl_stem(enc_ref.reshape(B * T1r, 3 * N_ENC),
                pp["spk_ln_g"], pp["spk_ln_b"], pp["spk_w0"], pp["spk_b0"])
    r = r.reshape(B, T1r, STEM[0])
    t_valid = T1r
    Tp_r = _round_up(T1r, 8)
    r = jnp.pad(r, ((0, 0), (0, Tp_r - T1r), (0, 0)))
    for bp in pp["spk_res"]:
        r, t_valid = pl_resnet_block(r, bp, t_valid)
    Tr = t_valid
    # final 1x1 speaker conv folded into the temporal sum (tiny: plain jnp)
    # NOTE: matches the reference module exactly (sum over ALL frames divided
    # by the nominal post-encoder length; no masking of padded ragged refs).
    new_len = ((((reference_length - L1) // S + 1) // 3 // 3 // 3)
               .astype(jnp.float32))
    spk_sum = jnp.sum(r, axis=1)                      # pad rows are zero
    spk_emb = (spk_sum @ pp["spk_w1"] + float(Tr) * pp["spk_b1"]) \
        / new_len[:, None]                            # [B, SPK]

    # speaker projections for the first block of every stack (tiny, jnp)
    H = STEM[1]
    spk_proj = spk_emb @ pp["tcn_spk_w"]              # [B, NUM_STACKS*H]
    rows = []
    for si in range(NUM_STACKS):
        for bi in range(TCN_BLOCKS):
            rows.append(spk_proj[:, si * H:(si + 1) * H] if bi == 0
                        else jnp.zeros((B, H), jnp.float32))
    sb = jnp.stack(rows, axis=1)[:, :, None, :]       # [B, NBLK, 1, H]
    dils = [2 ** bi for _ in range(NUM_STACKS) for bi in range(TCN_BLOCKS)]

    # all TCN stacks / blocks in ONE fused Pallas kernel (gridded over B)
    Tp = _round_up(T1, 8)
    x = jnp.pad(x, ((0, 0), (0, Tp - T1), (0, 0)))
    x = pl_tcn_all(x, sb, pp["tcn"], t_valid=T1, dils=dils)
    x = x[:, :T1, :]

    # fused mask heads + (enc * mask) + block-diagonal decoder matmul
    dec = pl_mask_decode(x.reshape(B * T1, STEM[0]),
                         enc_mix.reshape(B * T1, 3 * N_ENC),
                         pp["mask_w"], pp["mask_b"], pp["dec_w"])
    dec = dec.reshape(B, T1, L1 + L2 + L3)

    # per-scale overlap-add (ConvTranspose1d) + scalar output bias
    outs = []
    off = 0
    for Lk, bk in zip((L1, L2, L3), pp["dec_b"]):
        outs.append(_overlap_add(dec[:, :, off:off + Lk], Lk) + bk)
        off += Lk
    mix_short, mix_middle, mix_long = outs
    pad_s = max(0, T_mix - mix_short.shape[-1])
    mix_short = jnp.pad(mix_short, ((0, 0), (0, pad_s)))[:, :T_mix]
    mix_middle = mix_middle[:, :T_mix]
    mix_long = mix_long[:, :T_mix]

    logits = spk_emb @ pp["head_w"] + pp["head_b"]    # tiny, plain jnp
    return {
        "mix_short": mix_short[:, None, :],
        "mix_middle": mix_middle[:, None, :],
        "mix_long": mix_long[:, None, :],
        "speaker_logits": logits,
    }


# --------------------------- deterministic init ------------------------------
def init_params(key):
    cnt = [0]

    def rnd(shape, scale=0.1):
        cnt[0] += 1
        return (scale * jax.random.normal(jax.random.fold_in(key, cnt[0]),
                                          shape)).astype(jnp.float32)

    def near_one(shape):
        cnt[0] += 1
        return (1.0 + 0.05 * jax.random.normal(jax.random.fold_in(key, cnt[0]),
                                               shape)).astype(jnp.float32)

    enc = {}
    for name, L in (("short", L1), ("middle", L2), ("long", L3)):
        enc[name + "_w"] = rnd((L, N_ENC))
        enc[name + "_b"] = rnd((N_ENC,), 0.01)

    mix_post = dict(ln_g=near_one((3 * N_ENC,)), ln_b=rnd((3 * N_ENC,), 0.01),
                    w=rnd((3 * N_ENC, STEM[0])), b=rnd((STEM[0],), 0.01))

    def resnet(cin, cout):
        d = dict(w1=rnd((cin, cout)),
                 bn1_s=near_one((cout,)), bn1_t=rnd((cout,), 0.01),
                 a1=jnp.float32(0.25),
                 w2=rnd((cout, cout)),
                 bn2_s=near_one((cout,)), bn2_t=rnd((cout,), 0.01),
                 a2=jnp.float32(0.25))
        if cin != cout:
            d["wd"] = rnd((cin, cout))
        return d

    spk = dict(ln_g=near_one((3 * N_ENC,)), ln_b=rnd((3 * N_ENC,), 0.01),
               w0=rnd((3 * N_ENC, STEM[0])), b0=rnd((STEM[0],), 0.01),
               res=[resnet(STEM[0], STEM[0]),
                    resnet(STEM[0], STEM[1]),
                    resnet(STEM[1], STEM[1])],
               w1=rnd((STEM[1], SPK)), b1=rnd((SPK,), 0.01))

    def tcn_block_params(first):
        cin = STEM[0] + (SPK if first else 0)
        return dict(w_in=rnd((cin, STEM[1])), b_in=rnd((STEM[1],), 0.01),
                    a1=jnp.float32(0.25),
                    g1=near_one((STEM[1],)), be1=rnd((STEM[1],), 0.01),
                    w_d=rnd((TCN_K, STEM[1])), b_d=rnd((STEM[1],), 0.01),
                    a2=jnp.float32(0.25),
                    g2=near_one((STEM[1],)), be2=rnd((STEM[1],), 0.01),
                    w_out=rnd((STEM[1], STEM[0])), b_out=rnd((STEM[0],), 0.01))

    tcn = [[tcn_block_params(bi == 0) for bi in range(TCN_BLOCKS)]
           for _ in range(NUM_STACKS)]
    masks = [dict(w=rnd((STEM[0], N_ENC)), b=rnd((N_ENC,), 0.01))
             for _ in range(3)]
    dec = [dict(w=rnd((N_ENC, L)), b=rnd((), 0.01)) for L in (L1, L2, L3)]
    head = dict(w=rnd((SPK, NSPK)), b=rnd((NSPK,), 0.01))
    return dict(enc=enc, mix_post=mix_post, spk=spk, tcn=tcn,
                masks=masks, dec=dec, head=head)


def prepare_params(p):
    """Fold / fuse / reshape all static parameters ONCE, outside the jit."""
    f32 = jnp.float32
    row = lambda v: jnp.reshape(jnp.asarray(v, f32), (1, -1))

    q = {}
    # fused 3-scale encoder: single [L3, 3*N_ENC] weight (short/middle 0-padded)
    e = p["enc"]
    enc_w = jnp.zeros((L3, 3 * N_ENC), f32)
    enc_w = enc_w.at[:L1, 0 * N_ENC:1 * N_ENC].set(e["short_w"])
    enc_w = enc_w.at[:L2, 1 * N_ENC:2 * N_ENC].set(e["middle_w"])
    enc_w = enc_w.at[:L3, 2 * N_ENC:3 * N_ENC].set(e["long_w"])
    q["enc_w"] = enc_w
    q["enc_b"] = row(jnp.concatenate([e["short_b"], e["middle_b"], e["long_b"]]))

    mp = p["mix_post"]
    q["mix_ln_g"], q["mix_ln_b"] = row(mp["ln_g"]), row(mp["ln_b"])
    q["mix_w"], q["mix_b"] = mp["w"], row(mp["b"])

    sp = p["spk"]
    q["spk_ln_g"], q["spk_ln_b"] = row(sp["ln_g"]), row(sp["ln_b"])
    q["spk_w0"], q["spk_b0"] = sp["w0"], row(sp["b0"])

    # ResNet blocks: fold eval-BatchNorm scale/shift + PReLU alpha rows
    res = []
    for bp in sp["res"]:
        cout = bp["w1"].shape[1]
        d = dict(w1=bp["w1"] * bp["bn1_s"][None, :],
                 b1=row(bp["bn1_t"]),
                 a1=row(jnp.full((cout,), bp["a1"], f32)),
                 w2=bp["w2"] * bp["bn2_s"][None, :],
                 b2=row(bp["bn2_t"]),
                 a2=row(jnp.full((cout,), bp["a2"], f32)))
        if "wd" in bp:
            d["wd"] = bp["wd"]
        res.append(d)
    q["spk_res"] = res
    q["spk_w1"], q["spk_b1"] = sp["w1"], row(sp["b1"])

    # TCN: split speaker rows of every first-block input conv (fused into one
    # [SPK, NUM_STACKS*H] projection) and stack all block params for the
    # single fused TCN kernel.
    H = STEM[1]
    spk_ws = []
    stk = {k: [] for k in ("w_in", "b_in", "a1", "g1", "be1", "w_d", "b_d",
                           "a2", "g2", "be2", "w_out", "b_out")}
    for stack in p["tcn"]:
        for bi, bp in enumerate(stack):
            if bi == 0:
                stk["w_in"].append(bp["w_in"][:STEM[0]])
                spk_ws.append(bp["w_in"][STEM[0]:])
            else:
                stk["w_in"].append(bp["w_in"])
            stk["b_in"].append(row(bp["b_in"]))
            stk["a1"].append(row(jnp.full((H,), bp["a1"], f32)))
            stk["g1"].append(row(bp["g1"]))
            stk["be1"].append(row(bp["be1"]))
            stk["w_d"].append(bp["w_d"])
            stk["b_d"].append(row(bp["b_d"]))
            stk["a2"].append(row(jnp.full((H,), bp["a2"], f32)))
            stk["g2"].append(row(bp["g2"]))
            stk["be2"].append(row(bp["be2"]))
            stk["w_out"].append(bp["w_out"])
            stk["b_out"].append(row(bp["b_out"]))
    q["tcn"] = {k: jnp.stack(v, axis=0) for k, v in stk.items()}
    q["tcn_spk_w"] = jnp.concatenate(spk_ws, axis=1)          # [SPK, 4*H]

    # fused mask heads + block-diagonal decoder weight
    q["mask_w"] = jnp.concatenate([m["w"] for m in p["masks"]], axis=1)
    q["mask_b"] = row(jnp.concatenate([m["b"] for m in p["masks"]]))
    Ls = (L1, L2, L3)
    dec_w = jnp.zeros((3 * N_ENC, sum(Ls)), f32)
    off = 0
    for i, Lk in enumerate(Ls):
        dec_w = dec_w.at[i * N_ENC:(i + 1) * N_ENC, off:off + Lk].set(
            p["dec"][i]["w"])
        off += Lk
    q["dec_w"] = dec_w
    q["dec_b"] = [jnp.asarray(p["dec"][i]["b"], f32) for i in range(3)]

    q["head_w"], q["head_b"] = p["head"]["w"], row(p["head"]["b"])
    return q


# ---------------------------------- main -------------------------------------
if __name__ == "__main__":
    key = jax.random.PRNGKey(0)
    params = init_params(key)
    pp = prepare_params(params)          # folding / fusing happens once, outside jit

    k1, k2 = jax.random.split(jax.random.fold_in(key, 12345))
    B, T_MIX, T_REF = 2, 128, 200
    mix = jax.random.normal(k1, (B, T_MIX), jnp.float32)
    reference = jax.random.normal(k2, (B, T_REF), jnp.float32)
    reference_length = jnp.array([T_REF, T_REF], jnp.int32)

    fwd = jax.jit(spex_plus_forward)
    out = fwd(pp, mix, reference, reference_length)
    out = jax.block_until_ready(out)

    assert out["mix_short"].shape == (B, 1, T_MIX)
    assert out["mix_middle"].shape == (B, 1, T_MIX)
    assert out["mix_long"].shape == (B, 1, T_MIX)
    assert out["speaker_logits"].shape == (B, NSPK)
    for v in jax.tree_util.tree_leaves(out):
        assert bool(jnp.isfinite(v).all())

    print("KERNEL_OK")
</pallas_src>

<mosaic_0001>
module attributes {stable_mosaic.version = 11 : i64} {
  func.func @_matmul_kernel(%arg0: i32, %arg1: memref<104x32xf32, #tpu.memory_space<vmem>>, %arg2: memref<32x48xf32, #tpu.memory_space<vmem>>, %arg3: memref<1x48xf32, #tpu.memory_space<vmem>>, %arg4: memref<104x48xf32, #tpu.memory_space<vmem>>) attributes {dimension_semantics = [#tpu.dimension_semantics<parallel>], iteration_bounds = array<i64: 1>, scalar_prefetch = 0 : i64, scratch_operands = 0 : i64, tpu.core_type = #tpu.core_type<tc>, window_params = [{transform_indices = @transform_0, window_bounds = array<i64: 104, 32>}, {pipeline_mode = #tpu.pipeline_mode<synchronous>, transform_indices = @transform_1, window_bounds = array<i64: 32, 48>}, {pipeline_mode = #tpu.pipeline_mode<synchronous>, transform_indices = @transform_2, window_bounds = array<i64: 1, 48>}, {transform_indices = @transform_3, window_bounds = array<i64: 104, 48>}]} {
    %c0 = arith.constant 0 : index
    %c0_0 = arith.constant 0 : index
    %0 = vector.load %arg1[%c0, %c0_0] : memref<104x32xf32, #tpu.memory_space<vmem>>, vector<104x32xf32>
    %c0_1 = arith.constant 0 : index
    %c0_2 = arith.constant 0 : index
    %1 = vector.load %arg2[%c0_1, %c0_2] : memref<32x48xf32, #tpu.memory_space<vmem>>, vector<32x48xf32>
    %cst = arith.constant dense<0.000000e+00> : vector<104x48xf32>
    %2 = tpu.matmul %0, %1, %cst {dimension_numbers = #tpu.dot_dimension_numbers<[1], [0], [0], [1], [0, 0, 1, 1], [], []>} : vector<104x32xf32>, vector<32x48xf32>, vector<104x48xf32> -> vector<104x48xf32>
    %c0_3 = arith.constant 0 : index
    %c0_4 = arith.constant 0 : index
    %3 = vector.load %arg3[%c0_3, %c0_4] : memref<1x48xf32, #tpu.memory_space<vmem>>, vector<1x48xf32>
    %4 = vector.broadcast %3 : vector<1x48xf32> to vector<104x48xf32>
    %5 = arith.addf %2, %4 : vector<104x48xf32>
    %cst_5 = arith.constant 0.000000e+00 : f32
    %6 = vector.broadcast %cst_5 : f32 to vector<104x48xf32>
    %7 = arith.maximumf %5, %6 : vector<104x48xf32>
    %c0_6 = arith.constant 0 : index
    %c0_7 = arith.constant 0 : index
    %8 = vector.load %arg4[%c0_6, %c0_7] : memref<104x48xf32, #tpu.memory_space<vmem>>, vector<104x48xf32>
    tpu.vector_store %arg4[%c0_6, %c0_7], %7 {strides = array<i32>} : memref<104x48xf32, #tpu.memory_space<vmem>>, vector<104x48xf32>,
    return
  }
  func.func @transform_0(%arg0: i32) -> (i32, i32) {
    %c0_i32 = arith.constant 0 : i32
    %c0_i32_0 = arith.constant 0 : i32
    return %arg0, %c0_i32 : i32, i32
  }
  func.func @transform_1(%arg0: i32) -> (i32, i32) {
    %c0_i32 = arith.constant 0 : i32
    %c0_i32_0 = arith.constant 0 : i32
    %c0_i32_1 = arith.constant 0 : i32
    return %c0_i32, %c0_i32_0 : i32, i32
  }
  func.func @transform_2(%arg0: i32) -> (i32, i32) {
    %c0_i32 = arith.constant 0 : i32
    %c0_i32_0 = arith.constant 0 : i32
    %c0_i32_1 = arith.constant 0 : i32
    return %c0_i32, %c0_i32_0 : i32, i32
  }
  func.func @transform_3(%arg0: i32) -> (i32, i32) {
    %c0_i32 = arith.constant 0 : i32
    %c0_i32_0 = arith.constant 0 : i32
    return %arg0, %c0_i32 : i32, i32
  }
}

module attributes {stable_mosaic.version = 11 : i64} {
  func.func @_stem_kernel(%arg0: i32, %arg1: memref<104x48xf32, #tpu.memory_space<vmem>>, %arg2: memref<1x48xf32, #tpu.memory_space<vmem>>, %arg3: memref<1x48xf32, #tpu.memory_space<vmem>>, %arg4: memref<48x16xf32, #tpu.memory_space<vmem>>, %arg5: memref<1x16xf32, #tpu.memory_space<vmem>>, %arg6: memref<104x16xf32, #tpu.memory_space<vmem>>) attributes {dimension_semantics = [#tpu.dimension_semantics<parallel>], iteration_bounds = array<i64: 1>, scalar_prefetch = 0 : i64, scratch_operands = 0 : i64, tpu.core_type = #tpu.core_type<tc>, window_params = [{transform_indices = @transform_0, window_bounds = array<i64: 104, 48>}, {pipeline_mode = #tpu.pipeline_mode<synchronous>, transform_indices = @transform_1, window_bounds = array<i64: 1, 48>}, {pipeline_mode = #tpu.pipeline_mode<synchronous>, transform_indices = @transform_2, window_bounds = array<i64: 1, 48>}, {pipeline_mode = #tpu.pipeline_mode<synchronous>, transform_indices = @transform_3, window_bounds = array<i64: 48, 16>}, {pipeline_mode = #tpu.pipeline_mode<synchronous>, transform_indices = @transform_4, window_bounds = array<i64: 1, 16>}, {transform_indices = @transform_5, window_bounds = array<i64: 104, 16>}]} {
    %c0 = arith.constant 0 : index
    %c0_0 = arith.constant 0 : index
    %0 = vector.load %arg1[%c0, %c0_0] : memref<104x48xf32, #tpu.memory_space<vmem>>, vector<104x48xf32>
    %cst = arith.constant dense<0.000000e+00> : vector<104xf32>
    %1 = vector.multi_reduction <add>, %0, %cst [1] : vector<104x48xf32> to vector<104xf32>
    %2 = vector.shape_cast %1 : vector<104xf32> to vector<104x1xf32>
    %cst_1 = arith.constant 4.800000e+01 : f32
    %3 = vector.broadcast %cst_1 : f32 to vector<104x1xf32>
    %4 = arith.divf %2, %3 : vector<104x1xf32>
    %5 = vector.broadcast %4 : vector<104x1xf32> to vector<104x48xf32>
    %6 = arith.subf %0, %5 : vector<104x48xf32>
    %7 = arith.mulf %6, %6 : vector<104x48xf32>
    %cst_2 = arith.constant dense<0.000000e+00> : vector<104xf32>
    %8 = vector.multi_reduction <add>, %7, %cst_2 [1] : vector<104x48xf32> to vector<104xf32>
    %9 = vector.shape_cast %8 : vector<104xf32> to vector<104x1xf32>
    %cst_3 = arith.constant 4.800000e+01 : f32
    %10 = vector.broadcast %cst_3 : f32 to vector<104x1xf32>
    %11 = arith.divf %9, %10 : vector<104x1xf32>
    %12 = vector.broadcast %4 : vector<104x1xf32> to vector<104x48xf32>
    %13 = arith.subf %0, %12 : vector<104x48xf32>
    %cst_4 = arith.constant 9.99999974E-6 : f32
    %14 = vector.broadcast %cst_4 : f32 to vector<104x1xf32>
    %15 = arith.addf %11, %14 : vector<104x1xf32>
    %16 = math.rsqrt %15 : vector<104x1xf32>
    %17 = vector.broadcast %16 : vector<104x1xf32> to vector<104x48xf32>
    %18 = arith.mulf %13, %17 : vector<104x48xf32>
    %c0_5 = arith.constant 0 : index
    %c0_6 = arith.constant 0 : index
    %19 = vector.load %arg2[%c0_5, %c0_6] : memref<1x48xf32, #tpu.memory_space<vmem>>, vector<1x48xf32>
    %20 = vector.broadcast %19 : vector<1x48xf32> to vector<104x48xf32>
    %21 = arith.mulf %18, %20 : vector<104x48xf32>
    %c0_7 = arith.constant 0 : index
    %c0_8 = arith.constant 0 : index
    %22 = vector.load %arg3[%c0_7, %c0_8] : memref<1x48xf32, #tpu.memory_space<vmem>>, vector<1x48xf32>
    %23 = vector.broadcast %22 : vector<1x48xf32> to vector<104x48xf32>
    %24 = arith.addf %21, %23 : vector<104x48xf32>
    %c0_9 = arith.constant 0 : index
    %c0_10 = arith.constant 0 : index
    %25 = vector.load %arg4[%c0_9, %c0_10] : memref<48x16xf32, #tpu.memory_space<vmem>>, vector<48x16xf32>
    %cst_11 = arith.constant dense<0.000000e+00> : vector<104x16xf32>
    %26 = tpu.matmul %24, %25, %cst_11 {dimension_numbers = #tpu.dot_dimension_numbers<[1], [0], [0], [1], [0, 0, 1, 1], [], []>} : vector<104x48xf32>, vector<48x16xf32>, vector<104x16xf32> -> vector<104x16xf32>
    %c0_12 = arith.constant 0 : index
    %c0_13 = arith.constant 0 : index
    %27 = vector.load %arg5[%c0_12, %c0_13] : memref<1x16xf32, #tpu.memory_space<vmem>>, vector<1x16xf32>
    %28 = vector.broadcast %27 : vector<1x16xf32> to vector<104x16xf32>
    %29 = arith.addf %26, %28 : vector<104x16xf32>
    %c0_14 = arith.constant 0 : index
    %c0_15 = arith.constant 0 : index
    %30 = vector.load %arg6[%c0_14, %c0_15] : memref<104x16xf32, #tpu.memory_space<vmem>>, vector<104x16xf32>
    tpu.vector_store %arg6[%c0_14, %c0_15], %29 {strides = array<i32>} : memref<104x16xf32, #tpu.memory_space<vmem>>, vector<104x16xf32>,
    return
  }
  func.func @transform_0(%arg0: i32) -> (i32, i32) {
    %c0_i32 = arith.constant 0 : i32
    %c0_i32_0 = arith.constant 0 : i32
    return %arg0, %c0_i32 : i32, i32
  }
  func.func @transform_1(%arg0: i32) -> (i32, i32) {
    %c0_i32 = arith.constant 0 : i32
    %c0_i32_0 = arith.constant 0 : i32
    %c0_i32_1 = arith.constant 0 : i32
    return %c0_i32, %c0_i32_0 : i32, i32
  }
  func.func @transform_2(%arg0: i32) -> (i32, i32) {
    %c0_i32 = arith.constant 0 : i32
    %c0_i32_0 = arith.constant 0 : i32
    %c0_i32_1 = arith.constant 0 : i32
    return %c0_i32, %c0_i32_0 : i32, i32
  }
  func.func @transform_3(%arg0: i32) -> (i32, i32) {
    %c0_i32 = arith.constant 0 : i32
    %c0_i32_0 = arith.constant 0 : i32
    %c0_i32_1 = arith.constant 0 : i32
    return %c0_i32, %c0_i32_0 : i32, i32
  }
  func.func @transform_4(%arg0: i32) -> (i32, i32) {
    %c0_i32 = arith.constant 0 : i32
    %c0_i32_0 = arith.constant 0 : i32
    %c0_i32_1 = arith.constant 0 : i32
    return %c0_i32, %c0_i32_0 : i32, i32
  }
  func.func @transform_5(%arg0: i32) -> (i32, i32) {
    %c0_i32 = arith.constant 0 : i32
    %c0_i32_0 = arith.constant 0 : i32
    return %arg0, %c0_i32 : i32, i32
  }
}

module attributes {stable_mosaic.version = 11 : i64} {
  func.func @_resnet_kernel(%arg0: i32, %arg1: memref<1x16x16xf32, #tpu.memory_space<vmem>>, %arg2: memref<16x32xf32, #tpu.memory_space<vmem>>, %arg3: memref<1x32xf32, #tpu.memory_space<vmem>>, %arg4: memref<1x32xf32, #tpu.memory_space<vmem>>, %arg5: memref<32x32xf32, #tpu.memory_space<vmem>>, %arg6: memref<1x32xf32, #tpu.memory_space<vmem>>, %arg7: memref<1x32xf32, #tpu.memory_space<vmem>>, %arg8: memref<16x32xf32, #tpu.memory_space<vmem>>, %arg9: memref<1x8x32xf32, #tpu.memory_space<vmem>>, %arg10: memref<24x32xf32, #tpu.memory_space<vmem>>) attributes {dimension_semantics = [#tpu.dimension_semantics<parallel>], iteration_bounds = array<i64: 2>, scalar_prefetch = 0 : i64, scratch_operands = 1 : i64, tpu.core_type = #tpu.core_type<tc>, window_params = [{transform_indices = @transform_0, window_bounds = array<i64: 1, 16, 16>}, {pipeline_mode = #tpu.pipeline_mode<synchronous>, transform_indices = @transform_1, window_bounds = array<i64: 16, 32>}, {pipeline_mode = #tpu.pipeline_mode<synchronous>, transform_indices = @transform_2, window_bounds = array<i64: 1, 32>}, {pipeline_mode = #tpu.pipeline_mode<synchronous>, transform_indices = @transform_3, window_bounds = array<i64: 1, 32>}, {pipeline_mode = #tpu.pipeline_mode<synchronous>, transform_indices = @transform_4, window_bounds = array<i64: 32, 32>}, {pipeline_mode = #tpu.pipeline_mode<synchronous>, transform_indices = @transform_5, window_bounds = array<i64: 1, 32>}, {pipeline_mode = #tpu.pipeline_mode<synchronous>, transform_indices = @transform_6, window_bounds = array<i64: 1, 32>}, {pipeline_mode = #tpu.pipeline_mode<synchronous>, transform_indices = @transform_7, window_bounds = array<i64: 16, 32>}, {transform_indices = @transform_8, window_bounds = array<i64: 1, 8, 32>}]} {
    %c0 = arith.constant 0 : index
    %c0_0 = arith.constant 0 : index
    %c0_1 = arith.constant 0 : index
    %0 = vector.load %arg1[%c0, %c0_0, %c0_1] : memref<1x16x16xf32, #tpu.memory_space<vmem>>, vector<1x16x16xf32>
    %1 = vector.shape_cast %0 : vector<1x16x16xf32> to vector<16x16xf32>
    %c0_2 = arith.constant 0 : index
    %c0_3 = arith.constant 0 : index
    %2 = vector.load %arg2[%c0_2, %c0_3] : memref<16x32xf32, #tpu.memory_space<vmem>>, vector<16x32xf32>
    %cst = arith.constant dense<0.000000e+00> : vector<16x32xf32>
    %3 = tpu.matmul %1, %2, %cst {dimension_numbers = #tpu.dot_dimension_numbers<[1], [0], [0], [1], [0, 0, 1, 1], [], []>} : vector<16x16xf32>, vector<16x32xf32>, vector<16x32xf32> -> vector<16x32xf32>
    %c0_4 = arith.constant 0 : index
    %c0_5 = arith.constant 0 : index
    %4 = vector.load %arg3[%c0_4, %c0_5] : memref<1x32xf32, #tpu.memory_space<vmem>>, vector<1x32xf32>
    %5 = vector.broadcast %4 : vector<1x32xf32> to vector<16x32xf32>
    %6 = arith.addf %3, %5 : vector<16x32xf32>
    %cst_6 = arith.constant 0.000000e+00 : f32
    %7 = vector.broadcast %cst_6 : f32 to vector<16x32xf32>
    %8 = arith.cmpf oge, %6, %7 : vector<16x32xf32>
    %c0_7 = arith.constant 0 : index
    %c0_8 = arith.constant 0 : index
    %9 = vector.load %arg4[%c0_7, %c0_8] : memref<1x32xf32, #tpu.memory_space<vmem>>, vector<1x32xf32>
    %10 = vector.broadcast %9 : vector<1x32xf32> to vector<16x32xf32>
    %11 = arith.mulf %10, %6 : vector<16x32xf32>
    %12 = arith.select %8, %6, %11 : vector<16x32xi1>, vector<16x32xf32>
    %c0_9 = arith.constant 0 : index
    %c0_10 = arith.constant 0 : index
    %13 = vector.load %arg5[%c0_9, %c0_10] : memref<32x32xf32, #tpu.memory_space<vmem>>, vector<32x32xf32>
    %cst_11 = arith.constant dense<0.000000e+00> : vector<16x32xf32>
    %14 = tpu.matmul %12, %13, %cst_11 {dimension_numbers = #tpu.dot_dimension_numbers<[1], [0], [0], [1], [0, 0, 1, 1], [], []>} : vector<16x32xf32>, vector<32x32xf32>, vector<16x32xf32> -> vector<16x32xf32>
    %c0_12 = arith.constant 0 : index
    %c0_13 = arith.constant 0 : index
    %15 = vector.load %arg6[%c0_12, %c0_13] : memref<1x32xf32, #tpu.memory_space<vmem>>, vector<1x32xf32>
    %16 = vector.broadcast %15 : vector<1x32xf32> to vector<16x32xf32>
    %17 = arith.addf %14, %16 : vector<16x32xf32>
    %c0_14 = arith.constant 0 : index
    %c0_15 = arith.constant 0 : index
    %18 = vector.load %arg8[%c0_14, %c0_15] : memref<16x32xf32, #tpu.memory_space<vmem>>, vector<16x32xf32>
    %cst_16 = arith.constant dense<0.000000e+00> : vector<16x32xf32>
    %19 = tpu.matmul %1, %18, %cst_16 {dimension_numbers = #tpu.dot_dimension_numbers<[1], [0], [0], [1], [0, 0, 1, 1], [], []>} : vector<16x16xf32>, vector<16x32xf32>, vector<16x32xf32> -> vector<16x32xf32>
    %20 = arith.addf %17, %19 : vector<16x32xf32>
    %cst_17 = arith.constant 0.000000e+00 : f32
    %21 = vector.broadcast %cst_17 : f32 to vector<16x32xf32>
    %22 = arith.cmpf oge, %20, %21 : vector<16x32xf32>
    %c0_18 = arith.constant 0 : index
    %c0_19 = arith.constant 0 : index
    %23 = vector.load %arg7[%c0_18, %c0_19] : memref<1x32xf32, #tpu.memory_space<vmem>>, vector<1x32xf32>
    %24 = vector.broadcast %23 : vector<1x32xf32> to vector<16x32xf32>
    %25 = arith.mulf %24, %20 : vector<16x32xf32>
    %26 = arith.select %22, %20, %25 : vector<16x32xi1>, vector<16x32xf32>
    %c0_20 = arith.constant 0 : index
    %c0_21 = arith.constant 0 : index
    %27 = vector.load %arg10[%c0_20, %c0_21] : memref<24x32xf32, #tpu.memory_space<vmem>>, vector<16x32xf32>
    tpu.vector_store %arg10[%c0_20, %c0_21], %26 {strides = array<i32>} : memref<24x32xf32, #tpu.memory_space<vmem>>, vector<16x32xf32>,
    %c0_22 = arith.constant 0 : index
    %c0_23 = arith.constant 0 : index
    %28 = tpu.strided_load %arg10[%c0_22, %c0_23] {strides = array<i32: 3, 1>} : memref<24x32xf32, #tpu.memory_space<vmem>>, vector<8x32xf32>
    %c1 = arith.constant 1 : index
    %c0_24 = arith.constant 0 : index
    %29 = tpu.strided_load %arg10[%c1, %c0_24] {strides = array<i32: 3, 1>} : memref<24x32xf32, #tpu.memory_space<vmem>>, vector<8x32xf32>
    %30 = arith.maximumf %28, %29 : vector<8x32xf32>
    %c2 = arith.constant 2 : index
    %c0_25 = arith.constant 0 : index
    %31 = tpu.strided_load %arg10[%c2, %c0_25] {strides = array<i32: 3, 1>} : memref<24x32xf32, #tpu.memory_space<vmem>>, vector<8x32xf32>
    %32 = arith.maximumf %30, %31 : vector<8x32xf32>
    %33 = tpu.iota {dimensions = array<i32: 0>} : vector<8x1xi32>
    %c5_i32 = arith.constant 5 : i32
    %34 = vector.broadcast %c5_i32 : i32 to vector<8x1xi32>
    %35 = arith.cmpi slt, %33, %34 : vector<8x1xi32>
    %cst_26 = arith.constant 0.000000e+00 : f32
    %36 = vector.shape_cast %35 : vector<8x1xi1> to vector<8x1xi1>
    %37 = vector.broadcast %36 : vector<8x1xi1> to vector<8x32xi1>
    %38 = vector.broadcast %cst_26 : f32 to vector<8x32xf32>
    %39 = arith.select %37, %32, %38 : vector<8x32xi1>, vector<8x32xf32>
    %c0_27 = arith.constant 0 : index
    %c0_28 = arith.constant 0 : index
    %c0_29 = arith.constant 0 : index
    %40 = vector.load %arg9[%c0_27, %c0_28, %c0_29] : memref<1x8x32xf32, #tpu.memory_space<vmem>>, vector<1x8x32xf32>
    %41 = vector.shape_cast %40 : vector<1x8x32xf32> to vector<8x32xf32>
    %42 = vector.shape_cast %39 : vector<8x32xf32> to vector<1x8x32xf32>
    tpu.vector_store %arg9[%c0_27, %c0_28, %c0_29], %42 {strides = array<i32>} : memref<1x8x32xf32, #tpu.memory_space<vmem>>, vector<1x8x32xf32>,
    return
  }
  func.func @transform_0(%arg0: i32) -> (i32, i32, i32) {
    %c0_i32 = arith.constant 0 : i32
    %c0_i32_0 = arith.constant 0 : i32
    %c0_i32_1 = arith.constant 0 : i32
    return %arg0, %c0_i32, %c0_i32_0 : i32, i32, i32
  }
  func.func @transform_1(%arg0: i32) -> (i32, i32) {
    %c0_i32 = arith.constant 0 : i32
    %c0_i32_0 = arith.constant 0 : i32
    %c0_i32_1 = arith.constant 0 : i32
    return %c0_i32, %c0_i32_0 : i32, i32
  }
  func.func @transform_2(%arg0: i32) -> (i32, i32) {
    %c0_i32 = arith.constant 0 : i32
    %c0_i32_0 = arith.constant 0 : i32
    %c0_i32_1 = arith.constant 0 : i32
    return %c0_i32, %c0_i32_0 : i32, i32
  }
  func.func @transform_3(%arg0: i32) -> (i32, i32) {
    %c0_i32 = arith.constant 0 : i32
    %c0_i32_0 = arith.constant 0 : i32
    %c0_i32_1 = arith.constant 0 : i32
    return %c0_i32, %c0_i32_0 : i32, i32
  }
  func.func @transform_4(%arg0: i32) -> (i32, i32) {
    %c0_i32 = arith.constant 0 : i32
    %c0_i32_0 = arith.constant 0 : i32
    %c0_i32_1 = arith.constant 0 : i32
    return %c0_i32, %c0_i32_0 : i32, i32
  }
  func.func @transform_5(%arg0: i32) -> (i32, i32) {
    %c0_i32 = arith.constant 0 : i32
    %c0_i32_0 = arith.constant 0 : i32
    %c0_i32_1 = arith.constant 0 : i32
    return %c0_i32, %c0_i32_0 : i32, i32
  }
  func.func @transform_6(%arg0: i32) -> (i32, i32) {
    %c0_i32 = arith.constant 0 : i32
    %c0_i32_0 = arith.constant 0 : i32
    %c0_i32_1 = arith.constant 0 : i32
    return %c0_i32, %c0_i32_0 : i32, i32
  }
  func.func @transform_7(%arg0: i32) -> (i32, i32) {
    %c0_i32 = arith.constant 0 : i32
    %c0_i32_0 = arith.constant 0 : i32
    %c0_i32_1 = arith.constant 0 : i32
    return %c0_i32, %c0_i32_0 : i32, i32
  }
  func.func @transform_8(%arg0: i32) -> (i32, i32, i32) {
    %c0_i32 = arith.constant 0 : i32
    %c0_i32_0 = arith.constant 0 : i32
    %c0_i32_1 = arith.constant 0 : i32
    return %arg0, %c0_i32, %c0_i32_0 : i32, i32, i32
  }
}

module attributes {stable_mosaic.version = 11 : i64} {
  func.func @_resnet_kernel(%arg0: i32, %arg1: memref<1x56x16xf32, #tpu.memory_space<vmem>>, %arg2: memref<16x16xf32, #tpu.memory_space<vmem>>, %arg3: memref<1x16xf32, #tpu.memory_space<vmem>>, %arg4: memref<1x16xf32, #tpu.memory_space<vmem>>, %arg5: memref<16x16xf32, #tpu.memory_space<vmem>>, %arg6: memref<1x16xf32, #tpu.memory_space<vmem>>, %arg7: memref<1x16xf32, #tpu.memory_space<vmem>>, %arg8: memref<1x16x16xf32, #tpu.memory_space<vmem>>, %arg9: memref<56x16xf32, #tpu.memory_space<vmem>>) attributes {dimension_semantics = [#tpu.dimension_semantics<parallel>], iteration_bounds = array<i64: 2>, scalar_prefetch = 0 : i64, scratch_operands = 1 : i64, tpu.core_type = #tpu.core_type<tc>, window_params = [{transform_indices = @transform_0, window_bounds = array<i64: 1, 56, 16>}, {pipeline_mode = #tpu.pipeline_mode<synchronous>, transform_indices = @transform_1, window_bounds = array<i64: 16, 16>}, {pipeline_mode = #tpu.pipeline_mode<synchronous>, transform_indices = @transform_2, window_bounds = array<i64: 1, 16>}, {pipeline_mode = #tpu.pipeline_mode<synchronous>, transform_indices = @transform_3, window_bounds = array<i64: 1, 16>}, {pipeline_mode = #tpu.pipeline_mode<synchronous>, transform_indices = @transform_4, window_bounds = array<i64: 16, 16>}, {pipeline_mode = #tpu.pipeline_mode<synchronous>, transform_indices = @transform_5, window_bounds = array<i64: 1, 16>}, {pipeline_mode = #tpu.pipeline_mode<synchronous>, transform_indices = @transform_6, window_bounds = array<i64: 1, 16>}, {transform_indices = @transform_7, window_bounds = array<i64: 1, 16, 16>}]} {
    %c0 = arith.constant 0 : index
    %c0_0 = arith.constant 0 : index
    %c0_1 = arith.constant 0 : index
    %0 = vector.load %arg1[%c0, %c0_0, %c0_1] : memref<1x56x16xf32, #tpu.memory_space<vmem>>, vector<1x56x16xf32>
    %1 = vector.shape_cast %0 : vector<1x56x16xf32> to vector<56x16xf32>
    %c0_2 = arith.constant 0 : index
    %c0_3 = arith.constant 0 : index
    %2 = vector.load %arg2[%c0_2, %c0_3] : memref<16x16xf32, #tpu.memory_space<vmem>>, vector<16x16xf32>
    %cst = arith.constant dense<0.000000e+00> : vector<56x16xf32>
    %3 = tpu.matmul %1, %2, %cst {dimension_numbers = #tpu.dot_dimension_numbers<[1], [0], [0], [1], [0, 0, 1, 1], [], []>} : vector<56x16xf32>, vector<16x16xf32>, vector<56x16xf32> -> vector<56x16xf32>
    %c0_4 = arith.constant 0 : index
    %c0_5 = arith.constant 0 : index
    %4 = vector.load %arg3[%c0_4, %c0_5] : memref<1x16xf32, #tpu.memory_space<vmem>>, vector<1x16xf32>
    %5 = vector.broadcast %4 : vector<1x16xf32> to vector<56x16xf32>
    %6 = arith.addf %3, %5 : vector<56x16xf32>
    %cst_6 = arith.constant 0.000000e+00 : f32
    %7 = vector.broadcast %cst_6 : f32 to vector<56x16xf32>
    %8 = arith.cmpf oge, %6, %7 : vector<56x16xf32>
    %c0_7 = arith.constant 0 : index
    %c0_8 = arith.constant 0 : index
    %9 = vector.load %arg4[%c0_7, %c0_8] : memref<1x16xf32, #tpu.memory_space<vmem>>, vector<1x16xf32>
    %10 = vector.broadcast %9 : vector<1x16xf32> to vector<56x16xf32>
    %11 = arith.mulf %10, %6 : vector<56x16xf32>
    %12 = arith.select %8, %6, %11 : vector<56x16xi1>, vector<56x16xf32>
    %c0_9 = arith.constant 0 : index
    %c0_10 = arith.constant 0 : index
    %13 = vector.load %arg5[%c0_9, %c0_10] : memref<16x16xf32, #tpu.memory_space<vmem>>, vector<16x16xf32>
    %cst_11 = arith.constant dense<0.000000e+00> : vector<56x16xf32>
    %14 = tpu.matmul %12, %13, %cst_11 {dimension_numbers = #tpu.dot_dimension_numbers<[1], [0], [0], [1], [0, 0, 1, 1], [], []>} : vector<56x16xf32>, vector<16x16xf32>, vector<56x16xf32> -> vector<56x16xf32>
    %c0_12 = arith.constant 0 : index
    %c0_13 = arith.constant 0 : index
    %15 = vector.load %arg6[%c0_12, %c0_13] : memref<1x16xf32, #tpu.memory_space<vmem>>, vector<1x16xf32>
    %16 = vector.broadcast %15 : vector<1x16xf32> to vector<56x16xf32>
    %17 = arith.addf %14, %16 : vector<56x16xf32>
    %18 = arith.addf %17, %1 : vector<56x16xf32>
    %cst_14 = arith.constant 0.000000e+00 : f32
    %19 = vector.broadcast %cst_14 : f32 to vector<56x16xf32>
    %20 = arith.cmpf oge, %18, %19 : vector<56x16xf32>
    %c0_15 = arith.constant 0 : index
    %c0_16 = arith.constant 0 : index
    %21 = vector.load %arg7[%c0_15, %c0_16] : memref<1x16xf32, #tpu.memory_space<vmem>>, vector<1x16xf32>
    %22 = vector.broadcast %21 : vector<1x16xf32> to vector<56x16xf32>
    %23 = arith.mulf %22, %18 : vector<56x16xf32>
    %24 = arith.select %20, %18, %23 : vector<56x16xi1>, vector<56x16xf32>
    %c0_17 = arith.constant 0 : index
    %c0_18 = arith.constant 0 : index
    %25 = vector.load %arg9[%c0_17, %c0_18] : memref<56x16xf32, #tpu.memory_space<vmem>>, vector<56x16xf32>
    tpu.vector_store %arg9[%c0_17, %c0_18], %24 {strides = array<i32>} : memref<56x16xf32, #tpu.memory_space<vmem>>, vector<56x16xf32>,
    %c0_19 = arith.constant 0 : index
    %c0_20 = arith.constant 0 : index
    %26 = tpu.strided_load %arg9[%c0_19, %c0_20] {strides = array<i32: 3, 1>} : memref<56x16xf32, #tpu.memory_space<vmem>>, vector<16x16xf32>
    %c1 = arith.constant 1 : index
    %c0_21 = arith.constant 0 : index
    %27 = tpu.strided_load %arg9[%c1, %c0_21] {strides = array<i32: 3, 1>} : memref<56x16xf32, #tpu.memory_space<vmem>>, vector<16x16xf32>
    %28 = arith.maximumf %26, %27 : vector<16x16xf32>
    %c2 = arith.constant 2 : index
    %c0_22 = arith.constant 0 : index
    %29 = tpu.strided_load %arg9[%c2, %c0_22] {strides = array<i32: 3, 1>} : memref<56x16xf32, #tpu.memory_space<vmem>>, vector<16x16xf32>
    %30 = arith.maximumf %28, %29 : vector<16x16xf32>
    %31 = tpu.iota {dimensions = array<i32: 0>} : vector<16x1xi32>
    %c16_i32 = arith.constant 16 : i32
    %32 = vector.broadcast %c16_i32 : i32 to vector<16x1xi32>
    %33 = arith.cmpi slt, %31, %32 : vector<16x1xi32>
    %cst_23 = arith.constant 0.000000e+00 : f32
    %34 = vector.shape_cast %33 : vector<16x1xi1> to vector<16x1xi1>
    %35 = vector.broadcast %34 : vector<16x1xi1> to vector<16x16xi1>
    %36 = vector.broadcast %cst_23 : f32 to vector<16x16xf32>
    %37 = arith.select %35, %30, %36 : vector<16x16xi1>, vector<16x16xf32>
    %c0_24 = arith.constant 0 : index
    %c0_25 = arith.constant 0 : index
    %c0_26 = arith.constant 0 : index
    %38 = vector.load %arg8[%c0_24, %c0_25, %c0_26] : memref<1x16x16xf32, #tpu.memory_space<vmem>>, vector<1x16x16xf32>
    %39 = vector.shape_cast %38 : vector<1x16x16xf32> to vector<16x16xf32>
    %40 = vector.shape_cast %37 : vector<16x16xf32> to vector<1x16x16xf32>
    tpu.vector_store %arg8[%c0_24, %c0_25, %c0_26], %40 {strides = array<i32>} : memref<1x16x16xf32, #tpu.memory_space<vmem>>, vector<1x16x16xf32>,
    return
  }
  func.func @transform_0(%arg0: i32) -> (i32, i32, i32) {
    %c0_i32 = arith.constant 0 : i32
    %c0_i32_0 = arith.constant 0 : i32
    %c0_i32_1 = arith.constant 0 : i32
    return %arg0, %c0_i32, %c0_i32_0 : i32, i32, i32
  }
  func.func @transform_1(%arg0: i32) -> (i32, i32) {
    %c0_i32 = arith.constant 0 : i32
    %c0_i32_0 = arith.constant 0 : i32
    %c0_i32_1 = arith.constant 0 : i32
    return %c0_i32, %c0_i32_0 : i32, i32
  }
  func.func @transform_2(%arg0: i32) -> (i32, i32) {
    %c0_i32 = arith.constant 0 : i32
    %c0_i32_0 = arith.constant 0 : i32
    %c0_i32_1 = arith.constant 0 : i32
    return %c0_i32, %c0_i32_0 : i32, i32
  }
  func.func @transform_3(%arg0: i32) -> (i32, i32) {
    %c0_i32 = arith.constant 0 : i32
    %c0_i32_0 = arith.constant 0 : i32
    %c0_i32_1 = arith.constant 0 : i32
    return %c0_i32, %c0_i32_0 : i32, i32
  }
  func.func @transform_4(%arg0: i32) -> (i32, i32) {
    %c0_i32 = arith.constant 0 : i32
    %c0_i32_0 = arith.constant 0 : i32
    %c0_i32_1 = arith.constant 0 : i32
    return %c0_i32, %c0_i32_0 : i32, i32
  }
  func.func @transform_5(%arg0: i32) -> (i32, i32) {
    %c0_i32 = arith.constant 0 : i32
    %c0_i32_0 = arith.constant 0 : i32
    %c0_i32_1 = arith.constant 0 : i32
    return %c0_i32, %c0_i32_0 : i32, i32
  }
  func.func @transform_6(%arg0: i32) -> (i32, i32) {
    %c0_i32 = arith.constant 0 : i32
    %c0_i32_0 = arith.constant 0 : i32
    %c0_i32_1 = arith.constant 0 : i32
    return %c0_i32, %c0_i32_0 : i32, i32
  }
  func.func @transform_7(%arg0: i32) -> (i32, i32, i32) {
    %c0_i32 = arith.constant 0 : i32
    %c0_i32_0 = arith.constant 0 : i32
    %c0_i32_1 = arith.constant 0 : i32
    return %arg0, %c0_i32, %c0_i32_0 : i32, i32, i32
  }
}

module attributes {stable_mosaic.version = 11 : i64} {
  func.func @_resnet_kernel(%arg0: i32, %arg1: memref<1x8x32xf32, #tpu.memory_space<vmem>>, %arg2: memref<32x32xf32, #tpu.memory_space<vmem>>, %arg3: memref<1x32xf32, #tpu.memory_space<vmem>>, %arg4: memref<1x32xf32, #tpu.memory_space<vmem>>, %arg5: memref<32x32xf32, #tpu.memory_space<vmem>>, %arg6: memref<1x32xf32, #tpu.memory_space<vmem>>, %arg7: memref<1x32xf32, #tpu.memory_space<vmem>>, %arg8: memref<1x8x32xf32, #tpu.memory_space<vmem>>, %arg9: memref<24x32xf32, #tpu.memory_space<vmem>>) attributes {dimension_semantics = [#tpu.dimension_semantics<parallel>], iteration_bounds = array<i64: 2>, scalar_prefetch = 0 : i64, scratch_operands = 1 : i64, tpu.core_type = #tpu.core_type<tc>, window_params = [{transform_indices = @transform_0, window_bounds = array<i64: 1, 8, 32>}, {pipeline_mode = #tpu.pipeline_mode<synchronous>, transform_indices = @transform_1, window_bounds = array<i64: 32, 32>}, {pipeline_mode = #tpu.pipeline_mode<synchronous>, transform_indices = @transform_2, window_bounds = array<i64: 1, 32>}, {pipeline_mode = #tpu.pipeline_mode<synchronous>, transform_indices = @transform_3, window_bounds = array<i64: 1, 32>}, {pipeline_mode = #tpu.pipeline_mode<synchronous>, transform_indices = @transform_4, window_bounds = array<i64: 32, 32>}, {pipeline_mode = #tpu.pipeline_mode<synchronous>, transform_indices = @transform_5, window_bounds = array<i64: 1, 32>}, {pipeline_mode = #tpu.pipeline_mode<synchronous>, transform_indices = @transform_6, window_bounds = array<i64: 1, 32>}, {transform_indices = @transform_7, window_bounds = array<i64: 1, 8, 32>}]} {
    %c0 = arith.constant 0 : index
    %c0_0 = arith.constant 0 : index
    %c0_1 = arith.constant 0 : index
    %0 = vector.load %arg1[%c0, %c0_0, %c0_1] : memref<1x8x32xf32, #tpu.memory_space<vmem>>, vector<1x8x32xf32>
    %1 = vector.shape_cast %0 : vector<1x8x32xf32> to vector<8x32xf32>
    %c0_2 = arith.constant 0 : index
    %c0_3 = arith.constant 0 : index
    %2 = vector.load %arg2[%c0_2, %c0_3] : memref<32x32xf32, #tpu.memory_space<vmem>>, vector<32x32xf32>
    %cst = arith.constant dense<0.000000e+00> : vector<8x32xf32>
    %3 = tpu.matmul %1, %2, %cst {dimension_numbers = #tpu.dot_dimension_numbers<[1], [0], [0], [1], [0, 0, 1, 1], [], []>} : vector<8x32xf32>, vector<32x32xf32>, vector<8x32xf32> -> vector<8x32xf32>
    %c0_4 = arith.constant 0 : index
    %c0_5 = arith.constant 0 : index
    %4 = vector.load %arg3[%c0_4, %c0_5] : memref<1x32xf32, #tpu.memory_space<vmem>>, vector<1x32xf32>
    %5 = vector.broadcast %4 : vector<1x32xf32> to vector<8x32xf32>
    %6 = arith.addf %3, %5 : vector<8x32xf32>
    %cst_6 = arith.constant 0.000000e+00 : f32
    %7 = vector.broadcast %cst_6 : f32 to vector<8x32xf32>
    %8 = arith.cmpf oge, %6, %7 : vector<8x32xf32>
    %c0_7 = arith.constant 0 : index
    %c0_8 = arith.constant 0 : index
    %9 = vector.load %arg4[%c0_7, %c0_8] : memref<1x32xf32, #tpu.memory_space<vmem>>, vector<1x32xf32>
    %10 = vector.broadcast %9 : vector<1x32xf32> to vector<8x32xf32>
    %11 = arith.mulf %10, %6 : vector<8x32xf32>
    %12 = arith.select %8, %6, %11 : vector<8x32xi1>, vector<8x32xf32>
    %c0_9 = arith.constant 0 : index
    %c0_10 = arith.constant 0 : index
    %13 = vector.load %arg5[%c0_9, %c0_10] : memref<32x32xf32, #tpu.memory_space<vmem>>, vector<32x32xf32>
    %cst_11 = arith.constant dense<0.000000e+00> : vector<8x32xf32>
    %14 = tpu.matmul %12, %13, %cst_11 {dimension_numbers = #tpu.dot_dimension_numbers<[1], [0], [0], [1], [0, 0, 1, 1], [], []>} : vector<8x32xf32>, vector<32x32xf32>, vector<8x32xf32> -> vector<8x32xf32>
    %c0_12 = arith.constant 0 : index
    %c0_13 = arith.constant 0 : index
    %15 = vector.load %arg6[%c0_12, %c0_13] : memref<1x32xf32, #tpu.memory_space<vmem>>, vector<1x32xf32>
    %16 = vector.broadcast %15 : vector<1x32xf32> to vector<8x32xf32>
    %17 = arith.addf %14, %16 : vector<8x32xf32>
    %18 = arith.addf %17, %1 : vector<8x32xf32>
    %cst_14 = arith.constant 0.000000e+00 : f32
    %19 = vector.broadcast %cst_14 : f32 to vector<8x32xf32>
    %20 = arith.cmpf oge, %18, %19 : vector<8x32xf32>
    %c0_15 = arith.constant 0 : index
    %c0_16 = arith.constant 0 : index
    %21 = vector.load %arg7[%c0_15, %c0_16] : memref<1x32xf32, #tpu.memory_space<vmem>>, vector<1x32xf32>
    %22 = vector.broadcast %21 : vector<1x32xf32> to vector<8x32xf32>
    %23 = arith.mulf %22, %18 : vector<8x32xf32>
    %24 = arith.select %20, %18, %23 : vector<8x32xi1>, vector<8x32xf32>
    %c0_17 = arith.constant 0 : index
    %c0_18 = arith.constant 0 : index
    %25 = vector.load %arg9[%c0_17, %c0_18] : memref<24x32xf32, #tpu.memory_space<vmem>>, vector<8x32xf32>
    tpu.vector_store %arg9[%c0_17, %c0_18], %24 {strides = array<i32>} : memref<24x32xf32, #tpu.memory_space<vmem>>, vector<8x32xf32>,
    %c0_19 = arith.constant 0 : index
    %c0_20 = arith.constant 0 : index
    %26 = tpu.strided_load %arg9[%c0_19, %c0_20] {strides = array<i32: 3, 1>} : memref<24x32xf32, #tpu.memory_space<vmem>>, vector<8x32xf32>
    %c1 = arith.constant 1 : index
    %c0_21 = arith.constant 0 : index
    %27 = tpu.strided_load %arg9[%c1, %c0_21] {strides = array<i32: 3, 1>} : memref<24x32xf32, #tpu.memory_space<vmem>>, vector<8x32xf32>
    %28 = arith.maximumf %26, %27 : vector<8x32xf32>
    %c2 = arith.constant 2 : index
    %c0_22 = arith.constant 0 : index
    %29 = tpu.strided_load %arg9[%c2, %c0_22] {strides = array<i32: 3, 1>} : memref<24x32xf32, #tpu.memory_space<vmem>>, vector<8x32xf32>
    %30 = arith.maximumf %28, %29 : vector<8x32xf32>
    %31 = tpu.iota {dimensions = array<i32: 0>} : vector<8x1xi32>
    %c1_i32 = arith.constant 1 : i32
    %32 = vector.broadcast %c1_i32 : i32 to vector<8x1xi32>
    %33 = arith.cmpi slt, %31, %32 : vector<8x1xi32>
    %cst_23 = arith.constant 0.000000e+00 : f32
    %34 = vector.shape_cast %33 : vector<8x1xi1> to vector<8x1xi1>
    %35 = vector.broadcast %34 : vector<8x1xi1> to vector<8x32xi1>
    %36 = vector.broadcast %cst_23 : f32 to vector<8x32xf32>
    %37 = arith.select %35, %30, %36 : vector<8x32xi1>, vector<8x32xf32>
    %c0_24 = arith.constant 0 : index
    %c0_25 = arith.constant 0 : index
    %c0_26 = arith.constant 0 : index
    %38 = vector.load %arg8[%c0_24, %c0_25, %c0_26] : memref<1x8x32xf32, #tpu.memory_space<vmem>>, vector<1x8x32xf32>
    %39 = vector.shape_cast %38 : vector<1x8x32xf32> to vector<8x32xf32>
    %40 = vector.shape_cast %37 : vector<8x32xf32> to vector<1x8x32xf32>
    tpu.vector_store %arg8[%c0_24, %c0_25, %c0_26], %40 {strides = array<i32>} : memref<1x8x32xf32, #tpu.memory_space<vmem>>, vector<1x8x32xf32>,
    return
  }
  func.func @transform_0(%arg0: i32) -> (i32, i32, i32) {
    %c0_i32 = arith.constant 0 : i32
    %c0_i32_0 = arith.constant 0 : i32
    %c0_i32_1 = arith.constant 0 : i32
    return %arg0, %c0_i32, %c0_i32_0 : i32, i32, i32
  }
  func.func @transform_1(%arg0: i32) -> (i32, i32) {
    %c0_i32 = arith.constant 0 : i32
    %c0_i32_0 = arith.constant 0 : i32
    %c0_i32_1 = arith.constant 0 : i32
    return %c0_i32, %c0_i32_0 : i32, i32
  }
  func.func @transform_2(%arg0: i32) -> (i32, i32) {
    %c0_i32 = arith.constant 0 : i32
    %c0_i32_0 = arith.constant 0 : i32
    %c0_i32_1 = arith.constant 0 : i32
    return %c0_i32, %c0_i32_0 : i32, i32
  }
  func.func @transform_3(%arg0: i32) -> (i32, i32) {
    %c0_i32 = arith.constant 0 : i32
    %c0_i32_0 = arith.constant 0 : i32
    %c0_i32_1 = arith.constant 0 : i32
    return %c0_i32, %c0_i32_0 : i32, i32
  }
  func.func @transform_4(%arg0: i32) -> (i32, i32) {
    %c0_i32 = arith.constant 0 : i32
    %c0_i32_0 = arith.constant 0 : i32
    %c0_i32_1 = arith.constant 0 : i32
    return %c0_i32, %c0_i32_0 : i32, i32
  }
  func.func @transform_5(%arg0: i32) -> (i32, i32) {
    %c0_i32 = arith.constant 0 : i32
    %c0_i32_0 = arith.constant 0 : i32
    %c0_i32_1 = arith.constant 0 : i32
    return %c0_i32, %c0_i32_0 : i32, i32
  }
  func.func @transform_6(%arg0: i32) -> (i32, i32) {
    %c0_i32 = arith.constant 0 : i32
    %c0_i32_0 = arith.constant 0 : i32
    %c0_i32_1 = arith.constant 0 : i32
    return %c0_i32, %c0_i32_0 : i32, i32
  }
  func.func @transform_7(%arg0: i32) -> (i32, i32, i32) {
    %c0_i32 = arith.constant 0 : i32
    %c0_i32_0 = arith.constant 0 : i32
    %c0_i32_1 = arith.constant 0 : i32
    return %arg0, %c0_i32, %c0_i32_0 : i32, i32, i32
  }
}

module attributes {stable_mosaic.version = 11 : i64} {
  func.func @_matmul_kernel(%arg0: i32, %arg1: memref<64x32xf32, #tpu.memory_space<vmem>>, %arg2: memref<32x48xf32, #tpu.memory_space<vmem>>, %arg3: memref<1x48xf32, #tpu.memory_space<vmem>>, %arg4: memref<64x48xf32, #tpu.memory_space<vmem>>) attributes {dimension_semantics = [#tpu.dimension_semantics<parallel>], iteration_bounds = array<i64: 1>, scalar_prefetch = 0 : i64, scratch_operands = 0 : i64, tpu.core_type = #tpu.core_type<tc>, window_params = [{transform_indices = @transform_0, window_bounds = array<i64: 64, 32>}, {pipeline_mode = #tpu.pipeline_mode<synchronous>, transform_indices = @transform_1, window_bounds = array<i64: 32, 48>}, {pipeline_mode = #tpu.pipeline_mode<synchronous>, transform_indices = @transform_2, window_bounds = array<i64: 1, 48>}, {transform_indices = @transform_3, window_bounds = array<i64: 64, 48>}]} {
    %c0 = arith.constant 0 : index
    %c0_0 = arith.constant 0 : index
    %0 = vector.load %arg1[%c0, %c0_0] : memref<64x32xf32, #tpu.memory_space<vmem>>, vector<64x32xf32>
    %c0_1 = arith.constant 0 : index
    %c0_2 = arith.constant 0 : index
    %1 = vector.load %arg2[%c0_1, %c0_2] : memref<32x48xf32, #tpu.memory_space<vmem>>, vector<32x48xf32>
    %cst = arith.constant dense<0.000000e+00> : vector<64x48xf32>
    %2 = tpu.matmul %0, %1, %cst {dimension_numbers = #tpu.dot_dimension_numbers<[1], [0], [0], [1], [0, 0, 1, 1], [], []>} : vector<64x32xf32>, vector<32x48xf32>, vector<64x48xf32> -> vector<64x48xf32>
    %c0_3 = arith.constant 0 : index
    %c0_4 = arith.constant 0 : index
    %3 = vector.load %arg3[%c0_3, %c0_4] : memref<1x48xf32, #tpu.memory_space<vmem>>, vector<1x48xf32>
    %4 = vector.broadcast %3 : vector<1x48xf32> to vector<64x48xf32>
    %5 = arith.addf %2, %4 : vector<64x48xf32>
    %cst_5 = arith.constant 0.000000e+00 : f32
    %6 = vector.broadcast %cst_5 : f32 to vector<64x48xf32>
    %7 = arith.maximumf %5, %6 : vector<64x48xf32>
    %c0_6 = arith.constant 0 : index
    %c0_7 = arith.constant 0 : index
    %8 = vector.load %arg4[%c0_6, %c0_7] : memref<64x48xf32, #tpu.memory_space<vmem>>, vector<64x48xf32>
    tpu.vector_store %arg4[%c0_6, %c0_7], %7 {strides = array<i32>} : memref<64x48xf32, #tpu.memory_space<vmem>>, vector<64x48xf32>,
    return
  }
  func.func @transform_0(%arg0: i32) -> (i32, i32) {
    %c0_i32 = arith.constant 0 : i32
    %c0_i32_0 = arith.constant 0 : i32
    return %arg0, %c0_i32 : i32, i32
  }
  func.func @transform_1(%arg0: i32) -> (i32, i32) {
    %c0_i32 = arith.constant 0 : i32
    %c0_i32_0 = arith.constant 0 : i32
    %c0_i32_1 = arith.constant 0 : i32
    return %c0_i32, %c0_i32_0 : i32, i32
  }
  func.func @transform_2(%arg0: i32) -> (i32, i32) {
    %c0_i32 = arith.constant 0 : i32
    %c0_i32_0 = arith.constant 0 : i32
    %c0_i32_1 = arith.constant 0 : i32
    return %c0_i32, %c0_i32_0 : i32, i32
  }
  func.func @transform_3(%arg0: i32) -> (i32, i32) {
    %c0_i32 = arith.constant 0 : i32
    %c0_i32_0 = arith.constant 0 : i32
    return %arg0, %c0_i32 : i32, i32
  }
}

module attributes {stable_mosaic.version = 11 : i64} {
  func.func @_stem_kernel(%arg0: i32, %arg1: memref<64x48xf32, #tpu.memory_space<vmem>>, %arg2: memref<1x48xf32, #tpu.memory_space<vmem>>, %arg3: memref<1x48xf32, #tpu.memory_space<vmem>>, %arg4: memref<48x16xf32, #tpu.memory_space<vmem>>, %arg5: memref<1x16xf32, #tpu.memory_space<vmem>>, %arg6: memref<64x16xf32, #tpu.memory_space<vmem>>) attributes {dimension_semantics = [#tpu.dimension_semantics<parallel>], iteration_bounds = array<i64: 1>, scalar_prefetch = 0 : i64, scratch_operands = 0 : i64, tpu.core_type = #tpu.core_type<tc>, window_params = [{transform_indices = @transform_0, window_bounds = array<i64: 64, 48>}, {pipeline_mode = #tpu.pipeline_mode<synchronous>, transform_indices = @transform_1, window_bounds = array<i64: 1, 48>}, {pipeline_mode = #tpu.pipeline_mode<synchronous>, transform_indices = @transform_2, window_bounds = array<i64: 1, 48>}, {pipeline_mode = #tpu.pipeline_mode<synchronous>, transform_indices = @transform_3, window_bounds = array<i64: 48, 16>}, {pipeline_mode = #tpu.pipeline_mode<synchronous>, transform_indices = @transform_4, window_bounds = array<i64: 1, 16>}, {transform_indices = @transform_5, window_bounds = array<i64: 64, 16>}]} {
    %c0 = arith.constant 0 : index
    %c0_0 = arith.constant 0 : index
    %0 = vector.load %arg1[%c0, %c0_0] : memref<64x48xf32, #tpu.memory_space<vmem>>, vector<64x48xf32>
    %cst = arith.constant dense<0.000000e+00> : vector<64xf32>
    %1 = vector.multi_reduction <add>, %0, %cst [1] : vector<64x48xf32> to vector<64xf32>
    %2 = vector.shape_cast %1 : vector<64xf32> to vector<64x1xf32>
    %cst_1 = arith.constant 4.800000e+01 : f32
    %3 = vector.broadcast %cst_1 : f32 to vector<64x1xf32>
    %4 = arith.divf %2, %3 : vector<64x1xf32>
    %5 = vector.broadcast %4 : vector<64x1xf32> to vector<64x48xf32>
    %6 = arith.subf %0, %5 : vector<64x48xf32>
    %7 = arith.mulf %6, %6 : vector<64x48xf32>
    %cst_2 = arith.constant dense<0.000000e+00> : vector<64xf32>
    %8 = vector.multi_reduction <add>, %7, %cst_2 [1] : vector<64x48xf32> to vector<64xf32>
    %9 = vector.shape_cast %8 : vector<64xf32> to vector<64x1xf32>
    %cst_3 = arith.constant 4.800000e+01 : f32
    %10 = vector.broadcast %cst_3 : f32 to vector<64x1xf32>
    %11 = arith.divf %9, %10 : vector<64x1xf32>
    %12 = vector.broadcast %4 : vector<64x1xf32> to vector<64x48xf32>
    %13 = arith.subf %0, %12 : vector<64x48xf32>
    %cst_4 = arith.constant 9.99999974E-6 : f32
    %14 = vector.broadcast %cst_4 : f32 to vector<64x1xf32>
    %15 = arith.addf %11, %14 : vector<64x1xf32>
    %16 = math.rsqrt %15 : vector<64x1xf32>
    %17 = vector.broadcast %16 : vector<64x1xf32> to vector<64x48xf32>
    %18 = arith.mulf %13, %17 : vector<64x48xf32>
    %c0_5 = arith.constant 0 : index
    %c0_6 = arith.constant 0 : index
    %19 = vector.load %arg2[%c0_5, %c0_6] : memref<1x48xf32, #tpu.memory_space<vmem>>, vector<1x48xf32>
    %20 = vector.broadcast %19 : vector<1x48xf32> to vector<64x48xf32>
    %21 = arith.mulf %18, %20 : vector<64x48xf32>
    %c0_7 = arith.constant 0 : index
    %c0_8 = arith.constant 0 : index
    %22 = vector.load %arg3[%c0_7, %c0_8] : memref<1x48xf32, #tpu.memory_space<vmem>>, vector<1x48xf32>
    %23 = vector.broadcast %22 : vector<1x48xf32> to vector<64x48xf32>
    %24 = arith.addf %21, %23 : vector<64x48xf32>
    %c0_9 = arith.constant 0 : index
    %c0_10 = arith.constant 0 : index
    %25 = vector.load %arg4[%c0_9, %c0_10] : memref<48x16xf32, #tpu.memory_space<vmem>>, vector<48x16xf32>
    %cst_11 = arith.constant dense<0.000000e+00> : vector<64x16xf32>
    %26 = tpu.matmul %24, %25, %cst_11 {dimension_numbers = #tpu.dot_dimension_numbers<[1], [0], [0], [1], [0, 0, 1, 1], [], []>} : vector<64x48xf32>, vector<48x16xf32>, vector<64x16xf32> -> vector<64x16xf32>
    %c0_12 = arith.constant 0 : index
    %c0_13 = arith.constant 0 : index
    %27 = vector.load %arg5[%c0_12, %c0_13] : memref<1x16xf32, #tpu.memory_space<vmem>>, vector<1x16xf32>
    %28 = vector.broadcast %27 : vector<1x16xf32> to vector<64x16xf32>
    %29 = arith.addf %26, %28 : vector<64x16xf32>
    %c0_14 = arith.constant 0 : index
    %c0_15 = arith.constant 0 : index
    %30 = vector.load %arg6[%c0_14, %c0_15] : memref<64x16xf32, #tpu.memory_space<vmem>>, vector<64x16xf32>
    tpu.vector_store %arg6[%c0_14, %c0_15], %29 {strides = array<i32>} : memref<64x16xf32, #tpu.memory_space<vmem>>, vector<64x16xf32>,
    return
  }
  func.func @transform_0(%arg0: i32) -> (i32, i32) {
    %c0_i32 = arith.constant 0 : i32
    %c0_i32_0 = arith.constant 0 : i32
    return %arg0, %c0_i32 : i32, i32
  }
  func.func @transform_1(%arg0: i32) -> (i32, i32) {
    %c0_i32 = arith.constant 0 : i32
    %c0_i32_0 = arith.constant 0 : i32
    %c0_i32_1 = arith.constant 0 : i32
    return %c0_i32, %c0_i32_0 : i32, i32
  }
  func.func @transform_2(%arg0: i32) -> (i32, i32) {
    %c0_i32 = arith.constant 0 : i32
    %c0_i32_0 = arith.constant 0 : i32
    %c0_i32_1 = arith.constant 0 : i32
    return %c0_i32, %c0_i32_0 : i32, i32
  }
  func.func @transform_3(%arg0: i32) -> (i32, i32) {
    %c0_i32 = arith.constant 0 : i32
    %c0_i32_0 = arith.constant 0 : i32
    %c0_i32_1 = arith.constant 0 : i32
    return %c0_i32, %c0_i32_0 : i32, i32
  }
  func.func @transform_4(%arg0: i32) -> (i32, i32) {
    %c0_i32 = arith.constant 0 : i32
    %c0_i32_0 = arith.constant 0 : i32
    %c0_i32_1 = arith.constant 0 : i32
    return %c0_i32, %c0_i32_0 : i32, i32
  }
  func.func @transform_5(%arg0: i32) -> (i32, i32) {
    %c0_i32 = arith.constant 0 : i32
    %c0_i32_0 = arith.constant 0 : i32
    return %arg0, %c0_i32 : i32, i32
  }
}

module attributes {stable_mosaic.version = 11 : i64} {
  func.func @_mask_decode_kernel(%arg0: i32, %arg1: memref<64x16xf32, #tpu.memory_space<vmem>>, %arg2: memref<64x48xf32, #tpu.memory_space<vmem>>, %arg3: memref<16x48xf32, #tpu.memory_space<vmem>>, %arg4: memref<1x48xf32, #tpu.memory_space<vmem>>, %arg5: memref<48x56xf32, #tpu.memory_space<vmem>>, %arg6: memref<64x56xf32, #tpu.memory_space<vmem>>) attributes {dimension_semantics = [#tpu.dimension_semantics<parallel>], iteration_bounds = array<i64: 1>, scalar_prefetch = 0 : i64, scratch_operands = 0 : i64, tpu.core_type = #tpu.core_type<tc>, window_params = [{transform_indices = @transform_0, window_bounds = array<i64: 64, 16>}, {transform_indices = @transform_1, window_bounds = array<i64: 64, 48>}, {pipeline_mode = #tpu.pipeline_mode<synchronous>, transform_indices = @transform_2, window_bounds = array<i64: 16, 48>}, {pipeline_mode = #tpu.pipeline_mode<synchronous>, transform_indices = @transform_3, window_bounds = array<i64: 1, 48>}, {pipeline_mode = #tpu.pipeline_mode<synchronous>, transform_indices = @transform_4, window_bounds = array<i64: 48, 56>}, {transform_indices = @transform_5, window_bounds = array<i64: 64, 56>}]} {
    %c0 = arith.constant 0 : index
    %c0_0 = arith.constant 0 : index
    %0 = vector.load %arg1[%c0, %c0_0] : memref<64x16xf32, #tpu.memory_space<vmem>>, vector<64x16xf32>
    %c0_1 = arith.constant 0 : index
    %c0_2 = arith.constant 0 : index
    %1 = vector.load %arg3[%c0_1, %c0_2] : memref<16x48xf32, #tpu.memory_space<vmem>>, vector<16x48xf32>
    %cst = arith.constant dense<0.000000e+00> : vector<64x48xf32>
    %2 = tpu.matmul %0, %1, %cst {dimension_numbers = #tpu.dot_dimension_numbers<[1], [0], [0], [1], [0, 0, 1, 1], [], []>} : vector<64x16xf32>, vector<16x48xf32>, vector<64x48xf32> -> vector<64x48xf32>
    %c0_3 = arith.constant 0 : index
    %c0_4 = arith.constant 0 : index
    %3 = vector.load %arg4[%c0_3, %c0_4] : memref<1x48xf32, #tpu.memory_space<vmem>>, vector<1x48xf32>
    %4 = vector.broadcast %3 : vector<1x48xf32> to vector<64x48xf32>
    %5 = arith.addf %2, %4 : vector<64x48xf32>
    %cst_5 = arith.constant 0.000000e+00 : f32
    %6 = vector.broadcast %cst_5 : f32 to vector<64x48xf32>
    %7 = arith.maximumf %5, %6 : vector<64x48xf32>
    %c0_6 = arith.constant 0 : index
    %c0_7 = arith.constant 0 : index
    %8 = vector.load %arg2[%c0_6, %c0_7] : memref<64x48xf32, #tpu.memory_space<vmem>>, vector<64x48xf32>
    %9 = arith.mulf %7, %8 : vector<64x48xf32>
    %c0_8 = arith.constant 0 : index
    %c0_9 = arith.constant 0 : index
    %10 = vector.load %arg5[%c0_8, %c0_9] : memref<48x56xf32, #tpu.memory_space<vmem>>, vector<48x56xf32>
    %cst_10 = arith.constant dense<0.000000e+00> : vector<64x56xf32>
    %11 = tpu.matmul %9, %10, %cst_10 {dimension_numbers = #tpu.dot_dimension_numbers<[1], [0], [0], [1], [0, 0, 1, 1], [], []>} : vector<64x48xf32>, vector<48x56xf32>, vector<64x56xf32> -> vector<64x56xf32>
    %c0_11 = arith.constant 0 : index
    %c0_12 = arith.constant 0 : index
    %12 = vector.load %arg6[%c0_11, %c0_12] : memref<64x56xf32, #tpu.memory_space<vmem>>, vector<64x56xf32>
    tpu.vector_store %arg6[%c0_11, %c0_12], %11 {strides = array<i32>} : memref<64x56xf32, #tpu.memory_space<vmem>>, vector<64x56xf32>,
    return
  }
  func.func @transform_0(%arg0: i32) -> (i32, i32) {
    %c0_i32 = arith.constant 0 : i32
    %c0_i32_0 = arith.constant 0 : i32
    return %arg0, %c0_i32 : i32, i32
  }
  func.func @transform_1(%arg0: i32) -> (i32, i32) {
    %c0_i32 = arith.constant 0 : i32
    %c0_i32_0 = arith.constant 0 : i32
    return %arg0, %c0_i32 : i32, i32
  }
  func.func @transform_2(%arg0: i32) -> (i32, i32) {
    %c0_i32 = arith.constant 0 : i32
    %c0_i32_0 = arith.constant 0 : i32
    %c0_i32_1 = arith.constant 0 : i32
    return %c0_i32, %c0_i32_0 : i32, i32
  }
  func.func @transform_3(%arg0: i32) -> (i32, i32) {
    %c0_i32 = arith.constant 0 : i32
    %c0_i32_0 = arith.constant 0 : i32
    %c0_i32_1 = arith.constant 0 : i32
    return %c0_i32, %c0_i32_0 : i32, i32
  }
  func.func @transform_4(%arg0: i32) -> (i32, i32) {
    %c0_i32 = arith.constant 0 : i32
    %c0_i32_0 = arith.constant 0 : i32
    %c0_i32_1 = arith.constant 0 : i32
    return %c0_i32, %c0_i32_0 : i32, i32
  }
  func.func @transform_5(%arg0: i32) -> (i32, i32) {
    %c0_i32 = arith.constant 0 : i32
    %c0_i32_0 = arith.constant 0 : i32
    return %arg0, %c0_i32 : i32, i32
  }
}

module attributes {stable_mosaic.version = 11 : i64} {
  func.func @_tcn_all_kernel(%arg0: i32, %arg1: memref<1x32x16xf32, #tpu.memory_space<vmem>>, %arg2: memref<1x8x1x32xf32, #tpu.memory_space<vmem>>, %arg3: memref<8x16x32xf32, #tpu.memory_space<vmem>>, %arg4: memref<8x1x32xf32, #tpu.memory_space<vmem>>, %arg5: memref<8x1x32xf32, #tpu.memory_space<vmem>>, %arg6: memref<8x1x32xf32, #tpu.memory_space<vmem>>, %arg7: memref<8x1x32xf32, #tpu.memory_space<vmem>>, %arg8: memref<8x3x32xf32, #tpu.memory_space<vmem>>, %arg9: memref<8x1x32xf32, #tpu.memory_space<vmem>>, %arg10: memref<8x1x32xf32, #tpu.memory_space<vmem>>, %arg11: memref<8x1x32xf32, #tpu.memory_space<vmem>>, %arg12: memref<8x1x32xf32, #tpu.memory_space<vmem>>, %arg13: memref<8x32x16xf32, #tpu.memory_space<vmem>>, %arg14: memref<8x1x16xf32, #tpu.memory_space<vmem>>, %arg15: memref<1x32x16xf32, #tpu.memory_space<vmem>>) attributes {dimension_semantics = [#tpu.dimension_semantics<parallel>], iteration_bounds = array<i64: 2>, scalar_prefetch = 0 : i64, scratch_operands = 0 : i64, tpu.core_type = #tpu.core_type<tc>, window_params = [{transform_indices = @transform_0, window_bounds = array<i64: 1, 32, 16>}, {transform_indices = @transform_1, window_bounds = array<i64: 1, 8, 1, 32>}, {pipeline_mode = #tpu.pipeline_mode<synchronous>, transform_indices = @transform_2, window_bounds = array<i64: 8, 16, 32>}, {pipeline_mode = #tpu.pipeline_mode<synchronous>, transform_indices = @transform_3, window_bounds = array<i64: 8, 1, 32>}, {pipeline_mode = #tpu.pipeline_mode<synchronous>, transform_indices = @transform_4, window_bounds = array<i64: 8, 1, 32>}, {pipeline_mode = #tpu.pipeline_mode<synchronous>, transform_indices = @transform_5, window_bounds = array<i64: 8, 1, 32>}, {pipeline_mode = #tpu.pipeline_mode<synchronous>, transform_indices = @transform_6, window_bounds = array<i64: 8, 1, 32>}, {pipeline_mode = #tpu.pipeline_mode<synchronous>, transform_indices = @transform_7, window_bounds = array<i64: 8, 3, 32>}, {pipeline_mode = #tpu.pipeline_mode<synchronous>, transform_indices = @transform_8, window_bounds = array<i64: 8, 1, 32>}, {pipeline_mode = #tpu.pipeline_mode<synchronous>, transform_indices = @transform_9, window_bounds = array<i64: 8, 1, 32>}, {pipeline_mode = #tpu.pipeline_mode<synchronous>, transform_indices = @transform_10, window_bounds = array<i64: 8, 1, 32>}, {pipeline_mode = #tpu.pipeline_mode<synchronous>, transform_indices = @transform_11, window_bounds = array<i64: 8, 1, 32>}, {pipeline_mode = #tpu.pipeline_mode<synchronous>, transform_indices = @transform_12, window_bounds = array<i64: 8, 32, 16>}, {pipeline_mode = #tpu.pipeline_mode<synchronous>, transform_indices = @transform_13, window_bounds = array<i64: 8, 1, 16>}, {transform_indices = @transform_14, window_bounds = array<i64: 1, 32, 16>}]} {
    %0 = tpu.iota {dimensions = array<i32: 0>} : vector<32x1xi32>
    %c31_i32 = arith.constant 31 : i32
    %1 = vector.broadcast %c31_i32 : i32 to vector<32x1xi32>
    %2 = arith.cmpi slt, %0, %1 : vector<32x1xi32>
    %c0 = arith.constant 0 : index
    %c0_0 = arith.constant 0 : index
    %c0_1 = arith.constant 0 : index
    %3 = vector.load %arg1[%c0, %c0_0, %c0_1] : memref<1x32x16xf32, #tpu.memory_space<vmem>>, vector<1x32x16xf32>
    %4 = vector.shape_cast %3 : vector<1x32x16xf32> to vector<32x16xf32>
    %c0_2 = arith.constant 0 : index
    %c0_3 = arith.constant 0 : index
    %c0_4 = arith.constant 0 : index
    %5 = vector.load %arg3[%c0_2, %c0_3, %c0_4] : memref<8x16x32xf32, #tpu.memory_space<vmem>>, vector<1x16x32xf32>
    %6 = vector.shape_cast %5 : vector<1x16x32xf32> to vector<16x32xf32>
    %cst = arith.constant dense<0.000000e+00> : vector<32x32xf32>
    %7 = tpu.matmul %4, %6, %cst {dimension_numbers = #tpu.dot_dimension_numbers<[1], [0], [0], [1], [0, 0, 1, 1], [], []>} : vector<32x16xf32>, vector<16x32xf32>, vector<32x32xf32> -> vector<32x32xf32>
    %c0_5 = arith.constant 0 : index
    %c0_6 = arith.constant 0 : index
    %c0_7 = arith.constant 0 : index
    %c0_8 = arith.constant 0 : index
    %8 = vector.load %arg2[%c0_5, %c0_6, %c0_7, %c0_8] : memref<1x8x1x32xf32, #tpu.memory_space<vmem>>, vector<1x1x1x32xf32>
    %9 = vector.shape_cast %8 : vector<1x1x1x32xf32> to vector<1x32xf32>
    %10 = vector.broadcast %9 : vector<1x32xf32> to vector<32x32xf32>
    %11 = arith.addf %7, %10 : vector<32x32xf32>
    %c0_9 = arith.constant 0 : index
    %c0_10 = arith.constant 0 : index
    %c0_11 = arith.constant 0 : index
    %12 = vector.load %arg4[%c0_9, %c0_10, %c0_11] : memref<8x1x32xf32, #tpu.memory_space<vmem>>, vector<1x1x32xf32>
    %13 = vector.shape_cast %12 : vector<1x1x32xf32> to vector<1x32xf32>
    %14 = vector.broadcast %13 : vector<1x32xf32> to vector<32x32xf32>
    %15 = arith.addf %11, %14 : vector<32x32xf32>
    %cst_12 = arith.constant 0.000000e+00 : f32
    %16 = vector.broadcast %cst_12 : f32 to vector<32x32xf32>
    %17 = arith.cmpf oge, %15, %16 : vector<32x32xf32>
    %c0_13 = arith.constant 0 : index
    %c0_14 = arith.constant 0 : index
    %c0_15 = arith.constant 0 : index
    %18 = vector.load %arg5[%c0_13, %c0_14, %c0_15] : memref<8x1x32xf32, #tpu.memory_space<vmem>>, vector<1x1x32xf32>
    %19 = vector.shape_cast %18 : vector<1x1x32xf32> to vector<1x32xf32>
    %20 = vector.broadcast %19 : vector<1x32xf32> to vector<32x32xf32>
    %21 = arith.mulf %20, %15 : vector<32x32xf32>
    %22 = arith.select %17, %15, %21 : vector<32x32xi1>, vector<32x32xf32>
    %cst_16 = arith.constant 0.000000e+00 : f32
    %23 = vector.shape_cast %2 : vector<32x1xi1> to vector<32x1xi1>
    %24 = vector.broadcast %23 : vector<32x1xi1> to vector<32x32xi1>
    %25 = vector.broadcast %cst_16 : f32 to vector<32x32xf32>
    %26 = arith.select %24, %22, %25 : vector<32x32xi1>, vector<32x32xf32>
    %27 = vector.shape_cast %26 : vector<32x32xf32> to vector<1x32x32xf32>
    %cst_17 = arith.constant dense<0.000000e+00> : vector<1xf32>
    %28 = vector.multi_reduction <add>, %27, %cst_17 [1, 2] : vector<1x32x32xf32> to vector<1xf32>
    %29 = vector.shape_cast %28 : vector<1xf32> to vector<1x1x1xf32>
    %30 = vector.extract %29[0, 0, 0] : f32 from vector<1x1x1xf32>
    %cst_18 = arith.constant 0.00100806449 : f32
    %31 = arith.mulf %30, %cst_18 : f32
    %32 = arith.mulf %26, %26 : vector<32x32xf32>
    %33 = vector.shape_cast %32 : vector<32x32xf32> to vector<1x32x32xf32>
    %cst_19 = arith.constant dense<0.000000e+00> : vector<1xf32>
    %34 = vector.multi_reduction <add>, %33, %cst_19 [1, 2] : vector<1x32x32xf32> to vector<1xf32>
    %35 = vector.shape_cast %34 : vector<1xf32> to vector<1x1x1xf32>
    %36 = vector.extract %35[0, 0, 0] : f32 from vector<1x1x1xf32>
    %cst_20 = arith.constant 0.00100806449 : f32
    %37 = arith.mulf %36, %cst_20 : f32
    %38 = arith.mulf %31, %31 : f32
    %39 = arith.subf %37, %38 : f32
    %cst_21 = arith.constant 0.000000e+00 : f32
    %40 = arith.maximumf %39, %cst_21 : f32
    %41 = vector.broadcast %31 : f32 to vector<32x32xf32>
    %42 = arith.subf %22, %41 : vector<32x32xf32>
    %cst_22 = arith.constant 9.99999974E-6 : f32
    %43 = arith.addf %40, %cst_22 : f32
    %44 = math.rsqrt %43 : f32
    %45 = vector.broadcast %44 : f32 to vector<32x32xf32>
    %46 = arith.mulf %42, %45 : vector<32x32xf32>
    %c0_23 = arith.constant 0 : index
    %c0_24 = arith.constant 0 : index
    %c0_25 = arith.constant 0 : index
    %47 = vector.load %arg6[%c0_23, %c0_24, %c0_25] : memref<8x1x32xf32, #tpu.memory_space<vmem>>, vector<1x1x32xf32>
    %48 = vector.shape_cast %47 : vector<1x1x32xf32> to vector<1x32xf32>
    %49 = vector.broadcast %48 : vector<1x32xf32> to vector<32x32xf32>
    %50 = arith.mulf %46, %49 : vector<32x32xf32>
    %c0_26 = arith.constant 0 : index
    %c0_27 = arith.constant 0 : index
    %c0_28 = arith.constant 0 : index
    %51 = vector.load %arg7[%c0_26, %c0_27, %c0_28] : memref<8x1x32xf32, #tpu.memory_space<vmem>>, vector<1x1x32xf32>
    %52 = vector.shape_cast %51 : vector<1x1x32xf32> to vector<1x32xf32>
    %53 = vector.broadcast %52 : vector<1x32xf32> to vector<32x32xf32>
    %54 = arith.addf %50, %53 : vector<32x32xf32>
    %cst_29 = arith.constant 0.000000e+00 : f32
    %55 = vector.shape_cast %2 : vector<32x1xi1> to vector<32x1xi1>
    %56 = vector.broadcast %55 : vector<32x1xi1> to vector<32x32xi1>
    %57 = vector.broadcast %cst_29 : f32 to vector<32x32xf32>
    %58 = arith.select %56, %54, %57 : vector<32x32xi1>, vector<32x32xf32>
    %c0_30 = arith.constant 0 : index
    %c0_31 = arith.constant 0 : index
    %c0_32 = arith.constant 0 : index
    %59 = vector.load %arg8[%c0_30, %c0_31, %c0_32] : memref<8x3x32xf32, #tpu.memory_space<vmem>>, vector<1x3x32xf32>
    %60 = vector.shape_cast %59 : vector<1x3x32xf32> to vector<3x32xf32>
    %cst_33 = arith.constant 0.000000e+00 : f32
    %61 = vector.broadcast %cst_33 : f32 to vector<32x32xf32>
    %c1_i32 = arith.constant 1 : i32
    %62 = tpu.dynamic_rotate %58 by %c1_i32 dim 0 : vector<32x32xf32>, i32 -> vector<32x32xf32>
    %c-1_i32 = arith.constant -1 : i32
    %63 = vector.broadcast %c-1_i32 : i32 to vector<32x1xi32>
    %64 = arith.addi %0, %63 : vector<32x1xi32>
    %c0_i32 = arith.constant 0 : i32
    %65 = vector.broadcast %c0_i32 : i32 to vector<32x1xi32>
    %66 = arith.cmpi sge, %64, %65 : vector<32x1xi32>
    %c-1_i32_34 = arith.constant -1 : i32
    %67 = vector.broadcast %c-1_i32_34 : i32 to vector<32x1xi32>
    %68 = arith.addi %0, %67 : vector<32x1xi32>
    %c32_i32 = arith.constant 32 : i32
    %69 = vector.broadcast %c32_i32 : i32 to vector<32x1xi32>
    %70 = arith.cmpi slt, %68, %69 : vector<32x1xi32>
    %71 = arith.andi %66, %70 : vector<32x1xi1>
    %cst_35 = arith.constant 0.000000e+00 : f32
    %72 = vector.shape_cast %71 : vector<32x1xi1> to vector<32x1xi1>
    %73 = vector.broadcast %72 : vector<32x1xi1> to vector<32x32xi1>
    %74 = vector.broadcast %cst_35 : f32 to vector<32x32xf32>
    %75 = arith.select %73, %62, %74 : vector<32x32xi1>, vector<32x32xf32>
    %76 = vector.extract_strided_slice %60 {offsets = [0, 0], sizes = [1, 32], strides = [1, 1]} : vector<3x32xf32> to vector<1x32xf32>
    %77 = vector.broadcast %76 : vector<1x32xf32> to vector<32x32xf32>
    %78 = arith.mulf %75, %77 : vector<32x32xf32>
    %79 = arith.addf %61, %78 : vector<32x32xf32>
    %80 = vector.extract_strided_slice %60 {offsets = [1, 0], sizes = [1, 32], strides = [1, 1]} : vector<3x32xf32> to vector<1x32xf32>
    %81 = vector.broadcast %80 : vector<1x32xf32> to vector<32x32xf32>
    %82 = arith.mulf %58, %81 : vector<32x32xf32>
    %83 = arith.addf %79, %82 : vector<32x32xf32>
    %c31_i32_36 = arith.constant 31 : i32
    %84 = tpu.dynamic_rotate %58 by %c31_i32_36 dim 0 : vector<32x32xf32>, i32 -> vector<32x32xf32>
    %c1_i32_37 = arith.constant 1 : i32
    %85 = vector.broadcast %c1_i32_37 : i32 to vector<32x1xi32>
    %86 = arith.addi %0, %85 : vector<32x1xi32>
    %c0_i32_38 = arith.constant 0 : i32
    %87 = vector.broadcast %c0_i32_38 : i32 to vector<32x1xi32>
    %88 = arith.cmpi sge, %86, %87 : vector<32x1xi32>
    %c1_i32_39 = arith.constant 1 : i32
    %89 = vector.broadcast %c1_i32_39 : i32 to vector<32x1xi32>
    %90 = arith.addi %0, %89 : vector<32x1xi32>
    %c32_i32_40 = arith.constant 32 : i32
    %91 = vector.broadcast %c32_i32_40 : i32 to vector<32x1xi32>
    %92 = arith.cmpi slt, %90, %91 : vector<32x1xi32>
    %93 = arith.andi %88, %92 : vector<32x1xi1>
    %cst_41 = arith.constant 0.000000e+00 : f32
    %94 = vector.shape_cast %93 : vector<32x1xi1> to vector<32x1xi1>
    %95 = vector.broadcast %94 : vector<32x1xi1> to vector<32x32xi1>
    %96 = vector.broadcast %cst_41 : f32 to vector<32x32xf32>
    %97 = arith.select %95, %84, %96 : vector<32x32xi1>, vector<32x32xf32>
    %98 = vector.extract_strided_slice %60 {offsets = [2, 0], sizes = [1, 32], strides = [1, 1]} : vector<3x32xf32> to vector<1x32xf32>
    %99 = vector.broadcast %98 : vector<1x32xf32> to vector<32x32xf32>
    %100 = arith.mulf %97, %99 : vector<32x32xf32>
    %101 = arith.addf %83, %100 : vector<32x32xf32>
    %c0_42 = arith.constant 0 : index
    %c0_43 = arith.constant 0 : index
    %c0_44 = arith.constant 0 : index
    %102 = vector.load %arg9[%c0_42, %c0_43, %c0_44] : memref<8x1x32xf32, #tpu.memory_space<vmem>>, vector<1x1x32xf32>
    %103 = vector.shape_cast %102 : vector<1x1x32xf32> to vector<1x32xf32>
    %104 = vector.broadcast %103 : vector<1x32xf32> to vector<32x32xf32>
    %105 = arith.addf %101, %104 : vector<32x32xf32>
    %cst_45 = arith.constant 0.000000e+00 : f32
    %106 = vector.broadcast %cst_45 : f32 to vector<32x32xf32>
    %107 = arith.cmpf oge, %105, %106 : vector<32x32xf32>
    %c0_46 = arith.constant 0 : index
    %c0_47 = arith.constant 0 : index
    %c0_48 = arith.constant 0 : index
    %108 = vector.load %arg10[%c0_46, %c0_47, %c0_48] : memref<8x1x32xf32, #tpu.memory_space<vmem>>, vector<1x1x32xf32>
    %109 = vector.shape_cast %108 : vector<1x1x32xf32> to vector<1x32xf32>
    %110 = vector.broadcast %109 : vector<1x32xf32> to vector<32x32xf32>
    %111 = arith.mulf %110, %105 : vector<32x32xf32>
    %112 = arith.select %107, %105, %111 : vector<32x32xi1>, vector<32x32xf32>
    %cst_49 = arith.constant 0.000000e+00 : f32
    %113 = vector.shape_cast %2 : vector<32x1xi1> to vector<32x1xi1>
    %114 = vector.broadcast %113 : vector<32x1xi1> to vector<32x32xi1>
    %115 = vector.broadcast %cst_49 : f32 to vector<32x32xf32>
    %116 = arith.select %114, %112, %115 : vector<32x32xi1>, vector<32x32xf32>
    %117 = vector.shape_cast %116 : vector<32x32xf32> to vector<1x32x32xf32>
    %cst_50 = arith.constant dense<0.000000e+00> : vector<1xf32>
    %118 = vector.multi_reduction <add>, %117, %cst_50 [1, 2] : vector<1x32x32xf32> to vector<1xf32>
    %119 = vector.shape_cast %118 : vector<1xf32> to vector<1x1x1xf32>
    %120 = vector.extract %119[0, 0, 0] : f32 from vector<1x1x1xf32>
    %cst_51 = arith.constant 0.00100806449 : f32
    %121 = arith.mulf %120, %cst_51 : f32
    %122 = arith.mulf %116, %116 : vector<32x32xf32>
    %123 = vector.shape_cast %122 : vector<32x32xf32> to vector<1x32x32xf32>
    %cst_52 = arith.constant dense<0.000000e+00> : vector<1xf32>
    %124 = vector.multi_reduction <add>, %123, %cst_52 [1, 2] : vector<1x32x32xf32> to vector<1xf32>
    %125 = vector.shape_cast %124 : vector<1xf32> to vector<1x1x1xf32>
    %126 = vector.extract %125[0, 0, 0] : f32 from vector<1x1x1xf32>
    %cst_53 = arith.constant 0.00100806449 : f32
    %127 = arith.mulf %126, %cst_53 : f32
    %128 = arith.mulf %121, %121 : f32
    %129 = arith.subf %127, %128 : f32
    %cst_54 = arith.constant 0.000000e+00 : f32
    %130 = arith.maximumf %129, %cst_54 : f32
    %131 = vector.broadcast %121 : f32 to vector<32x32xf32>
    %132 = arith.subf %112, %131 : vector<32x32xf32>
    %cst_55 = arith.constant 9.99999974E-6 : f32
    %133 = arith.addf %130, %cst_55 : f32
    %134 = math.rsqrt %133 : f32
    %135 = vector.broadcast %134 : f32 to vector<32x32xf32>
    %136 = arith.mulf %132, %135 : vector<32x32xf32>
    %c0_56 = arith.constant 0 : index
    %c0_57 = arith.constant 0 : index
    %c0_58 = arith.constant 0 : index
    %137 = vector.load %arg11[%c0_56, %c0_57, %c0_58] : memref<8x1x32xf32, #tpu.memory_space<vmem>>, vector<1x1x32xf32>
    %138 = vector.shape_cast %137 : vector<1x1x32xf32> to vector<1x32xf32>
    %139 = vector.broadcast %138 : vector<1x32xf32> to vector<32x32xf32>
    %140 = arith.mulf %136, %139 : vector<32x32xf32>
    %c0_59 = arith.constant 0 : index
    %c0_60 = arith.constant 0 : index
    %c0_61 = arith.constant 0 : index
    %141 = vector.load %arg12[%c0_59, %c0_60, %c0_61] : memref<8x1x32xf32, #tpu.memory_space<vmem>>, vector<1x1x32xf32>
    %142 = vector.shape_cast %141 : vector<1x1x32xf32> to vector<1x32xf32>
    %143 = vector.broadcast %142 : vector<1x32xf32> to vector<32x32xf32>
    %144 = arith.addf %140, %143 : vector<32x32xf32>
    %c0_62 = arith.constant 0 : index
    %c0_63 = arith.constant 0 : index
    %c0_64 = arith.constant 0 : index
    %145 = vector.load %arg13[%c0_62, %c0_63, %c0_64] : memref<8x32x16xf32, #tpu.memory_space<vmem>>, vector<1x32x16xf32>
    %146 = vector.shape_cast %145 : vector<1x32x16xf32> to vector<32x16xf32>
    %cst_65 = arith.constant dense<0.000000e+00> : vector<32x16xf32>
    %147 = tpu.matmul %144, %146, %cst_65 {dimension_numbers = #tpu.dot_dimension_numbers<[1], [0], [0], [1], [0, 0, 1, 1], [], []>} : vector<32x32xf32>, vector<32x16xf32>, vector<32x16xf32> -> vector<32x16xf32>
    %c0_66 = arith.constant 0 : index
    %c0_67 = arith.constant 0 : index
    %c0_68 = arith.constant 0 : index
    %148 = vector.load %arg14[%c0_66, %c0_67, %c0_68] : memref<8x1x16xf32, #tpu.memory_space<vmem>>, vector<1x1x16xf32>
    %149 = vector.shape_cast %148 : vector<1x1x16xf32> to vector<1x16xf32>
    %150 = vector.broadcast %149 : vector<1x16xf32> to vector<32x16xf32>
    %151 = arith.addf %147, %150 : vector<32x16xf32>
    %152 = arith.addf %4, %151 : vector<32x16xf32>
    %cst_69 = arith.constant 0.000000e+00 : f32
    %153 = vector.shape_cast %2 : vector<32x1xi1> to vector<32x1xi1>
    %154 = vector.broadcast %153 : vector<32x1xi1> to vector<32x16xi1>
    %155 = vector.broadcast %cst_69 : f32 to vector<32x16xf32>
    %156 = arith.select %154, %152, %155 : vector<32x16xi1>, vector<32x16xf32>
    %c1 = arith.constant 1 : index
    %c0_70 = arith.constant 0 : index
    %c0_71 = arith.constant 0 : index
    %157 = vector.load %arg3[%c1, %c0_70, %c0_71] : memref<8x16x32xf32, #tpu.memory_space<vmem>>, vector<1x16x32xf32>
    %158 = vector.shape_cast %157 : vector<1x16x32xf32> to vector<16x32xf32>
    %cst_72 = arith.constant dense<0.000000e+00> : vector<32x32xf32>
    %159 = tpu.matmul %156, %158, %cst_72 {dimension_numbers = #tpu.dot_dimension_numbers<[1], [0], [0], [1], [0, 0, 1, 1], [], []>} : vector<32x16xf32>, vector<16x32xf32>, vector<32x32xf32> -> vector<32x32xf32>
    %c0_73 = arith.constant 0 : index
    %c1_74 = arith.constant 1 : index
    %c0_75 = arith.constant 0 : index
    %c0_76 = arith.constant 0 : index
    %160 = vector.load %arg2[%c0_73, %c1_74, %c0_75, %c0_76] : memref<1x8x1x32xf32, #tpu.memory_space<vmem>>, vector<1x1x1x32xf32>
    %161 = vector.shape_cast %160 : vector<1x1x1x32xf32> to vector<1x32xf32>
    %162 = vector.broadcast %161 : vector<1x32xf32> to vector<32x32xf32>
    %163 = arith.addf %159, %162 : vector<32x32xf32>
    %c1_77 = arith.constant 1 : index
    %c0_78 = arith.constant 0 : index
    %c0_79 = arith.constant 0 : index
    %164 = vector.load %arg4[%c1_77, %c0_78, %c0_79] : memref<8x1x32xf32, #tpu.memory_space<vmem>>, vector<1x1x32xf32>
    %165 = vector.shape_cast %164 : vector<1x1x32xf32> to vector<1x32xf32>
    %166 = vector.broadcast %165 : vector<1x32xf32> to vector<32x32xf32>
    %167 = arith.addf %163, %166 : vector<32x32xf32>
    %cst_80 = arith.constant 0.000000e+00 : f32
    %168 = vector.broadcast %cst_80 : f32 to vector<32x32xf32>
    %169 = arith.cmpf oge, %167, %168 : vector<32x32xf32>
    %c1_81 = arith.constant 1 : index
    %c0_82 = arith.constant 0 : index
    %c0_83 = arith.constant 0 : index
    %170 = vector.load %arg5[%c1_81, %c0_82, %c0_83] : memref<8x1x32xf32, #tpu.memory_space<vmem>>, vector<1x1x32xf32>
    %171 = vector.shape_cast %170 : vector<1x1x32xf32> to vector<1x32xf32>
    %172 = vector.broadcast %171 : vector<1x32xf32> to vector<32x32xf32>
    %173 = arith.mulf %172, %167 : vector<32x32xf32>
    %174 = arith.select %169, %167, %173 : vector<32x32xi1>, vector<32x32xf32>
    %cst_84 = arith.constant 0.000000e+00 : f32
    %175 = vector.shape_cast %2 : vector<32x1xi1> to vector<32x1xi1>
    %176 = vector.broadcast %175 : vector<32x1xi1> to vector<32x32xi1>
    %177 = vector.broadcast %cst_84 : f32 to vector<32x32xf32>
    %178 = arith.select %176, %174, %177 : vector<32x32xi1>, vector<32x32xf32>
    %179 = vector.shape_cast %178 : vector<32x32xf32> to vector<1x32x32xf32>
    %cst_85 = arith.constant dense<0.000000e+00> : vector<1xf32>
    %180 = vector.multi_reduction <add>, %179, %cst_85 [1, 2] : vector<1x32x32xf32> to vector<1xf32>
    %181 = vector.shape_cast %180 : vector<1xf32> to vector<1x1x1xf32>
    %182 = vector.extract %181[0, 0, 0] : f32 from vector<1x1x1xf32>
    %cst_86 = arith.constant 0.00100806449 : f32
    %183 = arith.mulf %182, %cst_86 : f32
    %184 = arith.mulf %178, %178 : vector<32x32xf32>
    %185 = vector.shape_cast %184 : vector<32x32xf32> to vector<1x32x32xf32>
    %cst_87 = arith.constant dense<0.000000e+00> : vector<1xf32>
    %186 = vector.multi_reduction <add>, %185, %cst_87 [1, 2] : vector<1x32x32xf32> to vector<1xf32>
    %187 = vector.shape_cast %186 : vector<1xf32> to vector<1x1x1xf32>
    %188 = vector.extract %187[0, 0, 0] : f32 from vector<1x1x1xf32>
    %cst_88 = arith.constant 0.00100806449 : f32
    %189 = arith.mulf %188, %cst_88 : f32
    %190 = arith.mulf %183, %183 : f32
    %191 = arith.subf %189, %190 : f32
    %cst_89 = arith.constant 0.000000e+00 : f32
    %192 = arith.maximumf %191, %cst_89 : f32
    %193 = vector.broadcast %183 : f32 to vector<32x32xf32>
    %194 = arith.subf %174, %193 : vector<32x32xf32>
    %cst_90 = arith.constant 9.99999974E-6 : f32
    %195 = arith.addf %192, %cst_90 : f32
    %196 = math.rsqrt %195 : f32
    %197 = vector.broadcast %196 : f32 to vector<32x32xf32>
    %198 = arith.mulf %194, %197 : vector<32x32xf32>
    %c1_91 = arith.constant 1 : index
    %c0_92 = arith.constant 0 : index
    %c0_93 = arith.constant 0 : index
    %199 = vector.load %arg6[%c1_91, %c0_92, %c0_93] : memref<8x1x32xf32, #tpu.memory_space<vmem>>, vector<1x1x32xf32>
    %200 = vector.shape_cast %199 : vector<1x1x32xf32> to vector<1x32xf32>
    %201 = vector.broadcast %200 : vector<1x32xf32> to vector<32x32xf32>
    %202 = arith.mulf %198, %201 : vector<32x32xf32>
    %c1_94 = arith.constant 1 : index
    %c0_95 = arith.constant 0 : index
    %c0_96 = arith.constant 0 : index
    %203 = vector.load %arg7[%c1_94, %c0_95, %c0_96] : memref<8x1x32xf32, #tpu.memory_space<vmem>>, vector<1x1x32xf32>
    %204 = vector.shape_cast %203 : vector<1x1x32xf32> to vector<1x32xf32>
    %205 = vector.broadcast %204 : vector<1x32xf32> to vector<32x32xf32>
    %206 = arith.addf %202, %205 : vector<32x32xf32>
    %cst_97 = arith.constant 0.000000e+00 : f32
    %207 = vector.shape_cast %2 : vector<32x1xi1> to vector<32x1xi1>
    %208 = vector.broadcast %207 : vector<32x1xi1> to vector<32x32xi1>
    %209 = vector.broadcast %cst_97 : f32 to vector<32x32xf32>
    %210 = arith.select %208, %206, %209 : vector<32x32xi1>, vector<32x32xf32>
    %c1_98 = arith.constant 1 : index
    %c0_99 = arith.constant 0 : index
    %c0_100 = arith.constant 0 : index
    %211 = vector.load %arg8[%c1_98, %c0_99, %c0_100] : memref<8x3x32xf32, #tpu.memory_space<vmem>>, vector<1x3x32xf32>
    %212 = vector.shape_cast %211 : vector<1x3x32xf32> to vector<3x32xf32>
    %cst_101 = arith.constant 0.000000e+00 : f32
    %213 = vector.broadcast %cst_101 : f32 to vector<32x32xf32>
    %c2_i32 = arith.constant 2 : i32
    %214 = tpu.dynamic_rotate %210 by %c2_i32 dim 0 : vector<32x32xf32>, i32 -> vector<32x32xf32>
    %c-2_i32 = arith.constant -2 : i32
    %215 = vector.broadcast %c-2_i32 : i32 to vector<32x1xi32>
    %216 = arith.addi %0, %215 : vector<32x1xi32>
    %c0_i32_102 = arith.constant 0 : i32
    %217 = vector.broadcast %c0_i32_102 : i32 to vector<32x1xi32>
    %218 = arith.cmpi sge, %216, %217 : vector<32x1xi32>
    %c-2_i32_103 = arith.constant -2 : i32
    %219 = vector.broadcast %c-2_i32_103 : i32 to vector<32x1xi32>
    %220 = arith.addi %0, %219 : vector<32x1xi32>
    %c32_i32_104 = arith.constant 32 : i32
    %221 = vector.broadcast %c32_i32_104 : i32 to vector<32x1xi32>
    %222 = arith.cmpi slt, %220, %221 : vector<32x1xi32>
    %223 = arith.andi %218, %222 : vector<32x1xi1>
    %cst_105 = arith.constant 0.000000e+00 : f32
    %224 = vector.shape_cast %223 : vector<32x1xi1> to vector<32x1xi1>
    %225 = vector.broadcast %224 : vector<32x1xi1> to vector<32x32xi1>
    %226 = vector.broadcast %cst_105 : f32 to vector<32x32xf32>
    %227 = arith.select %225, %214, %226 : vector<32x32xi1>, vector<32x32xf32>
    %228 = vector.extract_strided_slice %212 {offsets = [0, 0], sizes = [1, 32], strides = [1, 1]} : vector<3x32xf32> to vector<1x32xf32>
    %229 = vector.broadcast %228 : vector<1x32xf32> to vector<32x32xf32>
    %230 = arith.mulf %227, %229 : vector<32x32xf32>
    %231 = arith.addf %213, %230 : vector<32x32xf32>
    %232 = vector.extract_strided_slice %212 {offsets = [1, 0], sizes = [1, 32], strides = [1, 1]} : vector<3x32xf32> to vector<1x32xf32>
    %233 = vector.broadcast %232 : vector<1x32xf32> to vector<32x32xf32>
    %234 = arith.mulf %210, %233 : vector<32x32xf32>
    %235 = arith.addf %231, %234 : vector<32x32xf32>
    %c30_i32 = arith.constant 30 : i32
    %236 = tpu.dynamic_rotate %210 by %c30_i32 dim 0 : vector<32x32xf32>, i32 -> vector<32x32xf32>
    %c2_i32_106 = arith.constant 2 : i32
    %237 = vector.broadcast %c2_i32_106 : i32 to vector<32x1xi32>
    %238 = arith.addi %0, %237 : vector<32x1xi32>
    %c0_i32_107 = arith.constant 0 : i32
    %239 = vector.broadcast %c0_i32_107 : i32 to vector<32x1xi32>
    %240 = arith.cmpi sge, %238, %239 : vector<32x1xi32>
    %c2_i32_108 = arith.constant 2 : i32
    %241 = vector.broadcast %c2_i32_108 : i32 to vector<32x1xi32>
    %242 = arith.addi %0, %241 : vector<32x1xi32>
    %c32_i32_109 = arith.constant 32 : i32
    %243 = vector.broadcast %c32_i32_109 : i32 to vector<32x1xi32>
    %244 = arith.cmpi slt, %242, %243 : vector<32x1xi32>
    %245 = arith.andi %240, %244 : vector<32x1xi1>
    %cst_110 = arith.constant 0.000000e+00 : f32
    %246 = vector.shape_cast %245 : vector<32x1xi1> to vector<32x1xi1>
    %247 = vector.broadcast %246 : vector<32x1xi1> to vector<32x32xi1>
    %248 = vector.broadcast %cst_110 : f32 to vector<32x32xf32>
    %249 = arith.select %247, %236, %248 : vector<32x32xi1>, vector<32x32xf32>
    %250 = vector.extract_strided_slice %212 {offsets = [2, 0], sizes = [1, 32], strides = [1, 1]} : vector<3x32xf32> to vector<1x32xf32>
    %251 = vector.broadcast %250 : vector<1x32xf32> to vector<32x32xf32>
    %252 = arith.mulf %249, %251 : vector<32x32xf32>
    %253 = arith.addf %235, %252 : vector<32x32xf32>
    %c1_111 = arith.constant 1 : index
    %c0_112 = arith.constant 0 : index
    %c0_113 = arith.constant 0 : index
    %254 = vector.load %arg9[%c1_111, %c0_112, %c0_113] : memref<8x1x32xf32, #tpu.memory_space<vmem>>, vector<1x1x32xf32>
    %255 = vector.shape_cast %254 : vector<1x1x32xf32> to vector<1x32xf32>
    %256 = vector.broadcast %255 : vector<1x32xf32> to vector<32x32xf32>
    %257 = arith.addf %253, %256 : vector<32x32xf32>
    %cst_114 = arith.constant 0.000000e+00 : f32
    %258 = vector.broadcast %cst_114 : f32 to vector<32x32xf32>
    %259 = arith.cmpf oge, %257, %258 : vector<32x32xf32>
    %c1_115 = arith.constant 1 : index
    %c0_116 = arith.constant 0 : index
    %c0_117 = arith.constant 0 : index
    %260 = vector.load %arg10[%c1_115, %c0_116, %c0_117] : memref<8x1x32xf32, #tpu.memory_space<vmem>>, vector<1x1x32xf32>
    %261 = vector.shape_cast %260 : vector<1x1x32xf32> to vector<1x32xf32>
    %262 = vector.broadcast %261 : vector<1x32xf32> to vector<32x32xf32>
    %263 = arith.mulf %262, %257 : vector<32x32xf32>
    %264 = arith.select %259, %257, %263 : vector<32x32xi1>, vector<32x32xf32>
    %cst_118 = arith.constant 0.000000e+00 : f32
    %265 = vector.shape_cast %2 : vector<32x1xi1> to vector<32x1xi1>
    %266 = vector.broadcast %265 : vector<32x1xi1> to vector<32x32xi1>
    %267 = vector.broadcast %cst_118 : f32 to vector<32x32xf32>
    %268 = arith.select %266, %264, %267 : vector<32x32xi1>, vector<32x32xf32>
    %269 = vector.shape_cast %268 : vector<32x32xf32> to vector<1x32x32xf32>
    %cst_119 = arith.constant dense<0.000000e+00> : vector<1xf32>
    %270 = vector.multi_reduction <add>, %269, %cst_119 [1, 2] : vector<1x32x32xf32> to vector<1xf32>
    %271 = vector.shape_cast %270 : vector<1xf32> to vector<1x1x1xf32>
    %272 = vector.extract %271[0, 0, 0] : f32 from vector<1x1x1xf32>
    %cst_120 = arith.constant 0.00100806449 : f32
    %273 = arith.mulf %272, %cst_120 : f32
    %274 = arith.mulf %268, %268 : vector<32x32xf32>
    %275 = vector.shape_cast %274 : vector<32x32xf32> to vector<1x32x32xf32>
    %cst_121 = arith.constant dense<0.000000e+00> : vector<1xf32>
    %276 = vector.multi_reduction <add>, %275, %cst_121 [1, 2] : vector<1x32x32xf32> to vector<1xf32>
    %277 = vector.shape_cast %276 : vector<1xf32> to vector<1x1x1xf32>
    %278 = vector.extract %277[0, 0, 0] : f32 from vector<1x1x1xf32>
    %cst_122 = arith.constant 0.00100806449 : f32
    %279 = arith.mulf %278, %cst_122 : f32
    %280 = arith.mulf %273, %273 : f32
    %281 = arith.subf %279, %280 : f32
    %cst_123 = arith.constant 0.000000e+00 : f32
    %282 = arith.maximumf %281, %cst_123 : f32
    %283 = vector.broadcast %273 : f32 to vector<32x32xf32>
    %284 = arith.subf %264, %283 : vector<32x32xf32>
    %cst_124 = arith.constant 9.99999974E-6 : f32
    %285 = arith.addf %282, %cst_124 : f32
    %286 = math.rsqrt %285 : f32
    %287 = vector.broadcast %286 : f32 to vector<32x32xf32>
    %288 = arith.mulf %284, %287 : vector<32x32xf32>
    %c1_125 = arith.constant 1 : index
    %c0_126 = arith.constant 0 : index
    %c0_127 = arith.constant 0 : index
    %289 = vector.load %arg11[%c1_125, %c0_126, %c0_127] : memref<8x1x32xf32, #tpu.memory_space<vmem>>, vector<1x1x32xf32>
    %290 = vector.shape_cast %289 : vector<1x1x32xf32> to vector<1x32xf32>
    %291 = vector.broadcast %290 : vector<1x32xf32> to vector<32x32xf32>
    %292 = arith.mulf %288, %291 : vector<32x32xf32>
    %c1_128 = arith.constant 1 : index
    %c0_129 = arith.constant 0 : index
    %c0_130 = arith.constant 0 : index
    %293 = vector.load %arg12[%c1_128, %c0_129, %c0_130] : memref<8x1x32xf32, #tpu.memory_space<vmem>>, vector<1x1x32xf32>
    %294 = vector.shape_cast %293 : vector<1x1x32xf32> to vector<1x32xf32>
    %295 = vector.broadcast %294 : vector<1x32xf32> to vector<32x32xf32>
    %296 = arith.addf %292, %295 : vector<32x32xf32>
    %c1_131 = arith.constant 1 : index
    %c0_132 = arith.constant 0 : index
    %c0_133 = arith.constant 0 : index
    %297 = vector.load %arg13[%c1_131, %c0_132, %c0_133] : memref<8x32x16xf32, #tpu.memory_space<vmem>>, vector<1x32x16xf32>
    %298 = vector.shape_cast %297 : vector<1x32x16xf32> to vector<32x16xf32>
    %cst_134 = arith.constant dense<0.000000e+00> : vector<32x16xf32>
    %299 = tpu.matmul %296, %298, %cst_134 {dimension_numbers = #tpu.dot_dimension_numbers<[1], [0], [0], [1], [0, 0, 1, 1], [], []>} : vector<32x32xf32>, vector<32x16xf32>, vector<32x16xf32> -> vector<32x16xf32>
    %c1_135 = arith.constant 1 : index
    %c0_136 = arith.constant 0 : index
    %c0_137 = arith.constant 0 : index
    %300 = vector.load %arg14[%c1_135, %c0_136, %c0_137] : memref<8x1x16xf32, #tpu.memory_space<vmem>>, vector<1x1x16xf32>
    %301 = vector.shape_cast %300 : vector<1x1x16xf32> to vector<1x16xf32>
    %302 = vector.broadcast %301 : vector<1x16xf32> to vector<32x16xf32>
    %303 = arith.addf %299, %302 : vector<32x16xf32>
    %304 = arith.addf %156, %303 : vector<32x16xf32>
    %cst_138 = arith.constant 0.000000e+00 : f32
    %305 = vector.shape_cast %2 : vector<32x1xi1> to vector<32x1xi1>
    %306 = vector.broadcast %305 : vector<32x1xi1> to vector<32x16xi1>
    %307 = vector.broadcast %cst_138 : f32 to vector<32x16xf32>
    %308 = arith.select %306, %304, %307 : vector<32x16xi1>, vector<32x16xf32>
    %c2 = arith.constant 2 : index
    %c0_139 = arith.constant 0 : index
    %c0_140 = arith.constant 0 : index
    %309 = vector.load %arg3[%c2, %c0_139, %c0_140] : memref<8x16x32xf32, #tpu.memory_space<vmem>>, vector<1x16x32xf32>
    %310 = vector.shape_cast %309 : vector<1x16x32xf32> to vector<16x32xf32>
    %cst_141 = arith.constant dense<0.000000e+00> : vector<32x32xf32>
    %311 = tpu.matmul %308, %310, %cst_141 {dimension_numbers = #tpu.dot_dimension_numbers<[1], [0], [0], [1], [0, 0, 1, 1], [], []>} : vector<32x16xf32>, vector<16x32xf32>, vector<32x32xf32> -> vector<32x32xf32>
    %c0_142 = arith.constant 0 : index
    %c2_143 = arith.constant 2 : index
    %c0_144 = arith.constant 0 : index
    %c0_145 = arith.constant 0 : index
    %312 = vector.load %arg2[%c0_142, %c2_143, %c0_144, %c0_145] : memref<1x8x1x32xf32, #tpu.memory_space<vmem>>, vector<1x1x1x32xf32>
    %313 = vector.shape_cast %312 : vector<1x1x1x32xf32> to vector<1x32xf32>
    %314 = vector.broadcast %313 : vector<1x32xf32> to vector<32x32xf32>
    %315 = arith.addf %311, %314 : vector<32x32xf32>
    %c2_146 = arith.constant 2 : index
    %c0_147 = arith.constant 0 : index
    %c0_148 = arith.constant 0 : index
    %316 = vector.load %arg4[%c2_146, %c0_147, %c0_148] : memref<8x1x32xf32, #tpu.memory_space<vmem>>, vector<1x1x32xf32>
    %317 = vector.shape_cast %316 : vector<1x1x32xf32> to vector<1x32xf32>
    %318 = vector.broadcast %317 : vector<1x32xf32> to vector<32x32xf32>
    %319 = arith.addf %315, %318 : vector<32x32xf32>
    %cst_149 = arith.constant 0.000000e+00 : f32
    %320 = vector.broadcast %cst_149 : f32 to vector<32x32xf32>
    %321 = arith.cmpf oge, %319, %320 : vector<32x32xf32>
    %c2_150 = arith.constant 2 : index
    %c0_151 = arith.constant 0 : index
    %c0_152 = arith.constant 0 : index
    %322 = vector.load %arg5[%c2_150, %c0_151, %c0_152] : memref<8x1x32xf32, #tpu.memory_space<vmem>>, vector<1x1x32xf32>
    %323 = vector.shape_cast %322 : vector<1x1x32xf32> to vector<1x32xf32>
    %324 = vector.broadcast %323 : vector<1x32xf32> to vector<32x32xf32>
    %325 = arith.mulf %324, %319 : vector<32x32xf32>
    %326 = arith.select %321, %319, %325 : vector<32x32xi1>, vector<32x32xf32>
    %cst_153 = arith.constant 0.000000e+00 : f32
    %327 = vector.shape_cast %2 : vector<32x1xi1> to vector<32x1xi1>
    %328 = vector.broadcast %327 : vector<32x1xi1> to vector<32x32xi1>
    %329 = vector.broadcast %cst_153 : f32 to vector<32x32xf32>
    %330 = arith.select %328, %326, %329 : vector<32x32xi1>, vector<32x32xf32>
    %331 = vector.shape_cast %330 : vector<32x32xf32> to vector<1x32x32xf32>
    %cst_154 = arith.constant dense<0.000000e+00> : vector<1xf32>
    %332 = vector.multi_reduction <add>, %331, %cst_154 [1, 2] : vector<1x32x32xf32> to vector<1xf32>
    %333 = vector.shape_cast %332 : vector<1xf32> to vector<1x1x1xf32>
    %334 = vector.extract %333[0, 0, 0] : f32 from vector<1x1x1xf32>
    %cst_155 = arith.constant 0.00100806449 : f32
    %335 = arith.mulf %334, %cst_155 : f32
    %336 = arith.mulf %330, %330 : vector<32x32xf32>
    %337 = vector.shape_cast %336 : vector<32x32xf32> to vector<1x32x32xf32>
    %cst_156 = arith.constant dense<0.000000e+00> : vector<1xf32>
    %338 = vector.multi_reduction <add>, %337, %cst_156 [1, 2] : vector<1x32x32xf32> to vector<1xf32>
    %339 = vector.shape_cast %338 : vector<1xf32> to vector<1x1x1xf32>
    %340 = vector.extract %339[0, 0, 0] : f32 from vector<1x1x1xf32>
    %cst_157 = arith.constant 0.00100806449 : f32
    %341 = arith.mulf %340, %cst_157 : f32
    %342 = arith.mulf %335, %335 : f32
    %343 = arith.subf %341, %342 : f32
    %cst_158 = arith.constant 0.000000e+00 : f32
    %344 = arith.maximumf %343, %cst_158 : f32
    %345 = vector.broadcast %335 : f32 to vector<32x32xf32>
    %346 = arith.subf %326, %345 : vector<32x32xf32>
    %cst_159 = arith.constant 9.99999974E-6 : f32
    %347 = arith.addf %344, %cst_159 : f32
    %348 = math.rsqrt %347 : f32
    %349 = vector.broadcast %348 : f32 to vector<32x32xf32>
    %350 = arith.mulf %346, %349 : vector<32x32xf32>
    %c2_160 = arith.constant 2 : index
    %c0_161 = arith.constant 0 : index
    %c0_162 = arith.constant 0 : index
    %351 = vector.load %arg6[%c2_160, %c0_161, %c0_162] : memref<8x1x32xf32, #tpu.memory_space<vmem>>, vector<1x1x32xf32>
    %352 = vector.shape_cast %351 : vector<1x1x32xf32> to vector<1x32xf32>
    %353 = vector.broadcast %352 : vector<1x32xf32> to vector<32x32xf32>
    %354 = arith.mulf %350, %353 : vector<32x32xf32>
    %c2_163 = arith.constant 2 : index
    %c0_164 = arith.constant 0 : index
    %c0_165 = arith.constant 0 : index
    %355 = vector.load %arg7[%c2_163, %c0_164, %c0_165] : memref<8x1x32xf32, #tpu.memory_space<vmem>>, vector<1x1x32xf32>
    %356 = vector.shape_cast %355 : vector<1x1x32xf32> to vector<1x32xf32>
    %357 = vector.broadcast %356 : vector<1x32xf32> to vector<32x32xf32>
    %358 = arith.addf %354, %357 : vector<32x32xf32>
    %cst_166 = arith.constant 0.000000e+00 : f32
    %359 = vector.shape_cast %2 : vector<32x1xi1> to vector<32x1xi1>
    %360 = vector.broadcast %359 : vector<32x1xi1> to vector<32x32xi1>
    %361 = vector.broadcast %cst_166 : f32 to vector<32x32xf32>
    %362 = arith.select %360, %358, %361 : vector<32x32xi1>, vector<32x32xf32>
    %c2_167 = arith.constant 2 : index
    %c0_168 = arith.constant 0 : index
    %c0_169 = arith.constant 0 : index
    %363 = vector.load %arg8[%c2_167, %c0_168, %c0_169] : memref<8x3x32xf32, #tpu.memory_space<vmem>>, vector<1x3x32xf32>
    %364 = vector.shape_cast %363 : vector<1x3x32xf32> to vector<3x32xf32>
    %cst_170 = arith.constant 0.000000e+00 : f32
    %365 = vector.broadcast %cst_170 : f32 to vector<32x32xf32>
    %c1_i32_171 = arith.constant 1 : i32
    %366 = tpu.dynamic_rotate %362 by %c1_i32_171 dim 0 : vector<32x32xf32>, i32 -> vector<32x32xf32>
    %c-1_i32_172 = arith.constant -1 : i32
    %367 = vector.broadcast %c-1_i32_172 : i32 to vector<32x1xi32>
    %368 = arith.addi %0, %367 : vector<32x1xi32>
    %c0_i32_173 = arith.constant 0 : i32
    %369 = vector.broadcast %c0_i32_173 : i32 to vector<32x1xi32>
    %370 = arith.cmpi sge, %368, %369 : vector<32x1xi32>
    %c-1_i32_174 = arith.constant -1 : i32
    %371 = vector.broadcast %c-1_i32_174 : i32 to vector<32x1xi32>
    %372 = arith.addi %0, %371 : vector<32x1xi32>
    %c32_i32_175 = arith.constant 32 : i32
    %373 = vector.broadcast %c32_i32_175 : i32 to vector<32x1xi32>
    %374 = arith.cmpi slt, %372, %373 : vector<32x1xi32>
    %375 = arith.andi %370, %374 : vector<32x1xi1>
    %cst_176 = arith.constant 0.000000e+00 : f32
    %376 = vector.shape_cast %375 : vector<32x1xi1> to vector<32x1xi1>
    %377 = vector.broadcast %376 : vector<32x1xi1> to vector<32x32xi1>
    %378 = vector.broadcast %cst_176 : f32 to vector<32x32xf32>
    %379 = arith.select %377, %366, %378 : vector<32x32xi1>, vector<32x32xf32>
    %380 = vector.extract_strided_slice %364 {offsets = [0, 0], sizes = [1, 32], strides = [1, 1]} : vector<3x32xf32> to vector<1x32xf32>
    %381 = vector.broadcast %380 : vector<1x32xf32> to vector<32x32xf32>
    %382 = arith.mulf %379, %381 : vector<32x32xf32>
    %383 = arith.addf %365, %382 : vector<32x32xf32>
    %384 = vector.extract_strided_slice %364 {offsets = [1, 0], sizes = [1, 32], strides = [1, 1]} : vector<3x32xf32> to vector<1x32xf32>
    %385 = vector.broadcast %384 : vector<1x32xf32> to vector<32x32xf32>
    %386 = arith.mulf %362, %385 : vector<32x32xf32>
    %387 = arith.addf %383, %386 : vector<32x32xf32>
    %c31_i32_177 = arith.constant 31 : i32
    %388 = tpu.dynamic_rotate %362 by %c31_i32_177 dim 0 : vector<32x32xf32>, i32 -> vector<32x32xf32>
    %c1_i32_178 = arith.constant 1 : i32
    %389 = vector.broadcast %c1_i32_178 : i32 to vector<32x1xi32>
    %390 = arith.addi %0, %389 : vector<32x1xi32>
    %c0_i32_179 = arith.constant 0 : i32
    %391 = vector.broadcast %c0_i32_179 : i32 to vector<32x1xi32>
    %392 = arith.cmpi sge, %390, %391 : vector<32x1xi32>
    %c1_i32_180 = arith.constant 1 : i32
    %393 = vector.broadcast %c1_i32_180 : i32 to vector<32x1xi32>
    %394 = arith.addi %0, %393 : vector<32x1xi32>
    %c32_i32_181 = arith.constant 32 : i32
    %395 = vector.broadcast %c32_i32_181 : i32 to vector<32x1xi32>
    %396 = arith.cmpi slt, %394, %395 : vector<32x1xi32>
    %397 = arith.andi %392, %396 : vector<32x1xi1>
    %cst_182 = arith.constant 0.000000e+00 : f32
    %398 = vector.shape_cast %397 : vector<32x1xi1> to vector<32x1xi1>
    %399 = vector.broadcast %398 : vector<32x1xi1> to vector<32x32xi1>
    %400 = vector.broadcast %cst_182 : f32 to vector<32x32xf32>
    %401 = arith.select %399, %388, %400 : vector<32x32xi1>, vector<32x32xf32>
    %402 = vector.extract_strided_slice %364 {offsets = [2, 0], sizes = [1, 32], strides = [1, 1]} : vector<3x32xf32> to vector<1x32xf32>
    %403 = vector.broadcast %402 : vector<1x32xf32> to vector<32x32xf32>
    %404 = arith.mulf %401, %403 : vector<32x32xf32>
    %405 = arith.addf %387, %404 : vector<32x32xf32>
    %c2_183 = arith.constant 2 : index
    %c0_184 = arith.constant 0 : index
    %c0_185 = arith.constant 0 : index
    %406 = vector.load %arg9[%c2_183, %c0_184, %c0_185] : memref<8x1x32xf32, #tpu.memory_space<vmem>>, vector<1x1x32xf32>
    %407 = vector.shape_cast %406 : vector<1x1x32xf32> to vector<1x32xf32>
    %408 = vector.broadcast %407 : vector<1x32xf32> to vector<32x32xf32>
    %409 = arith.addf %405, %408 : vector<32x32xf32>
    %cst_186 = arith.constant 0.000000e+00 : f32
    %410 = vector.broadcast %cst_186 : f32 to vector<32x32xf32>
    %411 = arith.cmpf oge, %409, %410 : vector<32x32xf32>
    %c2_187 = arith.constant 2 : index
    %c0_188 = arith.constant 0 : index
    %c0_189 = arith.constant 0 : index
    %412 = vector.load %arg10[%c2_187, %c0_188, %c0_189] : memref<8x1x32xf32, #tpu.memory_space<vmem>>, vector<1x1x32xf32>
    %413 = vector.shape_cast %412 : vector<1x1x32xf32> to vector<1x32xf32>
    %414 = vector.broadcast %413 : vector<1x32xf32> to vector<32x32xf32>
    %415 = arith.mulf %414, %409 : vector<32x32xf32>
    %416 = arith.select %411, %409, %415 : vector<32x32xi1>, vector<32x32xf32>
    %cst_190 = arith.constant 0.000000e+00 : f32
    %417 = vector.shape_cast %2 : vector<32x1xi1> to vector<32x1xi1>
    %418 = vector.broadcast %417 : vector<32x1xi1> to vector<32x32xi1>
    %419 = vector.broadcast %cst_190 : f32 to vector<32x32xf32>
    %420 = arith.select %418, %416, %419 : vector<32x32xi1>, vector<32x32xf32>
    %421 = vector.shape_cast %420 : vector<32x32xf32> to vector<1x32x32xf32>
    %cst_191 = arith.constant dense<0.000000e+00> : vector<1xf32>
    %422 = vector.multi_reduction <add>, %421, %cst_191 [1, 2] : vector<1x32x32xf32> to vector<1xf32>
    %423 = vector.shape_cast %422 : vector<1xf32> to vector<1x1x1xf32>
    %424 = vector.extract %423[0, 0, 0] : f32 from vector<1x1x1xf32>
    %cst_192 = arith.constant 0.00100806449 : f32
    %425 = arith.mulf %424, %cst_192 : f32
    %426 = arith.mulf %420, %420 : vector<32x32xf32>
    %427 = vector.shape_cast %426 : vector<32x32xf32> to vector<1x32x32xf32>
    %cst_193 = arith.constant dense<0.000000e+00> : vector<1xf32>
    %428 = vector.multi_reduction <add>, %427, %cst_193 [1, 2] : vector<1x32x32xf32> to vector<1xf32>
    %429 = vector.shape_cast %428 : vector<1xf32> to vector<1x1x1xf32>
    %430 = vector.extract %429[0, 0, 0] : f32 from vector<1x1x1xf32>
    %cst_194 = arith.constant 0.00100806449 : f32
    %431 = arith.mulf %430, %cst_194 : f32
    %432 = arith.mulf %425, %425 : f32
    %433 = arith.subf %431, %432 : f32
    %cst_195 = arith.constant 0.000000e+00 : f32
    %434 = arith.maximumf %433, %cst_195 : f32
    %435 = vector.broadcast %425 : f32 to vector<32x32xf32>
    %436 = arith.subf %416, %435 : vector<32x32xf32>
    %cst_196 = arith.constant 9.99999974E-6 : f32
    %437 = arith.addf %434, %cst_196 : f32
    %438 = math.rsqrt %437 : f32
    %439 = vector.broadcast %438 : f32 to vector<32x32xf32>
    %440 = arith.mulf %436, %439 : vector<32x32xf32>
    %c2_197 = arith.constant 2 : index
    %c0_198 = arith.constant 0 : index
    %c0_199 = arith.constant 0 : index
    %441 = vector.load %arg11[%c2_197, %c0_198, %c0_199] : memref<8x1x32xf32, #tpu.memory_space<vmem>>, vector<1x1x32xf32>
    %442 = vector.shape_cast %441 : vector<1x1x32xf32> to vector<1x32xf32>
    %443 = vector.broadcast %442 : vector<1x32xf32> to vector<32x32xf32>
    %444 = arith.mulf %440, %443 : vector<32x32xf32>
    %c2_200 = arith.constant 2 : index
    %c0_201 = arith.constant 0 : index
    %c0_202 = arith.constant 0 : index
    %445 = vector.load %arg12[%c2_200, %c0_201, %c0_202] : memref<8x1x32xf32, #tpu.memory_space<vmem>>, vector<1x1x32xf32>
    %446 = vector.shape_cast %445 : vector<1x1x32xf32> to vector<1x32xf32>
    %447 = vector.broadcast %446 : vector<1x32xf32> to vector<32x32xf32>
    %448 = arith.addf %444, %447 : vector<32x32xf32>
    %c2_203 = arith.constant 2 : index
    %c0_204 = arith.constant 0 : index
    %c0_205 = arith.constant 0 : index
    %449 = vector.load %arg13[%c2_203, %c0_204, %c0_205] : memref<8x32x16xf32, #tpu.memory_space<vmem>>, vector<1x32x16xf32>
    %450 = vector.shape_cast %449 : vector<1x32x16xf32> to vector<32x16xf32>
    %cst_206 = arith.constant dense<0.000000e+00> : vector<32x16xf32>
    %451 = tpu.matmul %448, %450, %cst_206 {dimension_numbers = #tpu.dot_dimension_numbers<[1], [0], [0], [1], [0, 0, 1, 1], [], []>} : vector<32x32xf32>, vector<32x16xf32>, vector<32x16xf32> -> vector<32x16xf32>
    %c2_207 = arith.constant 2 : index
    %c0_208 = arith.constant 0 : index
    %c0_209 = arith.constant 0 : index
    %452 = vector.load %arg14[%c2_207, %c0_208, %c0_209] : memref<8x1x16xf32, #tpu.memory_space<vmem>>, vector<1x1x16xf32>
    %453 = vector.shape_cast %452 : vector<1x1x16xf32> to vector<1x16xf32>
    %454 = vector.broadcast %453 : vector<1x16xf32> to vector<32x16xf32>
    %455 = arith.addf %451, %454 : vector<32x16xf32>
    %456 = arith.addf %308, %455 : vector<32x16xf32>
    %cst_210 = arith.constant 0.000000e+00 : f32
    %457 = vector.shape_cast %2 : vector<32x1xi1> to vector<32x1xi1>
    %458 = vector.broadcast %457 : vector<32x1xi1> to vector<32x16xi1>
    %459 = vector.broadcast %cst_210 : f32 to vector<32x16xf32>
    %460 = arith.select %458, %456, %459 : vector<32x16xi1>, vector<32x16xf32>
    %c3 = arith.constant 3 : index
    %c0_211 = arith.constant 0 : index
    %c0_212 = arith.constant 0 : index
    %461 = vector.load %arg3[%c3, %c0_211, %c0_212] : memref<8x16x32xf32, #tpu.memory_space<vmem>>, vector<1x16x32xf32>
    %462 = vector.shape_cast %461 : vector<1x16x32xf32> to vector<16x32xf32>
    %cst_213 = arith.constant dense<0.000000e+00> : vector<32x32xf32>
    %463 = tpu.matmul %460, %462, %cst_213 {dimension_numbers = #tpu.dot_dimension_numbers<[1], [0], [0], [1], [0, 0, 1, 1], [], []>} : vector<32x16xf32>, vector<16x32xf32>, vector<32x32xf32> -> vector<32x32xf32>
    %c0_214 = arith.constant 0 : index
    %c3_215 = arith.constant 3 : index
    %c0_216 = arith.constant 0 : index
    %c0_217 = arith.constant 0 : index
    %464 = vector.load %arg2[%c0_214, %c3_215, %c0_216, %c0_217] : memref<1x8x1x32xf32, #tpu.memory_space<vmem>>, vector<1x1x1x32xf32>
    %465 = vector.shape_cast %464 : vector<1x1x1x32xf32> to vector<1x32xf32>
    %466 = vector.broadcast %465 : vector<1x32xf32> to vector<32x32xf32>
    %467 = arith.addf %463, %466 : vector<32x32xf32>
    %c3_218 = arith.constant 3 : index
    %c0_219 = arith.constant 0 : index
    %c0_220 = arith.constant 0 : index
    %468 = vector.load %arg4[%c3_218, %c0_219, %c0_220] : memref<8x1x32xf32, #tpu.memory_space<vmem>>, vector<1x1x32xf32>
    %469 = vector.shape_cast %468 : vector<1x1x32xf32> to vector<1x32xf32>
    %470 = vector.broadcast %469 : vector<1x32xf32> to vector<32x32xf32>
    %471 = arith.addf %467, %470 : vector<32x32xf32>
    %cst_221 = arith.constant 0.000000e+00 : f32
    %472 = vector.broadcast %cst_221 : f32 to vector<32x32xf32>
    %473 = arith.cmpf oge, %471, %472 : vector<32x32xf32>
    %c3_222 = arith.constant 3 : index
    %c0_223 = arith.constant 0 : index
    %c0_224 = arith.constant 0 : index
    %474 = vector.load %arg5[%c3_222, %c0_223, %c0_224] : memref<8x1x32xf32, #tpu.memory_space<vmem>>, vector<1x1x32xf32>
    %475 = vector.shape_cast %474 : vector<1x1x32xf32> to vector<1x32xf32>
    %476 = vector.broadcast %475 : vector<1x32xf32> to vector<32x32xf32>
    %477 = arith.mulf %476, %471 : vector<32x32xf32>
    %478 = arith.select %473, %471, %477 : vector<32x32xi1>, vector<32x32xf32>
    %cst_225 = arith.constant 0.000000e+00 : f32
    %479 = vector.shape_cast %2 : vector<32x1xi1> to vector<32x1xi1>
    %480 = vector.broadcast %479 : vector<32x1xi1> to vector<32x32xi1>
    %481 = vector.broadcast %cst_225 : f32 to vector<32x32xf32>
    %482 = arith.select %480, %478, %481 : vector<32x32xi1>, vector<32x32xf32>
    %483 = vector.shape_cast %482 : vector<32x32xf32> to vector<1x32x32xf32>
    %cst_226 = arith.constant dense<0.000000e+00> : vector<1xf32>
    %484 = vector.multi_reduction <add>, %483, %cst_226 [1, 2] : vector<1x32x32xf32> to vector<1xf32>
    %485 = vector.shape_cast %484 : vector<1xf32> to vector<1x1x1xf32>
    %486 = vector.extract %485[0, 0, 0] : f32 from vector<1x1x1xf32>
    %cst_227 = arith.constant 0.00100806449 : f32
    %487 = arith.mulf %486, %cst_227 : f32
    %488 = arith.mulf %482, %482 : vector<32x32xf32>
    %489 = vector.shape_cast %488 : vector<32x32xf32> to vector<1x32x32xf32>
    %cst_228 = arith.constant dense<0.000000e+00> : vector<1xf32>
    %490 = vector.multi_reduction <add>, %489, %cst_228 [1, 2] : vector<1x32x32xf32> to vector<1xf32>
    %491 = vector.shape_cast %490 : vector<1xf32> to vector<1x1x1xf32>
    %492 = vector.extract %491[0, 0, 0] : f32 from vector<1x1x1xf32>
    %cst_229 = arith.constant 0.00100806449 : f32
    %493 = arith.mulf %492, %cst_229 : f32
    %494 = arith.mulf %487, %487 : f32
    %495 = arith.subf %493, %494 : f32
    %cst_230 = arith.constant 0.000000e+00 : f32
    %496 = arith.maximumf %495, %cst_230 : f32
    %497 = vector.broadcast %487 : f32 to vector<32x32xf32>
    %498 = arith.subf %478, %497 : vector<32x32xf32>
    %cst_231 = arith.constant 9.99999974E-6 : f32
    %499 = arith.addf %496, %cst_231 : f32
    %500 = math.rsqrt %499 : f32
    %501 = vector.broadcast %500 : f32 to vector<32x32xf32>
    %502 = arith.mulf %498, %501 : vector<32x32xf32>
    %c3_232 = arith.constant 3 : index
    %c0_233 = arith.constant 0 : index
    %c0_234 = arith.constant 0 : index
    %503 = vector.load %arg6[%c3_232, %c0_233, %c0_234] : memref<8x1x32xf32, #tpu.memory_space<vmem>>, vector<1x1x32xf32>
    %504 = vector.shape_cast %503 : vector<1x1x32xf32> to vector<1x32xf32>
    %505 = vector.broadcast %504 : vector<1x32xf32> to vector<32x32xf32>
    %506 = arith.mulf %502, %505 : vector<32x32xf32>
    %c3_235 = arith.constant 3 : index
    %c0_236 = arith.constant 0 : index
    %c0_237 = arith.constant 0 : index
    %507 = vector.load %arg7[%c3_235, %c0_236, %c0_237] : memref<8x1x32xf32, #tpu.memory_space<vmem>>, vector<1x1x32xf32>
    %508 = vector.shape_cast %507 : vector<1x1x32xf32> to vector<1x32xf32>
    %509 = vector.broadcast %508 : vector<1x32xf32> to vector<32x32xf32>
    %510 = arith.addf %506, %509 : vector<32x32xf32>
    %cst_238 = arith.constant 0.000000e+00 : f32
    %511 = vector.shape_cast %2 : vector<32x1xi1> to vector<32x1xi1>
    %512 = vector.broadcast %511 : vector<32x1xi1> to vector<32x32xi1>
    %513 = vector.broadcast %cst_238 : f32 to vector<32x32xf32>
    %514 = arith.select %512, %510, %513 : vector<32x32xi1>, vector<32x32xf32>
    %c3_239 = arith.constant 3 : index
    %c0_240 = arith.constant 0 : index
    %c0_241 = arith.constant 0 : index
    %515 = vector.load %arg8[%c3_239, %c0_240, %c0_241] : memref<8x3x32xf32, #tpu.memory_space<vmem>>, vector<1x3x32xf32>
    %516 = vector.shape_cast %515 : vector<1x3x32xf32> to vector<3x32xf32>
    %cst_242 = arith.constant 0.000000e+00 : f32
    %517 = vector.broadcast %cst_242 : f32 to vector<32x32xf32>
    %c2_i32_243 = arith.constant 2 : i32
    %518 = tpu.dynamic_rotate %514 by %c2_i32_243 dim 0 : vector<32x32xf32>, i32 -> vector<32x32xf32>
    %c-2_i32_244 = arith.constant -2 : i32
    %519 = vector.broadcast %c-2_i32_244 : i32 to vector<32x1xi32>
    %520 = arith.addi %0, %519 : vector<32x1xi32>
    %c0_i32_245 = arith.constant 0 : i32
    %521 = vector.broadcast %c0_i32_245 : i32 to vector<32x1xi32>
    %522 = arith.cmpi sge, %520, %521 : vector<32x1xi32>
    %c-2_i32_246 = arith.constant -2 : i32
    %523 = vector.broadcast %c-2_i32_246 : i32 to vector<32x1xi32>
    %524 = arith.addi %0, %523 : vector<32x1xi32>
    %c32_i32_247 = arith.constant 32 : i32
    %525 = vector.broadcast %c32_i32_247 : i32 to vector<32x1xi32>
    %526 = arith.cmpi slt, %524, %525 : vector<32x1xi32>
    %527 = arith.andi %522, %526 : vector<32x1xi1>
    %cst_248 = arith.constant 0.000000e+00 : f32
    %528 = vector.shape_cast %527 : vector<32x1xi1> to vector<32x1xi1>
    %529 = vector.broadcast %528 : vector<32x1xi1> to vector<32x32xi1>
    %530 = vector.broadcast %cst_248 : f32 to vector<32x32xf32>
    %531 = arith.select %529, %518, %530 : vector<32x32xi1>, vector<32x32xf32>
    %532 = vector.extract_strided_slice %516 {offsets = [0, 0], sizes = [1, 32], strides = [1, 1]} : vector<3x32xf32> to vector<1x32xf32>
    %533 = vector.broadcast %532 : vector<1x32xf32> to vector<32x32xf32>
    %534 = arith.mulf %531, %533 : vector<32x32xf32>
    %535 = arith.addf %517, %534 : vector<32x32xf32>
    %536 = vector.extract_strided_slice %516 {offsets = [1, 0], sizes = [1, 32], strides = [1, 1]} : vector<3x32xf32> to vector<1x32xf32>
    %537 = vector.broadcast %536 : vector<1x32xf32> to vector<32x32xf32>
    %538 = arith.mulf %514, %537 : vector<32x32xf32>
    %539 = arith.addf %535, %538 : vector<32x32xf32>
    %c30_i32_249 = arith.constant 30 : i32
    %540 = tpu.dynamic_rotate %514 by %c30_i32_249 dim 0 : vector<32x32xf32>, i32 -> vector<32x32xf32>
    %c2_i32_250 = arith.constant 2 : i32
    %541 = vector.broadcast %c2_i32_250 : i32 to vector<32x1xi32>
    %542 = arith.addi %0, %541 : vector<32x1xi32>
    %c0_i32_251 = arith.constant 0 : i32
    %543 = vector.broadcast %c0_i32_251 : i32 to vector<32x1xi32>
    %544 = arith.cmpi sge, %542, %543 : vector<32x1xi32>
    %c2_i32_252 = arith.constant 2 : i32
    %545 = vector.broadcast %c2_i32_252 : i32 to vector<32x1xi32>
    %546 = arith.addi %0, %545 : vector<32x1xi32>
    %c32_i32_253 = arith.constant 32 : i32
    %547 = vector.broadcast %c32_i32_253 : i32 to vector<32x1xi32>
    %548 = arith.cmpi slt, %546, %547 : vector<32x1xi32>
    %549 = arith.andi %544, %548 : vector<32x1xi1>
    %cst_254 = arith.constant 0.000000e+00 : f32
    %550 = vector.shape_cast %549 : vector<32x1xi1> to vector<32x1xi1>
    %551 = vector.broadcast %550 : vector<32x1xi1> to vector<32x32xi1>
    %552 = vector.broadcast %cst_254 : f32 to vector<32x32xf32>
    %553 = arith.select %551, %540, %552 : vector<32x32xi1>, vector<32x32xf32>
    %554 = vector.extract_strided_slice %516 {offsets = [2, 0], sizes = [1, 32], strides = [1, 1]} : vector<3x32xf32> to vector<1x32xf32>
    %555 = vector.broadcast %554 : vector<1x32xf32> to vector<32x32xf32>
    %556 = arith.mulf %553, %555 : vector<32x32xf32>
    %557 = arith.addf %539, %556 : vector<32x32xf32>
    %c3_255 = arith.constant 3 : index
    %c0_256 = arith.constant 0 : index
    %c0_257 = arith.constant 0 : index
    %558 = vector.load %arg9[%c3_255, %c0_256, %c0_257] : memref<8x1x32xf32, #tpu.memory_space<vmem>>, vector<1x1x32xf32>
    %559 = vector.shape_cast %558 : vector<1x1x32xf32> to vector<1x32xf32>
    %560 = vector.broadcast %559 : vector<1x32xf32> to vector<32x32xf32>
    %561 = arith.addf %557, %560 : vector<32x32xf32>
    %cst_258 = arith.constant 0.000000e+00 : f32
    %562 = vector.broadcast %cst_258 : f32 to vector<32x32xf32>
    %563 = arith.cmpf oge, %561, %562 : vector<32x32xf32>
    %c3_259 = arith.constant 3 : index
    %c0_260 = arith.constant 0 : index
    %c0_261 = arith.constant 0 : index
    %564 = vector.load %arg10[%c3_259, %c0_260, %c0_261] : memref<8x1x32xf32, #tpu.memory_space<vmem>>, vector<1x1x32xf32>
    %565 = vector.shape_cast %564 : vector<1x1x32xf32> to vector<1x32xf32>
    %566 = vector.broadcast %565 : vector<1x32xf32> to vector<32x32xf32>
    %567 = arith.mulf %566, %561 : vector<32x32xf32>
    %568 = arith.select %563, %561, %567 : vector<32x32xi1>, vector<32x32xf32>
    %cst_262 = arith.constant 0.000000e+00 : f32
    %569 = vector.shape_cast %2 : vector<32x1xi1> to vector<32x1xi1>
    %570 = vector.broadcast %569 : vector<32x1xi1> to vector<32x32xi1>
    %571 = vector.broadcast %cst_262 : f32 to vector<32x32xf32>
    %572 = arith.select %570, %568, %571 : vector<32x32xi1>, vector<32x32xf32>
    %573 = vector.shape_cast %572 : vector<32x32xf32> to vector<1x32x32xf32>
    %cst_263 = arith.constant dense<0.000000e+00> : vector<1xf32>
    %574 = vector.multi_reduction <add>, %573, %cst_263 [1, 2] : vector<1x32x32xf32> to vector<1xf32>
    %575 = vector.shape_cast %574 : vector<1xf32> to vector<1x1x1xf32>
    %576 = vector.extract %575[0, 0, 0] : f32 from vector<1x1x1xf32>
    %cst_264 = arith.constant 0.00100806449 : f32
    %577 = arith.mulf %576, %cst_264 : f32
    %578 = arith.mulf %572, %572 : vector<32x32xf32>
    %579 = vector.shape_cast %578 : vector<32x32xf32> to vector<1x32x32xf32>
    %cst_265 = arith.constant dense<0.000000e+00> : vector<1xf32>
    %580 = vector.multi_reduction <add>, %579, %cst_265 [1, 2] : vector<1x32x32xf32> to vector<1xf32>
    %581 = vector.shape_cast %580 : vector<1xf32> to vector<1x1x1xf32>
    %582 = vector.extract %581[0, 0, 0] : f32 from vector<1x1x1xf32>
    %cst_266 = arith.constant 0.00100806449 : f32
    %583 = arith.mulf %582, %cst_266 : f32
    %584 = arith.mulf %577, %577 : f32
    %585 = arith.subf %583, %584 : f32
    %cst_267 = arith.constant 0.000000e+00 : f32
    %586 = arith.maximumf %585, %cst_267 : f32
    %587 = vector.broadcast %577 : f32 to vector<32x32xf32>
    %588 = arith.subf %568, %587 : vector<32x32xf32>
    %cst_268 = arith.constant 9.99999974E-6 : f32
    %589 = arith.addf %586, %cst_268 : f32
    %590 = math.rsqrt %589 : f32
    %591 = vector.broadcast %590 : f32 to vector<32x32xf32>
    %592 = arith.mulf %588, %591 : vector<32x32xf32>
    %c3_269 = arith.constant 3 : index
    %c0_270 = arith.constant 0 : index
    %c0_271 = arith.constant 0 : index
    %593 = vector.load %arg11[%c3_269, %c0_270, %c0_271] : memref<8x1x32xf32, #tpu.memory_space<vmem>>, vector<1x1x32xf32>
    %594 = vector.shape_cast %593 : vector<1x1x32xf32> to vector<1x32xf32>
    %595 = vector.broadcast %594 : vector<1x32xf32> to vector<32x32xf32>
    %596 = arith.mulf %592, %595 : vector<32x32xf32>
    %c3_272 = arith.constant 3 : index
    %c0_273 = arith.constant 0 : index
    %c0_274 = arith.constant 0 : index
    %597 = vector.load %arg12[%c3_272, %c0_273, %c0_274] : memref<8x1x32xf32, #tpu.memory_space<vmem>>, vector<1x1x32xf32>
    %598 = vector.shape_cast %597 : vector<1x1x32xf32> to vector<1x32xf32>
    %599 = vector.broadcast %598 : vector<1x32xf32> to vector<32x32xf32>
    %600 = arith.addf %596, %599 : vector<32x32xf32>
    %c3_275 = arith.constant 3 : index
    %c0_276 = arith.constant 0 : index
    %c0_277 = arith.constant 0 : index
    %601 = vector.load %arg13[%c3_275, %c0_276, %c0_277] : memref<8x32x16xf32, #tpu.memory_space<vmem>>, vector<1x32x16xf32>
    %602 = vector.shape_cast %601 : vector<1x32x16xf32> to vector<32x16xf32>
    %cst_278 = arith.constant dense<0.000000e+00> : vector<32x16xf32>
    %603 = tpu.matmul %600, %602, %cst_278 {dimension_numbers = #tpu.dot_dimension_numbers<[1], [0], [0], [1], [0, 0, 1, 1], [], []>} : vector<32x32xf32>, vector<32x16xf32>, vector<32x16xf32> -> vector<32x16xf32>
    %c3_279 = arith.constant 3 : index
    %c0_280 = arith.constant 0 : index
    %c0_281 = arith.constant 0 : index
    %604 = vector.load %arg14[%c3_279, %c0_280, %c0_281] : memref<8x1x16xf32, #tpu.memory_space<vmem>>, vector<1x1x16xf32>
    %605 = vector.shape_cast %604 : vector<1x1x16xf32> to vector<1x16xf32>
    %606 = vector.broadcast %605 : vector<1x16xf32> to vector<32x16xf32>
    %607 = arith.addf %603, %606 : vector<32x16xf32>
    %608 = arith.addf %460, %607 : vector<32x16xf32>
    %cst_282 = arith.constant 0.000000e+00 : f32
    %609 = vector.shape_cast %2 : vector<32x1xi1> to vector<32x1xi1>
    %610 = vector.broadcast %609 : vector<32x1xi1> to vector<32x16xi1>
    %611 = vector.broadcast %cst_282 : f32 to vector<32x16xf32>
    %612 = arith.select %610, %608, %611 : vector<32x16xi1>, vector<32x16xf32>
    %c4 = arith.constant 4 : index
    %c0_283 = arith.constant 0 : index
    %c0_284 = arith.constant 0 : index
    %613 = vector.load %arg3[%c4, %c0_283, %c0_284] : memref<8x16x32xf32, #tpu.memory_space<vmem>>, vector<1x16x32xf32>
    %614 = vector.shape_cast %613 : vector<1x16x32xf32> to vector<16x32xf32>
    %cst_285 = arith.constant dense<0.000000e+00> : vector<32x32xf32>
    %615 = tpu.matmul %612, %614, %cst_285 {dimension_numbers = #tpu.dot_dimension_numbers<[1], [0], [0], [1], [0, 0, 1, 1], [], []>} : vector<32x16xf32>, vector<16x32xf32>, vector<32x32xf32> -> vector<32x32xf32>
    %c0_286 = arith.constant 0 : index
    %c4_287 = arith.constant 4 : index
    %c0_288 = arith.constant 0 : index
    %c0_289 = arith.constant 0 : index
    %616 = vector.load %arg2[%c0_286, %c4_287, %c0_288, %c0_289] : memref<1x8x1x32xf32, #tpu.memory_space<vmem>>, vector<1x1x1x32xf32>
    %617 = vector.shape_cast %616 : vector<1x1x1x32xf32> to vector<1x32xf32>
    %618 = vector.broadcast %617 : vector<1x32xf32> to vector<32x32xf32>
    %619 = arith.addf %615, %618 : vector<32x32xf32>
    %c4_290 = arith.constant 4 : index
    %c0_291 = arith.constant 0 : index
    %c0_292 = arith.constant 0 : index
    %620 = vector.load %arg4[%c4_290, %c0_291, %c0_292] : memref<8x1x32xf32, #tpu.memory_space<vmem>>, vector<1x1x32xf32>
    %621 = vector.shape_cast %620 : vector<1x1x32xf32> to vector<1x32xf32>
    %622 = vector.broadcast %621 : vector<1x32xf32> to vector<32x32xf32>
    %623 = arith.addf %619, %622 : vector<32x32xf32>
    %cst_293 = arith.constant 0.000000e+00 : f32
    %624 = vector.broadcast %cst_293 : f32 to vector<32x32xf32>
    %625 = arith.cmpf oge, %623, %624 : vector<32x32xf32>
    %c4_294 = arith.constant 4 : index
    %c0_295 = arith.constant 0 : index
    %c0_296 = arith.constant 0 : index
    %626 = vector.load %arg5[%c4_294, %c0_295, %c0_296] : memref<8x1x32xf32, #tpu.memory_space<vmem>>, vector<1x1x32xf32>
    %627 = vector.shape_cast %626 : vector<1x1x32xf32> to vector<1x32xf32>
    %628 = vector.broadcast %627 : vector<1x32xf32> to vector<32x32xf32>
    %629 = arith.mulf %628, %623 : vector<32x32xf32>
    %630 = arith.select %625, %623, %629 : vector<32x32xi1>, vector<32x32xf32>
    %cst_297 = arith.constant 0.000000e+00 : f32
    %631 = vector.shape_cast %2 : vector<32x1xi1> to vector<32x1xi1>
    %632 = vector.broadcast %631 : vector<32x1xi1> to vector<32x32xi1>
    %633 = vector.broadcast %cst_297 : f32 to vector<32x32xf32>
    %634 = arith.select %632, %630, %633 : vector<32x32xi1>, vector<32x32xf32>
    %635 = vector.shape_cast %634 : vector<32x32xf32> to vector<1x32x32xf32>
    %cst_298 = arith.constant dense<0.000000e+00> : vector<1xf32>
    %636 = vector.multi_reduction <add>, %635, %cst_298 [1, 2] : vector<1x32x32xf32> to vector<1xf32>
    %637 = vector.shape_cast %636 : vector<1xf32> to vector<1x1x1xf32>
    %638 = vector.extract %637[0, 0, 0] : f32 from vector<1x1x1xf32>
    %cst_299 = arith.constant 0.00100806449 : f32
    %639 = arith.mulf %638, %cst_299 : f32
    %640 = arith.mulf %634, %634 : vector<32x32xf32>
    %641 = vector.shape_cast %640 : vector<32x32xf32> to vector<1x32x32xf32>
    %cst_300 = arith.constant dense<0.000000e+00> : vector<1xf32>
    %642 = vector.multi_reduction <add>, %641, %cst_300 [1, 2] : vector<1x32x32xf32> to vector<1xf32>
    %643 = vector.shape_cast %642 : vector<1xf32> to vector<1x1x1xf32>
    %644 = vector.extract %643[0, 0, 0] : f32 from vector<1x1x1xf32>
    %cst_301 = arith.constant 0.00100806449 : f32
    %645 = arith.mulf %644, %cst_301 : f32
    %646 = arith.mulf %639, %639 : f32
    %647 = arith.subf %645, %646 : f32
    %cst_302 = arith.constant 0.000000e+00 : f32
    %648 = arith.maximumf %647, %cst_302 : f32
    %649 = vector.broadcast %639 : f32 to vector<32x32xf32>
    %650 = arith.subf %630, %649 : vector<32x32xf32>
    %cst_303 = arith.constant 9.99999974E-6 : f32
    %651 = arith.addf %648, %cst_303 : f32
    %652 = math.rsqrt %651 : f32
    %653 = vector.broadcast %652 : f32 to vector<32x32xf32>
    %654 = arith.mulf %650, %653 : vector<32x32xf32>
    %c4_304 = arith.constant 4 : index
    %c0_305 = arith.constant 0 : index
    %c0_306 = arith.constant 0 : index
    %655 = vector.load %arg6[%c4_304, %c0_305, %c0_306] : memref<8x1x32xf32, #tpu.memory_space<vmem>>, vector<1x1x32xf32>
    %656 = vector.shape_cast %655 : vector<1x1x32xf32> to vector<1x32xf32>
    %657 = vector.broadcast %656 : vector<1x32xf32> to vector<32x32xf32>
    %658 = arith.mulf %654, %657 : vector<32x32xf32>
    %c4_307 = arith.constant 4 : index
    %c0_308 = arith.constant 0 : index
    %c0_309 = arith.constant 0 : index
    %659 = vector.load %arg7[%c4_307, %c0_308, %c0_309] : memref<8x1x32xf32, #tpu.memory_space<vmem>>, vector<1x1x32xf32>
    %660 = vector.shape_cast %659 : vector<1x1x32xf32> to vector<1x32xf32>
    %661 = vector.broadcast %660 : vector<1x32xf32> to vector<32x32xf32>
    %662 = arith.addf %658, %661 : vector<32x32xf32>
    %cst_310 = arith.constant 0.000000e+00 : f32
    %663 = vector.shape_cast %2 : vector<32x1xi1> to vector<32x1xi1>
    %664 = vector.broadcast %663 : vector<32x1xi1> to vector<32x32xi1>
    %665 = vector.broadcast %cst_310 : f32 to vector<32x32xf32>
    %666 = arith.select %664, %662, %665 : vector<32x32xi1>, vector<32x32xf32>
    %c4_311 = arith.constant 4 : index
    %c0_312 = arith.constant 0 : index
    %c0_313 = arith.constant 0 : index
    %667 = vector.load %arg8[%c4_311, %c0_312, %c0_313] : memref<8x3x32xf32, #tpu.memory_space<vmem>>, vector<1x3x32xf32>
    %668 = vector.shape_cast %667 : vector<1x3x32xf32> to vector<3x32xf32>
    %cst_314 = arith.constant 0.000000e+00 : f32
    %669 = vector.broadcast %cst_314 : f32 to vector<32x32xf32>
    %c1_i32_315 = arith.constant 1 : i32
    %670 = tpu.dynamic_rotate %666 by %c1_i32_315 dim 0 : vector<32x32xf32>, i32 -> vector<32x32xf32>
    %c-1_i32_316 = arith.constant -1 : i32
    %671 = vector.broadcast %c-1_i32_316 : i32 to vector<32x1xi32>
    %672 = arith.addi %0, %671 : vector<32x1xi32>
    %c0_i32_317 = arith.constant 0 : i32
    %673 = vector.broadcast %c0_i32_317 : i32 to vector<32x1xi32>
    %674 = arith.cmpi sge, %672, %673 : vector<32x1xi32>
    %c-1_i32_318 = arith.constant -1 : i32
    %675 = vector.broadcast %c-1_i32_318 : i32 to vector<32x1xi32>
    %676 = arith.addi %0, %675 : vector<32x1xi32>
    %c32_i32_319 = arith.constant 32 : i32
    %677 = vector.broadcast %c32_i32_319 : i32 to vector<32x1xi32>
    %678 = arith.cmpi slt, %676, %677 : vector<32x1xi32>
    %679 = arith.andi %674, %678 : vector<32x1xi1>
    %cst_320 = arith.constant 0.000000e+00 : f32
    %680 = vector.shape_cast %679 : vector<32x1xi1> to vector<32x1xi1>
    %681 = vector.broadcast %680 : vector<32x1xi1> to vector<32x32xi1>
    %682 = vector.broadcast %cst_320 : f32 to vector<32x32xf32>
    %683 = arith.select %681, %670, %682 : vector<32x32xi1>, vector<32x32xf32>
    %684 = vector.extract_strided_slice %668 {offsets = [0, 0], sizes = [1, 32], strides = [1, 1]} : vector<3x32xf32> to vector<1x32xf32>
    %685 = vector.broadcast %684 : vector<1x32xf32> to vector<32x32xf32>
    %686 = arith.mulf %683, %685 : vector<32x32xf32>
    %687 = arith.addf %669, %686 : vector<32x32xf32>
    %688 = vector.extract_strided_slice %668 {offsets = [1, 0], sizes = [1, 32], strides = [1, 1]} : vector<3x32xf32> to vector<1x32xf32>
    %689 = vector.broadcast %688 : vector<1x32xf32> to vector<32x32xf32>
    %690 = arith.mulf %666, %689 : vector<32x32xf32>
    %691 = arith.addf %687, %690 : vector<32x32xf32>
    %c31_i32_321 = arith.constant 31 : i32
    %692 = tpu.dynamic_rotate %666 by %c31_i32_321 dim 0 : vector<32x32xf32>, i32 -> vector<32x32xf32>
    %c1_i32_322 = arith.constant 1 : i32
    %693 = vector.broadcast %c1_i32_322 : i32 to vector<32x1xi32>
    %694 = arith.addi %0, %693 : vector<32x1xi32>
    %c0_i32_323 = arith.constant 0 : i32
    %695 = vector.broadcast %c0_i32_323 : i32 to vector<32x1xi32>
    %696 = arith.cmpi sge, %694, %695 : vector<32x1xi32>
    %c1_i32_324 = arith.constant 1 : i32
    %697 = vector.broadcast %c1_i32_324 : i32 to vector<32x1xi32>
    %698 = arith.addi %0, %697 : vector<32x1xi32>
    %c32_i32_325 = arith.constant 32 : i32
    %699 = vector.broadcast %c32_i32_325 : i32 to vector<32x1xi32>
    %700 = arith.cmpi slt, %698, %699 : vector<32x1xi32>
    %701 = arith.andi %696, %700 : vector<32x1xi1>
    %cst_326 = arith.constant 0.000000e+00 : f32
    %702 = vector.shape_cast %701 : vector<32x1xi1> to vector<32x1xi1>
    %703 = vector.broadcast %702 : vector<32x1xi1> to vector<32x32xi1>
    %704 = vector.broadcast %cst_326 : f32 to vector<32x32xf32>
    %705 = arith.select %703, %692, %704 : vector<32x32xi1>, vector<32x32xf32>
    %706 = vector.extract_strided_slice %668 {offsets = [2, 0], sizes = [1, 32], strides = [1, 1]} : vector<3x32xf32> to vector<1x32xf32>
    %707 = vector.broadcast %706 : vector<1x32xf32> to vector<32x32xf32>
    %708 = arith.mulf %705, %707 : vector<32x32xf32>
    %709 = arith.addf %691, %708 : vector<32x32xf32>
    %c4_327 = arith.constant 4 : index
    %c0_328 = arith.constant 0 : index
    %c0_329 = arith.constant 0 : index
    %710 = vector.load %arg9[%c4_327, %c0_328, %c0_329] : memref<8x1x32xf32, #tpu.memory_space<vmem>>, vector<1x1x32xf32>
    %711 = vector.shape_cast %710 : vector<1x1x32xf32> to vector<1x32xf32>
    %712 = vector.broadcast %711 : vector<1x32xf32> to vector<32x32xf32>
    %713 = arith.addf %709, %712 : vector<32x32xf32>
    %cst_330 = arith.constant 0.000000e+00 : f32
    %714 = vector.broadcast %cst_330 : f32 to vector<32x32xf32>
    %715 = arith.cmpf oge, %713, %714 : vector<32x32xf32>
    %c4_331 = arith.constant 4 : index
    %c0_332 = arith.constant 0 : index
    %c0_333 = arith.constant 0 : index
    %716 = vector.load %arg10[%c4_331, %c0_332, %c0_333] : memref<8x1x32xf32, #tpu.memory_space<vmem>>, vector<1x1x32xf32>
    %717 = vector.shape_cast %716 : vector<1x1x32xf32> to vector<1x32xf32>
    %718 = vector.broadcast %717 : vector<1x32xf32> to vector<32x32xf32>
    %719 = arith.mulf %718, %713 : vector<32x32xf32>
    %720 = arith.select %715, %713, %719 : vector<32x32xi1>, vector<32x32xf32>
    %cst_334 = arith.constant 0.000000e+00 : f32
    %721 = vector.shape_cast %2 : vector<32x1xi1> to vector<32x1xi1>
    %722 = vector.broadcast %721 : vector<32x1xi1> to vector<32x32xi1>
    %723 = vector.broadcast %cst_334 : f32 to vector<32x32xf32>
    %724 = arith.select %722, %720, %723 : vector<32x32xi1>, vector<32x32xf32>
    %725 = vector.shape_cast %724 : vector<32x32xf32> to vector<1x32x32xf32>
    %cst_335 = arith.constant dense<0.000000e+00> : vector<1xf32>
    %726 = vector.multi_reduction <add>, %725, %cst_335 [1, 2] : vector<1x32x32xf32> to vector<1xf32>
    %727 = vector.shape_cast %726 : vector<1xf32> to vector<1x1x1xf32>
    %728 = vector.extract %727[0, 0, 0] : f32 from vector<1x1x1xf32>
    %cst_336 = arith.constant 0.00100806449 : f32
    %729 = arith.mulf %728, %cst_336 : f32
    %730 = arith.mulf %724, %724 : vector<32x32xf32>
    %731 = vector.shape_cast %730 : vector<32x32xf32> to vector<1x32x32xf32>
    %cst_337 = arith.constant dense<0.000000e+00> : vector<1xf32>
    %732 = vector.multi_reduction <add>, %731, %cst_337 [1, 2] : vector<1x32x32xf32> to vector<1xf32>
    %733 = vector.shape_cast %732 : vector<1xf32> to vector<1x1x1xf32>
    %734 = vector.extract %733[0, 0, 0] : f32 from vector<1x1x1xf32>
    %cst_338 = arith.constant 0.00100806449 : f32
    %735 = arith.mulf %734, %cst_338 : f32
    %736 = arith.mulf %729, %729 : f32
    %737 = arith.subf %735, %736 : f32
    %cst_339 = arith.constant 0.000000e+00 : f32
    %738 = arith.maximumf %737, %cst_339 : f32
    %739 = vector.broadcast %729 : f32 to vector<32x32xf32>
    %740 = arith.subf %720, %739 : vector<32x32xf32>
    %cst_340 = arith.constant 9.99999974E-6 : f32
    %741 = arith.addf %738, %cst_340 : f32
    %742 = math.rsqrt %741 : f32
    %743 = vector.broadcast %742 : f32 to vector<32x32xf32>
    %744 = arith.mulf %740, %743 : vector<32x32xf32>
    %c4_341 = arith.constant 4 : index
    %c0_342 = arith.constant 0 : index
    %c0_343 = arith.constant 0 : index
    %745 = vector.load %arg11[%c4_341, %c0_342, %c0_343] : memref<8x1x32xf32, #tpu.memory_space<vmem>>, vector<1x1x32xf32>
    %746 = vector.shape_cast %745 : vector<1x1x32xf32> to vector<1x32xf32>
    %747 = vector.broadcast %746 : vector<1x32xf32> to vector<32x32xf32>
    %748 = arith.mulf %744, %747 : vector<32x32xf32>
    %c4_344 = arith.constant 4 : index
    %c0_345 = arith.constant 0 : index
    %c0_346 = arith.constant 0 : index
    %749 = vector.load %arg12[%c4_344, %c0_345, %c0_346] : memref<8x1x32xf32, #tpu.memory_space<vmem>>, vector<1x1x32xf32>
    %750 = vector.shape_cast %749 : vector<1x1x32xf32> to vector<1x32xf32>
    %751 = vector.broadcast %750 : vector<1x32xf32> to vector<32x32xf32>
    %752 = arith.addf %748, %751 : vector<32x32xf32>
    %c4_347 = arith.constant 4 : index
    %c0_348 = arith.constant 0 : index
    %c0_349 = arith.constant 0 : index
    %753 = vector.load %arg13[%c4_347, %c0_348, %c0_349] : memref<8x32x16xf32, #tpu.memory_space<vmem>>, vector<1x32x16xf32>
    %754 = vector.shape_cast %753 : vector<1x32x16xf32> to vector<32x16xf32>
    %cst_350 = arith.constant dense<0.000000e+00> : vector<32x16xf32>
    %755 = tpu.matmul %752, %754, %cst_350 {dimension_numbers = #tpu.dot_dimension_numbers<[1], [0], [0], [1], [0, 0, 1, 1], [], []>} : vector<32x32xf32>, vector<32x16xf32>, vector<32x16xf32> -> vector<32x16xf32>
    %c4_351 = arith.constant 4 : index
    %c0_352 = arith.constant 0 : index
    %c0_353 = arith.constant 0 : index
    %756 = vector.load %arg14[%c4_351, %c0_352, %c0_353] : memref<8x1x16xf32, #tpu.memory_space<vmem>>, vector<1x1x16xf32>
    %757 = vector.shape_cast %756 : vector<1x1x16xf32> to vector<1x16xf32>
    %758 = vector.broadcast %757 : vector<1x16xf32> to vector<32x16xf32>
    %759 = arith.addf %755, %758 : vector<32x16xf32>
    %760 = arith.addf %612, %759 : vector<32x16xf32>
    %cst_354 = arith.constant 0.000000e+00 : f32
    %761 = vector.shape_cast %2 : vector<32x1xi1> to vector<32x1xi1>
    %762 = vector.broadcast %761 : vector<32x1xi1> to vector<32x16xi1>
    %763 = vector.broadcast %cst_354 : f32 to vector<32x16xf32>
    %764 = arith.select %762, %760, %763 : vector<32x16xi1>, vector<32x16xf32>
    %c5 = arith.constant 5 : index
    %c0_355 = arith.constant 0 : index
    %c0_356 = arith.constant 0 : index
    %765 = vector.load %arg3[%c5, %c0_355, %c0_356] : memref<8x16x32xf32, #tpu.memory_space<vmem>>, vector<1x16x32xf32>
    %766 = vector.shape_cast %765 : vector<1x16x32xf32> to vector<16x32xf32>
    %cst_357 = arith.constant dense<0.000000e+00> : vector<32x32xf32>
    %767 = tpu.matmul %764, %766, %cst_357 {dimension_numbers = #tpu.dot_dimension_numbers<[1], [0], [0], [1], [0, 0, 1, 1], [], []>} : vector<32x16xf32>, vector<16x32xf32>, vector<32x32xf32> -> vector<32x32xf32>
    %c0_358 = arith.constant 0 : index
    %c5_359 = arith.constant 5 : index
    %c0_360 = arith.constant 0 : index
    %c0_361 = arith.constant 0 : index
    %768 = vector.load %arg2[%c0_358, %c5_359, %c0_360, %c0_361] : memref<1x8x1x32xf32, #tpu.memory_space<vmem>>, vector<1x1x1x32xf32>
    %769 = vector.shape_cast %768 : vector<1x1x1x32xf32> to vector<1x32xf32>
    %770 = vector.broadcast %769 : vector<1x32xf32> to vector<32x32xf32>
    %771 = arith.addf %767, %770 : vector<32x32xf32>
    %c5_362 = arith.constant 5 : index
    %c0_363 = arith.constant 0 : index
    %c0_364 = arith.constant 0 : index
    %772 = vector.load %arg4[%c5_362, %c0_363, %c0_364] : memref<8x1x32xf32, #tpu.memory_space<vmem>>, vector<1x1x32xf32>
    %773 = vector.shape_cast %772 : vector<1x1x32xf32> to vector<1x32xf32>
    %774 = vector.broadcast %773 : vector<1x32xf32> to vector<32x32xf32>
    %775 = arith.addf %771, %774 : vector<32x32xf32>
    %cst_365 = arith.constant 0.000000e+00 : f32
    %776 = vector.broadcast %cst_365 : f32 to vector<32x32xf32>
    %777 = arith.cmpf oge, %775, %776 : vector<32x32xf32>
    %c5_366 = arith.constant 5 : index
    %c0_367 = arith.constant 0 : index
    %c0_368 = arith.constant 0 : index
    %778 = vector.load %arg5[%c5_366, %c0_367, %c0_368] : memref<8x1x32xf32, #tpu.memory_space<vmem>>, vector<1x1x32xf32>
    %779 = vector.shape_cast %778 : vector<1x1x32xf32> to vector<1x32xf32>
    %780 = vector.broadcast %779 : vector<1x32xf32> to vector<32x32xf32>
    %781 = arith.mulf %780, %775 : vector<32x32xf32>
    %782 = arith.select %777, %775, %781 : vector<32x32xi1>, vector<32x32xf32>
    %cst_369 = arith.constant 0.000000e+00 : f32
    %783 = vector.shape_cast %2 : vector<32x1xi1> to vector<32x1xi1>
    %784 = vector.broadcast %783 : vector<32x1xi1> to vector<32x32xi1>
    %785 = vector.broadcast %cst_369 : f32 to vector<32x32xf32>
    %786 = arith.select %784, %782, %785 : vector<32x32xi1>, vector<32x32xf32>
    %787 = vector.shape_cast %786 : vector<32x32xf32> to vector<1x32x32xf32>
    %cst_370 = arith.constant dense<0.000000e+00> : vector<1xf32>
    %788 = vector.multi_reduction <add>, %787, %cst_370 [1, 2] : vector<1x32x32xf32> to vector<1xf32>
    %789 = vector.shape_cast %788 : vector<1xf32> to vector<1x1x1xf32>
    %790 = vector.extract %789[0, 0, 0] : f32 from vector<1x1x1xf32>
    %cst_371 = arith.constant 0.00100806449 : f32
    %791 = arith.mulf %790, %cst_371 : f32
    %792 = arith.mulf %786, %786 : vector<32x32xf32>
    %793 = vector.shape_cast %792 : vector<32x32xf32> to vector<1x32x32xf32>
    %cst_372 = arith.constant dense<0.000000e+00> : vector<1xf32>
    %794 = vector.multi_reduction <add>, %793, %cst_372 [1, 2] : vector<1x32x32xf32> to vector<1xf32>
    %795 = vector.shape_cast %794 : vector<1xf32> to vector<1x1x1xf32>
    %796 = vector.extract %795[0, 0, 0] : f32 from vector<1x1x1xf32>
    %cst_373 = arith.constant 0.00100806449 : f32
    %797 = arith.mulf %796, %cst_373 : f32
    %798 = arith.mulf %791, %791 : f32
    %799 = arith.subf %797, %798 : f32
    %cst_374 = arith.constant 0.000000e+00 : f32
    %800 = arith.maximumf %799, %cst_374 : f32
    %801 = vector.broadcast %791 : f32 to vector<32x32xf32>
    %802 = arith.subf %782, %801 : vector<32x32xf32>
    %cst_375 = arith.constant 9.99999974E-6 : f32
    %803 = arith.addf %800, %cst_375 : f32
    %804 = math.rsqrt %803 : f32
    %805 = vector.broadcast %804 : f32 to vector<32x32xf32>
    %806 = arith.mulf %802, %805 : vector<32x32xf32>
    %c5_376 = arith.constant 5 : index
    %c0_377 = arith.constant 0 : index
    %c0_378 = arith.constant 0 : index
    %807 = vector.load %arg6[%c5_376, %c0_377, %c0_378] : memref<8x1x32xf32, #tpu.memory_space<vmem>>, vector<1x1x32xf32>
    %808 = vector.shape_cast %807 : vector<1x1x32xf32> to vector<1x32xf32>
    %809 = vector.broadcast %808 : vector<1x32xf32> to vector<32x32xf32>
    %810 = arith.mulf %806, %809 : vector<32x32xf32>
    %c5_379 = arith.constant 5 : index
    %c0_380 = arith.constant 0 : index
    %c0_381 = arith.constant 0 : index
    %811 = vector.load %arg7[%c5_379, %c0_380, %c0_381] : memref<8x1x32xf32, #tpu.memory_space<vmem>>, vector<1x1x32xf32>
    %812 = vector.shape_cast %811 : vector<1x1x32xf32> to vector<1x32xf32>
    %813 = vector.broadcast %812 : vector<1x32xf32> to vector<32x32xf32>
    %814 = arith.addf %810, %813 : vector<32x32xf32>
    %cst_382 = arith.constant 0.000000e+00 : f32
    %815 = vector.shape_cast %2 : vector<32x1xi1> to vector<32x1xi1>
    %816 = vector.broadcast %815 : vector<32x1xi1> to vector<32x32xi1>
    %817 = vector.broadcast %cst_382 : f32 to vector<32x32xf32>
    %818 = arith.select %816, %814, %817 : vector<32x32xi1>, vector<32x32xf32>
    %c5_383 = arith.constant 5 : index
    %c0_384 = arith.constant 0 : index
    %c0_385 = arith.constant 0 : index
    %819 = vector.load %arg8[%c5_383, %c0_384, %c0_385] : memref<8x3x32xf32, #tpu.memory_space<vmem>>, vector<1x3x32xf32>
    %820 = vector.shape_cast %819 : vector<1x3x32xf32> to vector<3x32xf32>
    %cst_386 = arith.constant 0.000000e+00 : f32
    %821 = vector.broadcast %cst_386 : f32 to vector<32x32xf32>
    %c2_i32_387 = arith.constant 2 : i32
    %822 = tpu.dynamic_rotate %818 by %c2_i32_387 dim 0 : vector<32x32xf32>, i32 -> vector<32x32xf32>
    %c-2_i32_388 = arith.constant -2 : i32
    %823 = vector.broadcast %c-2_i32_388 : i32 to vector<32x1xi32>
    %824 = arith.addi %0, %823 : vector<32x1xi32>
    %c0_i32_389 = arith.constant 0 : i32
    %825 = vector.broadcast %c0_i32_389 : i32 to vector<32x1xi32>
    %826 = arith.cmpi sge, %824, %825 : vector<32x1xi32>
    %c-2_i32_390 = arith.constant -2 : i32
    %827 = vector.broadcast %c-2_i32_390 : i32 to vector<32x1xi32>
    %828 = arith.addi %0, %827 : vector<32x1xi32>
    %c32_i32_391 = arith.constant 32 : i32
    %829 = vector.broadcast %c32_i32_391 : i32 to vector<32x1xi32>
    %830 = arith.cmpi slt, %828, %829 : vector<32x1xi32>
    %831 = arith.andi %826, %830 : vector<32x1xi1>
    %cst_392 = arith.constant 0.000000e+00 : f32
    %832 = vector.shape_cast %831 : vector<32x1xi1> to vector<32x1xi1>
    %833 = vector.broadcast %832 : vector<32x1xi1> to vector<32x32xi1>
    %834 = vector.broadcast %cst_392 : f32 to vector<32x32xf32>
    %835 = arith.select %833, %822, %834 : vector<32x32xi1>, vector<32x32xf32>
    %836 = vector.extract_strided_slice %820 {offsets = [0, 0], sizes = [1, 32], strides = [1, 1]} : vector<3x32xf32> to vector<1x32xf32>
    %837 = vector.broadcast %836 : vector<1x32xf32> to vector<32x32xf32>
    %838 = arith.mulf %835, %837 : vector<32x32xf32>
    %839 = arith.addf %821, %838 : vector<32x32xf32>
    %840 = vector.extract_strided_slice %820 {offsets = [1, 0], sizes = [1, 32], strides = [1, 1]} : vector<3x32xf32> to vector<1x32xf32>
    %841 = vector.broadcast %840 : vector<1x32xf32> to vector<32x32xf32>
    %842 = arith.mulf %818, %841 : vector<32x32xf32>
    %843 = arith.addf %839, %842 : vector<32x32xf32>
    %c30_i32_393 = arith.constant 30 : i32
    %844 = tpu.dynamic_rotate %818 by %c30_i32_393 dim 0 : vector<32x32xf32>, i32 -> vector<32x32xf32>
    %c2_i32_394 = arith.constant 2 : i32
    %845 = vector.broadcast %c2_i32_394 : i32 to vector<32x1xi32>
    %846 = arith.addi %0, %845 : vector<32x1xi32>
    %c0_i32_395 = arith.constant 0 : i32
    %847 = vector.broadcast %c0_i32_395 : i32 to vector<32x1xi32>
    %848 = arith.cmpi sge, %846, %847 : vector<32x1xi32>
    %c2_i32_396 = arith.constant 2 : i32
    %849 = vector.broadcast %c2_i32_396 : i32 to vector<32x1xi32>
    %850 = arith.addi %0, %849 : vector<32x1xi32>
    %c32_i32_397 = arith.constant 32 : i32
    %851 = vector.broadcast %c32_i32_397 : i32 to vector<32x1xi32>
    %852 = arith.cmpi slt, %850, %851 : vector<32x1xi32>
    %853 = arith.andi %848, %852 : vector<32x1xi1>
    %cst_398 = arith.constant 0.000000e+00 : f32
    %854 = vector.shape_cast %853 : vector<32x1xi1> to vector<32x1xi1>
    %855 = vector.broadcast %854 : vector<32x1xi1> to vector<32x32xi1>
    %856 = vector.broadcast %cst_398 : f32 to vector<32x32xf32>
    %857 = arith.select %855, %844, %856 : vector<32x32xi1>, vector<32x32xf32>
    %858 = vector.extract_strided_slice %820 {offsets = [2, 0], sizes = [1, 32], strides = [1, 1]} : vector<3x32xf32> to vector<1x32xf32>
    %859 = vector.broadcast %858 : vector<1x32xf32> to vector<32x32xf32>
    %860 = arith.mulf %857, %859 : vector<32x32xf32>
    %861 = arith.addf %843, %860 : vector<32x32xf32>
    %c5_399 = arith.constant 5 : index
    %c0_400 = arith.constant 0 : index
    %c0_401 = arith.constant 0 : index
    %862 = vector.load %arg9[%c5_399, %c0_400, %c0_401] : memref<8x1x32xf32, #tpu.memory_space<vmem>>, vector<1x1x32xf32>
    %863 = vector.shape_cast %862 : vector<1x1x32xf32> to vector<1x32xf32>
    %864 = vector.broadcast %863 : vector<1x32xf32> to vector<32x32xf32>
    %865 = arith.addf %861, %864 : vector<32x32xf32>
    %cst_402 = arith.constant 0.000000e+00 : f32
    %866 = vector.broadcast %cst_402 : f32 to vector<32x32xf32>
    %867 = arith.cmpf oge, %865, %866 : vector<32x32xf32>
    %c5_403 = arith.constant 5 : index
    %c0_404 = arith.constant 0 : index
    %c0_405 = arith.constant 0 : index
    %868 = vector.load %arg10[%c5_403, %c0_404, %c0_405] : memref<8x1x32xf32, #tpu.memory_space<vmem>>, vector<1x1x32xf32>
    %869 = vector.shape_cast %868 : vector<1x1x32xf32> to vector<1x32xf32>
    %870 = vector.broadcast %869 : vector<1x32xf32> to vector<32x32xf32>
    %871 = arith.mulf %870, %865 : vector<32x32xf32>
    %872 = arith.select %867, %865, %871 : vector<32x32xi1>, vector<32x32xf32>
    %cst_406 = arith.constant 0.000000e+00 : f32
    %873 = vector.shape_cast %2 : vector<32x1xi1> to vector<32x1xi1>
    %874 = vector.broadcast %873 : vector<32x1xi1> to vector<32x32xi1>
    %875 = vector.broadcast %cst_406 : f32 to vector<32x32xf32>
    %876 = arith.select %874, %872, %875 : vector<32x32xi1>, vector<32x32xf32>
    %877 = vector.shape_cast %876 : vector<32x32xf32> to vector<1x32x32xf32>
    %cst_407 = arith.constant dense<0.000000e+00> : vector<1xf32>
    %878 = vector.multi_reduction <add>, %877, %cst_407 [1, 2] : vector<1x32x32xf32> to vector<1xf32>
    %879 = vector.shape_cast %878 : vector<1xf32> to vector<1x1x1xf32>
    %880 = vector.extract %879[0, 0, 0] : f32 from vector<1x1x1xf32>
    %cst_408 = arith.constant 0.00100806449 : f32
    %881 = arith.mulf %880, %cst_408 : f32
    %882 = arith.mulf %876, %876 : vector<32x32xf32>
    %883 = vector.shape_cast %882 : vector<32x32xf32> to vector<1x32x32xf32>
    %cst_409 = arith.constant dense<0.000000e+00> : vector<1xf32>
    %884 = vector.multi_reduction <add>, %883, %cst_409 [1, 2] : vector<1x32x32xf32> to vector<1xf32>
    %885 = vector.shape_cast %884 : vector<1xf32> to vector<1x1x1xf32>
    %886 = vector.extract %885[0, 0, 0] : f32 from vector<1x1x1xf32>
    %cst_410 = arith.constant 0.00100806449 : f32
    %887 = arith.mulf %886, %cst_410 : f32
    %888 = arith.mulf %881, %881 : f32
    %889 = arith.subf %887, %888 : f32
    %cst_411 = arith.constant 0.000000e+00 : f32
    %890 = arith.maximumf %889, %cst_411 : f32
    %891 = vector.broadcast %881 : f32 to vector<32x32xf32>
    %892 = arith.subf %872, %891 : vector<32x32xf32>
    %cst_412 = arith.constant 9.99999974E-6 : f32
    %893 = arith.addf %890, %cst_412 : f32
    %894 = math.rsqrt %893 : f32
    %895 = vector.broadcast %894 : f32 to vector<32x32xf32>
    %896 = arith.mulf %892, %895 : vector<32x32xf32>
    %c5_413 = arith.constant 5 : index
    %c0_414 = arith.constant 0 : index
    %c0_415 = arith.constant 0 : index
    %897 = vector.load %arg11[%c5_413, %c0_414, %c0_415] : memref<8x1x32xf32, #tpu.memory_space<vmem>>, vector<1x1x32xf32>
    %898 = vector.shape_cast %897 : vector<1x1x32xf32> to vector<1x32xf32>
    %899 = vector.broadcast %898 : vector<1x32xf32> to vector<32x32xf32>
    %900 = arith.mulf %896, %899 : vector<32x32xf32>
    %c5_416 = arith.constant 5 : index
    %c0_417 = arith.constant 0 : index
    %c0_418 = arith.constant 0 : index
    %901 = vector.load %arg12[%c5_416, %c0_417, %c0_418] : memref<8x1x32xf32, #tpu.memory_space<vmem>>, vector<1x1x32xf32>
    %902 = vector.shape_cast %901 : vector<1x1x32xf32> to vector<1x32xf32>
    %903 = vector.broadcast %902 : vector<1x32xf32> to vector<32x32xf32>
    %904 = arith.addf %900, %903 : vector<32x32xf32>
    %c5_419 = arith.constant 5 : index
    %c0_420 = arith.constant 0 : index
    %c0_421 = arith.constant 0 : index
    %905 = vector.load %arg13[%c5_419, %c0_420, %c0_421] : memref<8x32x16xf32, #tpu.memory_space<vmem>>, vector<1x32x16xf32>
    %906 = vector.shape_cast %905 : vector<1x32x16xf32> to vector<32x16xf32>
    %cst_422 = arith.constant dense<0.000000e+00> : vector<32x16xf32>
    %907 = tpu.matmul %904, %906, %cst_422 {dimension_numbers = #tpu.dot_dimension_numbers<[1], [0], [0], [1], [0, 0, 1, 1], [], []>} : vector<32x32xf32>, vector<32x16xf32>, vector<32x16xf32> -> vector<32x16xf32>
    %c5_423 = arith.constant 5 : index
    %c0_424 = arith.constant 0 : index
    %c0_425 = arith.constant 0 : index
    %908 = vector.load %arg14[%c5_423, %c0_424, %c0_425] : memref<8x1x16xf32, #tpu.memory_space<vmem>>, vector<1x1x16xf32>
    %909 = vector.shape_cast %908 : vector<1x1x16xf32> to vector<1x16xf32>
    %910 = vector.broadcast %909 : vector<1x16xf32> to vector<32x16xf32>
    %911 = arith.addf %907, %910 : vector<32x16xf32>
    %912 = arith.addf %764, %911 : vector<32x16xf32>
    %cst_426 = arith.constant 0.000000e+00 : f32
    %913 = vector.shape_cast %2 : vector<32x1xi1> to vector<32x1xi1>
    %914 = vector.broadcast %913 : vector<32x1xi1> to vector<32x16xi1>
    %915 = vector.broadcast %cst_426 : f32 to vector<32x16xf32>
    %916 = arith.select %914, %912, %915 : vector<32x16xi1>, vector<32x16xf32>
    %c6 = arith.constant 6 : index
    %c0_427 = arith.constant 0 : index
    %c0_428 = arith.constant 0 : index
    %917 = vector.load %arg3[%c6, %c0_427, %c0_428] : memref<8x16x32xf32, #tpu.memory_space<vmem>>, vector<1x16x32xf32>
    %918 = vector.shape_cast %917 : vector<1x16x32xf32> to vector<16x32xf32>
    %cst_429 = arith.constant dense<0.000000e+00> : vector<32x32xf32>
    %919 = tpu.matmul %916, %918, %cst_429 {dimension_numbers = #tpu.dot_dimension_numbers<[1], [0], [0], [1], [0, 0, 1, 1], [], []>} : vector<32x16xf32>, vector<16x32xf32>, vector<32x32xf32> -> vector<32x32xf32>
    %c0_430 = arith.constant 0 : index
    %c6_431 = arith.constant 6 : index
    %c0_432 = arith.constant 0 : index
    %c0_433 = arith.constant 0 : index
    %920 = vector.load %arg2[%c0_430, %c6_431, %c0_432, %c0_433] : memref<1x8x1x32xf32, #tpu.memory_space<vmem>>, vector<1x1x1x32xf32>
    %921 = vector.shape_cast %920 : vector<1x1x1x32xf32> to vector<1x32xf32>
    %922 = vector.broadcast %921 : vector<1x32xf32> to vector<32x32xf32>
    %923 = arith.addf %919, %922 : vector<32x32xf32>
    %c6_434 = arith.constant 6 : index
    %c0_435 = arith.constant 0 : index
    %c0_436 = arith.constant 0 : index
    %924 = vector.load %arg4[%c6_434, %c0_435, %c0_436] : memref<8x1x32xf32, #tpu.memory_space<vmem>>, vector<1x1x32xf32>
    %925 = vector.shape_cast %924 : vector<1x1x32xf32> to vector<1x32xf32>
    %926 = vector.broadcast %925 : vector<1x32xf32> to vector<32x32xf32>
    %927 = arith.addf %923, %926 : vector<32x32xf32>
    %cst_437 = arith.constant 0.000000e+00 : f32
    %928 = vector.broadcast %cst_437 : f32 to vector<32x32xf32>
    %929 = arith.cmpf oge, %927, %928 : vector<32x32xf32>
    %c6_438 = arith.constant 6 : index
    %c0_439 = arith.constant 0 : index
    %c0_440 = arith.constant 0 : index
    %930 = vector.load %arg5[%c6_438, %c0_439, %c0_440] : memref<8x1x32xf32, #tpu.memory_space<vmem>>, vector<1x1x32xf32>
    %931 = vector.shape_cast %930 : vector<1x1x32xf32> to vector<1x32xf32>
    %932 = vector.broadcast %931 : vector<1x32xf32> to vector<32x32xf32>
    %933 = arith.mulf %932, %927 : vector<32x32xf32>
    %934 = arith.select %929, %927, %933 : vector<32x32xi1>, vector<32x32xf32>
    %cst_441 = arith.constant 0.000000e+00 : f32
    %935 = vector.shape_cast %2 : vector<32x1xi1> to vector<32x1xi1>
    %936 = vector.broadcast %935 : vector<32x1xi1> to vector<32x32xi1>
    %937 = vector.broadcast %cst_441 : f32 to vector<32x32xf32>
    %938 = arith.select %936, %934, %937 : vector<32x32xi1>, vector<32x32xf32>
    %939 = vector.shape_cast %938 : vector<32x32xf32> to vector<1x32x32xf32>
    %cst_442 = arith.constant dense<0.000000e+00> : vector<1xf32>
    %940 = vector.multi_reduction <add>, %939, %cst_442 [1, 2] : vector<1x32x32xf32> to vector<1xf32>
    %941 = vector.shape_cast %940 : vector<1xf32> to vector<1x1x1xf32>
    %942 = vector.extract %941[0, 0, 0] : f32 from vector<1x1x1xf32>
    %cst_443 = arith.constant 0.00100806449 : f32
    %943 = arith.mulf %942, %cst_443 : f32
    %944 = arith.mulf %938, %938 : vector<32x32xf32>
    %945 = vector.shape_cast %944 : vector<32x32xf32> to vector<1x32x32xf32>
    %cst_444 = arith.constant dense<0.000000e+00> : vector<1xf32>
    %946 = vector.multi_reduction <add>, %945, %cst_444 [1, 2] : vector<1x32x32xf32> to vector<1xf32>
    %947 = vector.shape_cast %946 : vector<1xf32> to vector<1x1x1xf32>
    %948 = vector.extract %947[0, 0, 0] : f32 from vector<1x1x1xf32>
    %cst_445 = arith.constant 0.00100806449 : f32
    %949 = arith.mulf %948, %cst_445 : f32
    %950 = arith.mulf %943, %943 : f32
    %951 = arith.subf %949, %950 : f32
    %cst_446 = arith.constant 0.000000e+00 : f32
    %952 = arith.maximumf %951, %cst_446 : f32
    %953 = vector.broadcast %943 : f32 to vector<32x32xf32>
    %954 = arith.subf %934, %953 : vector<32x32xf32>
    %cst_447 = arith.constant 9.99999974E-6 : f32
    %955 = arith.addf %952, %cst_447 : f32
    %956 = math.rsqrt %955 : f32
    %957 = vector.broadcast %956 : f32 to vector<32x32xf32>
    %958 = arith.mulf %954, %957 : vector<32x32xf32>
    %c6_448 = arith.constant 6 : index
    %c0_449 = arith.constant 0 : index
    %c0_450 = arith.constant 0 : index
    %959 = vector.load %arg6[%c6_448, %c0_449, %c0_450] : memref<8x1x32xf32, #tpu.memory_space<vmem>>, vector<1x1x32xf32>
    %960 = vector.shape_cast %959 : vector<1x1x32xf32> to vector<1x32xf32>
    %961 = vector.broadcast %960 : vector<1x32xf32> to vector<32x32xf32>
    %962 = arith.mulf %958, %961 : vector<32x32xf32>
    %c6_451 = arith.constant 6 : index
    %c0_452 = arith.constant 0 : index
    %c0_453 = arith.constant 0 : index
    %963 = vector.load %arg7[%c6_451, %c0_452, %c0_453] : memref<8x1x32xf32, #tpu.memory_space<vmem>>, vector<1x1x32xf32>
    %964 = vector.shape_cast %963 : vector<1x1x32xf32> to vector<1x32xf32>
    %965 = vector.broadcast %964 : vector<1x32xf32> to vector<32x32xf32>
    %966 = arith.addf %962, %965 : vector<32x32xf32>
    %cst_454 = arith.constant 0.000000e+00 : f32
    %967 = vector.shape_cast %2 : vector<32x1xi1> to vector<32x1xi1>
    %968 = vector.broadcast %967 : vector<32x1xi1> to vector<32x32xi1>
    %969 = vector.broadcast %cst_454 : f32 to vector<32x32xf32>
    %970 = arith.select %968, %966, %969 : vector<32x32xi1>, vector<32x32xf32>
    %c6_455 = arith.constant 6 : index
    %c0_456 = arith.constant 0 : index
    %c0_457 = arith.constant 0 : index
    %971 = vector.load %arg8[%c6_455, %c0_456, %c0_457] : memref<8x3x32xf32, #tpu.memory_space<vmem>>, vector<1x3x32xf32>
    %972 = vector.shape_cast %971 : vector<1x3x32xf32> to vector<3x32xf32>
    %cst_458 = arith.constant 0.000000e+00 : f32
    %973 = vector.broadcast %cst_458 : f32 to vector<32x32xf32>
    %c1_i32_459 = arith.constant 1 : i32
    %974 = tpu.dynamic_rotate %970 by %c1_i32_459 dim 0 : vector<32x32xf32>, i32 -> vector<32x32xf32>
    %c-1_i32_460 = arith.constant -1 : i32
    %975 = vector.broadcast %c-1_i32_460 : i32 to vector<32x1xi32>
    %976 = arith.addi %0, %975 : vector<32x1xi32>
    %c0_i32_461 = arith.constant 0 : i32
    %977 = vector.broadcast %c0_i32_461 : i32 to vector<32x1xi32>
    %978 = arith.cmpi sge, %976, %977 : vector<32x1xi32>
    %c-1_i32_462 = arith.constant -1 : i32
    %979 = vector.broadcast %c-1_i32_462 : i32 to vector<32x1xi32>
    %980 = arith.addi %0, %979 : vector<32x1xi32>
    %c32_i32_463 = arith.constant 32 : i32
    %981 = vector.broadcast %c32_i32_463 : i32 to vector<32x1xi32>
    %982 = arith.cmpi slt, %980, %981 : vector<32x1xi32>
    %983 = arith.andi %978, %982 : vector<32x1xi1>
    %cst_464 = arith.constant 0.000000e+00 : f32
    %984 = vector.shape_cast %983 : vector<32x1xi1> to vector<32x1xi1>
    %985 = vector.broadcast %984 : vector<32x1xi1> to vector<32x32xi1>
    %986 = vector.broadcast %cst_464 : f32 to vector<32x32xf32>
    %987 = arith.select %985, %974, %986 : vector<32x32xi1>, vector<32x32xf32>
    %988 = vector.extract_strided_slice %972 {offsets = [0, 0], sizes = [1, 32], strides = [1, 1]} : vector<3x32xf32> to vector<1x32xf32>
    %989 = vector.broadcast %988 : vector<1x32xf32> to vector<32x32xf32>
    %990 = arith.mulf %987, %989 : vector<32x32xf32>
    %991 = arith.addf %973, %990 : vector<32x32xf32>
    %992 = vector.extract_strided_slice %972 {offsets = [1, 0], sizes = [1, 32], strides = [1, 1]} : vector<3x32xf32> to vector<1x32xf32>
    %993 = vector.broadcast %992 : vector<1x32xf32> to vector<32x32xf32>
    %994 = arith.mulf %970, %993 : vector<32x32xf32>
    %995 = arith.addf %991, %994 : vector<32x32xf32>
    %c31_i32_465 = arith.constant 31 : i32
    %996 = tpu.dynamic_rotate %970 by %c31_i32_465 dim 0 : vector<32x32xf32>, i32 -> vector<32x32xf32>
    %c1_i32_466 = arith.constant 1 : i32
    %997 = vector.broadcast %c1_i32_466 : i32 to vector<32x1xi32>
    %998 = arith.addi %0, %997 : vector<32x1xi32>
    %c0_i32_467 = arith.constant 0 : i32
    %999 = vector.broadcast %c0_i32_467 : i32 to vector<32x1xi32>
    %1000 = arith.cmpi sge, %998, %999 : vector<32x1xi32>
    %c1_i32_468 = arith.constant 1 : i32
    %1001 = vector.broadcast %c1_i32_468 : i32 to vector<32x1xi32>
    %1002 = arith.addi %0, %1001 : vector<32x1xi32>
    %c32_i32_469 = arith.constant 32 : i32
    %1003 = vector.broadcast %c32_i32_469 : i32 to vector<32x1xi32>
    %1004 = arith.cmpi slt, %1002, %1003 : vector<32x1xi32>
    %1005 = arith.andi %1000, %1004 : vector<32x1xi1>
    %cst_470 = arith.constant 0.000000e+00 : f32
    %1006 = vector.shape_cast %1005 : vector<32x1xi1> to vector<32x1xi1>
    %1007 = vector.broadcast %1006 : vector<32x1xi1> to vector<32x32xi1>
    %1008 = vector.broadcast %cst_470 : f32 to vector<32x32xf32>
    %1009 = arith.select %1007, %996, %1008 : vector<32x32xi1>, vector<32x32xf32>
    %1010 = vector.extract_strided_slice %972 {offsets = [2, 0], sizes = [1, 32], strides = [1, 1]} : vector<3x32xf32> to vector<1x32xf32>
    %1011 = vector.broadcast %1010 : vector<1x32xf32> to vector<32x32xf32>
    %1012 = arith.mulf %1009, %1011 : vector<32x32xf32>
    %1013 = arith.addf %995, %1012 : vector<32x32xf32>
    %c6_471 = arith.constant 6 : index
    %c0_472 = arith.constant 0 : index
    %c0_473 = arith.constant 0 : index
    %1014 = vector.load %arg9[%c6_471, %c0_472, %c0_473] : memref<8x1x32xf32, #tpu.memory_space<vmem>>, vector<1x1x32xf32>
    %1015 = vector.shape_cast %1014 : vector<1x1x32xf32> to vector<1x32xf32>
    %1016 = vector.broadcast %1015 : vector<1x32xf32> to vector<32x32xf32>
    %1017 = arith.addf %1013, %1016 : vector<32x32xf32>
    %cst_474 = arith.constant 0.000000e+00 : f32
    %1018 = vector.broadcast %cst_474 : f32 to vector<32x32xf32>
    %1019 = arith.cmpf oge, %1017, %1018 : vector<32x32xf32>
    %c6_475 = arith.constant 6 : index
    %c0_476 = arith.constant 0 : index
    %c0_477 = arith.constant 0 : index
    %1020 = vector.load %arg10[%c6_475, %c0_476, %c0_477] : memref<8x1x32xf32, #tpu.memory_space<vmem>>, vector<1x1x32xf32>
    %1021 = vector.shape_cast %1020 : vector<1x1x32xf32> to vector<1x32xf32>
    %1022 = vector.broadcast %1021 : vector<1x32xf32> to vector<32x32xf32>
    %1023 = arith.mulf %1022, %1017 : vector<32x32xf32>
    %1024 = arith.select %1019, %1017, %1023 : vector<32x32xi1>, vector<32x32xf32>
    %cst_478 = arith.constant 0.000000e+00 : f32
    %1025 = vector.shape_cast %2 : vector<32x1xi1> to vector<32x1xi1>
    %1026 = vector.broadcast %1025 : vector<32x1xi1> to vector<32x32xi1>
    %1027 = vector.broadcast %cst_478 : f32 to vector<32x32xf32>
    %1028 = arith.select %1026, %1024, %1027 : vector<32x32xi1>, vector<32x32xf32>
    %1029 = vector.shape_cast %1028 : vector<32x32xf32> to vector<1x32x32xf32>
    %cst_479 = arith.constant dense<0.000000e+00> : vector<1xf32>
    %1030 = vector.multi_reduction <add>, %1029, %cst_479 [1, 2] : vector<1x32x32xf32> to vector<1xf32>
    %1031 = vector.shape_cast %1030 : vector<1xf32> to vector<1x1x1xf32>
    %1032 = vector.extract %1031[0, 0, 0] : f32 from vector<1x1x1xf32>
    %cst_480 = arith.constant 0.00100806449 : f32
    %1033 = arith.mulf %1032, %cst_480 : f32
    %1034 = arith.mulf %1028, %1028 : vector<32x32xf32>
    %1035 = vector.shape_cast %1034 : vector<32x32xf32> to vector<1x32x32xf32>
    %cst_481 = arith.constant dense<0.000000e+00> : vector<1xf32>
    %1036 = vector.multi_reduction <add>, %1035, %cst_481 [1, 2] : vector<1x32x32xf32> to vector<1xf32>
    %1037 = vector.shape_cast %1036 : vector<1xf32> to vector<1x1x1xf32>
    %1038 = vector.extract %1037[0, 0, 0] : f32 from vector<1x1x1xf32>
    %cst_482 = arith.constant 0.00100806449 : f32
    %1039 = arith.mulf %1038, %cst_482 : f32
    %1040 = arith.mulf %1033, %1033 : f32
    %1041 = arith.subf %1039, %1040 : f32
    %cst_483 = arith.constant 0.000000e+00 : f32
    %1042 = arith.maximumf %1041, %cst_483 : f32
    %1043 = vector.broadcast %1033 : f32 to vector<32x32xf32>
    %1044 = arith.subf %1024, %1043 : vector<32x32xf32>
    %cst_484 = arith.constant 9.99999974E-6 : f32
    %1045 = arith.addf %1042, %cst_484 : f32
    %1046 = math.rsqrt %1045 : f32
    %1047 = vector.broadcast %1046 : f32 to vector<32x32xf32>
    %1048 = arith.mulf %1044, %1047 : vector<32x32xf32>
    %c6_485 = arith.constant 6 : index
    %c0_486 = arith.constant 0 : index
    %c0_487 = arith.constant 0 : index
    %1049 = vector.load %arg11[%c6_485, %c0_486, %c0_487] : memref<8x1x32xf32, #tpu.memory_space<vmem>>, vector<1x1x32xf32>
    %1050 = vector.shape_cast %1049 : vector<1x1x32xf32> to vector<1x32xf32>
    %1051 = vector.broadcast %1050 : vector<1x32xf32> to vector<32x32xf32>
    %1052 = arith.mulf %1048, %1051 : vector<32x32xf32>
    %c6_488 = arith.constant 6 : index
    %c0_489 = arith.constant 0 : index
    %c0_490 = arith.constant 0 : index
    %1053 = vector.load %arg12[%c6_488, %c0_489, %c0_490] : memref<8x1x32xf32, #tpu.memory_space<vmem>>, vector<1x1x32xf32>
    %1054 = vector.shape_cast %1053 : vector<1x1x32xf32> to vector<1x32xf32>
    %1055 = vector.broadcast %1054 : vector<1x32xf32> to vector<32x32xf32>
    %1056 = arith.addf %1052, %1055 : vector<32x32xf32>
    %c6_491 = arith.constant 6 : index
    %c0_492 = arith.constant 0 : index
    %c0_493 = arith.constant 0 : index
    %1057 = vector.load %arg13[%c6_491, %c0_492, %c0_493] : memref<8x32x16xf32, #tpu.memory_space<vmem>>, vector<1x32x16xf32>
    %1058 = vector.shape_cast %1057 : vector<1x32x16xf32> to vector<32x16xf32>
    %cst_494 = arith.constant dense<0.000000e+00> : vector<32x16xf32>
    %1059 = tpu.matmul %1056, %1058, %cst_494 {dimension_numbers = #tpu.dot_dimension_numbers<[1], [0], [0], [1], [0, 0, 1, 1], [], []>} : vector<32x32xf32>, vector<32x16xf32>, vector<32x16xf32> -> vector<32x16xf32>
    %c6_495 = arith.constant 6 : index
    %c0_496 = arith.constant 0 : index
    %c0_497 = arith.constant 0 : index
    %1060 = vector.load %arg14[%c6_495, %c0_496, %c0_497] : memref<8x1x16xf32, #tpu.memory_space<vmem>>, vector<1x1x16xf32>
    %1061 = vector.shape_cast %1060 : vector<1x1x16xf32> to vector<1x16xf32>
    %1062 = vector.broadcast %1061 : vector<1x16xf32> to vector<32x16xf32>
    %1063 = arith.addf %1059, %1062 : vector<32x16xf32>
    %1064 = arith.addf %916, %1063 : vector<32x16xf32>
    %cst_498 = arith.constant 0.000000e+00 : f32
    %1065 = vector.shape_cast %2 : vector<32x1xi1> to vector<32x1xi1>
    %1066 = vector.broadcast %1065 : vector<32x1xi1> to vector<32x16xi1>
    %1067 = vector.broadcast %cst_498 : f32 to vector<32x16xf32>
    %1068 = arith.select %1066, %1064, %1067 : vector<32x16xi1>, vector<32x16xf32>
    %c7 = arith.constant 7 : index
    %c0_499 = arith.constant 0 : index
    %c0_500 = arith.constant 0 : index
    %1069 = vector.load %arg3[%c7, %c0_499, %c0_500] : memref<8x16x32xf32, #tpu.memory_space<vmem>>, vector<1x16x32xf32>
    %1070 = vector.shape_cast %1069 : vector<1x16x32xf32> to vector<16x32xf32>
    %cst_501 = arith.constant dense<0.000000e+00> : vector<32x32xf32>
    %1071 = tpu.matmul %1068, %1070, %cst_501 {dimension_numbers = #tpu.dot_dimension_numbers<[1], [0], [0], [1], [0, 0, 1, 1], [], []>} : vector<32x16xf32>, vector<16x32xf32>, vector<32x32xf32> -> vector<32x32xf32>
    %c0_502 = arith.constant 0 : index
    %c7_503 = arith.constant 7 : index
    %c0_504 = arith.constant 0 : index
    %c0_505 = arith.constant 0 : index
    %1072 = vector.load %arg2[%c0_502, %c7_503, %c0_504, %c0_505] : memref<1x8x1x32xf32, #tpu.memory_space<vmem>>, vector<1x1x1x32xf32>
    %1073 = vector.shape_cast %1072 : vector<1x1x1x32xf32> to vector<1x32xf32>
    %1074 = vector.broadcast %1073 : vector<1x32xf32> to vector<32x32xf32>
    %1075 = arith.addf %1071, %1074 : vector<32x32xf32>
    %c7_506 = arith.constant 7 : index
    %c0_507 = arith.constant 0 : index
    %c0_508 = arith.constant 0 : index
    %1076 = vector.load %arg4[%c7_506, %c0_507, %c0_508] : memref<8x1x32xf32, #tpu.memory_space<vmem>>, vector<1x1x32xf32>
    %1077 = vector.shape_cast %1076 : vector<1x1x32xf32> to vector<1x32xf32>
    %1078 = vector.broadcast %1077 : vector<1x32xf32> to vector<32x32xf32>
    %1079 = arith.addf %1075, %1078 : vector<32x32xf32>
    %cst_509 = arith.constant 0.000000e+00 : f32
    %1080 = vector.broadcast %cst_509 : f32 to vector<32x32xf32>
    %1081 = arith.cmpf oge, %1079, %1080 : vector<32x32xf32>
    %c7_510 = arith.constant 7 : index
    %c0_511 = arith.constant 0 : index
    %c0_512 = arith.constant 0 : index
    %1082 = vector.load %arg5[%c7_510, %c0_511, %c0_512] : memref<8x1x32xf32, #tpu.memory_space<vmem>>, vector<1x1x32xf32>
    %1083 = vector.shape_cast %1082 : vector<1x1x32xf32> to vector<1x32xf32>
    %1084 = vector.broadcast %1083 : vector<1x32xf32> to vector<32x32xf32>
    %1085 = arith.mulf %1084, %1079 : vector<32x32xf32>
    %1086 = arith.select %1081, %1079, %1085 : vector<32x32xi1>, vector<32x32xf32>
    %cst_513 = arith.constant 0.000000e+00 : f32
    %1087 = vector.shape_cast %2 : vector<32x1xi1> to vector<32x1xi1>
    %1088 = vector.broadcast %1087 : vector<32x1xi1> to vector<32x32xi1>
    %1089 = vector.broadcast %cst_513 : f32 to vector<32x32xf32>
    %1090 = arith.select %1088, %1086, %1089 : vector<32x32xi1>, vector<32x32xf32>
    %1091 = vector.shape_cast %1090 : vector<32x32xf32> to vector<1x32x32xf32>
    %cst_514 = arith.constant dense<0.000000e+00> : vector<1xf32>
    %1092 = vector.multi_reduction <add>, %1091, %cst_514 [1, 2] : vector<1x32x32xf32> to vector<1xf32>
    %1093 = vector.shape_cast %1092 : vector<1xf32> to vector<1x1x1xf32>
    %1094 = vector.extract %1093[0, 0, 0] : f32 from vector<1x1x1xf32>
    %cst_515 = arith.constant 0.00100806449 : f32
    %1095 = arith.mulf %1094, %cst_515 : f32
    %1096 = arith.mulf %1090, %1090 : vector<32x32xf32>
    %1097 = vector.shape_cast %1096 : vector<32x32xf32> to vector<1x32x32xf32>
    %cst_516 = arith.constant dense<0.000000e+00> : vector<1xf32>
    %1098 = vector.multi_reduction <add>, %1097, %cst_516 [1, 2] : vector<1x32x32xf32> to vector<1xf32>
    %1099 = vector.shape_cast %1098 : vector<1xf32> to vector<1x1x1xf32>
    %1100 = vector.extract %1099[0, 0, 0] : f32 from vector<1x1x1xf32>
    %cst_517 = arith.constant 0.00100806449 : f32
    %1101 = arith.mulf %1100, %cst_517 : f32
    %1102 = arith.mulf %1095, %1095 : f32
    %1103 = arith.subf %1101, %1102 : f32
    %cst_518 = arith.constant 0.000000e+00 : f32
    %1104 = arith.maximumf %1103, %cst_518 : f32
    %1105 = vector.broadcast %1095 : f32 to vector<32x32xf32>
    %1106 = arith.subf %1086, %1105 : vector<32x32xf32>
    %cst_519 = arith.constant 9.99999974E-6 : f32
    %1107 = arith.addf %1104, %cst_519 : f32
    %1108 = math.rsqrt %1107 : f32
    %1109 = vector.broadcast %1108 : f32 to vector<32x32xf32>
    %1110 = arith.mulf %1106, %1109 : vector<32x32xf32>
    %c7_520 = arith.constant 7 : index
    %c0_521 = arith.constant 0 : index
    %c0_522 = arith.constant 0 : index
    %1111 = vector.load %arg6[%c7_520, %c0_521, %c0_522] : memref<8x1x32xf32, #tpu.memory_space<vmem>>, vector<1x1x32xf32>
    %1112 = vector.shape_cast %1111 : vector<1x1x32xf32> to vector<1x32xf32>
    %1113 = vector.broadcast %1112 : vector<1x32xf32> to vector<32x32xf32>
    %1114 = arith.mulf %1110, %1113 : vector<32x32xf32>
    %c7_523 = arith.constant 7 : index
    %c0_524 = arith.constant 0 : index
    %c0_525 = arith.constant 0 : index
    %1115 = vector.load %arg7[%c7_523, %c0_524, %c0_525] : memref<8x1x32xf32, #tpu.memory_space<vmem>>, vector<1x1x32xf32>
    %1116 = vector.shape_cast %1115 : vector<1x1x32xf32> to vector<1x32xf32>
    %1117 = vector.broadcast %1116 : vector<1x32xf32> to vector<32x32xf32>
    %1118 = arith.addf %1114, %1117 : vector<32x32xf32>
    %cst_526 = arith.constant 0.000000e+00 : f32
    %1119 = vector.shape_cast %2 : vector<32x1xi1> to vector<32x1xi1>
    %1120 = vector.broadcast %1119 : vector<32x1xi1> to vector<32x32xi1>
    %1121 = vector.broadcast %cst_526 : f32 to vector<32x32xf32>
    %1122 = arith.select %1120, %1118, %1121 : vector<32x32xi1>, vector<32x32xf32>
    %c7_527 = arith.constant 7 : index
    %c0_528 = arith.constant 0 : index
    %c0_529 = arith.constant 0 : index
    %1123 = vector.load %arg8[%c7_527, %c0_528, %c0_529] : memref<8x3x32xf32, #tpu.memory_space<vmem>>, vector<1x3x32xf32>
    %1124 = vector.shape_cast %1123 : vector<1x3x32xf32> to vector<3x32xf32>
    %cst_530 = arith.constant 0.000000e+00 : f32
    %1125 = vector.broadcast %cst_530 : f32 to vector<32x32xf32>
    %c2_i32_531 = arith.constant 2 : i32
    %1126 = tpu.dynamic_rotate %1122 by %c2_i32_531 dim 0 : vector<32x32xf32>, i32 -> vector<32x32xf32>
    %c-2_i32_532 = arith.constant -2 : i32
    %1127 = vector.broadcast %c-2_i32_532 : i32 to vector<32x1xi32>
    %1128 = arith.addi %0, %1127 : vector<32x1xi32>
    %c0_i32_533 = arith.constant 0 : i32
    %1129 = vector.broadcast %c0_i32_533 : i32 to vector<32x1xi32>
    %1130 = arith.cmpi sge, %1128, %1129 : vector<32x1xi32>
    %c-2_i32_534 = arith.constant -2 : i32
    %1131 = vector.broadcast %c-2_i32_534 : i32 to vector<32x1xi32>
    %1132 = arith.addi %0, %1131 : vector<32x1xi32>
    %c32_i32_535 = arith.constant 32 : i32
    %1133 = vector.broadcast %c32_i32_535 : i32 to vector<32x1xi32>
    %1134 = arith.cmpi slt, %1132, %1133 : vector<32x1xi32>
    %1135 = arith.andi %1130, %1134 : vector<32x1xi1>
    %cst_536 = arith.constant 0.000000e+00 : f32
    %1136 = vector.shape_cast %1135 : vector<32x1xi1> to vector<32x1xi1>
    %1137 = vector.broadcast %1136 : vector<32x1xi1> to vector<32x32xi1>
    %1138 = vector.broadcast %cst_536 : f32 to vector<32x32xf32>
    %1139 = arith.select %1137, %1126, %1138 : vector<32x32xi1>, vector<32x32xf32>
    %1140 = vector.extract_strided_slice %1124 {offsets = [0, 0], sizes = [1, 32], strides = [1, 1]} : vector<3x32xf32> to vector<1x32xf32>
    %1141 = vector.broadcast %1140 : vector<1x32xf32> to vector<32x32xf32>
    %1142 = arith.mulf %1139, %1141 : vector<32x32xf32>
    %1143 = arith.addf %1125, %1142 : vector<32x32xf32>
    %1144 = vector.extract_strided_slice %1124 {offsets = [1, 0], sizes = [1, 32], strides = [1, 1]} : vector<3x32xf32> to vector<1x32xf32>
    %1145 = vector.broadcast %1144 : vector<1x32xf32> to vector<32x32xf32>
    %1146 = arith.mulf %1122, %1145 : vector<32x32xf32>
    %1147 = arith.addf %1143, %1146 : vector<32x32xf32>
    %c30_i32_537 = arith.constant 30 : i32
    %1148 = tpu.dynamic_rotate %1122 by %c30_i32_537 dim 0 : vector<32x32xf32>, i32 -> vector<32x32xf32>
    %c2_i32_538 = arith.constant 2 : i32
    %1149 = vector.broadcast %c2_i32_538 : i32 to vector<32x1xi32>
    %1150 = arith.addi %0, %1149 : vector<32x1xi32>
    %c0_i32_539 = arith.constant 0 : i32
    %1151 = vector.broadcast %c0_i32_539 : i32 to vector<32x1xi32>
    %1152 = arith.cmpi sge, %1150, %1151 : vector<32x1xi32>
    %c2_i32_540 = arith.constant 2 : i32
    %1153 = vector.broadcast %c2_i32_540 : i32 to vector<32x1xi32>
    %1154 = arith.addi %0, %1153 : vector<32x1xi32>
    %c32_i32_541 = arith.constant 32 : i32
    %1155 = vector.broadcast %c32_i32_541 : i32 to vector<32x1xi32>
    %1156 = arith.cmpi slt, %1154, %1155 : vector<32x1xi32>
    %1157 = arith.andi %1152, %1156 : vector<32x1xi1>
    %cst_542 = arith.constant 0.000000e+00 : f32
    %1158 = vector.shape_cast %1157 : vector<32x1xi1> to vector<32x1xi1>
    %1159 = vector.broadcast %1158 : vector<32x1xi1> to vector<32x32xi1>
    %1160 = vector.broadcast %cst_542 : f32 to vector<32x32xf32>
    %1161 = arith.select %1159, %1148, %1160 : vector<32x32xi1>, vector<32x32xf32>
    %1162 = vector.extract_strided_slice %1124 {offsets = [2, 0], sizes = [1, 32], strides = [1, 1]} : vector<3x32xf32> to vector<1x32xf32>
    %1163 = vector.broadcast %1162 : vector<1x32xf32> to vector<32x32xf32>
    %1164 = arith.mulf %1161, %1163 : vector<32x32xf32>
    %1165 = arith.addf %1147, %1164 : vector<32x32xf32>
    %c7_543 = arith.constant 7 : index
    %c0_544 = arith.constant 0 : index
    %c0_545 = arith.constant 0 : index
    %1166 = vector.load %arg9[%c7_543, %c0_544, %c0_545] : memref<8x1x32xf32, #tpu.memory_space<vmem>>, vector<1x1x32xf32>
    %1167 = vector.shape_cast %1166 : vector<1x1x32xf32> to vector<1x32xf32>
    %1168 = vector.broadcast %1167 : vector<1x32xf32> to vector<32x32xf32>
    %1169 = arith.addf %1165, %1168 : vector<32x32xf32>
    %cst_546 = arith.constant 0.000000e+00 : f32
    %1170 = vector.broadcast %cst_546 : f32 to vector<32x32xf32>
    %1171 = arith.cmpf oge, %1169, %1170 : vector<32x32xf32>
    %c7_547 = arith.constant 7 : index
    %c0_548 = arith.constant 0 : index
    %c0_549 = arith.constant 0 : index
    %1172 = vector.load %arg10[%c7_547, %c0_548, %c0_549] : memref<8x1x32xf32, #tpu.memory_space<vmem>>, vector<1x1x32xf32>
    %1173 = vector.shape_cast %1172 : vector<1x1x32xf32> to vector<1x32xf32>
    %1174 = vector.broadcast %1173 : vector<1x32xf32> to vector<32x32xf32>
    %1175 = arith.mulf %1174, %1169 : vector<32x32xf32>
    %1176 = arith.select %1171, %1169, %1175 : vector<32x32xi1>, vector<32x32xf32>
    %cst_550 = arith.constant 0.000000e+00 : f32
    %1177 = vector.shape_cast %2 : vector<32x1xi1> to vector<32x1xi1>
    %1178 = vector.broadcast %1177 : vector<32x1xi1> to vector<32x32xi1>
    %1179 = vector.broadcast %cst_550 : f32 to vector<32x32xf32>
    %1180 = arith.select %1178, %1176, %1179 : vector<32x32xi1>, vector<32x32xf32>
    %1181 = vector.shape_cast %1180 : vector<32x32xf32> to vector<1x32x32xf32>
    %cst_551 = arith.constant dense<0.000000e+00> : vector<1xf32>
    %1182 = vector.multi_reduction <add>, %1181, %cst_551 [1, 2] : vector<1x32x32xf32> to vector<1xf32>
    %1183 = vector.shape_cast %1182 : vector<1xf32> to vector<1x1x1xf32>
    %1184 = vector.extract %1183[0, 0, 0] : f32 from vector<1x1x1xf32>
    %cst_552 = arith.constant 0.00100806449 : f32
    %1185 = arith.mulf %1184, %cst_552 : f32
    %1186 = arith.mulf %1180, %1180 : vector<32x32xf32>
    %1187 = vector.shape_cast %1186 : vector<32x32xf32> to vector<1x32x32xf32>
    %cst_553 = arith.constant dense<0.000000e+00> : vector<1xf32>
    %1188 = vector.multi_reduction <add>, %1187, %cst_553 [1, 2] : vector<1x32x32xf32> to vector<1xf32>
    %1189 = vector.shape_cast %1188 : vector<1xf32> to vector<1x1x1xf32>
    %1190 = vector.extract %1189[0, 0, 0] : f32 from vector<1x1x1xf32>
    %cst_554 = arith.constant 0.00100806449 : f32
    %1191 = arith.mulf %1190, %cst_554 : f32
    %1192 = arith.mulf %1185, %1185 : f32
    %1193 = arith.subf %1191, %1192 : f32
    %cst_555 = arith.constant 0.000000e+00 : f32
    %1194 = arith.maximumf %1193, %cst_555 : f32
    %1195 = vector.broadcast %1185 : f32 to vector<32x32xf32>
    %1196 = arith.subf %1176, %1195 : vector<32x32xf32>
    %cst_556 = arith.constant 9.99999974E-6 : f32
    %1197 = arith.addf %1194, %cst_556 : f32
    %1198 = math.rsqrt %1197 : f32
    %1199 = vector.broadcast %1198 : f32 to vector<32x32xf32>
    %1200 = arith.mulf %1196, %1199 : vector<32x32xf32>
    %c7_557 = arith.constant 7 : index
    %c0_558 = arith.constant 0 : index
    %c0_559 = arith.constant 0 : index
    %1201 = vector.load %arg11[%c7_557, %c0_558, %c0_559] : memref<8x1x32xf32, #tpu.memory_space<vmem>>, vector<1x1x32xf32>
    %1202 = vector.shape_cast %1201 : vector<1x1x32xf32> to vector<1x32xf32>
    %1203 = vector.broadcast %1202 : vector<1x32xf32> to vector<32x32xf32>
    %1204 = arith.mulf %1200, %1203 : vector<32x32xf32>
    %c7_560 = arith.constant 7 : index
    %c0_561 = arith.constant 0 : index
    %c0_562 = arith.constant 0 : index
    %1205 = vector.load %arg12[%c7_560, %c0_561, %c0_562] : memref<8x1x32xf32, #tpu.memory_space<vmem>>, vector<1x1x32xf32>
    %1206 = vector.shape_cast %1205 : vector<1x1x32xf32> to vector<1x32xf32>
    %1207 = vector.broadcast %1206 : vector<1x32xf32> to vector<32x32xf32>
    %1208 = arith.addf %1204, %1207 : vector<32x32xf32>
    %c7_563 = arith.constant 7 : index
    %c0_564 = arith.constant 0 : index
    %c0_565 = arith.constant 0 : index
    %1209 = vector.load %arg13[%c7_563, %c0_564, %c0_565] : memref<8x32x16xf32, #tpu.memory_space<vmem>>, vector<1x32x16xf32>
    %1210 = vector.shape_cast %1209 : vector<1x32x16xf32> to vector<32x16xf32>
    %cst_566 = arith.constant dense<0.000000e+00> : vector<32x16xf32>
    %1211 = tpu.matmul %1208, %1210, %cst_566 {dimension_numbers = #tpu.dot_dimension_numbers<[1], [0], [0], [1], [0, 0, 1, 1], [], []>} : vector<32x32xf32>, vector<32x16xf32>, vector<32x16xf32> -> vector<32x16xf32>
    %c7_567 = arith.constant 7 : index
    %c0_568 = arith.constant 0 : index
    %c0_569 = arith.constant 0 : index
    %1212 = vector.load %arg14[%c7_567, %c0_568, %c0_569] : memref<8x1x16xf32, #tpu.memory_space<vmem>>, vector<1x1x16xf32>
    %1213 = vector.shape_cast %1212 : vector<1x1x16xf32> to vector<1x16xf32>
    %1214 = vector.broadcast %1213 : vector<1x16xf32> to vector<32x16xf32>
    %1215 = arith.addf %1211, %1214 : vector<32x16xf32>
    %1216 = arith.addf %1068, %1215 : vector<32x16xf32>
    %cst_570 = arith.constant 0.000000e+00 : f32
    %1217 = vector.shape_cast %2 : vector<32x1xi1> to vector<32x1xi1>
    %1218 = vector.broadcast %1217 : vector<32x1xi1> to vector<32x16xi1>
    %1219 = vector.broadcast %cst_570 : f32 to vector<32x16xf32>
    %1220 = arith.select %1218, %1216, %1219 : vector<32x16xi1>, vector<32x16xf32>
    %c0_571 = arith.constant 0 : index
    %c0_572 = arith.constant 0 : index
    %c0_573 = arith.constant 0 : index
    %1221 = vector.load %arg15[%c0_571, %c0_572, %c0_573] : memref<1x32x16xf32, #tpu.memory_space<vmem>>, vector<1x32x16xf32>
    %1222 = vector.shape_cast %1221 : vector<1x32x16xf32> to vector<32x16xf32>
    %1223 = vector.shape_cast %1220 : vector<32x16xf32> to vector<1x32x16xf32>
    tpu.vector_store %arg15[%c0_571, %c0_572, %c0_573], %1223 {strides = array<i32>} : memref<1x32x16xf32, #tpu.memory_space<vmem>>, vector<1x32x16xf32>,
    return
  }
  func.func @transform_0(%arg0: i32) -> (i32, i32, i32) {
    %c0_i32 = arith.constant 0 : i32
    %c0_i32_0 = arith.constant 0 : i32
    %c0_i32_1 = arith.constant 0 : i32
    return %arg0, %c0_i32, %c0_i32_0 : i32, i32, i32
  }
  func.func @transform_1(%arg0: i32) -> (i32, i32, i32, i32) {
    %c0_i32 = arith.constant 0 : i32
    %c0_i32_0 = arith.constant 0 : i32
    %c0_i32_1 = arith.constant 0 : i32
    %c0_i32_2 = arith.constant 0 : i32
    return %arg0, %c0_i32, %c0_i32_0, %c0_i32_1 : i32, i32, i32, i32
  }
  func.func @transform_2(%arg0: i32) -> (i32, i32, i32) {
    %c0_i32 = arith.constant 0 : i32
    %c0_i32_0 = arith.constant 0 : i32
    %c0_i32_1 = arith.constant 0 : i32
    %c0_i32_2 = arith.constant 0 : i32
    return %c0_i32, %c0_i32_0, %c0_i32_1 : i32, i32, i32
  }
  func.func @transform_3(%arg0: i32) -> (i32, i32, i32) {
    %c0_i32 = arith.constant 0 : i32
    %c0_i32_0 = arith.constant 0 : i32
    %c0_i32_1 = arith.constant 0 : i32
    %c0_i32_2 = arith.constant 0 : i32
    return %c0_i32, %c0_i32_0, %c0_i32_1 : i32, i32, i32
  }
  func.func @transform_4(%arg0: i32) -> (i32, i32, i32) {
    %c0_i32 = arith.constant 0 : i32
    %c0_i32_0 = arith.constant 0 : i32
    %c0_i32_1 = arith.constant 0 : i32
    %c0_i32_2 = arith.constant 0 : i32
    return %c0_i32, %c0_i32_0, %c0_i32_1 : i32, i32, i32
  }
  func.func @transform_5(%arg0: i32) -> (i32, i32, i32) {
    %c0_i32 = arith.constant 0 : i32
    %c0_i32_0 = arith.constant 0 : i32
    %c0_i32_1 = arith.constant 0 : i32
    %c0_i32_2 = arith.constant 0 : i32
    return %c0_i32, %c0_i32_0, %c0_i32_1 : i32, i32, i32
  }
  func.func @transform_6(%arg0: i32) -> (i32, i32, i32) {
    %c0_i32 = arith.constant 0 : i32
    %c0_i32_0 = arith.constant 0 : i32
    %c0_i32_1 = arith.constant 0 : i32
    %c0_i32_2 = arith.constant 0 : i32
    return %c0_i32, %c0_i32_0, %c0_i32_1 : i32, i32, i32
  }
  func.func @transform_7(%arg0: i32) -> (i32, i32, i32) {
    %c0_i32 = arith.constant 0 : i32
    %c0_i32_0 = arith.constant 0 : i32
    %c0_i32_1 = arith.constant 0 : i32
    %c0_i32_2 = arith.constant 0 : i32
    return %c0_i32, %c0_i32_0, %c0_i32_1 : i32, i32, i32
  }
  func.func @transform_8(%arg0: i32) -> (i32, i32, i32) {
    %c0_i32 = arith.constant 0 : i32
    %c0_i32_0 = arith.constant 0 : i32
    %c0_i32_1 = arith.constant 0 : i32
    %c0_i32_2 = arith.constant 0 : i32
    return %c0_i32, %c0_i32_0, %c0_i32_1 : i32, i32, i32
  }
  func.func @transform_9(%arg0: i32) -> (i32, i32, i32) {
    %c0_i32 = arith.constant 0 : i32
    %c0_i32_0 = arith.constant 0 : i32
    %c0_i32_1 = arith.constant 0 : i32
    %c0_i32_2 = arith.constant 0 : i32
    return %c0_i32, %c0_i32_0, %c0_i32_1 : i32, i32, i32
  }
  func.func @transform_10(%arg0: i32) -> (i32, i32, i32) {
    %c0_i32 = arith.constant 0 : i32
    %c0_i32_0 = arith.constant 0 : i32
    %c0_i32_1 = arith.constant 0 : i32
    %c0_i32_2 = arith.constant 0 : i32
    return %c0_i32, %c0_i32_0, %c0_i32_1 : i32, i32, i32
  }
  func.func @transform_11(%arg0: i32) -> (i32, i32, i32) {
    %c0_i32 = arith.constant 0 : i32
    %c0_i32_0 = arith.constant 0 : i32
    %c0_i32_1 = arith.constant 0 : i32
    %c0_i32_2 = arith.constant 0 : i32
    return %c0_i32, %c0_i32_0, %c0_i32_1 : i32, i32, i32
  }
  func.func @transform_12(%arg0: i32) -> (i32, i32, i32) {
    %c0_i32 = arith.constant 0 : i32
    %c0_i32_0 = arith.constant 0 : i32
    %c0_i32_1 = arith.constant 0 : i32
    %c0_i32_2 = arith.constant 0 : i32
    return %c0_i32, %c0_i32_0, %c0_i32_1 : i32, i32, i32
  }
  func.func @transform_13(%arg0: i32) -> (i32, i32, i32) {
    %c0_i32 = arith.constant 0 : i32
    %c0_i32_0 = arith.constant 0 : i32
    %c0_i32_1 = arith.constant 0 : i32
    %c0_i32_2 = arith.constant 0 : i32
    return %c0_i32, %c0_i32_0, %c0_i32_1 : i32, i32, i32
  }
  func.func @transform_14(%arg0: i32) -> (i32, i32, i32) {
    %c0_i32 = arith.constant 0 : i32
    %c0_i32_0 = arith.constant 0 : i32
    %c0_i32_1 = arith.constant 0 : i32
    return %arg0, %c0_i32, %c0_i32_0 : i32, i32, i32
  }
}

</mosaic_0001>

<bundles_post_ra>
// kernel: spex_plus_forward.10
= control target key start
LH: loop header
LB: loop body
LE: loop exit
PB: predicated region body
PF: predicated region fallthrough
CT: control target
= control target key end

     0   :  { %v330_v0 = vmov 0.0|0.0   ;;  %vm331_vm0 = vmmov 0   ;;  %v332_v6 = vmov 0.0   ;;  %vm38_vm1 = vcmask 261120   ;;  %s500_s1 = inlined_call_operand.vmem [shape: f32[32,48], index: 1, kind: input, shape index: {}]   ;;  %s501_s0 = inlined_call_operand.vmem [shape: f32[104,32], index: 0, kind: input, shape index: {}]   ;;  %s502_s2 = inlined_call_operand.vmem [shape: f32[1,48], index: 2, kind: input, shape index: {}]   ;;  %s503_s3 = inlined_call_operand.vmem [shape: f32[104,48], index: 3, kind: output, shape index: {}]  }
   0x1   :  { %317 = vmatprep.subr.bf16.mxu0 %v330_v0  ;;  %v27_v1 = vld [vmem:[%s500_s1] sm:$0xff]  ;;  %v28_v2 = vld [vmem:[%s500_s1 + $0x8] sm:$0xff]  ;;  %323 = vmatprep.subr.bf16.mxu1 %v330_v0  ;;  %v29_v3 = vld [vmem:[%s500_s1 + $0x10] sm:$0xff]  ;;  %vm221_vm2 = vcmask 392192  }
   0x2   :  { %v318_v4 = vpack.c.bf16 %v28_v2, %v27_v1  ;;  %v30_v5 = vld [vmem:[%s500_s1 + $0x18] sm:$0xff]  ;;  %278 = vmatprep.mubr.msk.f32.mxu0 %vm331_vm0, %v332_v6  ;;  %299 = vmatprep.mubr.msk.f32.mxu1 %vm331_vm0, %v332_v6  ;;  %v14_v8 = vld [vmem:[%s501_s0] sm:$0xff]  ;;  %v15_v10 = vld [vmem:[%s501_s0 + $0x8] sm:$0xff] }
   0x3   :  { %v321_v7 = vpack.c.bf16 %v30_v5, %v29_v3  ;;  %v21_v9 = vld [vmem:[%s501_s0 + $0x38] sm:$0xff]  ;;  %v22_v11 = vld [vmem:[%s501_s0 + $0x40] sm:$0xff]  ;;  %v16_v12 = vld [vmem:[%s501_s0 + $0x10] sm:$0xff] }
   0x4   :  { %319 = vmatpush3.bf16.msra.mxu0 %v318_v4  ;;  %325 = vmatpush3.bf16.msra.mxu1 %v318_v4  ;;  %v23_v13 = vld [vmem:[%s501_s0 + $0x48] sm:$0xff]  ;;  %v17_v14 = vld [vmem:[%s501_s0 + $0x18] sm:$0xff]  ;;  %v24_v15 = vld [vmem:[%s501_s0 + $0x50] sm:$0xff] }
   0x5   :  { %320 = vmatprep.subr.bf16.mxu0 %v330_v0  ;;  %324 = vmatprep.subr.bf16.mxu1 %v330_v0  ;;  %v18_v16 = vld [vmem:[%s501_s0 + $0x20] sm:$0xff]  ;;  %v25_v17 = vld [vmem:[%s501_s0 + $0x58] sm:$0xff]  ;;  %v19_v18 = vld [vmem:[%s501_s0 + $0x28] sm:$0xff] }
   0x6   :  { %v26_v19 = vld [vmem:[%s501_s0 + $0x60] sm:$0xff]  ;;  %v20_v20 = vld [vmem:[%s501_s0 + $0x30] sm:$0xff] }
   0x7   :  { %v433_v21 = vld [vmem:[%s502_s2] ss:$0 sm:$0xff] }
   0x8   :  { %322 = vmatpush3.bf16.msra.mxu0 %v321_v7  ;;  %326 = vmatpush3.bf16.msra.mxu1 %v321_v7 }
   0xb   :  { %279 = vmatmul.mubr.msk.f32.vlgmr.msra.gmra.mrb[0].mxu0 %vm38_vm1, %v14_v8  ;;  %300 = vmatmul.mubr.msk.f32.vlgmr.msra.gmra.mrb[0].mxu1 %vm38_vm1, %v21_v9 }
   0xc   :  { %281 = vmatprep.mubr.msk.f32.mxu0 %vm331_vm0, %v332_v6  ;;  %302 = vmatprep.mubr.msk.f32.mxu1 %vm331_vm0, %v332_v6 }
   0xf   :  { %282 = vmatmul.mubr.msk.f32.gmra.mrb[2].mxu0 %vm38_vm1, %v15_v10  ;;  %303 = vmatmul.mubr.msk.f32.gmra.mrb[2].mxu1 %vm38_vm1, %v22_v11 }
  0x10   :  { %284 = vmatprep.mubr.msk.f32.mxu0 %vm331_vm0, %v332_v6  ;;  %305 = vmatprep.mubr.msk.f32.mxu1 %vm331_vm0, %v332_v6 }
  0x13   :  { %285 = vmatmul.mubr.msk.f32.gmra.mrb[4].mxu0 %vm38_vm1, %v16_v12  ;;  %306 = vmatmul.mubr.msk.f32.gmra.mrb[4].mxu1 %vm38_vm1, %v23_v13 }
  0x14   :  { %287 = vmatprep.mubr.msk.f32.mxu0 %vm331_vm0, %v332_v6  ;;  %308 = vmatprep.mubr.msk.f32.mxu1 %vm331_vm0, %v332_v6 }
  0x17   :  { %288 = vmatmul.mubr.msk.f32.gmra.mrb[6].mxu0 %vm38_vm1, %v17_v14  ;;  %309 = vmatmul.mubr.msk.f32.gmra.mrb[6].mxu1 %vm38_vm1, %v24_v15 }
  0x18   :  { %290 = vmatprep.mubr.msk.f32.mxu0 %vm331_vm0, %v332_v6  ;;  %311 = vmatprep.mubr.msk.f32.mxu1 %vm331_vm0, %v332_v6 }
  0x1b   :  { %291 = vmatmul.mubr.msk.f32.gmra.mrb[8].mxu0 %vm38_vm1, %v18_v16  ;;  %312 = vmatmul.mubr.msk.f32.gmra.mrb[8].mxu1 %vm38_vm1, %v25_v17 }
  0x1c   :  { %293 = vmatprep.mubr.msk.f32.mxu0 %vm331_vm0, %v332_v6  ;;  %314 = vmatprep.mubr.msk.f32.mxu1 %vm331_vm0, %v332_v6 }
  0x1f   :  { %294 = vmatmul.mubr.msk.f32.gmra.mrb[10].mxu0 %vm38_vm1, %v19_v18  ;;  %315 = vmatmul.mubr.msk.f32.gmra.mrb[10].mxu1 %vm38_vm1, %v26_v19 }
  0x20   :  { %296 = vmatprep.mubr.msk.f32.mxu0 %vm331_vm0, %v332_v6 }
  0x23   :  { %297 = vmatmul.mubr.msk.f32.gmra.mrb[12].mxu0 %vm38_vm1, %v20_v20 }
  0xde   :  { %v144_v22 = vpop.f32.mrb[0].mxu0  ;;  %v179_v23 = vpop.f32.mrb[0].mxu1 }
  0xdf   :  { %v145_v24 = vadd.f32 %v433_v21, %v144_v22  ;;  %v280_v25 = vpop.f32.mrb[1].mxu0  ;;  %v180_v26 = vadd.f32 %v433_v21, %v179_v23  ;;  %v301_v27 = vpop.f32.mrb[1].mxu1 }
  0xe1   :  { %v208_v28 = vmax.f32 %v145_v24, 0.0  ;;  %v215_v29 = vmax.f32 %v180_v26, 0.0 }
  0xe2   :  { %v149_v30 = vpop.f32.mrb[2].mxu0  ;;  %v184_v31 = vpop.f32.mrb[2].mxu1 }
  0xe3   :  { %222 = vst.msk [vmem:[%s503_s3] sm:$0xff] %vm221_vm2, %v208_v28  ;;  %229 = vst.msk [vmem:[%s503_s3 + $0x38] sm:$0xff] %vm221_vm2, %v215_v29  ;;  %v150_v32 = vadd.f32 %v433_v21, %v149_v30  ;;  %v283_v33 = vpop.f32.mrb[3].mxu0  ;;  %v185_v34 = vadd.f32 %v433_v21, %v184_v31  ;;  %v304_v35 = vpop.f32.mrb[3].mxu1 }
  0xe5   :  { %v209_v36 = vmax.f32 %v150_v32, 0.0  ;;  %v216_v37 = vmax.f32 %v185_v34, 0.0 }
  0xe6   :  { %v154_v38 = vpop.f32.mrb[4].mxu0  ;;  %v189_v39 = vpop.f32.mrb[4].mxu1 }
  0xe7   :  { %223 = vst.msk [vmem:[%s503_s3 + $0x8] sm:$0xff] %vm221_vm2, %v209_v36  ;;  %230 = vst.msk [vmem:[%s503_s3 + $0x40] sm:$0xff] %vm221_vm2, %v216_v37  ;;  %v155_v40 = vadd.f32 %v433_v21, %v154_v38  ;;  %v286_v41 = vpop.f32.mrb[5].mxu0  ;;  %v190_v42 = vadd.f32 %v433_v21, %v189_v39  ;;  %v307_v43 = vpop.f32.mrb[5].mxu1 }
  0xe9   :  { %v210_v44 = vmax.f32 %v155_v40, 0.0  ;;  %v217_v45 = vmax.f32 %v190_v42, 0.0 }
  0xea   :  { %v159_v46 = vpop.f32.mrb[6].mxu0  ;;  %v194_v47 = vpop.f32.mrb[6].mxu1 }
  0xeb   :  { %224 = vst.msk [vmem:[%s503_s3 + $0x10] sm:$0xff] %vm221_vm2, %v210_v44  ;;  %231 = vst.msk [vmem:[%s503_s3 + $0x48] sm:$0xff] %vm221_vm2, %v217_v45  ;;  %v160_v48 = vadd.f32 %v433_v21, %v159_v46  ;;  %v289_v49 = vpop.f32.mrb[7].mxu0  ;;  %v195_v50 = vadd.f32 %v433_v21, %v194_v47  ;;  %v310_v51 = vpop.f32.mrb[7].mxu1 }
  0xed   :  { %v211_v52 = vmax.f32 %v160_v48, 0.0  ;;  %v218_v53 = vmax.f32 %v195_v50, 0.0 }
  0xee   :  { %v164_v54 = vpop.f32.mrb[8].mxu0  ;;  %v199_v55 = vpop.f32.mrb[8].mxu1 }
  0xef   :  { %225 = vst.msk [vmem:[%s503_s3 + $0x18] sm:$0xff] %vm221_vm2, %v211_v52  ;;  %232 = vst.msk [vmem:[%s503_s3 + $0x50] sm:$0xff] %vm221_vm2, %v218_v53  ;;  %v165_v56 = vadd.f32 %v433_v21, %v164_v54  ;;  %v292_v57 = vpop.f32.mrb[9].mxu0  ;;  %v200_v58 = vadd.f32 %v433_v21, %v199_v55  ;;  %v313_v59 = vpop.f32.mrb[9].mxu1 }
  0xf1   :  { %v212_v60 = vmax.f32 %v165_v56, 0.0  ;;  %v219_v61 = vmax.f32 %v200_v58, 0.0 }
  0xf2   :  { %v169_v62 = vpop.f32.mrb[10].mxu0  ;;  %v204_v63 = vpop.f32.mrb[10].mxu1 }
  0xf3   :  { %226 = vst.msk [vmem:[%s503_s3 + $0x20] sm:$0xff] %vm221_vm2, %v212_v60  ;;  %233 = vst.msk [vmem:[%s503_s3 + $0x58] sm:$0xff] %vm221_vm2, %v219_v61  ;;  %v170_v0 = vadd.f32 %v433_v21, %v169_v62  ;;  %v295_v1 = vpop.f32.mrb[11].mxu0  ;;  %v205_v2 = vadd.f32 %v433_v21, %v204_v63  ;;  %v316_v3 = vpop.f32.mrb[11].mxu1 }
  0xf5   :  { %v213_v4 = vmax.f32 %v170_v0, 0.0  ;;  %v220_v5 = vmax.f32 %v205_v2, 0.0 }
  0xf6   :  { %v174_v6 = vpop.f32.mrb[12].mxu0 }
  0xf7   :  { %227 = vst.msk [vmem:[%s503_s3 + $0x28] sm:$0xff] %vm221_vm2, %v213_v4  ;;  %234 = vst.msk [vmem:[%s503_s3 + $0x60] sm:$0xff] %vm221_vm2, %v220_v5  ;;  %v175_v7 = vadd.f32 %v433_v21, %v174_v6  ;;  %v298_v8 = vpop.f32.mrb[13].mxu0 }
  0xf9   :  { %v214_v9 = vmax.f32 %v175_v7, 0.0 }
  0xfb   :  { %228 = vst.msk [vmem:[%s503_s3 + $0x30] sm:$0xff] %vm221_vm2, %v214_v9 }

// kernel: spex_plus_forward.12
= control target key start
LH: loop header
LB: loop body
LE: loop exit
PB: predicated region body
PF: predicated region fallthrough
CT: control target
= control target key end

     0   :  { %vm33_vm0 = vcmask 392192   ;;  %vm575_vm1 = vmmov 0   ;;  %vm426_vm2 = vcmask 130048   ;;  %s905_s0 = inlined_call_operand.vmem [shape: f32[104,48], index: 0, kind: input, shape index: {}]   ;;  %s906_s3 = inlined_call_operand.vmem [shape: f32[48,16], index: 3, kind: input, shape index: {}]   ;;  %s907_s1 = inlined_call_operand.vmem [shape: f32[1,48], index: 1, kind: input, shape index: {}]   ;;  %s908_s2 = inlined_call_operand.vmem [shape: f32[1,48], index: 2, kind: input, shape index: {}]   ;;  %s909_s4 = inlined_call_operand.vmem [shape: f32[1,16], index: 4, kind: input, shape index: {}]   ;;  %s910_s5 = inlined_call_operand.vmem [shape: f32[104,16], index: 5, kind: output, shape index: {}]  }
   0x1   :  { %v20_v0 = vld [vmem:[%s905_s0] sm:$0xff]  ;;  %v27_v1 = vld [vmem:[%s905_s0 + $0x38] sm:$0xff]  ;;  %v21_v2 = vld [vmem:[%s905_s0 + $0x8] sm:$0xff] }
   0x2   :  { %v34_v3 = vsel %vm33_vm0, %v20_v0, 0.0  ;;  %v55_v4 = vsel %vm33_vm0, %v27_v1, 0.0  ;;  %v22_v5 = vld [vmem:[%s905_s0 + $0x10] sm:$0xff]  ;;  %v37_v6 = vsel %vm33_vm0, %v21_v2, 0.0  ;;  %v28_v8 = vld [vmem:[%s905_s0 + $0x40] sm:$0xff]  ;;  %v23_v9 = vld [vmem:[%s905_s0 + $0x18] sm:$0xff] }
   0x3   :  { %35 = vadd.xlane.f32.xlu0 %v34_v3  ;;  %56 = vadd.xlane.f32.xlu1 %v55_v4  ;;  %v40_v7 = vsel %vm33_vm0, %v22_v5, 0.0  ;;  %v58_v10 = vsel %vm33_vm0, %v28_v8, 0.0  ;;  %v43_v11 = vsel %vm33_vm0, %v23_v9, 0.0  ;;  %v29_v12 = vld [vmem:[%s905_s0 + $0x48] sm:$0xff]  ;;  %v24_v13 = vld [vmem:[%s905_s0 + $0x20] sm:$0xff]  ;;  %v642_v16 = vld [vmem:[%s905_s0 + $0x50] sm:$0xff] }
   0x4   :  { %v61_v14 = vsel %vm33_vm0, %v29_v12, 0.0  ;;  %v46_v15 = vsel %vm33_vm0, %v24_v13, 0.0  ;;  %v647_v17 = vld [vmem:[%s905_s0 + $0x28] sm:$0xff]  ;;  %v64_v18 = vsel %vm33_vm0, %v642_v16, 0.0  ;;  %v656_v20 = vld [vmem:[%s905_s0 + $0x58] sm:$0xff]  ;;  %v661_v21 = vld [vmem:[%s905_s0 + $0x30] sm:$0xff] }
   0x5   :  { %v49_v19 = vsel %vm33_vm0, %v647_v17, 0.0  ;;  %v67_v22 = vsel %vm33_vm0, %v656_v20, 0.0  ;;  %v52_v23 = vsel %vm33_vm0, %v661_v21, 0.0  ;;  %v670_v24 = vld [vmem:[%s905_s0 + $0x60] sm:$0xff] }
   0x6   :  { %v70_v25 = vsel %vm33_vm0, %v670_v24, 0.0 }
   0x7   :  { %38 = vadd.xlane.f32.xlu0 %v37_v6  ;;  %41 = vadd.xlane.f32.xlu1 %v40_v7 }
   0xb   :  { %59 = vadd.xlane.f32.xlu0 %v58_v10  ;;  %44 = vadd.xlane.f32.xlu1 %v43_v11 }
   0xf   :  { %62 = vadd.xlane.f32.xlu0 %v61_v14  ;;  %47 = vadd.xlane.f32.xlu1 %v46_v15 }
  0x13   :  { %65 = vadd.xlane.f32.xlu0 %v64_v18  ;;  %50 = vadd.xlane.f32.xlu1 %v49_v19 }
  0x17   :  { %68 = vadd.xlane.f32.xlu0 %v67_v22  ;;  %53 = vadd.xlane.f32.xlu1 %v52_v23 }
  0x1b   :  { %71 = vadd.xlane.f32.xlu0 %v70_v25 }
  0x90   :  { %v36_v26 = vpop.xlane.xlu0 %35  ;;  %v57_v27 = vpop.xlane.xlu1 %56 }
  0x91   :  { %v74_v28 = vmul.f32 0.020833334, %v36_v26  ;;  %v81_v29 = vmul.f32 0.020833334, %v57_v27  ;;  %v244_v27 = vld [vmem:[%s906_s3] sm:$0xff] }
  0x93   :  { %v674_v30 = vsub.f32 %v20_v0, %v74_v28  ;;  %v676_v31 = vsub.f32 %v27_v1, %v81_v29  ;;  %v245_v28 = vld [vmem:[%s906_s3 + $0x8] sm:$0xff] }
  0x94   :  { %v39_v32 = vpop.xlane.xlu0 %38  ;;  %v42_v33 = vpop.xlane.xlu1 %41  ;;  %v531_v29 = vpack.c.bf16 %v245_v28, %v244_v27 }
  0x95   :  { %v75_v34 = vmul.f32 0.020833334, %v39_v32  ;;  %v76_v35 = vmul.f32 0.020833334, %v42_v33  ;;  %v100_v36 = vmul.f32 %v674_v30, %v674_v30  ;;  %v107_v37 = vmul.f32 %v676_v31, %v676_v31  ;;  %v246_v33 = vld [vmem:[%s906_s3 + $0x10] sm:$0xff] }
  0x96   :  { %v574_v32 = vmov 0.0|0.0  }
  0x97   :  { %v682_v38 = vsub.f32 %v21_v2, %v75_v34  ;;  %v684_v39 = vsub.f32 %v22_v5, %v76_v35  ;;  %v113_v40 = vsel %vm33_vm0, %v100_v36, 0.0  ;;  %v134_v43 = vsel %vm33_vm0, %v107_v37, 0.0  ;;  %530 = vmatprep.subr.bf16.mxu0 %v574_v32  ;;  %539 = vmatprep.subr.bf16.mxu1 %v574_v32  ;;  %v247_v34 = vld [vmem:[%s906_s3 + $0x18] sm:$0xff]  ;;  %v248_v36 = vld [vmem:[%s906_s3 + $0x20] sm:$0xff]  ;;  %v249_v37 = vld [vmem:[%s906_s3 + $0x28] sm:$0xff] }
  0x98   :  { %114 = vadd.xlane.f32.xlu1 %v113_v40  ;;  %v60_v41 = vpop.xlane.xlu0 %59  ;;  %v45_v42 = vpop.xlane.xlu1 %44  ;;  %532 = vmatpush3.bf16.msra.mxu0 %v531_v29  ;;  %v534_v35 = vpack.c.bf16 %v247_v34, %v246_v33  ;;  %v537_v40 = vpack.c.bf16 %v249_v37, %v248_v36 }
  0x99   :  { %v82_v44 = vmul.f32 0.020833334, %v60_v41  ;;  %v77_v45 = vmul.f32 0.020833334, %v45_v42  ;;  %v101_v46 = vmul.f32 %v682_v38, %v682_v38  ;;  %v102_v47 = vmul.f32 %v684_v39, %v684_v39  ;;  %542 = vmatpush3.bf16.msra.mxu1 %v531_v29  ;;  %533 = vmatprep.subr.bf16.mxu0 %v574_v32 }
  0x9a   :  { %540 = vmatprep.subr.bf16.mxu1 %v574_v32  ;;  %v576_v41 = vmov 0.0  }
  0x9b   :  { %v692_v48 = vsub.f32 %v28_v8, %v82_v44  ;;  %v694_v49 = vsub.f32 %v23_v9, %v77_v45  ;;  %v116_v50 = vsel %vm33_vm0, %v101_v46, 0.0  ;;  %v119_v53 = vsel %vm33_vm0, %v102_v47, 0.0  ;;  %491 = vmatprep.mubr.msk.f32.mxu0 %vm575_vm1, %v576_v41  ;;  %512 = vmatprep.mubr.msk.f32.mxu1 %vm575_vm1, %v576_v41 }
  0x9c   :  { %135 = vadd.xlane.f32.xlu1 %v134_v43  ;;  %117 = vadd.xlane.f32.xlu0 %v116_v50  ;;  %v63_v51 = vpop.xlane.xlu0 %62  ;;  %v48_v52 = vpop.xlane.xlu1 %47 }
  0x9d   :  { %v83_v54 = vmul.f32 0.020833334, %v63_v51  ;;  %v78_v55 = vmul.f32 0.020833334, %v48_v52  ;;  %v108_v56 = vmul.f32 %v692_v48, %v692_v48  ;;  %v103_v57 = vmul.f32 %v694_v49, %v694_v49  ;;  %535 = vmatpush3.bf16.msra.mxu0 %v534_v35  ;;  %543 = vmatpush3.bf16.msra.mxu1 %v534_v35 }
  0x9e   :  { %536 = vmatprep.subr.bf16.mxu0 %v574_v32  ;;  %541 = vmatprep.subr.bf16.mxu1 %v574_v32 }
  0x9f   :  { %v702_v58 = vsub.f32 %v29_v12, %v83_v54  ;;  %v704_v59 = vsub.f32 %v24_v13, %v78_v55  ;;  %v137_v60 = vsel %vm33_vm0, %v108_v56, 0.0  ;;  %v122_v63 = vsel %vm33_vm0, %v103_v57, 0.0 }
  0xa0   :  { %120 = vadd.xlane.f32.xlu0 %v119_v53  ;;  %138 = vadd.xlane.f32.xlu1 %v137_v60  ;;  %v66_v61 = vpop.xlane.xlu0 %65  ;;  %v51_v62 = vpop.xlane.xlu1 %50 }
  0xa1   :  { %v84_v0 = vmul.f32 0.020833334, %v66_v61  ;;  %v79_v1 = vmul.f32 0.020833334, %v51_v62  ;;  %v109_v2 = vmul.f32 %v702_v58, %v702_v58  ;;  %v104_v3 = vmul.f32 %v704_v59, %v704_v59  ;;  %538 = vmatpush3.bf16.msra.mxu0 %v537_v40  ;;  %544 = vmatpush3.bf16.msra.mxu1 %v537_v40 }
  0xa3   :  { %v713_v4 = vsub.f32 %v642_v16, %v84_v0  ;;  %v716_v5 = vsub.f32 %v647_v17, %v79_v1  ;;  %v140_v6 = vsel %vm33_vm0, %v109_v2, 0.0  ;;  %v125_v9 = vsel %vm33_vm0, %v104_v3, 0.0 }
  0xa4   :  { %123 = vadd.xlane.f32.xlu0 %v122_v63  ;;  %141 = vadd.xlane.f32.xlu1 %v140_v6  ;;  %v69_v7 = vpop.xlane.xlu0 %68  ;;  %v54_v8 = vpop.xlane.xlu1 %53  ;;  %v769_v6 = vld [vmem:[%s907_s1] ss:$0 sm:$0xff] }
  0xa5   :  { %v85_v10 = vmul.f32 0.020833334, %v69_v7  ;;  %v80_v11 = vmul.f32 0.020833334, %v54_v8  ;;  %v110_v12 = vmul.f32 %v713_v4, %v713_v4  ;;  %v105_v13 = vmul.f32 %v716_v5, %v716_v5 }
  0xa7   :  { %v725_v14 = vsub.f32 %v656_v20, %v85_v10  ;;  %v728_v15 = vsub.f32 %v661_v21, %v80_v11  ;;  %v143_v16 = vsel %vm33_vm0, %v110_v12, 0.0  ;;  %v128_v19 = vsel %vm33_vm0, %v105_v13, 0.0  ;;  %v775_v12 = vld [vmem:[%s908_s2] ss:$0 sm:$0xff] }
  0xa8   :  { %126 = vadd.xlane.f32.xlu0 %v125_v9  ;;  %144 = vadd.xlane.f32.xlu1 %v143_v16  ;;  %v72_v17 = vpop.xlane.xlu0 %71 }
  0xa9   :  { %v86_v18 = vmul.f32 0.020833334, %v72_v17  ;;  %v111_v22 = vmul.f32 %v725_v14, %v725_v14  ;;  %v106_v23 = vmul.f32 %v728_v15, %v728_v15 }
  0xab   :  { %v737_v20 = vsub.f32 %v670_v24, %v86_v18  ;;  %v146_v21 = vsel %vm33_vm0, %v111_v22, 0.0  ;;  %v131_v25 = vsel %vm33_vm0, %v106_v23, 0.0 }
  0xac   :  { %129 = vadd.xlane.f32.xlu0 %v128_v19  ;;  %147 = vadd.xlane.f32.xlu1 %v146_v21 }
  0xad   :  { %v112_v26 = vmul.f32 %v737_v20, %v737_v20 }
  0xaf   :  { %v149_v24 = vsel %vm33_vm0, %v112_v26, 0.0 }
  0xb0   :  { %132 = vadd.xlane.f32.xlu0 %v131_v25  ;;  %150 = vadd.xlane.f32.xlu1 %v149_v24 }
 0x125   :  { %v115_v42 = vpop.xlane.xlu1 %114 }
 0x126   :  { %v152_v43 = vmul.f32 0.020833334, %v115_v42 }
 0x128   :  { %v165_v44 = vadd.f32 1e-05, %v152_v43 }
 0x129   :  { %v136_v45 = vpop.xlane.xlu1 %135  ;;  %v118_v46 = vpop.xlane.xlu0 %117 }
 0x12a   :  { %548 = vrsqrt.f32 %v165_v44  ;;  %v159_v47 = vmul.f32 0.020833334, %v136_v45  ;;  %v153_v50 = vmul.f32 0.020833334, %v118_v46 }
 0x12c   :  { %v172_v51 = vadd.f32 1e-05, %v159_v47  ;;  %v166_v52 = vadd.f32 1e-05, %v153_v50 }
 0x12d   :  { %v139_v53 = vpop.xlane.xlu1 %138  ;;  %v121_v54 = vpop.xlane.xlu0 %120 }
 0x12e   :  { %550 = vrsqrt.f32 %v172_v51  ;;  %v160_v55 = vmul.f32 0.020833334, %v139_v53  ;;  %v154_v56 = vmul.f32 0.020833334, %v121_v54 }
 0x12f   :  { %552 = vrsqrt.f32 %v166_v52 }
 0x130   :  { %v173_v57 = vadd.f32 1e-05, %v160_v55  ;;  %v167_v60 = vadd.f32 1e-05, %v154_v56 }
 0x131   :  { %v142_v61 = vpop.xlane.xlu1 %141  ;;  %v124_v62 = vpop.xlane.xlu0 %123 }
 0x132   :  { %554 = vrsqrt.f32 %v173_v57  ;;  %v161_v63 = vmul.f32 0.020833334, %v142_v61  ;;  %v155_v0 = vmul.f32 0.020833334, %v124_v62 }
 0x133   :  { %556 = vrsqrt.f32 %v167_v60 }
 0x134   :  { %v549_v1 = vpop.eup %548  ;;  %v174_v2 = vadd.f32 1e-05, %v161_v63  ;;  %v168_v3 = vadd.f32 1e-05, %v155_v0 }
 0x135   :  { %v145_v7 = vpop.xlane.xlu1 %144  ;;  %v127_v8 = vpop.xlane.xlu0 %126  ;;  %v191_v9 = vmul.f32 %v549_v1, %v674_v30 }
 0x136   :  { %558 = vrsqrt.f32 %v174_v2  ;;  %v162_v10 = vmul.f32 0.020833334, %v145_v7  ;;  %v156_v11 = vmul.f32 0.020833334, %v127_v8 }
 0x137   :  { %560 = vrsqrt.f32 %v168_v3  ;;  %v211_v13 = vmul.f32 %v769_v6, %v191_v9 }
 0x138   :  { %v551_v16 = vpop.eup %550  ;;  %v175_v17 = vadd.f32 1e-05, %v162_v10  ;;  %v169_v18 = vadd.f32 1e-05, %v156_v11 }
 0x139   :  { %v553_v19 = vpop.eup %552  ;;  %v148_v22 = vpop.xlane.xlu1 %147  ;;  %v231_v21 = vadd.f32 %v775_v12, %v211_v13  ;;  %v198_v30 = vmul.f32 %v551_v16, %v676_v31 }
 0x13a   :  { %v130_v23 = vpop.xlane.xlu0 %129  ;;  %562 = vrsqrt.f32 %v175_v17  ;;  %v163_v25 = vmul.f32 0.020833334, %v148_v22  ;;  %v192_v27 = vmul.f32 %v553_v19, %v682_v38 }
 0x13b   :  { %v157_v26 = vmul.f32 0.020833334, %v130_v23  ;;  %564 = vrsqrt.f32 %v169_v18  ;;  %492 = vmatmul.mubr.msk.f32.vlgmr.msra.gmra.mrb[0].mxu0 %vm33_vm0, %v231_v21  ;;  %v218_v28 = vmul.f32 %v769_v6, %v198_v30 }
 0x13c   :  { %v555_v24 = vpop.eup %554  ;;  %v176_v29 = vadd.f32 1e-05, %v163_v25  ;;  %494 = vmatprep.mubr.msk.f32.mxu0 %vm575_vm1, %v576_v41  ;;  %v212_v33 = vmul.f32 %v769_v6, %v192_v27 }
 0x13d   :  { %v170_v32 = vadd.f32 1e-05, %v157_v26  ;;  %v557_v34 = vpop.eup %556  ;;  %v151_v31 = vpop.xlane.xlu1 %150  ;;  %v238_v36 = vadd.f32 %v775_v12, %v218_v28  ;;  %v199_v38 = vmul.f32 %v555_v24, %v692_v48 }
 0x13e   :  { %v133_v35 = vpop.xlane.xlu0 %132  ;;  %566 = vrsqrt.f32 %v176_v29  ;;  %v164_v37 = vmul.f32 0.020833334, %v151_v31  ;;  %v232_v42 = vadd.f32 %v775_v12, %v212_v33  ;;  %v193_v43 = vmul.f32 %v557_v34, %v684_v39 }
 0x13f   :  { %v158_v40 = vmul.f32 0.020833334, %v133_v35  ;;  %568 = vrsqrt.f32 %v170_v32  ;;  %513 = vmatmul.mubr.msk.f32.vlgmr.msra.gmra.mrb[0].mxu1 %vm33_vm0, %v238_v36  ;;  %v219_v44 = vmul.f32 %v769_v6, %v199_v38 }
 0x140   :  { %v559_v45 = vpop.eup %558  ;;  %v177_v46 = vadd.f32 1e-05, %v164_v37  ;;  %495 = vmatmul.mubr.msk.f32.gmra.mrb[2].mxu0 %vm33_vm0, %v232_v42  ;;  %515 = vmatprep.mubr.msk.f32.mxu1 %vm575_vm1, %v576_v41  ;;  %v213_v50 = vmul.f32 %v769_v6, %v193_v43 }
 0x141   :  { %v171_v47 = vadd.f32 1e-05, %v158_v40  ;;  %v561_v48 = vpop.eup %560  ;;  %497 = vmatprep.mubr.msk.f32.mxu0 %vm575_vm1, %v576_v41  ;;  %v239_v51 = vadd.f32 %v775_v12, %v219_v44  ;;  %v200_v39 = vmul.f32 %v559_v45, %v702_v58 }
 0x142   :  { %570 = vrsqrt.f32 %v177_v46  ;;  %v194_v52 = vmul.f32 %v561_v48, %v694_v49  ;;  %v233_v53 = vadd.f32 %v775_v12, %v213_v50 }
 0x143   :  { %572 = vrsqrt.f32 %v171_v47  ;;  %516 = vmatmul.mubr.msk.f32.gmra.mrb[2].mxu1 %vm33_vm0, %v239_v51  ;;  %v220_v54 = vmul.f32 %v769_v6, %v200_v39 }
 0x144   :  { %v563_v55 = vpop.eup %562  ;;  %518 = vmatprep.mubr.msk.f32.mxu1 %vm575_vm1, %v576_v41  ;;  %v214_v56 = vmul.f32 %v769_v6, %v194_v52  ;;  %498 = vmatmul.mubr.msk.f32.gmra.mrb[4].mxu0 %vm33_vm0, %v233_v53 }
 0x145   :  { %v565_v57 = vpop.eup %564  ;;  %v240_v58 = vadd.f32 %v775_v12, %v220_v54  ;;  %v201_v49 = vmul.f32 %v563_v55, %v713_v4  ;;  %500 = vmatprep.mubr.msk.f32.mxu0 %vm575_vm1, %v576_v41 }
 0x146   :  { %v234_v60 = vadd.f32 %v775_v12, %v214_v56  ;;  %v195_v61 = vmul.f32 %v565_v57, %v704_v59 }
 0x147   :  { %519 = vmatmul.mubr.msk.f32.gmra.mrb[4].mxu1 %vm33_vm0, %v240_v58  ;;  %v221_v62 = vmul.f32 %v769_v6, %v201_v49 }
 0x148   :  { %v567_v63 = vpop.eup %566  ;;  %521 = vmatprep.mubr.msk.f32.mxu1 %vm575_vm1, %v576_v41  ;;  %v215_v0 = vmul.f32 %v769_v6, %v195_v61  ;;  %501 = vmatmul.mubr.msk.f32.gmra.mrb[6].mxu0 %vm33_vm0, %v234_v60 }
 0x149   :  { %v569_v1 = vpop.eup %568  ;;  %v241_v4 = vadd.f32 %v775_v12, %v221_v62  ;;  %v202_v2 = vmul.f32 %v567_v63, %v725_v14  ;;  %503 = vmatprep.mubr.msk.f32.mxu0 %vm575_vm1, %v576_v41 }
 0x14a   :  { %v235_v59 = vadd.f32 %v775_v12, %v215_v0  ;;  %v196_v3 = vmul.f32 %v569_v1, %v716_v5 }
 0x14b   :  { %522 = vmatmul.mubr.msk.f32.gmra.mrb[6].mxu1 %vm33_vm0, %v241_v4  ;;  %v222_v7 = vmul.f32 %v769_v6, %v202_v2 }
 0x14c   :  { %v571_v8 = vpop.eup %570  ;;  %524 = vmatprep.mubr.msk.f32.mxu1 %vm575_vm1, %v576_v41  ;;  %v216_v9 = vmul.f32 %v769_v6, %v196_v3  ;;  %504 = vmatmul.mubr.msk.f32.gmra.mrb[8].mxu0 %vm33_vm0, %v235_v59 }
 0x14d   :  { %v573_v10 = vpop.eup %572  ;;  %v242_v14 = vadd.f32 %v775_v12, %v222_v7  ;;  %v203_v11 = vmul.f32 %v571_v8, %v737_v20  ;;  %506 = vmatprep.mubr.msk.f32.mxu0 %vm575_vm1, %v576_v41 }
 0x14e   :  { %v236_v5 = vadd.f32 %v775_v12, %v216_v9  ;;  %v197_v13 = vmul.f32 %v573_v10, %v728_v15  ;;  %v446_v15 = vld [vmem:[%s909_s4] ss:$0 sm:$0xff] }
 0x14f   :  { %525 = vmatmul.mubr.msk.f32.gmra.mrb[8].mxu1 %vm33_vm0, %v242_v14  ;;  %v223_v16 = vmul.f32 %v769_v6, %v203_v11 }
 0x150   :  { %527 = vmatprep.mubr.msk.f32.mxu1 %vm575_vm1, %v576_v41  ;;  %v217_v17 = vmul.f32 %v769_v6, %v197_v13  ;;  %507 = vmatmul.mubr.msk.f32.gmra.mrb[10].mxu0 %vm33_vm0, %v236_v5 }
 0x151   :  { %v243_v20 = vadd.f32 %v775_v12, %v223_v16  ;;  %509 = vmatprep.mubr.msk.f32.mxu0 %vm575_vm1, %v576_v41 }
 0x152   :  { %v237_v18 = vadd.f32 %v775_v12, %v217_v17 }
 0x153   :  { %528 = vmatmul.mubr.msk.f32.gmra.mrb[10].mxu1 %vm33_vm0, %v243_v20 }
 0x154   :  { %510 = vmatmul.mubr.msk.f32.gmra.mrb[12].mxu0 %vm33_vm0, %v237_v18 }
 0x20e   :  { %v362_v19 = vpop.f32.mrb[0].mxu0 }
 0x20f   :  { %v363_v6 = vadd.f32 %v446_v15, %v362_v19  ;;  %v493_v22 = vpop.f32.mrb[1].mxu0 }
 0x211   :  { %427 = vst.msk [vmem:[%s910_s5] sm:$0xff] %vm426_vm2, %v363_v6 }
 0x212   :  { %v397_v41 = vpop.f32.mrb[0].mxu1 }
 0x213   :  { %v367_v23 = vpop.f32.mrb[2].mxu0  ;;  %v398_v12 = vadd.f32 %v446_v15, %v397_v41  ;;  %v514_v21 = vpop.f32.mrb[1].mxu1 }
 0x214   :  { %v368_v30 = vadd.f32 %v446_v15, %v367_v23  ;;  %v496_v25 = vpop.f32.mrb[3].mxu0 }
 0x215   :  { %434 = vst.msk [vmem:[%s910_s5 + $0x38] sm:$0xff] %vm426_vm2, %v398_v12 }
 0x216   :  { %428 = vst.msk [vmem:[%s910_s5 + $0x8] sm:$0xff] %vm426_vm2, %v368_v30  ;;  %v402_v26 = vpop.f32.mrb[2].mxu1 }
 0x217   :  { %v403_v27 = vadd.f32 %v446_v15, %v402_v26  ;;  %v517_v28 = vpop.f32.mrb[3].mxu1  ;;  %v372_v24 = vpop.f32.mrb[4].mxu0 }
 0x218   :  { %v373_v29 = vadd.f32 %v446_v15, %v372_v24  ;;  %v499_v32 = vpop.f32.mrb[5].mxu0 }
 0x219   :  { %435 = vst.msk [vmem:[%s910_s5 + $0x40] sm:$0xff] %vm426_vm2, %v403_v27 }
 0x21a   :  { %v407_v33 = vpop.f32.mrb[4].mxu1  ;;  %429 = vst.msk [vmem:[%s910_s5 + $0x10] sm:$0xff] %vm426_vm2, %v373_v29 }
 0x21b   :  { %v408_v34 = vadd.f32 %v446_v15, %v407_v33  ;;  %v520_v31 = vpop.f32.mrb[5].mxu1  ;;  %v377_v35 = vpop.f32.mrb[6].mxu0 }
 0x21c   :  { %v378_v36 = vadd.f32 %v446_v15, %v377_v35  ;;  %v502_v38 = vpop.f32.mrb[7].mxu0 }
 0x21d   :  { %436 = vst.msk [vmem:[%s910_s5 + $0x48] sm:$0xff] %vm426_vm2, %v408_v34 }
 0x21e   :  { %v412_v37 = vpop.f32.mrb[6].mxu1  ;;  %430 = vst.msk [vmem:[%s910_s5 + $0x18] sm:$0xff] %vm426_vm2, %v378_v36 }
 0x21f   :  { %v413_v40 = vadd.f32 %v446_v15, %v412_v37  ;;  %v523_v42 = vpop.f32.mrb[7].mxu1  ;;  %v382_v43 = vpop.f32.mrb[8].mxu0 }
 0x220   :  { %v383_v44 = vadd.f32 %v446_v15, %v382_v43  ;;  %v505_v45 = vpop.f32.mrb[9].mxu0 }
 0x221   :  { %437 = vst.msk [vmem:[%s910_s5 + $0x50] sm:$0xff] %vm426_vm2, %v413_v40 }
 0x222   :  { %v417_v46 = vpop.f32.mrb[8].mxu1  ;;  %431 = vst.msk [vmem:[%s910_s5 + $0x20] sm:$0xff] %vm426_vm2, %v383_v44 }
 0x223   :  { %v418_v47 = vadd.f32 %v446_v15, %v417_v46  ;;  %v526_v48 = vpop.f32.mrb[9].mxu1  ;;  %v387_v50 = vpop.f32.mrb[10].mxu0 }
 0x224   :  { %v388_v51 = vadd.f32 %v446_v15, %v387_v50  ;;  %v508_v39 = vpop.f32.mrb[11].mxu0 }
 0x225   :  { %438 = vst.msk [vmem:[%s910_s5 + $0x58] sm:$0xff] %vm426_vm2, %v418_v47 }
 0x226   :  { %v422_v52 = vpop.f32.mrb[10].mxu1  ;;  %432 = vst.msk [vmem:[%s910_s5 + $0x28] sm:$0xff] %vm426_vm2, %v388_v51 }
 0x227   :  { %v423_v53 = vadd.f32 %v446_v15, %v422_v52  ;;  %v529_v54 = vpop.f32.mrb[11].mxu1  ;;  %v392_v55 = vpop.f32.mrb[12].mxu0 }
 0x228   :  { %v393_v56 = vadd.f32 %v446_v15, %v392_v55  ;;  %v511_v57 = vpop.f32.mrb[13].mxu0 }
 0x229   :  { %439 = vst.msk [vmem:[%s910_s5 + $0x60] sm:$0xff] %vm426_vm2, %v423_v53 }
 0x22a   :  { %433 = vst.msk [vmem:[%s910_s5 + $0x30] sm:$0xff] %vm426_vm2, %v393_v56 }

// kernel: spex_plus_forward.14
= control target key start
LH: loop header
LB: loop body
LE: loop exit
PB: predicated region body
PF: predicated region fallthrough
CT: control target
= control target key end

     0   :  { %s805_s27 = smov 0   ;;  %s871_s0 = inlined_call_operand.vmem [shape: f32[2,16,16], index: 0, kind: input, shape index: {}]   ;;  %s872_s1 = inlined_call_operand.vmem [shape: f32[16,32], index: 1, kind: input, shape index: {}]   ;;  %s873_s2 = inlined_call_operand.vmem [shape: f32[1,32], index: 2, kind: input, shape index: {}]   ;;  %s874_s3 = inlined_call_operand.vmem [shape: f32[1,32], index: 3, kind: input, shape index: {}]   ;;  %s875_s4 = inlined_call_operand.vmem [shape: f32[32,32], index: 4, kind: input, shape index: {}]   ;;  %s876_s5 = inlined_call_operand.vmem [shape: f32[1,32], index: 5, kind: input, shape index: {}]   ;;  %s877_s6 = inlined_call_operand.vmem [shape: f32[1,32], index: 6, kind: input, shape index: {}]   ;;  %s878_s7 = inlined_call_operand.vmem [shape: f32[16,32], index: 7, kind: input, shape index: {}]   ;;  %s879_s8 = inlined_call_operand.vmem [shape: f32[2,8,32], index: 8, kind: output, shape index: {}]  }
   0x1 LB: > { %s664_s28 = sadd.s32 4294967295, %s758_s27   ;;  %p668_p0 = scmp.ge.s32.totalorder %s758_s27, 1  ;;  %s758_s27 = sphi %s805_s27, %s18_s27  }
   0x2   : > { %p262_p1 = scmp.lt.s32.totalorder %s758_s27, 3 }
   0x4   : > { %p263_p2 = pnand %p668_p0, %p262_p1 }
   0x5   : > { %v306_v0 = vld [vmem:[%s872_s1] sm:$0xff] (!%p263_p2)  ;;  %v307_v1 = vld [vmem:[%s872_s1 + $0x8] sm:$0xff] (!%p263_p2)  ;;  %p295_p3 = scmp.lt.s32.totalorder (!%p263_p2), %s664_s28, 1  ;;  %vm315_vm0 = vcmask (!%p263_p2), 130048   ;;  %v412_v8 = vld [vmem:[%s875_s4 + $0x10] sm:$0xff] (!%p263_p2)  ;;  %vm421_vm3 = vcmask (!%p263_p2), 261120   ;;  %v604_v38 = vlaneseq (!%p263_p2) }
   0x6   : > { %266 = sbr.rel (%p263_p2) target bundleno = 471 (0x1d7), region = 52  ;;  %v724_v2 = vpack.c.bf16 (!%p263_p2), %v307_v1, %v306_v0  ;;  %v410_v5 = vld [vmem:[%s875_s4] sm:$0xff] (!%p263_p2)  ;;  %v411_v6 = vld [vmem:[%s875_s4 + $0x8] sm:$0xff] (!%p263_p2)  ;;  %v413_v9 = vld [vmem:[%s875_s4 + $0x18] sm:$0xff] (!%p263_p2) }
   0x7   : > { %v728_v7 = vpack.c.bf16 (!%p263_p2), %v411_v6, %v410_v5  ;;  %v732_v10 = vpack.c.bf16 (!%p263_p2), %v413_v9, %v412_v8  ;;  %v503_v11 = vld [vmem:[%s878_s7] sm:$0xff] (!%p263_p2)  ;;  %v504_v12 = vld [vmem:[%s878_s7 + $0x8] sm:$0xff] (!%p263_p2)  ;;  %v605_v39 = vshrl.u32 (!%p263_p2), %v604_v38, 7 }
   0x8   : > { %725 = vmatprep.subr.bf16.mxu0 (!%p263_p2), %v724_v2  ;;  %v736_v13 = vpack.c.bf16 (!%p263_p2), %v504_v12, %v503_v11  ;;  %v672_v14 = vld [vmem:[%s873_s2] ss:$0 sm:$0xff] (!%p263_p2) }
   0x9   : > { %727 = vmatpush3.bf16.msra.mxu0 (!%p263_p2), %v724_v2  ;;  %729 = vmatprep.subr.bf16.mxu1 (!%p263_p2), %v728_v7  ;;  %v675_v16 = vld [vmem:[%s874_s3] ss:$0 sm:$0xff] (!%p263_p2)  ;;  %vm606_vm6 = vcmp.lt.s32.totalorder (!%p263_p2), %v605_v39, 5 }
   0xa   : > { %731 = vmatpush3.bf16.msra.mxu1 (!%p263_p2), %v728_v7  ;;  %737 = vmatprep.subr.bf16.mxu0 (!%p263_p2), %v736_v13  ;;  %v676_v26 = vld [vmem:[%s876_s5] ss:$0 sm:$0xff] (!%p263_p2) }
   0xb   : > { %733 = vmatprep.subr.bf16.mxu1 (!%p263_p2), %v732_v10  ;;  %v681_v31 = vld [vmem:[%s877_s6] ss:$0 sm:$0xff] (!%p263_p2) }
   0xd   : > { %s881_s28 = smov (!%p295_p3, %s664_s28), 1 }
   0xe   : > { %s684_s11 = sshll.u32 %s881_s28, 4  ;;  %735 = vmatpush3.bf16.msra.mxu1 %v732_v10  ;;  %s671_s15 = sshll.u32 %s881_s28, 3 }
   0xf   : > { %s299_s14 = scalar_lea.vmem %s871_s0, %s684_s11  ;;  %s303_s18 = scalar_lea.vmem %s879_s8, %s671_s15 }
  0x10   : > { %v304_v3 = vld [vmem:[%s299_s14] sm:$0xff]  ;;  %v305_v4 = vld [vmem:[%s299_s14 + $0x8] sm:$0xff] }
  0x11   : > { %703 = vmatprep.mubr.msk.f32.mxu0 %vm315_vm0, %v304_v3 }
  0x12   : > { %704 = vmatmul.mubr.msk.f32.vlgmr.msra.gmra.mrb[0].mxu0 %vm315_vm0, %v305_v4 }
  0x13   : > { %721 = vmatprep.mubr.msk.f32.mxu0 %vm315_vm0, %v304_v3  ;;  %739 = vmatpush3.bf16.msra.mxu0 %v736_v13 }
  0x16   : > { %722 = vmatmul.mubr.msk.f32.vlgmr.msra.gmra.mrb[2].mxu0 %vm315_vm0, %v305_v4 }
  0xe5   : > { %v705_v15 = vpop.f32.mrb[0].mxu0 }
  0xe6   : > { %v394_v17 = vadd.f32 %v705_v15, %v672_v14  ;;  %v388_v18 = vpop.f32.mrb[1].mxu0 }
  0xe7   : > { %v389_v19 = vadd.f32 %v672_v14, %v388_v18 }
  0xe8   : > { %v407_v20 = vmul.f32 %v675_v16, %v394_v17  ;;  %vm398_vm1 = vcmp.ge.f32.partialorder %v394_v17, 0.0 }
  0xe9   : > { %vm397_vm2 = vcmp.ge.f32.partialorder %v389_v19, 0.0  ;;  %v406_v21 = vmul.f32 %v675_v16, %v389_v19  ;;  %v723_v24 = vpop.f32.mrb[2].mxu0 }
  0xea   : > { %v409_v23 = vsel %vm398_vm1, %v394_v17, %v407_v20  ;;  %v571_v25 = vpop.f32.mrb[3].mxu0 }
  0xeb   : > { %v408_v22 = vsel %vm397_vm2, %v389_v19, %v406_v21 }
  0xec   : > { %714 = vmatprep.mubr.msk.f32.mxu1 %vm421_vm3, %v408_v22 }
  0xed   : > { %715 = vmatmul.mubr.msk.f32.vlgmr.msra.gmra.mrb[0].mxu1 %vm421_vm3, %v409_v23 }
 0x1c0   : > { %v716_v27 = vpop.f32.mrb[0].mxu1 }
 0x1c1   : > { %v500_v28 = vadd.f32 %v716_v27, %v676_v26  ;;  %v494_v29 = vpop.f32.mrb[1].mxu1 }
 0x1c2   : > { %v495_v30 = vadd.f32 %v676_v26, %v494_v29 }
 0x1c3   : > { %v581_v32 = vadd.f32 %v723_v24, %v500_v28 }
 0x1c4   : > { %v580_v33 = vadd.f32 %v571_v25, %v495_v30 }
 0x1c5   : > { %vm583_vm4 = vcmp.ge.f32.partialorder %v581_v32, 0.0  ;;  %v592_v34 = vmul.f32 %v681_v31, %v581_v32 }
 0x1c6   : > { %vm582_vm5 = vcmp.ge.f32.partialorder %v580_v33, 0.0  ;;  %v591_v35 = vmul.f32 %v681_v31, %v580_v33 }
 0x1c7   : > { %v594_v36 = vsel %vm583_vm4, %v581_v32, %v592_v34 }
 0x1c8   : > { %596 = vst.msk [vmem:[#allocation2 + $0x8] sm:$0xff] %vm421_vm3, %v594_v36  ;;  %v593_v37 = vsel %vm582_vm5, %v580_v33, %v591_v35 }
 0x1c9   : > { %595 = vst.msk [vmem:[#allocation2] sm:$0xff] %vm421_vm3, %v593_v37 }
 0x1d0   : > { %v597_v40 = vld [vmem:[#allocation2] ss:$3 sm:$0xff]  ;;  %v599_v41 = vld [vmem:[#allocation2 + $0x1] ss:$3 sm:$0xff]  ;;  %v602_v43 = vld [vmem:[#allocation2 + $0x2] ss:$3 sm:$0xff] }
 0x1d1   : > { %v600_v42 = vmax.f32 %v597_v40, %v599_v41 }
 0x1d3   : > { %v603_v44 = vmax.f32 %v600_v42, %v602_v43 }
 0x1d5   : > { %v609_v45 = vsel %vm606_vm6, %v603_v44, 0.0 }
 0x1d6   : > { %610 = vst.msk [vmem:[%s303_s18] sm:$0xff] %vm421_vm3, %v609_v45 }
 0x1d7 PF: > { %s18_s27 = sadd.s32 1, %s758_s27  }
 0x1d8   : > { %p15_p4 = scmp.ge.s32.totalorder %s18_s27, 4  }
 0x1da   :  { %17 = sbr.rel (!%p15_p4) target bundleno = 1 (0x1), region = 84 }

// kernel: spex_plus_forward.13
= control target key start
LH: loop header
LB: loop body
LE: loop exit
PB: predicated region body
PF: predicated region fallthrough
CT: control target
= control target key end

     0   :  { %s866_s24 = smov 0   ;;  %s985_s0 = inlined_call_operand.vmem [shape: f32[2,56,16], index: 0, kind: input, shape index: {}]   ;;  %s986_s1 = inlined_call_operand.vmem [shape: f32[16,16], index: 1, kind: input, shape index: {}]   ;;  %s987_s2 = inlined_call_operand.vmem [shape: f32[1,16], index: 2, kind: input, shape index: {}]   ;;  %s988_s3 = inlined_call_operand.vmem [shape: f32[1,16], index: 3, kind: input, shape index: {}]   ;;  %s989_s4 = inlined_call_operand.vmem [shape: f32[16,16], index: 4, kind: input, shape index: {}]   ;;  %s990_s5 = inlined_call_operand.vmem [shape: f32[1,16], index: 5, kind: input, shape index: {}]   ;;  %s991_s6 = inlined_call_operand.vmem [shape: f32[1,16], index: 6, kind: input, shape index: {}]   ;;  %s992_s7 = inlined_call_operand.vmem [shape: f32[2,16,16], index: 7, kind: output, shape index: {}]  }
   0x1 LB: > { %s700_s25 = sadd.s32 4294967295, %s821_s24   ;;  %p704_p0 = scmp.ge.s32.totalorder %s821_s24, 1  ;;  %s821_s24 = sphi %s866_s24, %s17_s24  }
   0x2   : > { %p237_p1 = scmp.lt.s32.totalorder %s821_s24, 3 }
   0x4   : > { %p238_p2 = pnand %p704_p0, %p237_p1 }
   0x5   : > { %v286_v0 = vld [vmem:[%s986_s1] sm:$0xff] (!%p238_p2)  ;;  %v287_v1 = vld [vmem:[%s986_s1 + $0x8] sm:$0xff] (!%p238_p2)  ;;  %p269_p3 = scmp.lt.s32.totalorder (!%p238_p2), %s700_s25, 1  ;;  %v823_v2 = vmov (!%p238_p2), 0.0|0.0   ;;  %vm824_vm0 = vmmov (!%p238_p2), 0   ;;  %v825_v4 = vmov (!%p238_p2), 0.0  }
   0x6   : > { %241 = sbr.rel (%p238_p2) target bundleno = 487 (0x1e7), region = 48  ;;  %797 = vmatprep.subr.bf16.mxu0 (!%p238_p2), %v823_v2  ;;  %v798_v3 = vpack.c.bf16 (!%p238_p2), %v287_v1, %v286_v0  ;;  %751 = vmatprep.mubr.msk.f32.mxu0 (!%p238_p2), %vm824_vm0, %v825_v4  ;;  %vm295_vm1 = vcmask (!%p238_p2), 130048   ;;  %v445_v12 = vld [vmem:[%s989_s4] sm:$0xff] (!%p238_p2)  ;;  %v446_v13 = vld [vmem:[%s989_s4 + $0x8] sm:$0xff] (!%p238_p2) }
   0x7   : > { %800 = vmatprep.subr.bf16.mxu1 (!%p238_p2), %v823_v2  ;;  %776 = vmatprep.mubr.msk.f32.mxu1 (!%p238_p2), %vm824_vm0, %v825_v4  ;;  %v801_v14 = vpack.c.bf16 (!%p238_p2), %v446_v13, %v445_v12  ;;  %v708_v15 = vld [vmem:[%s987_s2] ss:$0 sm:$0xff] (!%p238_p2) }
   0x8   : > { %799 = vmatpush3.bf16.msra.mxu0 (!%p238_p2), %v798_v3  ;;  %v716_v17 = vld [vmem:[%s988_s3] ss:$0 sm:$0xff] (!%p238_p2) }
   0x9   : > { %802 = vmatpush3.bf16.msra.mxu1 (!%p238_p2), %v801_v14  ;;  %v717_v52 = vld [vmem:[%s990_s5] ss:$0 sm:$0xff] (!%p238_p2) }
   0xa   : > { %v725_v56 = vld [vmem:[%s991_s6] ss:$0 sm:$0xff] (!%p238_p2) }
   0xd   : > { %s994_s25 = smov (!%p269_p3, %s700_s25), 1 }
   0xe   : > { %s803_s30 = smul.u32 56, %s994_s25  ;;  %s728_s23 = sshll.u32 %s994_s25, 4 }
   0xf   : > { %s278_s28 = scalar_lea.vmem %s992_s7, %s728_s23 }
  0x10   : > { %s273_s10 = scalar_lea.vmem %s985_s0, %s803_s30 }
  0x11   : > { %v890_v5 = vld [vmem:[%s273_s10] sm:$0xff]  ;;  %v896_v6 = vld [vmem:[%s273_s10 + $0x8] sm:$0xff]  ;;  %v902_v7 = vld [vmem:[%s273_s10 + $0x10] sm:$0xff] }
  0x12   : > { %752 = vmatmul.mubr.msk.f32.vlgmr.msra.gmra.mrb[0].mxu0 %vm295_vm1, %v890_v5  ;;  %v908_v8 = vld [vmem:[%s273_s10 + $0x18] sm:$0xff]  ;;  %v914_v9 = vld [vmem:[%s273_s10 + $0x20] sm:$0xff]  ;;  %v920_v10 = vld [vmem:[%s273_s10 + $0x28] sm:$0xff] }
  0x13   : > { %754 = vmatprep.mubr.msk.f32.mxu0 %vm824_vm0, %v825_v4  ;;  %v285_v11 = vld [vmem:[%s273_s10 + $0x30] sm:$0xff] }
  0x16   : > { %755 = vmatmul.mubr.msk.f32.gmra.mrb[2].mxu0 %vm295_vm1, %v896_v6 }
  0x17   : > { %757 = vmatprep.mubr.msk.f32.mxu0 %vm824_vm0, %v825_v4 }
  0x1a   : > { %758 = vmatmul.mubr.msk.f32.gmra.mrb[4].mxu0 %vm295_vm1, %v902_v7 }
  0x1b   : > { %760 = vmatprep.mubr.msk.f32.mxu0 %vm824_vm0, %v825_v4 }
  0x1e   : > { %761 = vmatmul.mubr.msk.f32.gmra.mrb[6].mxu0 %vm295_vm1, %v908_v8 }
  0x1f   : > { %763 = vmatprep.mubr.msk.f32.mxu0 %vm824_vm0, %v825_v4 }
  0x22   : > { %764 = vmatmul.mubr.msk.f32.gmra.mrb[8].mxu0 %vm295_vm1, %v914_v9 }
  0x23   : > { %766 = vmatprep.mubr.msk.f32.mxu0 %vm824_vm0, %v825_v4 }
  0x26   : > { %767 = vmatmul.mubr.msk.f32.gmra.mrb[10].mxu0 %vm295_vm1, %v920_v10 }
  0x27   : > { %769 = vmatprep.mubr.msk.f32.mxu0 %vm824_vm0, %v825_v4 }
  0x2a   : > { %770 = vmatmul.mubr.msk.f32.gmra.mrb[12].mxu0 %vm295_vm1, %v285_v11 }
  0xe5   : > { %v383_v16 = vpop.f32.mrb[0].mxu0 }
  0xe6   : > { %v384_v18 = vadd.f32 %v708_v15, %v383_v16  ;;  %v753_v19 = vpop.f32.mrb[1].mxu0 }
  0xe8   : > { %vm417_vm2 = vcmp.ge.f32.partialorder %v384_v18, 0.0  ;;  %v431_v20 = vmul.f32 %v716_v17, %v384_v18 }
  0xe9   : > { %v388_v21 = vpop.f32.mrb[2].mxu0 }
  0xea   : > { %v389_v22 = vadd.f32 %v708_v15, %v388_v21  ;;  %v756_v23 = vpop.f32.mrb[3].mxu0  ;;  %v438_v24 = vsel %vm417_vm2, %v384_v18, %v431_v20 }
  0xeb   : > { %777 = vmatmul.mubr.msk.f32.vlgmr.msra.gmra.mrb[0].mxu1 %vm295_vm1, %v438_v24 }
  0xec   : > { %vm418_vm3 = vcmp.ge.f32.partialorder %v389_v22, 0.0  ;;  %v432_v25 = vmul.f32 %v716_v17, %v389_v22  ;;  %779 = vmatprep.mubr.msk.f32.mxu1 %vm824_vm0, %v825_v4 }
  0xed   : > { %v393_v26 = vpop.f32.mrb[4].mxu0 }
  0xee   : > { %v394_v27 = vadd.f32 %v708_v15, %v393_v26  ;;  %v759_v28 = vpop.f32.mrb[5].mxu0  ;;  %v439_v29 = vsel %vm418_vm3, %v389_v22, %v432_v25 }
  0xef   : > { %780 = vmatmul.mubr.msk.f32.gmra.mrb[2].mxu1 %vm295_vm1, %v439_v29 }
  0xf0   : > { %vm419_vm4 = vcmp.ge.f32.partialorder %v394_v27, 0.0  ;;  %v433_v30 = vmul.f32 %v716_v17, %v394_v27  ;;  %782 = vmatprep.mubr.msk.f32.mxu1 %vm824_vm0, %v825_v4 }
  0xf1   : > { %v398_v31 = vpop.f32.mrb[6].mxu0 }
  0xf2   : > { %v399_v32 = vadd.f32 %v708_v15, %v398_v31  ;;  %v762_v33 = vpop.f32.mrb[7].mxu0  ;;  %v440_v34 = vsel %vm419_vm4, %v394_v27, %v433_v30 }
  0xf3   : > { %783 = vmatmul.mubr.msk.f32.gmra.mrb[4].mxu1 %vm295_vm1, %v440_v34 }
  0xf4   : > { %vm420_vm5 = vcmp.ge.f32.partialorder %v399_v32, 0.0  ;;  %v434_v35 = vmul.f32 %v716_v17, %v399_v32  ;;  %785 = vmatprep.mubr.msk.f32.mxu1 %vm824_vm0, %v825_v4 }
  0xf5   : > { %v403_v36 = vpop.f32.mrb[8].mxu0 }
  0xf6   : > { %v404_v37 = vadd.f32 %v708_v15, %v403_v36  ;;  %v765_v38 = vpop.f32.mrb[9].mxu0  ;;  %v441_v39 = vsel %vm420_vm5, %v399_v32, %v434_v35 }
  0xf7   : > { %786 = vmatmul.mubr.msk.f32.gmra.mrb[6].mxu1 %vm295_vm1, %v441_v39 }
  0xf8   : > { %vm421_vm6 = vcmp.ge.f32.partialorder %v404_v37, 0.0  ;;  %v435_v40 = vmul.f32 %v716_v17, %v404_v37  ;;  %788 = vmatprep.mubr.msk.f32.mxu1 %vm824_vm0, %v825_v4 }
  0xf9   : > { %v408_v41 = vpop.f32.mrb[10].mxu0 }
  0xfa   : > { %v409_v42 = vadd.f32 %v708_v15, %v408_v41  ;;  %v768_v43 = vpop.f32.mrb[11].mxu0  ;;  %v442_v44 = vsel %vm421_vm6, %v404_v37, %v435_v40 }
  0xfb   : > { %789 = vmatmul.mubr.msk.f32.gmra.mrb[8].mxu1 %vm295_vm1, %v442_v44 }
  0xfc   : > { %vm422_vm7 = vcmp.ge.f32.partialorder %v409_v42, 0.0  ;;  %v436_v45 = vmul.f32 %v716_v17, %v409_v42  ;;  %791 = vmatprep.mubr.msk.f32.mxu1 %vm824_vm0, %v825_v4 }
  0xfd   : > { %v413_v46 = vpop.f32.mrb[12].mxu0 }
  0xfe   : > { %v443_v47 = vsel %vm422_vm7, %v409_v42, %v436_v45  ;;  %v414_v48 = vadd.f32 %v708_v15, %v413_v46  ;;  %v771_v49 = vpop.f32.mrb[13].mxu0 }
  0xff   : > { %792 = vmatmul.mubr.msk.f32.gmra.mrb[10].mxu1 %vm295_vm1, %v443_v47 }
 0x100   : > { %vm423_vm8 = vcmp.ge.f32.partialorder %v414_v48, 0.0  ;;  %v437_v50 = vmul.f32 %v716_v17, %v414_v48  ;;  %794 = vmatprep.mubr.msk.f32.mxu1 %vm824_vm0, %v825_v4 }
 0x102   : > { %v444_v51 = vsel %vm423_vm8, %v414_v48, %v437_v50 }
 0x103   : > { %795 = vmatmul.mubr.msk.f32.gmra.mrb[12].mxu1 %vm295_vm1, %v444_v51 }
 0x1be   : > { %v541_v53 = vpop.f32.mrb[0].mxu1 }
 0x1bf   : > { %v542_v54 = vadd.f32 %v717_v52, %v541_v53  ;;  %v778_v55 = vpop.f32.mrb[1].mxu1 }
 0x1c1   : > { %v575_v57 = vadd.f32 %v542_v54, %v890_v5 }
 0x1c2   : > { %v546_v58 = vpop.f32.mrb[2].mxu1 }
 0x1c3   : > { %vm582_vm9 = vcmp.ge.f32.partialorder %v575_v57, 0.0  ;;  %v596_v59 = vmul.f32 %v725_v56, %v575_v57  ;;  %v547_v60 = vadd.f32 %v717_v52, %v546_v58  ;;  %v781_v61 = vpop.f32.mrb[3].mxu1 }
 0x1c5   : > { %v603_v62 = vsel %vm582_vm9, %v575_v57, %v596_v59  ;;  %v576_v63 = vadd.f32 %v547_v60, %v896_v6 }
 0x1c6   : > { %610 = vst.msk [vmem:[#allocation2] sm:$0xff] %vm295_vm1, %v603_v62  ;;  %v551_v0 = vpop.f32.mrb[4].mxu1 }
 0x1c7   : > { %vm583_vm10 = vcmp.ge.f32.partialorder %v576_v63, 0.0  ;;  %v597_v1 = vmul.f32 %v725_v56, %v576_v63  ;;  %v552_v2 = vadd.f32 %v717_v52, %v551_v0  ;;  %v784_v3 = vpop.f32.mrb[5].mxu1 }
 0x1c9   : > { %v604_v4 = vsel %vm583_vm10, %v576_v63, %v597_v1  ;;  %v577_v11 = vadd.f32 %v552_v2, %v902_v7 }
 0x1ca   : > { %611 = vst.msk [vmem:[#allocation2 + $0x8] sm:$0xff] %vm295_vm1, %v604_v4  ;;  %v556_v5 = vpop.f32.mrb[6].mxu1 }
 0x1cb   : > { %vm584_vm11 = vcmp.ge.f32.partialorder %v577_v11, 0.0  ;;  %v598_v12 = vmul.f32 %v725_v56, %v577_v11  ;;  %v557_v13 = vadd.f32 %v717_v52, %v556_v5  ;;  %v787_v14 = vpop.f32.mrb[7].mxu1 }
 0x1cd   : > { %v605_v15 = vsel %vm584_vm11, %v577_v11, %v598_v12  ;;  %v578_v6 = vadd.f32 %v557_v13, %v908_v8 }
 0x1ce   : > { %612 = vst.msk [vmem:[#allocation2 + $0x10] sm:$0xff] %vm295_vm1, %v605_v15  ;;  %v561_v16 = vpop.f32.mrb[8].mxu1 }
 0x1cf   : > { %vm585_vm12 = vcmp.ge.f32.partialorder %v578_v6, 0.0  ;;  %v599_v17 = vmul.f32 %v725_v56, %v578_v6  ;;  %v562_v18 = vadd.f32 %v717_v52, %v561_v16  ;;  %v790_v19 = vpop.f32.mrb[9].mxu1 }
 0x1d1   : > { %v606_v20 = vsel %vm585_vm12, %v578_v6, %v599_v17  ;;  %v579_v7 = vadd.f32 %v562_v18, %v914_v9 }
 0x1d2   : > { %613 = vst.msk [vmem:[#allocation2 + $0x18] sm:$0xff] %vm295_vm1, %v606_v20  ;;  %v566_v21 = vpop.f32.mrb[10].mxu1 }
 0x1d3   : > { %vm586_vm13 = vcmp.ge.f32.partialorder %v579_v7, 0.0  ;;  %v600_v22 = vmul.f32 %v725_v56, %v579_v7  ;;  %v567_v23 = vadd.f32 %v717_v52, %v566_v21  ;;  %v793_v24 = vpop.f32.mrb[11].mxu1 }
 0x1d5   : > { %v617_v25 = vld [vmem:[#allocation2] ss:$3 sm:$0xff]  ;;  %v621_v8 = vld [vmem:[#allocation2 + $0x1] ss:$3 sm:$0xff]  ;;  %v607_v26 = vsel %vm586_vm13, %v579_v7, %v600_v22  ;;  %v580_v27 = vadd.f32 %v567_v23, %v920_v10  ;;  %v627_v9 = vld [vmem:[#allocation2 + $0x2] ss:$3 sm:$0xff] }
 0x1d6   : > { %v624_v28 = vmax.f32 %v617_v25, %v621_v8  ;;  %614 = vst.msk [vmem:[#allocation2 + $0x20] sm:$0xff] %vm295_vm1, %v607_v26  ;;  %v571_v29 = vpop.f32.mrb[12].mxu1 }
 0x1d7   : > { %vm587_vm14 = vcmp.ge.f32.partialorder %v580_v27, 0.0  ;;  %v601_v30 = vmul.f32 %v725_v56, %v580_v27  ;;  %v796_v31 = vpop.f32.mrb[13].mxu1 }
 0x1d8   : > { %v630_v32 = vmax.f32 %v624_v28, %v627_v9 }
 0x1d9   : > { %v608_v33 = vsel %vm587_vm14, %v580_v27, %v601_v30 }
 0x1da   : > { %643 = vst.msk [vmem:[%s278_s28] sm:$0xff] %vm295_vm1, %v630_v32  ;;  %615 = vst.msk [vmem:[#allocation2 + $0x28] sm:$0xff] %vm295_vm1, %v608_v33 }
 0x1e1   : > { %v619_v34 = vld [vmem:[#allocation2 + $0x18] ss:$3 sm:$0xff]  ;;  %v623_v10 = vld [vmem:[#allocation2 + $0x19] ss:$3 sm:$0xff]  ;;  %v629_v36 = vld [vmem:[#allocation2 + $0x1a] ss:$3 sm:$0xff] }
 0x1e2   : > { %v625_v35 = vmax.f32 %v619_v34, %v623_v10 }
 0x1e4   : > { %v631_v37 = vmax.f32 %v625_v35, %v629_v36 }
 0x1e6   : > { %644 = vst.msk [vmem:[%s278_s28 + $0x8] sm:$0xff] %vm295_vm1, %v631_v37 }
 0x1e7 PF: > { %s17_s24 = sadd.s32 1, %s821_s24  }
 0x1e8   : > { %p14_p4 = scmp.ge.s32.totalorder %s17_s24, 4  }
 0x1ea   :  { %16 = sbr.rel (!%p14_p4) target bundleno = 1 (0x1), region = 83 }

// kernel: spex_plus_forward.15
= control target key start
LH: loop header
LB: loop body
LE: loop exit
PB: predicated region body
PF: predicated region fallthrough
CT: control target
= control target key end

     0   :  { %s654_s24 = smov 0   ;;  %s718_s0 = inlined_call_operand.vmem [shape: f32[2,8,32], index: 0, kind: input, shape index: {}]   ;;  %s719_s1 = inlined_call_operand.vmem [shape: f32[32,32], index: 1, kind: input, shape index: {}]   ;;  %s720_s2 = inlined_call_operand.vmem [shape: f32[1,32], index: 2, kind: input, shape index: {}]   ;;  %s721_s3 = inlined_call_operand.vmem [shape: f32[1,32], index: 3, kind: input, shape index: {}]   ;;  %s722_s4 = inlined_call_operand.vmem [shape: f32[32,32], index: 4, kind: input, shape index: {}]   ;;  %s723_s5 = inlined_call_operand.vmem [shape: f32[1,32], index: 5, kind: input, shape index: {}]   ;;  %s724_s6 = inlined_call_operand.vmem [shape: f32[1,32], index: 6, kind: input, shape index: {}]   ;;  %s725_s7 = inlined_call_operand.vmem [shape: f32[2,8,32], index: 7, kind: output, shape index: {}]  }
   0x1 LB: > { %s533_s25 = sadd.s32 4294967295, %s609_s24   ;;  %p537_p0 = scmp.ge.s32.totalorder %s609_s24, 1  ;;  %s609_s24 = sphi %s654_s24, %s17_s24  }
   0x2   : > { %p236_p1 = scmp.lt.s32.totalorder %s609_s24, 3 }
   0x4   : > { %p237_p2 = pnand %p537_p0, %p236_p1 }
   0x5   : > { %v275_v0 = vld [vmem:[%s719_s1] sm:$0xff] (!%p237_p2)  ;;  %v276_v1 = vld [vmem:[%s719_s1 + $0x8] sm:$0xff] (!%p237_p2)  ;;  %v277_v2 = vld [vmem:[%s719_s1 + $0x10] sm:$0xff] (!%p237_p2)  ;;  %v611_v3 = vmov (!%p237_p2), 0.0|0.0   ;;  %vm612_vm0 = vmmov (!%p237_p2), 0   ;;  %v613_v6 = vmov (!%p237_p2), 0.0   ;;  %v473_v30 = vlaneseq (!%p237_p2) }
   0x6   : > { %240 = sbr.rel (%p237_p2) target bundleno = 467 (0x1d3), region = 48  ;;  %580 = vmatprep.subr.bf16.mxu0 (!%p237_p2), %v611_v3  ;;  %v581_v4 = vpack.c.bf16 (!%p237_p2), %v276_v1, %v275_v0  ;;  %v278_v5 = vld [vmem:[%s719_s1 + $0x18] sm:$0xff] (!%p237_p2)  ;;  %566 = vmatprep.mubr.msk.f32.mxu0 (!%p237_p2), %vm612_vm0, %v613_v6  ;;  %p266_p3 = scmp.lt.s32.totalorder (!%p237_p2), %s533_s25, 1  ;;  %v370_v7 = vld [vmem:[%s722_s4] sm:$0xff] (!%p237_p2)  ;;  %v371_v8 = vld [vmem:[%s722_s4 + $0x8] sm:$0xff] (!%p237_p2)  ;;  %vm286_vm1 = vcmask (!%p237_p2), 261120  }
   0x7   : > { %586 = vmatprep.subr.bf16.mxu1 (!%p237_p2), %v611_v3  ;;  %v587_v9 = vpack.c.bf16 (!%p237_p2), %v371_v8, %v370_v7  ;;  %577 = vmatprep.mubr.msk.f32.mxu1 (!%p237_p2), %vm612_vm0, %v613_v6  ;;  %v584_v10 = vpack.c.bf16 (!%p237_p2), %v278_v5, %v277_v2  ;;  %v372_v12 = vld [vmem:[%s722_s4 + $0x10] sm:$0xff] (!%p237_p2)  ;;  %v373_v13 = vld [vmem:[%s722_s4 + $0x18] sm:$0xff] (!%p237_p2)  ;;  %v540_v15 = vld [vmem:[%s720_s2] ss:$0 sm:$0xff] (!%p237_p2)  ;;  %v474_v31 = vshrl.u32 (!%p237_p2), %v473_v30, 7 }
   0x8   : > { %582 = vmatpush3.bf16.msra.mxu0 (!%p237_p2), %v581_v4  ;;  %v590_v14 = vpack.c.bf16 (!%p237_p2), %v373_v13, %v372_v12  ;;  %v542_v17 = vld [vmem:[%s721_s3] ss:$0 sm:$0xff] (!%p237_p2) }
   0x9   : > { %583 = vmatprep.subr.bf16.mxu0 (!%p237_p2), %v611_v3  ;;  %588 = vmatpush3.bf16.msra.mxu1 (!%p237_p2), %v587_v9  ;;  %v543_v22 = vld [vmem:[%s723_s5] ss:$0 sm:$0xff] (!%p237_p2)  ;;  %vm475_vm4 = vcmp.lt.s32.totalorder (!%p237_p2), %v474_v31, 1 }
   0xa   : > { %589 = vmatprep.subr.bf16.mxu1 (!%p237_p2), %v611_v3  ;;  %v545_v26 = vld [vmem:[%s724_s6] ss:$0 sm:$0xff] (!%p237_p2) }
   0xc   : > { %585 = vmatpush3.bf16.msra.mxu0 (!%p237_p2), %v584_v10 }
   0xd   : > { %s727_s25 = smov (!%p266_p3, %s533_s25), 1  ;;  %591 = vmatpush3.bf16.msra.mxu1 %v590_v14 }
   0xe   : > { %s538_s15 = sshll.u32 %s727_s25, 3 }
   0xf   : > { %s269_s18 = scalar_lea.vmem %s718_s0, %s538_s15  ;;  %s273_s12 = scalar_lea.vmem %s725_s7, %s538_s15 }
  0x10   : > { %v274_v11 = vld [vmem:[%s269_s18] sm:$0xff] }
  0x11   : > { %567 = vmatmul.mubr.msk.f32.vlgmr.msra.gmra.mrb[0].mxu0 %vm286_vm1, %v274_v11 }
  0xe4   : > { %v356_v16 = vpop.f32.mrb[0].mxu0 }
  0xe5   : > { %v357_v18 = vadd.f32 %v540_v15, %v356_v16  ;;  %v568_v19 = vpop.f32.mrb[1].mxu0 }
  0xe7   : > { %vm360_vm2 = vcmp.ge.f32.partialorder %v357_v18, 0.0  ;;  %v368_v20 = vmul.f32 %v542_v17, %v357_v18 }
  0xe9   : > { %v369_v21 = vsel %vm360_vm2, %v357_v18, %v368_v20 }
  0xea   : > { %578 = vmatmul.mubr.msk.f32.vlgmr.msra.gmra.mrb[0].mxu1 %vm286_vm1, %v369_v21 }
 0x1bd   : > { %v450_v23 = vpop.f32.mrb[0].mxu1 }
 0x1be   : > { %v451_v24 = vadd.f32 %v543_v22, %v450_v23  ;;  %v579_v25 = vpop.f32.mrb[1].mxu1 }
 0x1c0   : > { %v454_v27 = vadd.f32 %v451_v24, %v274_v11 }
 0x1c2   : > { %vm455_vm3 = vcmp.ge.f32.partialorder %v454_v27, 0.0  ;;  %v463_v28 = vmul.f32 %v545_v26, %v454_v27 }
 0x1c4   : > { %v464_v29 = vsel %vm455_vm3, %v454_v27, %v463_v28 }
 0x1c5   : > { %465 = vst.msk [vmem:[#allocation2] sm:$0xff] %vm286_vm1, %v464_v29 }
 0x1cc   : > { %v466_v32 = vld [vmem:[#allocation2] ss:$3 sm:$0xff]  ;;  %v468_v33 = vld [vmem:[#allocation2 + $0x1] ss:$3 sm:$0xff]  ;;  %v471_v35 = vld [vmem:[#allocation2 + $0x2] ss:$3 sm:$0xff] }
 0x1cd   : > { %v469_v34 = vmax.f32 %v466_v32, %v468_v33 }
 0x1cf   : > { %v472_v36 = vmax.f32 %v469_v34, %v471_v35 }
 0x1d1   : > { %v478_v37 = vsel %vm475_vm4, %v472_v36, 0.0 }
 0x1d2   : > { %479 = vst.msk [vmem:[%s273_s12] sm:$0xff] %vm286_vm1, %v478_v37 }
 0x1d3 PF: > { %s17_s24 = sadd.s32 1, %s609_s24  }
 0x1d4   : > { %p14_p4 = scmp.ge.s32.totalorder %s17_s24, 4  }
 0x1d6   :  { %16 = sbr.rel (!%p14_p4) target bundleno = 1 (0x1), region = 80 }

// kernel: spex_plus_forward.9
= control target key start
LH: loop header
LB: loop body
LE: loop exit
PB: predicated region body
PF: predicated region fallthrough
CT: control target
= control target key end

     0   :  { %vm33_vm0 = vcmask 261120   ;;  %vm171_vm1 = vcmask 392192   ;;  %s336_s1 = inlined_call_operand.vmem [shape: f32[32,48], index: 1, kind: input, shape index: {}]   ;;  %s337_s0 = inlined_call_operand.vmem [shape: f32[64,32], index: 0, kind: input, shape index: {}]   ;;  %s338_s2 = inlined_call_operand.vmem [shape: f32[1,48], index: 2, kind: input, shape index: {}]   ;;  %s339_s3 = inlined_call_operand.vmem [shape: f32[64,48], index: 3, kind: output, shape index: {}]  }
   0x1   :  { %v22_v0 = vld [vmem:[%s336_s1] sm:$0xff]  ;;  %v23_v1 = vld [vmem:[%s336_s1 + $0x8] sm:$0xff]  ;;  %v24_v2 = vld [vmem:[%s336_s1 + $0x10] sm:$0xff] }
   0x2   :  { %v225_v3 = vpack.c.bf16 %v23_v1, %v22_v0  ;;  %v25_v4 = vld [vmem:[%s336_s1 + $0x18] sm:$0xff]  ;;  %v14_v5 = vld [vmem:[%s337_s0] sm:$0xff]  ;;  %v15_v8 = vld [vmem:[%s337_s0 + $0x8] sm:$0xff] }
   0x3   :  { %v18_v6 = vld [vmem:[%s337_s0 + $0x20] sm:$0xff]  ;;  %v229_v7 = vpack.c.bf16 %v25_v4, %v24_v2  ;;  %213 = vmatprep.mubr.msk.f32.mxu0 %vm33_vm0, %v14_v5  ;;  %v19_v9 = vld [vmem:[%s337_s0 + $0x28] sm:$0xff]  ;;  %v16_v10 = vld [vmem:[%s337_s0 + $0x10] sm:$0xff] }
   0x4   :  { %219 = vmatprep.mubr.msk.f32.mxu1 %vm33_vm0, %v18_v6  ;;  %226 = vmatprep.subr.bf16.mxu0 %v225_v3  ;;  %v20_v11 = vld [vmem:[%s337_s0 + $0x30] sm:$0xff]  ;;  %v17_v12 = vld [vmem:[%s337_s0 + $0x18] sm:$0xff]  ;;  %v184_v14 = vld [vmem:[%s338_s2] ss:$0 sm:$0xff] }
   0x5   :  { %233 = vmatprep.subr.bf16.mxu1 %v225_v3  ;;  %228 = vmatpush3.bf16.msra.mxu0 %v225_v3  ;;  %v21_v13 = vld [vmem:[%s337_s0 + $0x38] sm:$0xff] }
   0x6   :  { %235 = vmatpush3.bf16.msra.mxu1 %v225_v3  ;;  %230 = vmatprep.subr.bf16.mxu0 %v229_v7 }
   0x7   :  { %234 = vmatprep.subr.bf16.mxu1 %v229_v7 }
   0x9   :  { %232 = vmatpush3.bf16.msra.mxu0 %v229_v7 }
   0xa   :  { %236 = vmatpush3.bf16.msra.mxu1 %v229_v7 }
   0xc   :  { %214 = vmatmul.mubr.msk.f32.vlgmr.msra.gmra.mrb[0].mxu0 %vm33_vm0, %v15_v8 }
   0xd   :  { %220 = vmatmul.mubr.msk.f32.vlgmr.msra.gmra.mrb[0].mxu1 %vm33_vm0, %v19_v9  ;;  %216 = vmatprep.mubr.msk.f32.mxu0 %vm33_vm0, %v16_v10 }
   0xe   :  { %222 = vmatprep.mubr.msk.f32.mxu1 %vm33_vm0, %v20_v11 }
  0x10   :  { %217 = vmatmul.mubr.msk.f32.gmra.mrb[2].mxu0 %vm33_vm0, %v17_v12 }
  0x11   :  { %223 = vmatmul.mubr.msk.f32.gmra.mrb[2].mxu1 %vm33_vm0, %v21_v13 }
  0xdf   :  { %v215_v15 = vpop.f32.mrb[0].mxu0 }
  0xe0   :  { %v221_v16 = vpop.f32.mrb[0].mxu1  ;;  %v130_v17 = vadd.f32 %v215_v15, %v184_v14  ;;  %v124_v19 = vpop.f32.mrb[1].mxu0 }
  0xe1   :  { %v150_v18 = vadd.f32 %v221_v16, %v184_v14  ;;  %v144_v20 = vpop.f32.mrb[1].mxu1  ;;  %v125_v21 = vadd.f32 %v184_v14, %v124_v19 }
  0xe2   :  { %v145_v22 = vadd.f32 %v184_v14, %v144_v20  ;;  %v164_v23 = vmax.f32 %v130_v17, 0.0 }
  0xe3   :  { %v168_v24 = vmax.f32 %v150_v18, 0.0  ;;  %v163_v25 = vmax.f32 %v125_v21, 0.0  ;;  %v218_v27 = vpop.f32.mrb[2].mxu0 }
  0xe4   :  { %v167_v26 = vmax.f32 %v145_v22, 0.0  ;;  %v224_v28 = vpop.f32.mrb[2].mxu1  ;;  %173 = vst.msk [vmem:[%s339_s3 + $0x8] sm:$0xff] %vm171_vm1, %v164_v23  ;;  %v140_v29 = vadd.f32 %v218_v27, %v184_v14  ;;  %v134_v31 = vpop.f32.mrb[3].mxu0 }
  0xe5   :  { %177 = vst.msk [vmem:[%s339_s3 + $0x28] sm:$0xff] %vm171_vm1, %v168_v24  ;;  %v160_v30 = vadd.f32 %v224_v28, %v184_v14  ;;  %v154_v32 = vpop.f32.mrb[3].mxu1  ;;  %172 = vst.msk [vmem:[%s339_s3] sm:$0xff] %vm171_vm1, %v163_v25  ;;  %v135_v33 = vadd.f32 %v184_v14, %v134_v31 }
  0xe6   :  { %176 = vst.msk [vmem:[%s339_s3 + $0x20] sm:$0xff] %vm171_vm1, %v167_v26  ;;  %v155_v34 = vadd.f32 %v184_v14, %v154_v32  ;;  %v166_v35 = vmax.f32 %v140_v29, 0.0 }
  0xe7   :  { %v170_v36 = vmax.f32 %v160_v30, 0.0  ;;  %v165_v37 = vmax.f32 %v135_v33, 0.0 }
  0xe8   :  { %v169_v38 = vmax.f32 %v155_v34, 0.0  ;;  %175 = vst.msk [vmem:[%s339_s3 + $0x18] sm:$0xff] %vm171_vm1, %v166_v35 }
  0xe9   :  { %179 = vst.msk [vmem:[%s339_s3 + $0x38] sm:$0xff] %vm171_vm1, %v170_v36  ;;  %174 = vst.msk [vmem:[%s339_s3 + $0x10] sm:$0xff] %vm171_vm1, %v165_v37 }
  0xea   :  { %178 = vst.msk [vmem:[%s339_s3 + $0x30] sm:$0xff] %vm171_vm1, %v169_v38 }

// kernel: spex_plus_forward.11
= control target key start
LH: loop header
LB: loop body
LE: loop exit
PB: predicated region body
PF: predicated region fallthrough
CT: control target
= control target key end

     0   :  { %vm28_vm0 = vcmask 392192   ;;  %vm306_vm1 = vcmask 130048   ;;  %s579_s0 = inlined_call_operand.vmem [shape: f32[64,48], index: 0, kind: input, shape index: {}]   ;;  %s580_s3 = inlined_call_operand.vmem [shape: f32[48,16], index: 3, kind: input, shape index: {}]   ;;  %s581_s1 = inlined_call_operand.vmem [shape: f32[1,48], index: 1, kind: input, shape index: {}]   ;;  %s582_s2 = inlined_call_operand.vmem [shape: f32[1,48], index: 2, kind: input, shape index: {}]   ;;  %s583_s4 = inlined_call_operand.vmem [shape: f32[1,16], index: 4, kind: input, shape index: {}]   ;;  %s584_s5 = inlined_call_operand.vmem [shape: f32[64,16], index: 5, kind: output, shape index: {}]  }
   0x1   :  { %v20_v0 = vld [vmem:[%s579_s0] sm:$0xff]  ;;  %v21_v1 = vld [vmem:[%s579_s0 + $0x8] sm:$0xff]  ;;  %v22_v8 = vld [vmem:[%s579_s0 + $0x10] sm:$0xff] }
   0x2   :  { %v24_v2 = vld [vmem:[%s579_s0 + $0x20] sm:$0xff]  ;;  %v29_v3 = vsel %vm28_vm0, %v20_v0, 0.0  ;;  %v32_v4 = vsel %vm28_vm0, %v21_v1, 0.0  ;;  %v25_v5 = vld [vmem:[%s579_s0 + $0x28] sm:$0xff]  ;;  %v26_v9 = vld [vmem:[%s579_s0 + $0x30] sm:$0xff]  ;;  %v35_v10 = vsel %vm28_vm0, %v22_v8, 0.0 }
   0x3   :  { %30 = vadd.xlane.f32.xlu0 %v29_v3  ;;  %33 = vadd.xlane.f32.xlu1 %v32_v4  ;;  %v41_v6 = vsel %vm28_vm0, %v24_v2, 0.0  ;;  %v44_v7 = vsel %vm28_vm0, %v25_v5, 0.0  ;;  %v47_v11 = vsel %vm28_vm0, %v26_v9, 0.0  ;;  %v23_v12 = vld [vmem:[%s579_s0 + $0x18] sm:$0xff]  ;;  %v164_v56 = vld [vmem:[%s580_s3] sm:$0xff]  ;;  %v165_v57 = vld [vmem:[%s580_s3 + $0x8] sm:$0xff] }
   0x4   :  { %v27_v13 = vld [vmem:[%s579_s0 + $0x38] sm:$0xff]  ;;  %v38_v14 = vsel %vm28_vm0, %v23_v12, 0.0  ;;  %v368_v58 = vpack.c.bf16 %v165_v57, %v164_v56  ;;  %v166_v59 = vld [vmem:[%s580_s3 + $0x10] sm:$0xff]  ;;  %v168_v62 = vld [vmem:[%s580_s3 + $0x20] sm:$0xff] }
   0x5   :  { %v50_v15 = vsel %vm28_vm0, %v27_v13, 0.0  ;;  %v167_v60 = vld [vmem:[%s580_s3 + $0x18] sm:$0xff]  ;;  %v169_v63 = vld [vmem:[%s580_s3 + $0x28] sm:$0xff] }
   0x6   :  { %369 = vmatprep.subr.bf16.mxu0 %v368_v58  ;;  %380 = vmatprep.subr.bf16.mxu1 %v368_v58  ;;  %v372_v61 = vpack.c.bf16 %v167_v60, %v166_v59 }
   0x7   :  { %42 = vadd.xlane.f32.xlu0 %v41_v6  ;;  %45 = vadd.xlane.f32.xlu1 %v44_v7 }
   0x8   :  { %371 = vmatpush3.bf16.msra.mxu0 %v368_v58  ;;  %383 = vmatpush3.bf16.msra.mxu1 %v368_v58 }
   0x9   :  { %373 = vmatprep.subr.bf16.mxu0 %v372_v61  ;;  %381 = vmatprep.subr.bf16.mxu1 %v372_v61 }
   0xb   :  { %36 = vadd.xlane.f32.xlu0 %v35_v10  ;;  %48 = vadd.xlane.f32.xlu1 %v47_v11 }
   0xc   :  { %375 = vmatpush3.bf16.msra.mxu0 %v372_v61  ;;  %384 = vmatpush3.bf16.msra.mxu1 %v372_v61 }
   0xf   :  { %39 = vadd.xlane.f32.xlu0 %v38_v14  ;;  %51 = vadd.xlane.f32.xlu1 %v50_v15 }
  0x90   :  { %v31_v16 = vpop.xlane.xlu0 %30  ;;  %v34_v17 = vpop.xlane.xlu1 %33 }
  0x91   :  { %v54_v18 = vmul.f32 0.020833334, %v31_v16  ;;  %v55_v19 = vmul.f32 0.020833334, %v34_v17 }
  0x93   :  { %v464_v20 = vsub.f32 %v20_v0, %v54_v18  ;;  %v466_v21 = vsub.f32 %v21_v1, %v55_v19  ;;  %v376_v0 = vpack.c.bf16 %v169_v63, %v168_v62 }
  0x94   :  { %v43_v22 = vpop.xlane.xlu0 %42  ;;  %v46_v23 = vpop.xlane.xlu1 %45 }
  0x95   :  { %v58_v24 = vmul.f32 0.020833334, %v43_v22  ;;  %v59_v25 = vmul.f32 0.020833334, %v46_v23  ;;  %v70_v26 = vmul.f32 %v464_v20, %v464_v20  ;;  %v71_v27 = vmul.f32 %v466_v21, %v466_v21  ;;  %377 = vmatprep.subr.bf16.mxu0 %v376_v0  ;;  %382 = vmatprep.subr.bf16.mxu1 %v376_v0 }
  0x96   :  { %379 = vmatpush3.bf16.msra.mxu0 %v376_v0  ;;  %385 = vmatpush3.bf16.msra.mxu1 %v376_v0 }
  0x97   :  { %v472_v28 = vsub.f32 %v24_v2, %v58_v24  ;;  %v474_v29 = vsub.f32 %v25_v5, %v59_v25  ;;  %v78_v30 = vsel %vm28_vm0, %v70_v26, 0.0  ;;  %v81_v33 = vsel %vm28_vm0, %v71_v27, 0.0  ;;  %v319_v25 = vld [vmem:[%s581_s1] ss:$0 sm:$0xff] }
  0x98   :  { %79 = vadd.xlane.f32.xlu0 %v78_v30  ;;  %v37_v31 = vpop.xlane.xlu0 %36  ;;  %v49_v32 = vpop.xlane.xlu1 %48 }
  0x99   :  { %v56_v34 = vmul.f32 0.020833334, %v37_v31  ;;  %v60_v35 = vmul.f32 0.020833334, %v49_v32  ;;  %v74_v36 = vmul.f32 %v472_v28, %v472_v28  ;;  %v75_v37 = vmul.f32 %v474_v29, %v474_v29  ;;  %v320_v31 = vld [vmem:[%s582_s2] ss:$0 sm:$0xff] }
  0x9b   :  { %v482_v38 = vsub.f32 %v22_v8, %v56_v34  ;;  %v484_v39 = vsub.f32 %v26_v9, %v60_v35  ;;  %v90_v40 = vsel %vm28_vm0, %v74_v36, 0.0  ;;  %v93_v43 = vsel %vm28_vm0, %v75_v37, 0.0 }
  0x9c   :  { %82 = vadd.xlane.f32.xlu0 %v81_v33  ;;  %91 = vadd.xlane.f32.xlu1 %v90_v40  ;;  %v40_v41 = vpop.xlane.xlu0 %39  ;;  %v52_v42 = vpop.xlane.xlu1 %51 }
  0x9d   :  { %v57_v44 = vmul.f32 0.020833334, %v40_v41  ;;  %v61_v45 = vmul.f32 0.020833334, %v52_v42  ;;  %v72_v46 = vmul.f32 %v482_v38, %v482_v38  ;;  %v76_v47 = vmul.f32 %v484_v39, %v484_v39 }
  0x9f   :  { %v492_v48 = vsub.f32 %v23_v12, %v57_v44  ;;  %v494_v49 = vsub.f32 %v27_v13, %v61_v45  ;;  %v84_v50 = vsel %vm28_vm0, %v72_v46, 0.0  ;;  %v96_v51 = vsel %vm28_vm0, %v76_v47, 0.0 }
  0xa0   :  { %94 = vadd.xlane.f32.xlu1 %v93_v43  ;;  %85 = vadd.xlane.f32.xlu0 %v84_v50 }
  0xa1   :  { %v73_v52 = vmul.f32 %v492_v48, %v492_v48  ;;  %v77_v53 = vmul.f32 %v494_v49, %v494_v49 }
  0xa3   :  { %v87_v54 = vsel %vm28_vm0, %v73_v52, 0.0  ;;  %v99_v55 = vsel %vm28_vm0, %v77_v53, 0.0 }
  0xa4   :  { %97 = vadd.xlane.f32.xlu1 %v96_v51  ;;  %88 = vadd.xlane.f32.xlu0 %v87_v54 }
  0xa8   :  { %100 = vadd.xlane.f32.xlu1 %v99_v55 }
 0x125   :  { %v80_v1 = vpop.xlane.xlu0 %79 }
 0x126   :  { %v102_v2 = vmul.f32 0.020833334, %v80_v1 }
 0x128   :  { %v110_v3 = vadd.f32 1e-05, %v102_v2 }
 0x129   :  { %v92_v4 = vpop.xlane.xlu1 %91  ;;  %v83_v5 = vpop.xlane.xlu0 %82 }
 0x12a   :  { %386 = vrsqrt.f32 %v110_v3  ;;  %v106_v6 = vmul.f32 0.020833334, %v92_v4  ;;  %v103_v7 = vmul.f32 0.020833334, %v83_v5 }
 0x12c   :  { %v114_v8 = vadd.f32 1e-05, %v106_v6  ;;  %v111_v9 = vadd.f32 1e-05, %v103_v7 }
 0x12d   :  { %v95_v10 = vpop.xlane.xlu1 %94  ;;  %v86_v11 = vpop.xlane.xlu0 %85 }
 0x12e   :  { %388 = vrsqrt.f32 %v114_v8  ;;  %v107_v12 = vmul.f32 0.020833334, %v95_v10  ;;  %v104_v13 = vmul.f32 0.020833334, %v86_v11 }
 0x12f   :  { %390 = vrsqrt.f32 %v111_v9 }
 0x130   :  { %v115_v14 = vadd.f32 1e-05, %v107_v12  ;;  %v112_v15 = vadd.f32 1e-05, %v104_v13 }
 0x131   :  { %v98_v16 = vpop.xlane.xlu1 %97  ;;  %v89_v17 = vpop.xlane.xlu0 %88 }
 0x132   :  { %392 = vrsqrt.f32 %v115_v14  ;;  %v108_v18 = vmul.f32 0.020833334, %v98_v16  ;;  %v105_v19 = vmul.f32 0.020833334, %v89_v17 }
 0x133   :  { %394 = vrsqrt.f32 %v112_v15 }
 0x134   :  { %v387_v22 = vpop.eup %386  ;;  %v116_v23 = vadd.f32 1e-05, %v108_v18  ;;  %v113_v24 = vadd.f32 1e-05, %v105_v19 }
 0x135   :  { %v101_v26 = vpop.xlane.xlu1 %100  ;;  %v126_v27 = vmul.f32 %v387_v22, %v464_v20 }
 0x136   :  { %396 = vrsqrt.f32 %v116_v23  ;;  %v109_v30 = vmul.f32 0.020833334, %v101_v26 }
 0x137   :  { %398 = vrsqrt.f32 %v113_v24  ;;  %v141_v32 = vmul.f32 %v319_v25, %v126_v27 }
 0x138   :  { %v389_v33 = vpop.eup %388  ;;  %v117_v34 = vadd.f32 1e-05, %v109_v30 }
 0x139   :  { %v391_v35 = vpop.eup %390  ;;  %v156_v36 = vadd.f32 %v320_v31, %v141_v32  ;;  %v130_v37 = vmul.f32 %v389_v33, %v472_v28 }
 0x13a   :  { %400 = vrsqrt.f32 %v117_v34  ;;  %v127_v40 = vmul.f32 %v391_v35, %v466_v21 }
 0x13b   :  { %356 = vmatprep.mubr.msk.f32.mxu0 %vm28_vm0, %v156_v36  ;;  %v145_v20 = vmul.f32 %v319_v25, %v130_v37 }
 0x13c   :  { %v393_v41 = vpop.eup %392  ;;  %v142_v42 = vmul.f32 %v319_v25, %v127_v40 }
 0x13d   :  { %v395_v43 = vpop.eup %394  ;;  %v160_v44 = vadd.f32 %v320_v31, %v145_v20  ;;  %v131_v45 = vmul.f32 %v393_v41, %v474_v29 }
 0x13e   :  { %v157_v46 = vadd.f32 %v320_v31, %v142_v42  ;;  %v128_v47 = vmul.f32 %v395_v43, %v482_v38 }
 0x13f   :  { %362 = vmatprep.mubr.msk.f32.mxu1 %vm28_vm0, %v160_v44  ;;  %v146_v50 = vmul.f32 %v319_v25, %v131_v45 }
 0x140   :  { %v397_v51 = vpop.eup %396  ;;  %357 = vmatmul.mubr.msk.f32.vlgmr.msra.gmra.mrb[0].mxu0 %vm28_vm0, %v157_v46  ;;  %v143_v28 = vmul.f32 %v319_v25, %v128_v47 }
 0x141   :  { %v399_v21 = vpop.eup %398  ;;  %v161_v52 = vadd.f32 %v320_v31, %v146_v50  ;;  %v132_v53 = vmul.f32 %v397_v51, %v484_v39 }
 0x142   :  { %v158_v54 = vadd.f32 %v320_v31, %v143_v28  ;;  %v129_v55 = vmul.f32 %v399_v21, %v492_v48  ;;  %v321_v48 = vld [vmem:[%s583_s4] ss:$0 sm:$0xff] }
 0x143   :  { %363 = vmatmul.mubr.msk.f32.vlgmr.msra.gmra.mrb[0].mxu1 %vm28_vm0, %v161_v52  ;;  %v147_v29 = vmul.f32 %v319_v25, %v132_v53 }
 0x144   :  { %v401_v56 = vpop.eup %400  ;;  %359 = vmatprep.mubr.msk.f32.mxu0 %vm28_vm0, %v158_v54  ;;  %v144_v38 = vmul.f32 %v319_v25, %v129_v55 }
 0x145   :  { %v162_v57 = vadd.f32 %v320_v31, %v147_v29  ;;  %v133_v58 = vmul.f32 %v401_v56, %v494_v49 }
 0x146   :  { %v159_v59 = vadd.f32 %v320_v31, %v144_v38 }
 0x147   :  { %365 = vmatprep.mubr.msk.f32.mxu1 %vm28_vm0, %v162_v57  ;;  %v148_v60 = vmul.f32 %v319_v25, %v133_v58 }
 0x148   :  { %360 = vmatmul.mubr.msk.f32.gmra.mrb[2].mxu0 %vm28_vm0, %v159_v59 }
 0x149   :  { %v163_v39 = vadd.f32 %v320_v31, %v148_v60 }
 0x14b   :  { %366 = vmatmul.mubr.msk.f32.gmra.mrb[2].mxu1 %vm28_vm0, %v163_v39 }
 0x213   :  { %v358_v61 = vpop.f32.mrb[0].mxu0 }
 0x214   :  { %v273_v62 = vadd.f32 %v358_v61, %v321_v48  ;;  %v267_v63 = vpop.f32.mrb[1].mxu0 }
 0x215   :  { %v268_v0 = vadd.f32 %v321_v48, %v267_v63 }
 0x216   :  { %308 = vst.msk [vmem:[%s584_s5 + $0x8] sm:$0xff] %vm306_vm1, %v273_v62  ;;  %v364_v49 = vpop.f32.mrb[0].mxu1 }
 0x217   :  { %307 = vst.msk [vmem:[%s584_s5] sm:$0xff] %vm306_vm1, %v268_v0  ;;  %v293_v1 = vadd.f32 %v364_v49, %v321_v48  ;;  %v287_v2 = vpop.f32.mrb[1].mxu1 }
 0x218   :  { %v288_v3 = vadd.f32 %v321_v48, %v287_v2 }
 0x219   :  { %312 = vst.msk [vmem:[%s584_s5 + $0x28] sm:$0xff] %vm306_vm1, %v293_v1 }
 0x21a   :  { %311 = vst.msk [vmem:[%s584_s5 + $0x20] sm:$0xff] %vm306_vm1, %v288_v3 }
 0x21b   :  { %v361_v4 = vpop.f32.mrb[2].mxu0 }
 0x21c   :  { %v283_v5 = vadd.f32 %v361_v4, %v321_v48  ;;  %v277_v6 = vpop.f32.mrb[3].mxu0 }
 0x21d   :  { %v278_v7 = vadd.f32 %v321_v48, %v277_v6 }
 0x21e   :  { %310 = vst.msk [vmem:[%s584_s5 + $0x18] sm:$0xff] %vm306_vm1, %v283_v5  ;;  %v367_v8 = vpop.f32.mrb[2].mxu1 }
 0x21f   :  { %309 = vst.msk [vmem:[%s584_s5 + $0x10] sm:$0xff] %vm306_vm1, %v278_v7  ;;  %v303_v9 = vadd.f32 %v367_v8, %v321_v48  ;;  %v297_v10 = vpop.f32.mrb[3].mxu1 }
 0x220   :  { %v298_v11 = vadd.f32 %v321_v48, %v297_v10 }
 0x221   :  { %314 = vst.msk [vmem:[%s584_s5 + $0x38] sm:$0xff] %vm306_vm1, %v303_v9 }
 0x222   :  { %313 = vst.msk [vmem:[%s584_s5 + $0x30] sm:$0xff] %vm306_vm1, %v298_v11 }

// kernel: spex_plus_forward.17
= control target key start
LH: loop header
LB: loop body
LE: loop exit
PB: predicated region body
PF: predicated region fallthrough
CT: control target
= control target key end

     0   :  { %vm37_vm0 = vcmask 130048   ;;  %vm197_vm1 = vcmask 392192   ;;  %vm327_vm2 = vcmask 457728   ;;  %s596_s2 = inlined_call_operand.vmem [shape: f32[16,48], index: 2, kind: input, shape index: {}]   ;;  %s597_s0 = inlined_call_operand.vmem [shape: f32[64,16], index: 0, kind: input, shape index: {}]   ;;  %s598_s4 = inlined_call_operand.vmem [shape: f32[48,56], index: 4, kind: input, shape index: {}]   ;;  %s599_s3 = inlined_call_operand.vmem [shape: f32[1,48], index: 3, kind: input, shape index: {}]   ;;  %s600_s1 = inlined_call_operand.vmem [shape: f32[64,48], index: 1, kind: input, shape index: {}]   ;;  %s601_s5 = inlined_call_operand.vmem [shape: f32[64,56], index: 5, kind: output, shape index: {}]  }
   0x1   :  { %v28_v0 = vld [vmem:[%s596_s2] sm:$0xff]  ;;  %v29_v1 = vld [vmem:[%s596_s2 + $0x8] sm:$0xff]  ;;  %v22_v8 = vld [vmem:[%s597_s0 + $0x10] sm:$0xff] }
   0x2   :  { %v20_v2 = vld [vmem:[%s597_s0] sm:$0xff]  ;;  %v421_v3 = vpack.c.bf16 %v29_v1, %v28_v0  ;;  %v192_v5 = vld [vmem:[%s598_s4 + $0x8] sm:$0xff]  ;;  %v23_v9 = vld [vmem:[%s597_s0 + $0x18] sm:$0xff] }
   0x3   :  { %385 = vmatprep.mubr.msk.f32.mxu0 %vm37_vm0, %v20_v2  ;;  %v191_v4 = vld [vmem:[%s598_s4] sm:$0xff]  ;;  %v21_v6 = vld [vmem:[%s597_s0 + $0x8] sm:$0xff]  ;;  %v26_v12 = vld [vmem:[%s597_s0 + $0x30] sm:$0xff] }
   0x4   :  { %422 = vmatprep.subr.bf16.mxu0 %v421_v3  ;;  %v425_v7 = vpack.c.bf16 %v192_v5, %v191_v4  ;;  %v24_v10 = vld [vmem:[%s597_s0 + $0x20] sm:$0xff]  ;;  %v25_v11 = vld [vmem:[%s597_s0 + $0x28] sm:$0xff]  ;;  %v27_v13 = vld [vmem:[%s597_s0 + $0x38] sm:$0xff] }
   0x5   :  { %424 = vmatpush3.bf16.msra.mxu0 %v421_v3  ;;  %v193_v14 = vld [vmem:[%s598_s4 + $0x10] sm:$0xff]  ;;  %v194_v15 = vld [vmem:[%s598_s4 + $0x18] sm:$0xff]  ;;  %v195_v17 = vld [vmem:[%s598_s4 + $0x20] sm:$0xff] }
   0x6   :  { %426 = vmatprep.subr.bf16.mxu0 %v425_v7  ;;  %437 = vmatprep.subr.bf16.mxu1 %v425_v7  ;;  %v429_v16 = vpack.c.bf16 %v194_v15, %v193_v14  ;;  %v196_v18 = vld [vmem:[%s598_s4 + $0x28] sm:$0xff]  ;;  %v340_v20 = vld [vmem:[%s599_s3] ss:$0 sm:$0xff]  ;;  %v177_v36 = vld [vmem:[%s600_s1 + $0x10] sm:$0xff] }
   0x7   :  { %440 = vmatpush3.bf16.msra.mxu1 %v425_v7  ;;  %v433_v19 = vpack.c.bf16 %v196_v18, %v195_v17  ;;  %v175_v26 = vld [vmem:[%s600_s1] sm:$0xff]  ;;  %v176_v27 = vld [vmem:[%s600_s1 + $0x8] sm:$0xff]  ;;  %v178_v37 = vld [vmem:[%s600_s1 + $0x18] sm:$0xff] }
   0x8   :  { %386 = vmatmul.mubr.msk.f32.vlgmr.msra.gmra.mrb[0].mxu0 %vm37_vm0, %v21_v6  ;;  %438 = vmatprep.subr.bf16.mxu1 %v429_v16  ;;  %v179_v46 = vld [vmem:[%s600_s1 + $0x20] sm:$0xff]  ;;  %v180_v47 = vld [vmem:[%s600_s1 + $0x28] sm:$0xff]  ;;  %v181_v56 = vld [vmem:[%s600_s1 + $0x30] sm:$0xff] }
   0x9   :  { %388 = vmatprep.mubr.msk.f32.mxu0 %vm37_vm0, %v22_v8  ;;  %428 = vmatpush3.bf16.msra.mxu0 %v425_v7  ;;  %v182_v57 = vld [vmem:[%s600_s1 + $0x38] sm:$0xff] }
   0xa   :  { %430 = vmatprep.subr.bf16.mxu0 %v429_v16 }
   0xb   :  { %441 = vmatpush3.bf16.msra.mxu1 %v429_v16 }
   0xc   :  { %389 = vmatmul.mubr.msk.f32.gmra.mrb[2].mxu0 %vm37_vm0, %v23_v9  ;;  %439 = vmatprep.subr.bf16.mxu1 %v433_v19 }
   0xd   :  { %391 = vmatprep.mubr.msk.f32.mxu0 %vm37_vm0, %v24_v10  ;;  %432 = vmatpush3.bf16.msra.mxu0 %v429_v16 }
   0xe   :  { %434 = vmatprep.subr.bf16.mxu0 %v433_v19 }
   0xf   :  { %442 = vmatpush3.bf16.msra.mxu1 %v433_v19 }
  0x10   :  { %392 = vmatmul.mubr.msk.f32.gmra.mrb[4].mxu0 %vm37_vm0, %v25_v11 }
  0x11   :  { %394 = vmatprep.mubr.msk.f32.mxu0 %vm37_vm0, %v26_v12  ;;  %436 = vmatpush3.bf16.msra.mxu0 %v433_v19 }
  0x14   :  { %395 = vmatmul.mubr.msk.f32.gmra.mrb[6].mxu0 %vm37_vm0, %v27_v13 }
  0xdb   :  { %v387_v21 = vpop.f32.mrb[0].mxu0 }
  0xdc   :  { %v134_v22 = vadd.f32 %v387_v21, %v340_v20  ;;  %v128_v23 = vpop.f32.mrb[1].mxu0 }
  0xdd   :  { %v129_v24 = vadd.f32 %v340_v20, %v128_v23 }
  0xde   :  { %v168_v25 = vmax.f32 %v134_v22, 0.0 }
  0xdf   :  { %v167_v28 = vmax.f32 %v129_v24, 0.0  ;;  %v390_v29 = vpop.f32.mrb[2].mxu0 }
  0xe0   :  { %v144_v30 = vadd.f32 %v390_v29, %v340_v20  ;;  %v138_v31 = vpop.f32.mrb[3].mxu0  ;;  %v184_v34 = vmul.f32 %v176_v27, %v168_v25 }
  0xe1   :  { %v183_v32 = vmul.f32 %v175_v26, %v167_v28  ;;  %v139_v33 = vadd.f32 %v340_v20, %v138_v31 }
  0xe2   :  { %v170_v35 = vmax.f32 %v144_v30, 0.0 }
  0xe3   :  { %v169_v38 = vmax.f32 %v139_v33, 0.0  ;;  %v393_v39 = vpop.f32.mrb[4].mxu0  ;;  %409 = vmatprep.mubr.msk.f32.mxu0 %vm197_vm1, %v183_v32 }
  0xe4   :  { %v154_v40 = vadd.f32 %v393_v39, %v340_v20  ;;  %v148_v41 = vpop.f32.mrb[5].mxu0  ;;  %410 = vmatmul.mubr.msk.f32.vlgmr.msra.gmra.mrb[8].mxu0 %vm197_vm1, %v184_v34  ;;  %v186_v44 = vmul.f32 %v178_v37, %v170_v35 }
  0xe5   :  { %v149_v42 = vadd.f32 %v340_v20, %v148_v41  ;;  %v185_v43 = vmul.f32 %v177_v36, %v169_v38 }
  0xe6   :  { %v172_v45 = vmax.f32 %v154_v40, 0.0 }
  0xe7   :  { %v171_v48 = vmax.f32 %v149_v42, 0.0  ;;  %v396_v49 = vpop.f32.mrb[6].mxu0  ;;  %412 = vmatprep.mubr.msk.f32.mxu1 %vm197_vm1, %v185_v43 }
  0xe8   :  { %v164_v50 = vadd.f32 %v396_v49, %v340_v20  ;;  %v158_v51 = vpop.f32.mrb[7].mxu0  ;;  %413 = vmatmul.mubr.msk.f32.vlgmr.msra.gmra.mrb[0].mxu1 %vm197_vm1, %v186_v44  ;;  %v188_v54 = vmul.f32 %v180_v47, %v172_v45 }
  0xe9   :  { %v187_v52 = vmul.f32 %v179_v46, %v171_v48  ;;  %v159_v53 = vadd.f32 %v340_v20, %v158_v51 }
  0xea   :  { %v174_v55 = vmax.f32 %v164_v50, 0.0 }
  0xeb   :  { %v173_v58 = vmax.f32 %v159_v53, 0.0  ;;  %415 = vmatprep.mubr.msk.f32.mxu1 %vm197_vm1, %v187_v52 }
  0xec   :  { %416 = vmatmul.mubr.msk.f32.gmra.mrb[2].mxu1 %vm197_vm1, %v188_v54  ;;  %v190_v60 = vmul.f32 %v182_v57, %v174_v55 }
  0xed   :  { %v189_v59 = vmul.f32 %v181_v56, %v173_v58 }
  0xef   :  { %418 = vmatprep.mubr.msk.f32.mxu1 %vm197_vm1, %v189_v59 }
  0xf0   :  { %419 = vmatmul.mubr.msk.f32.gmra.mrb[4].mxu1 %vm197_vm1, %v190_v60 }
 0x1b7   :  { %v411_v61 = vpop.f32.mrb[8].mxu0 }
 0x1b8   :  { %329 = vst.msk [vmem:[%s601_s5 + $0x8] sm:$0xff] %vm327_vm2, %v411_v61  ;;  %v288_v62 = vpop.f32.mrb[9].mxu0 }
 0x1b9   :  { %328 = vst.msk [vmem:[%s601_s5] sm:$0xff] %vm327_vm2, %v288_v62 }
 0x1bb   :  { %v414_v63 = vpop.f32.mrb[0].mxu1 }
 0x1bc   :  { %331 = vst.msk [vmem:[%s601_s5 + $0x18] sm:$0xff] %vm327_vm2, %v414_v63  ;;  %v298_v0 = vpop.f32.mrb[1].mxu1 }
 0x1bd   :  { %330 = vst.msk [vmem:[%s601_s5 + $0x10] sm:$0xff] %vm327_vm2, %v298_v0 }
 0x1bf   :  { %v417_v1 = vpop.f32.mrb[2].mxu1 }
 0x1c0   :  { %333 = vst.msk [vmem:[%s601_s5 + $0x28] sm:$0xff] %vm327_vm2, %v417_v1  ;;  %v308_v2 = vpop.f32.mrb[3].mxu1 }
 0x1c1   :  { %332 = vst.msk [vmem:[%s601_s5 + $0x20] sm:$0xff] %vm327_vm2, %v308_v2 }
 0x1c3   :  { %v420_v3 = vpop.f32.mrb[4].mxu1 }
 0x1c4   :  { %335 = vst.msk [vmem:[%s601_s5 + $0x38] sm:$0xff] %vm327_vm2, %v420_v3  ;;  %v318_v4 = vpop.f32.mrb[5].mxu1 }
 0x1c5   :  { %334 = vst.msk [vmem:[%s601_s5 + $0x30] sm:$0xff] %vm327_vm2, %v318_v4 }

// kernel: spex_plus_forward.16
= control target key start
LH: loop header
LB: loop body
LE: loop exit
PB: predicated region body
PF: predicated region fallthrough
CT: control target
= control target key end

     0   :  { %s5740_s29 = smov 0   ;;  %s7057_s0 = inlined_call_operand.vmem [shape: f32[2,32,16], index: 0, kind: input, shape index: {}]   ;;  %s7058_s1 = inlined_call_operand.vmem [shape: f32[2,8,1,32], index: 1, kind: input, shape index: {}]   ;;  %s7059_s2 = inlined_call_operand.vmem [shape: f32[8,16,32], index: 2, kind: input, shape index: {}]   ;;  %s7060_s3 = inlined_call_operand.vmem [shape: f32[8,1,32], index: 3, kind: input, shape index: {}]   ;;  %s7061_s4 = inlined_call_operand.vmem [shape: f32[8,1,32], index: 4, kind: input, shape index: {}]   ;;  %s7062_s5 = inlined_call_operand.vmem [shape: f32[8,1,32], index: 5, kind: input, shape index: {}]   ;;  %s7063_s6 = inlined_call_operand.vmem [shape: f32[8,1,32], index: 6, kind: input, shape index: {}]   ;;  %s7064_s7 = inlined_call_operand.vmem [shape: f32[8,3,32], index: 7, kind: input, shape index: {}]   ;;  %s7065_s8 = inlined_call_operand.vmem [shape: f32[8,1,32], index: 8, kind: input, shape index: {}]   ;;  %s7066_s9 = inlined_call_operand.vmem [shape: f32[8,1,32], index: 9, kind: input, shape index: {}]   ;;  %s7067_s10 = inlined_call_operand.vmem [shape: f32[8,1,32], index: 10, kind: input, shape index: {}]   ;;  %s7068_s11 = inlined_call_operand.vmem [shape: f32[8,1,32], index: 11, kind: input, shape index: {}]   ;;  %s7069_s12 = inlined_call_operand.vmem [shape: f32[8,32,16], index: 12, kind: input, shape index: {}]   ;;  %s7070_s13 = inlined_call_operand.vmem [shape: f32[8,1,16], index: 13, kind: input, shape index: {}]   ;;  %s7071_s14 = inlined_call_operand.vmem [shape: f32[2,32,16], index: 14, kind: output, shape index: {}]  }
   0x1 LB: > { %s4842_s30 = sadd.s32 4294967295, %s5662_s29   ;;  %p4846_p0 = scmp.ge.s32.totalorder %s5662_s29, 1  ;;  %s5662_s29 = sphi %s5740_s29, %s24_s29  }
   0x2   : > { %p421_p1 = scmp.lt.s32.totalorder %s5662_s29, 3 }
   0x4   : > { %p422_p2 = pnand %p4846_p0, %p421_p1 }
   0x5   : > { %v498_v0 = vld [vmem:[%s7059_s2] sm:$0xff] (!%p422_p2)  ;;  %v499_v1 = vld [vmem:[%s7059_s2 + $0x8] sm:$0xff] (!%p422_p2)  ;;  %p471_p3 = scmp.lt.s32.totalorder (!%p422_p2), %s4842_s30, 1  ;;  %vm507_vm0 = vcmask (!%p422_p2), 130048   ;;  %v485_v7 = vlaneseq (!%p422_p2)  ;;  %vm647_vm2 = vcmask (!%p422_p2), 261120   ;;  %s5664_s24 = smov (!%p422_p2), 0.0  }
   0x6   : > { %425 = sbr.rel (%p422_p2) target bundleno = 8328 (0x2088), region = 76  ;;  %v5423_v2 = vpack.c.bf16 (!%p422_p2), %v499_v1, %v498_v0  ;;  %v4857_v11 = vld [vmem:[%s7060_s3] ss:$0 sm:$0xff] (!%p422_p2) }
   0x7   : > { %v5785_v9 = vshrl.u32 (!%p422_p2), %v485_v7, 7  ;;  %v4858_v14 = vld [vmem:[%s7061_s4] ss:$0 sm:$0xff] (!%p422_p2) }
   0x8   : > { %5424 = vmatprep.subr.bf16.mxu0 (!%p422_p2), %v5423_v2 }
   0x9   : > { %5426 = vmatpush3.bf16.msra.mxu0 (!%p422_p2), %v5423_v2  ;;  %v5794_v17 = vadd.s32 (!%p422_p2), 24, %v5785_v9  ;;  %vm734_vm7 = vcmp.lt.s32.totalorder (!%p422_p2), %v5785_v9, 1  ;;  %vm795_vm9 = vcmp.lt.s32.totalorder (!%p422_p2), %v5785_v9, 7 }
   0xb   : > { %vm493_vm4 = vcmp.lt.s32.totalorder (!%p422_p2), %v5794_v17, 31 }
   0xd   : > { %s7075_s30 = smov (!%p471_p3, %s4842_s30), 1 }
   0xe   : > { %s7072_s19 = sshll.u32 %s7075_s30, 5  ;;  %s4849_s23 = sshll.u32 %s7075_s30, 3 }
   0xf   : > { %s475_s22 = scalar_lea.vmem %s7057_s0, %s7072_s19  ;;  %s5782_s26 = scalar_lea.vmem %s7058_s1, %s4849_s23 }
  0x10   : > { %v5762_v3 = vld [vmem:[%s475_s22] sm:$0xff]  ;;  %v5764_v4 = vld [vmem:[%s475_s22 + $0x8] sm:$0xff]  ;;  %v5766_v5 = vld [vmem:[%s475_s22 + $0x10] sm:$0xff] }
  0x11   : > { %5235 = vmatprep.mubr.msk.f32.mxu0 %vm507_vm0, %v5762_v3  ;;  %v5774_v6 = vld [vmem:[%s475_s22 + $0x18] sm:$0xff]  ;;  %v4852_v8 = vld [vmem:[%s5782_s26] ss:$0 sm:$0xff] }
  0x12   : > { %5236 = vmatmul.mubr.msk.f32.vlgmr.msra.gmra.mrb[0].mxu0 %vm507_vm0, %v5764_v4 }
  0x13   : > { %5238 = vmatprep.mubr.msk.f32.mxu0 %vm507_vm0, %v5766_v5 }
  0x16   : > { %5239 = vmatmul.mubr.msk.f32.gmra.mrb[2].mxu0 %vm507_vm0, %v5774_v6 }
  0xe5   : > { %v5237_v10 = vpop.f32.mrb[0].mxu0 }
  0xe6   : > { %v592_v12 = vadd.f32 %v5237_v10, %v4852_v8  ;;  %v586_v13 = vpop.f32.mrb[1].mxu0 }
  0xe7   : > { %v587_v15 = vadd.f32 %v4852_v8, %v586_v13 }
  0xe8   : > { %v613_v16 = vadd.f32 %v4857_v11, %v592_v12 }
  0xe9   : > { %v612_v18 = vadd.f32 %v4857_v11, %v587_v15  ;;  %v5240_v19 = vpop.f32.mrb[2].mxu0  ;;  %v4859_v15 = vld [vmem:[%s7062_s5] ss:$0 sm:$0xff] }
  0xea   : > { %vm617_vm1 = vcmp.ge.f32.partialorder %v613_v16, 0.0  ;;  %v628_v20 = vmul.f32 %v4858_v14, %v613_v16  ;;  %v602_v21 = vadd.f32 %v5240_v19, %v4852_v8  ;;  %v596_v22 = vpop.f32.mrb[3].mxu0 }
  0xeb   : > { %vm616_vm3 = vcmp.ge.f32.partialorder %v612_v18, 0.0  ;;  %v627_v23 = vmul.f32 %v4858_v14, %v612_v18  ;;  %v597_v24 = vadd.f32 %v4852_v8, %v596_v22 }
  0xec   : > { %v5796_v25 = vsel %vm617_vm1, %v613_v16, %v628_v20  ;;  %v615_v26 = vadd.f32 %v4857_v11, %v602_v21  ;;  %v5824_v16 = vsub.s32 0, %v5785_v9 }
  0xed   : > { %v5799_v27 = vsel %vm616_vm3, %v612_v18, %v627_v23  ;;  %v614_v28 = vadd.f32 %v4857_v11, %v597_v24  ;;  %v649_v29 = vsel %vm647_vm2, %v5796_v25, 0.0  ;;  %v666_v30 = vmul.f32 %v5796_v25, %v5796_v25  ;;  %v729_v23 = vld [vmem:[%s7064_s7] sm:$0x7] }
  0xee   : > { %v630_v31 = vmul.f32 %v4858_v14, %v615_v26  ;;  %vm619_vm5 = vcmp.ge.f32.partialorder %v615_v26, 0.0  ;;  %v648_v32 = vsel %vm647_vm2, %v5799_v27, 0.0  ;;  %v665_v33 = vmul.f32 %v5799_v27, %v5799_v27  ;;  %v4860_v24 = vld [vmem:[%s7063_s6] ss:$0 sm:$0xff] }
  0xef   : > { %vm618_vm6 = vcmp.ge.f32.partialorder %v614_v28, 0.0  ;;  %v629_v34 = vmul.f32 %v4858_v14, %v614_v28  ;;  %v670_v37 = vsel %vm647_vm2, %v666_v30, 0.0  ;;  %v650_v40 = vadd.f32 %v649_v29, %v648_v32 }
  0xf0   : > { %v634_v35 = vsel %vm619_vm5, %v615_v26, %v630_v31  ;;  %v669_v36 = vsel %vm647_vm2, %v665_v33, 0.0  ;;  %v5827_v18 = vsub.s32 1, %v5785_v9  ;;  %v5839_v26 = vadd.s32 1, %v5794_v17 }
  0xf1   : > { %v633_v38 = vsel %vm618_vm6, %v614_v28, %v629_v34  ;;  %v646_v39 = vsel %vm493_vm4, %v634_v35, 0.0  ;;  %v671_v44 = vadd.f32 %v670_v37, %v669_v36  ;;  %v770_v32 = vrot.slane %v729_v23, %v5824_v16 }
  0xf2   : > { %v651_v41 = vsel %vm647_vm2, %v633_v38, 0.0  ;;  %v667_v42 = vmul.f32 %v633_v38, %v633_v38  ;;  %v653_v45 = vsel %vm647_vm2, %v646_v39, 0.0  ;;  %v668_v46 = vmul.f32 %v646_v39, %v646_v39 }
  0xf3   : > { %v652_v43 = vadd.f32 %v651_v41, %v650_v40  ;;  %v782_v33 = vrot.slane %v729_v23, %v5827_v18  ;;  %vm811_vm10 = vcmp.lt.s32.totalorder %v5839_v26, 32  ;;  %vm1300_vm6 = vcmp.lt.s32.totalorder %v5785_v9, 2 }
  0xf4   : > { %v672_v47 = vsel %vm647_vm2, %v667_v42, 0.0  ;;  %v674_v50 = vsel %vm647_vm2, %v668_v46, 0.0 }
  0xf5   : > { %v654_v48 = vadd.f32 %v653_v45, %v652_v43  ;;  %v673_v49 = vadd.f32 %v672_v47, %v671_v44 }
  0xf7   : > { %655 = vadd.xlane.f32.xlu0 %v654_v48  ;;  %v675_v51 = vadd.f32 %v674_v50, %v673_v49 }
  0xfb   : > { %676 = vadd.xlane.f32.xlu0 %v675_v51 }
 0x184   : > { %v656_v52 = vpop.xlane.xlu0 %655 }
 0x185   : > { %v657_v53 = vrot.slane %v656_v52, 4 }
 0x187   : > { %v658_v54 = vadd.f32 %v657_v53, %v656_v52 }
 0x188   : > { %v677_v55 = vpop.xlane.xlu0 %676 }
 0x189   : > { %v659_v56 = vrot.slane %v658_v54, 2  ;;  %v678_v57 = vrot.slane %v677_v55, 4 }
 0x18b   : > { %v679_v58 = vadd.f32 %v678_v57, %v677_v55  ;;  %v660_v59 = vadd.f32 %v659_v56, %v658_v54 }
 0x18d   : > { %v680_v60 = vrot.slane %v679_v58, 2  ;;  %v661_v61 = vrot.slane %v660_v59, 1 }
 0x18f   : > { %v662_v62 = vadd.f32 %v661_v61, %v660_v59  ;;  %v681_v63 = vadd.f32 %v680_v60, %v679_v58 }
 0x191   : > { %5519 = vpush %v662_v62  ;;  %v682_v0 = vrot.slane %v681_v63, 1 }
 0x193   : > { %v683_v1 = vadd.f32 %v682_v0, %v681_v63 }
 0x195   : > { %5521 = vpush %v683_v1 }
 0x1c2   : > { %s5520_s17 = spop %5519 }
 0x1c3   : > { %s664_s18 = smul.f32 0.0010080645, %s5520_s17 }
 0x1c5   : > { %s686_s20 = smul.f32 %s664_s18, %s664_s18  ;;  %v689_v8 = vstv %s664_s18 }
 0x1c6   : > { %s5522_s21 = spop %5521  ;;  %v690_v10 = vsub.f32 %v5799_v27, %v689_v8  ;;  %v691_v11 = vsub.f32 %v5796_v25, %v689_v8  ;;  %v692_v12 = vsub.f32 %v633_v38, %v689_v8  ;;  %v693_v13 = vsub.f32 %v634_v35, %v689_v8 }
 0x1c7   : > { %s685_s22 = smul.f32 0.0010080645, %s5522_s21  ;;  %v5836_v25 = vadd.s32 4294967295, %v5785_v9  ;;  %v5842_v27 = vsub.s32 2, %v5785_v9 }
 0x1c9   : > { %s687_s23 = ssub.f32 %s685_s22, %s686_s20  ;;  %vm743_vm8 = vcmp.ge.s32.totalorder %v5836_v25, 0  ;;  %v831_v38 = vrot.slane %v729_v23, %v5842_v27 }
 0x1cb   : > { %s688_s25 = smax.f32 %s5664_s24, %s687_s23 }
 0x1cc   : > { %s694_s27 = sadd.f32 1e-05, %s688_s25 }
 0x1ce   : > { %v695_v2 = vstv %s694_s27 }
 0x1cf   : > { %5624 = vrsqrt.f32 %v695_v2 }
 0x1d9   : > { %v5625_v7 = vpop.eup %5624 }
 0x1da   : > { %5523 = vpush %v5625_v7 }
 0x20b   : > { %s5524_s28 = spop %5523 }
 0x20c   : > { %v698_v14 = vstv %s5524_s28 }
 0x20d   : > { %v699_v19 = vmul.f32 %v698_v14, %v690_v10  ;;  %v700_v20 = vmul.f32 %v698_v14, %v691_v11  ;;  %v701_v21 = vmul.f32 %v698_v14, %v692_v12  ;;  %v702_v22 = vmul.f32 %v698_v14, %v693_v13 }
 0x20f   : > { %v710_v28 = vmul.f32 %v4859_v15, %v699_v19  ;;  %v711_v29 = vmul.f32 %v4859_v15, %v700_v20  ;;  %v712_v30 = vmul.f32 %v4859_v15, %v701_v21  ;;  %v713_v31 = vmul.f32 %v4859_v15, %v702_v22  ;;  %v4861_v19 = vld [vmem:[%s7065_s8] ss:$0 sm:$0xff] }
 0x211   : > { %v721_v34 = vadd.f32 %v4860_v24, %v710_v28  ;;  %v722_v35 = vadd.f32 %v4860_v24, %v711_v29  ;;  %v723_v36 = vadd.f32 %v4860_v24, %v712_v30  ;;  %v724_v37 = vadd.f32 %v4860_v24, %v713_v31  ;;  %v4862_v24 = vld [vmem:[%s7066_s9] ss:$0 sm:$0xff] }
 0x213   : > { %v728_v39 = vsel %vm493_vm4, %v724_v37, 0.0  ;;  %v730_v40 = vrot.slane %v721_v34, 7  ;;  %v731_v41 = vrot.slane %v722_v35, 7  ;;  %v732_v42 = vrot.slane %v723_v36, 7 }
 0x214   : > { %v733_v43 = vrot.slane %v728_v39, 7  ;;  %v783_v44 = vmul.f32 %v782_v33, %v721_v34  ;;  %v784_v45 = vmul.f32 %v782_v33, %v722_v35  ;;  %v785_v46 = vmul.f32 %v782_v33, %v723_v36 }
 0x215   : > { %v737_v47 = vsel %vm734_vm7, %v730_v40, %v731_v41  ;;  %v786_v48 = vmul.f32 %v782_v33, %v728_v39  ;;  %v791_v49 = vrot.slane %v721_v34, 1  ;;  %v792_v50 = vrot.slane %v722_v35, 1 }
 0x216   : > { %v738_v51 = vsel %vm734_vm7, %v733_v43, %v730_v40  ;;  %v772_v52 = vmul.f32 %v770_v32, %v737_v47  ;;  %v793_v53 = vrot.slane %v723_v36, 1  ;;  %v794_v54 = vrot.slane %v728_v39, 1 }
 0x217   : > { %v763_v55 = vsel %vm743_vm8, %v738_v51, 0.0  ;;  %v735_v56 = vsel %vm734_vm7, %v732_v42, %v733_v43  ;;  %v736_v57 = vsel %vm734_vm7, %v731_v41, %v732_v42  ;;  %v798_v58 = vsel %vm795_vm9, %v791_v49, %v792_v50 }
 0x218   : > { %v771_v59 = vmul.f32 %v770_v32, %v763_v55  ;;  %v788_v60 = vadd.f32 %v784_v45, %v772_v52  ;;  %v773_v61 = vmul.f32 %v770_v32, %v736_v57  ;;  %v774_v62 = vmul.f32 %v770_v32, %v735_v56 }
 0x219   : > { %v796_v63 = vsel %vm795_vm9, %v793_v53, %v794_v54  ;;  %v797_v0 = vsel %vm795_vm9, %v792_v50, %v793_v53  ;;  %v799_v1 = vsel %vm795_vm9, %v794_v54, %v791_v49  ;;  %v832_v2 = vmul.f32 %v831_v38, %v798_v58 }
 0x21a   : > { %v787_v7 = vadd.f32 %v783_v44, %v771_v59  ;;  %v789_v8 = vadd.f32 %v785_v46, %v773_v61  ;;  %v790_v10 = vadd.f32 %v786_v48, %v774_v62  ;;  %v827_v11 = vsel %vm811_vm10, %v799_v1, 0.0 }
 0x21b   : > { %v833_v12 = vmul.f32 %v831_v38, %v797_v0  ;;  %v834_v13 = vmul.f32 %v831_v38, %v796_v63  ;;  %v835_v14 = vmul.f32 %v831_v38, %v827_v11 }
 0x21c   : > { %v836_v15 = vadd.f32 %v832_v2, %v787_v7 }
 0x21d   : > { %v837_v20 = vadd.f32 %v833_v12, %v788_v60  ;;  %v838_v21 = vadd.f32 %v834_v13, %v789_v8  ;;  %v839_v22 = vadd.f32 %v835_v14, %v790_v10  ;;  %v951_v8 = vld [vmem:[%s7069_s12] sm:$0xff]  ;;  %v952_v10 = vld [vmem:[%s7069_s12 + $0x8] sm:$0xff]  ;;  %v953_v14 = vld [vmem:[%s7069_s12 + $0x10] sm:$0xff] }
 0x21e   : > { %v847_v23 = vadd.f32 %v4861_v19, %v836_v15  ;;  %v5427_v11 = vpack.c.bf16 %v952_v10, %v951_v8  ;;  %v954_v15 = vld [vmem:[%s7069_s12 + $0x18] sm:$0xff] }
 0x21f   : > { %v848_v28 = vadd.f32 %v4861_v19, %v837_v20  ;;  %v849_v29 = vadd.f32 %v4861_v19, %v838_v21  ;;  %v850_v30 = vadd.f32 %v4861_v19, %v839_v22  ;;  %v5431_v19 = vpack.c.bf16 %v954_v15, %v953_v14  ;;  %v4870_v22 = vld [vmem:[%s7059_s2 + $0x10] sm:$0xff] }
 0x220   : > { %vm851_vm11 = vcmp.ge.f32.partialorder %v847_v23, 0.0  ;;  %v862_v31 = vmul.f32 %v4862_v24, %v847_v23  ;;  %5428 = vmatprep.subr.bf16.mxu1 %v5427_v11 }
 0x221   : > { %vm852_vm12 = vcmp.ge.f32.partialorder %v848_v28, 0.0  ;;  %vm853_vm13 = vcmp.ge.f32.partialorder %v849_v29, 0.0  ;;  %vm854_vm14 = vcmp.ge.f32.partialorder %v850_v30, 0.0  ;;  %v863_v32 = vmul.f32 %v4862_v24, %v848_v28  ;;  %5430 = vmatpush3.bf16.msra.mxu1 %v5427_v11 }
 0x222   : > { %v864_v33 = vmul.f32 %v4862_v24, %v849_v29  ;;  %v865_v34 = vmul.f32 %v4862_v24, %v850_v30  ;;  %v5879_v35 = vsel %vm851_vm11, %v847_v23, %v862_v31  ;;  %5432 = vmatprep.subr.bf16.mxu1 %v5431_v19  ;;  %v4871_v23 = vld [vmem:[%s7059_s2 + $0x18] sm:$0xff] }
 0x223   : > { %v5881_v36 = vsel %vm852_vm12, %v848_v28, %v863_v32  ;;  %v874_v37 = vsel %vm647_vm2, %v5879_v35, 0.0  ;;  %v891_v38 = vmul.f32 %v5879_v35, %v5879_v35  ;;  %v5435_v24 = vpack.c.bf16 %v4871_v23, %v4870_v22 }
 0x224   : > { %v5887_v39 = vsel %vm853_vm13, %v849_v29, %v864_v33  ;;  %v5889_v40 = vsel %vm854_vm14, %v850_v30, %v865_v34  ;;  %v875_v41 = vsel %vm647_vm2, %v5881_v36, 0.0  ;;  %v892_v42 = vmul.f32 %v5881_v36, %v5881_v36 }
 0x225   : > { %v873_v43 = vsel %vm493_vm4, %v5889_v40, 0.0  ;;  %v876_v44 = vadd.f32 %v875_v41, %v874_v37  ;;  %v893_v45 = vmul.f32 %v5887_v39, %v5887_v39  ;;  %v877_v46 = vsel %vm647_vm2, %v5887_v39, 0.0  ;;  %5434 = vmatpush3.bf16.msra.mxu1 %v5431_v19  ;;  %5436 = vmatprep.subr.bf16.mxu0 %v5435_v24 }
 0x226   : > { %v895_v47 = vsel %vm647_vm2, %v891_v38, 0.0  ;;  %v896_v48 = vsel %vm647_vm2, %v892_v42, 0.0  ;;  %v879_v51 = vsel %vm647_vm2, %v873_v43, 0.0  ;;  %v894_v52 = vmul.f32 %v873_v43, %v873_v43  ;;  %5438 = vmatpush3.bf16.msra.mxu0 %v5435_v24  ;;  %v4863_v38 = vld [vmem:[%s7067_s10] ss:$0 sm:$0xff] }
 0x227   : > { %v878_v49 = vadd.f32 %v877_v46, %v876_v44  ;;  %v897_v50 = vadd.f32 %v896_v48, %v895_v47  ;;  %v898_v53 = vsel %vm647_vm2, %v893_v45, 0.0  ;;  %vm1361_vm12 = vcmp.lt.s32.totalorder %v5785_v9, 6 }
 0x228   : > { %v900_v56 = vsel %vm647_vm2, %v894_v52, 0.0 }
 0x229   : > { %v880_v54 = vadd.f32 %v879_v51, %v878_v49  ;;  %v899_v55 = vadd.f32 %v898_v53, %v897_v50  ;;  %v4865_v50 = vld [vmem:[%s7070_s13] ss:$0 sm:$0xff] }
 0x22b   : > { %881 = vadd.xlane.f32.xlu1 %v880_v54  ;;  %v901_v57 = vadd.f32 %v900_v56, %v899_v55 }
 0x22f   : > { %902 = vadd.xlane.f32.xlu1 %v901_v57 }
 0x2b8   : > { %v882_v58 = vpop.xlane.xlu1 %881 }
 0x2b9   : > { %v883_v59 = vrot.slane %v882_v58, 4 }
 0x2bb   : > { %v884_v60 = vadd.f32 %v883_v59, %v882_v58 }
 0x2bc   : > { %v903_v61 = vpop.xlane.xlu1 %902 }
 0x2bd   : > { %v885_v62 = vrot.slane %v884_v60, 2  ;;  %v904_v63 = vrot.slane %v903_v61, 4 }
 0x2bf   : > { %v905_v0 = vadd.f32 %v904_v63, %v903_v61  ;;  %v886_v1 = vadd.f32 %v885_v62, %v884_v60 }
 0x2c1   : > { %v906_v2 = vrot.slane %v905_v0, 2  ;;  %v887_v7 = vrot.slane %v886_v1, 1 }
 0x2c3   : > { %v888_v12 = vadd.f32 %v887_v7, %v886_v1  ;;  %v907_v13 = vadd.f32 %v906_v2, %v905_v0 }
 0x2c5   : > { %5525 = vpush %v888_v12  ;;  %v908_v20 = vrot.slane %v907_v13, 1 }
 0x2c7   : > { %v909_v21 = vadd.f32 %v908_v20, %v907_v13 }
 0x2c9   : > { %5527 = vpush %v909_v21 }
 0x2f6   : > { %s5526_s15 = spop %5525 }
 0x2f7   : > { %s890_s16 = smul.f32 0.0010080645, %s5526_s15 }
 0x2f9   : > { %s912_s17 = smul.f32 %s890_s16, %s890_s16  ;;  %v915_v30 = vstv %s890_s16 }
 0x2fa   : > { %s5528_s18 = spop %5527  ;;  %v916_v31 = vsub.f32 %v5879_v35, %v915_v30  ;;  %v917_v32 = vsub.f32 %v5881_v36, %v915_v30  ;;  %v918_v33 = vsub.f32 %v5887_v39, %v915_v30  ;;  %v919_v34 = vsub.f32 %v5889_v40, %v915_v30  ;;  %v4864_v35 = vld [vmem:[%s7068_s11] ss:$0 sm:$0xff] }
 0x2fb   : > { %s911_s20 = smul.f32 0.0010080645, %s5528_s18 }
 0x2fd   : > { %s913_s21 = ssub.f32 %s911_s20, %s912_s17 }
 0x2ff   : > { %s914_s22 = smax.f32 %s5664_s24, %s913_s21 }
 0x300   : > { %s920_s19 = sadd.f32 1e-05, %s914_s22 }
 0x302   : > { %v921_v28 = vstv %s920_s19 }
 0x303   : > { %5626 = vrsqrt.f32 %v921_v28 }
 0x30d   : > { %v5627_v29 = vpop.eup %5626 }
 0x30e   : > { %5529 = vpush %v5627_v29 }
 0x33f   : > { %s5530_s23 = spop %5529 }
 0x340   : > { %v924_v37 = vstv %s5530_s23 }
 0x341   : > { %v925_v41 = vmul.f32 %v924_v37, %v916_v31  ;;  %v926_v42 = vmul.f32 %v924_v37, %v917_v32  ;;  %v927_v43 = vmul.f32 %v924_v37, %v918_v33  ;;  %v928_v44 = vmul.f32 %v924_v37, %v919_v34 }
 0x343   : > { %v937_v45 = vmul.f32 %v4863_v38, %v926_v42  ;;  %v938_v36 = vmul.f32 %v4863_v38, %v927_v43  ;;  %v936_v46 = vmul.f32 %v4863_v38, %v925_v41  ;;  %v939_v48 = vmul.f32 %v4863_v38, %v928_v44 }
 0x345   : > { %v947_v39 = vadd.f32 %v4864_v35, %v936_v46  ;;  %v948_v47 = vadd.f32 %v4864_v35, %v937_v45  ;;  %v949_v40 = vadd.f32 %v4864_v35, %v938_v36  ;;  %v950_v49 = vadd.f32 %v4864_v35, %v939_v48 }
 0x347   : > { %5249 = vmatprep.mubr.msk.f32.mxu1 %vm647_vm2, %v947_v39 }
 0x348   : > { %5250 = vmatmul.mubr.msk.f32.vlgmr.msra.gmra.mrb[0].mxu1 %vm647_vm2, %v948_v47 }
 0x349   : > { %5252 = vmatprep.mubr.msk.f32.mxu1 %vm647_vm2, %v949_v40 }
 0x34c   : > { %5253 = vmatmul.mubr.msk.f32.gmra.mrb[2].mxu1 %vm647_vm2, %v950_v49 }
 0x41b   : > { %v5251_v51 = vpop.f32.mrb[0].mxu1 }
 0x41c   : > { %v1046_v52 = vadd.f32 %v5251_v51, %v4865_v50  ;;  %v1040_v53 = vpop.f32.mrb[1].mxu1 }
 0x41d   : > { %v1041_v54 = vadd.f32 %v4865_v50, %v1040_v53 }
 0x41e   : > { %v5947_v57 = vadd.f32 %v1046_v52, %v5764_v4  ;;  %v4873_v4 = vld [vmem:[%s5782_s26 + $0x1] ss:$0 sm:$0xff] }
 0x41f   : > { %v5944_v55 = vadd.f32 %v1041_v54, %v5762_v3  ;;  %v5254_v56 = vpop.f32.mrb[2].mxu1 }
 0x420   : > { %v1056_v58 = vadd.f32 %v5254_v56, %v4865_v50  ;;  %v1050_v59 = vpop.f32.mrb[3].mxu1 }
 0x421   : > { %v1051_v60 = vadd.f32 %v4865_v50, %v1050_v59  ;;  %5259 = vmatprep.mubr.msk.f32.mxu0 %vm507_vm0, %v5944_v55 }
 0x422   : > { %v1062_v61 = vadd.f32 %v1056_v58, %v5774_v6  ;;  %5260 = vmatmul.mubr.msk.f32.vlgmr.msra.gmra.mrb[4].mxu0 %vm507_vm0, %v5947_v57  ;;  %v4879_v6 = vld [vmem:[%s7060_s3 + $0x1] ss:$0 sm:$0xff] }
 0x423   : > { %v5955_v62 = vadd.f32 %v1051_v60, %v5766_v5  ;;  %v4881_v5 = vld [vmem:[%s7061_s4 + $0x1] ss:$0 sm:$0xff] }
 0x424   : > { %v5959_v3 = vsel %vm493_vm4, %v1062_v61, 0.0 }
 0x425   : > { %5262 = vmatprep.mubr.msk.f32.mxu0 %vm507_vm0, %v5955_v62 }
 0x426   : > { %5263 = vmatmul.mubr.msk.f32.gmra.mrb[6].mxu0 %vm507_vm0, %v5959_v3 }
 0x4f5   : > { %v5261_v63 = vpop.f32.mrb[4].mxu0 }
 0x4f6   : > { %v1162_v0 = vadd.f32 %v5261_v63, %v4873_v4  ;;  %v1156_v1 = vpop.f32.mrb[5].mxu0 }
 0x4f7   : > { %v1157_v2 = vadd.f32 %v4873_v4, %v1156_v1 }
 0x4f8   : > { %v1184_v7 = vadd.f32 %v4879_v6, %v1162_v0 }
 0x4f9   : > { %v1183_v8 = vadd.f32 %v4879_v6, %v1157_v2  ;;  %v5264_v10 = vpop.f32.mrb[6].mxu0 }
 0x4fa   : > { %vm1188_vm15 = vcmp.ge.f32.partialorder %v1184_v7, 0.0  ;;  %v1200_v11 = vmul.f32 %v4881_v5, %v1184_v7  ;;  %v1172_v12 = vadd.f32 %v5264_v10, %v4873_v4  ;;  %v1166_v13 = vpop.f32.mrb[7].mxu0 }
 0x4fb   : > { %vm1187_vm1 = vcmp.ge.f32.partialorder %v1183_v8, 0.0  ;;  %v1199_v14 = vmul.f32 %v4881_v5, %v1183_v8  ;;  %v1167_v15 = vadd.f32 %v4873_v4, %v1166_v13 }
 0x4fc   : > { %v5972_v19 = vsel %vm1188_vm15, %v1184_v7, %v1200_v11  ;;  %v1186_v20 = vadd.f32 %v4879_v6, %v1172_v12  ;;  %v4883_v12 = vld [vmem:[%s7062_s5 + $0x1] ss:$0 sm:$0xff] }
 0x4fd   : > { %v5974_v21 = vsel %vm1187_vm1, %v1183_v8, %v1199_v14  ;;  %v1185_v22 = vadd.f32 %v4879_v6, %v1167_v15  ;;  %v1212_v23 = vsel %vm647_vm2, %v5972_v19, 0.0  ;;  %v1229_v24 = vmul.f32 %v5972_v19, %v5972_v19 }
 0x4fe   : > { %v1202_v28 = vmul.f32 %v4881_v5, %v1186_v20  ;;  %vm1190_vm3 = vcmp.ge.f32.partialorder %v1186_v20, 0.0  ;;  %v1211_v29 = vsel %vm647_vm2, %v5974_v21, 0.0  ;;  %v1228_v30 = vmul.f32 %v5974_v21, %v5974_v21 }
 0x4ff   : > { %vm1189_vm5 = vcmp.ge.f32.partialorder %v1185_v22, 0.0  ;;  %v1201_v31 = vmul.f32 %v4881_v5, %v1185_v22  ;;  %v1233_v34 = vsel %vm647_vm2, %v1229_v24, 0.0  ;;  %v1213_v41 = vadd.f32 %v1212_v23, %v1211_v29 }
 0x500   : > { %v1206_v32 = vsel %vm1190_vm3, %v1186_v20, %v1202_v28  ;;  %v1232_v33 = vsel %vm647_vm2, %v1228_v30, 0.0  ;;  %v6008_v23 = vadd.s32 2, %v5794_v17 }
 0x501   : > { %v1205_v37 = vsel %vm1189_vm5, %v1185_v22, %v1201_v31  ;;  %v1210_v38 = vsel %vm493_vm4, %v1206_v32, 0.0  ;;  %v1234_v45 = vadd.f32 %v1233_v34, %v1232_v33  ;;  %v4886_v22 = vld [vmem:[%s7064_s7 + $0x4] sm:$0x7] }
 0x502   : > { %v1214_v42 = vsel %vm647_vm2, %v1205_v37, 0.0  ;;  %v1230_v43 = vmul.f32 %v1205_v37, %v1205_v37  ;;  %v1231_v44 = vmul.f32 %v1210_v38, %v1210_v38  ;;  %v1216_v36 = vsel %vm647_vm2, %v1210_v38, 0.0 }
 0x503   : > { %v1215_v35 = vadd.f32 %v1214_v42, %v1213_v41  ;;  %v1336_v31 = vrot.slane %v4886_v22, %v5824_v16  ;;  %vm1377_vm13 = vcmp.lt.s32.totalorder %v6008_v23, 32  ;;  %v1397_v41 = vrot.slane %v4886_v22, %v5842_v27 }
 0x504   : > { %v1235_v46 = vsel %vm647_vm2, %v1230_v43, 0.0  ;;  %v1237_v48 = vsel %vm647_vm2, %v1231_v44, 0.0 }
 0x505   : > { %v1217_v39 = vadd.f32 %v1216_v36, %v1215_v35  ;;  %v1236_v47 = vadd.f32 %v1235_v46, %v1234_v45 }
 0x507   : > { %1218 = vadd.xlane.f32.xlu0 %v1217_v39  ;;  %v1238_v40 = vadd.f32 %v1237_v48, %v1236_v47 }
 0x509   : > { %1239 = vadd.xlane.f32.xlu1 %v1238_v40 }
 0x594   : > { %v1219_v49 = vpop.xlane.xlu0 %1218 }
 0x595   : > { %v1220_v50 = vrot.slane %v1219_v49, 4 }
 0x596   : > { %v1240_v51 = vpop.xlane.xlu1 %1239 }
 0x597   : > { %v1221_v52 = vadd.f32 %v1220_v50, %v1219_v49  ;;  %v1241_v53 = vrot.slane %v1240_v51, 4 }
 0x599   : > { %v1222_v54 = vrot.slane %v1221_v52, 2  ;;  %v1242_v56 = vadd.f32 %v1241_v53, %v1240_v51 }
 0x59b   : > { %v1243_v58 = vrot.slane %v1242_v56, 2  ;;  %v1223_v59 = vadd.f32 %v1222_v54, %v1221_v52 }
 0x59d   : > { %v1224_v60 = vrot.slane %v1223_v59, 1  ;;  %v1244_v61 = vadd.f32 %v1243_v58, %v1242_v56 }
 0x59f   : > { %v1225_v4 = vadd.f32 %v1224_v60, %v1223_v59  ;;  %v1245_v63 = vrot.slane %v1244_v61, 1 }
 0x5a1   : > { %5531 = vpush %v1225_v4  ;;  %v1246_v6 = vadd.f32 %v1245_v63, %v1244_v61 }
 0x5a3   : > { %5533 = vpush %v1246_v6 }
 0x5d2   : > { %s5532_s22 = spop %5531 }
 0x5d3   : > { %s1227_s23 = smul.f32 0.0010080645, %s5532_s22 }
 0x5d4   : > { %s5534_s25 = spop %5533 }
 0x5d5   : > { %s1249_s27 = smul.f32 %s1227_s23, %s1227_s23  ;;  %v1252_v5 = vstv %s1227_s23 }
 0x5d6   : > { %s1248_s19 = smul.f32 0.0010080645, %s5534_s25  ;;  %v1253_v2 = vsub.f32 %v5974_v21, %v1252_v5  ;;  %v1254_v7 = vsub.f32 %v5972_v19, %v1252_v5  ;;  %v1255_v8 = vsub.f32 %v1205_v37, %v1252_v5  ;;  %v1256_v10 = vsub.f32 %v1206_v32, %v1252_v5  ;;  %v4885_v19 = vld [vmem:[%s7063_s6 + $0x1] ss:$0 sm:$0xff] }
 0x5d7   : > { %v6005_v21 = vadd.s32 4294967294, %v5785_v9  ;;  %v1348_v32 = vrot.slane %v4886_v22, %v5827_v18  ;;  %v5100_v9 = vld [vmem:[%s7066_s9 + $0x7] ss:$0 sm:$0xff] }
 0x5d8   : > { %s1250_s28 = ssub.f32 %s1248_s19, %s1249_s27 }
 0x5d9   : > { %vm1309_vm11 = vcmp.ge.s32.totalorder %v6005_v21, 0 }
 0x5da   : > { %s1251_s15 = smax.f32 %s5664_s24, %s1250_s28 }
 0x5db   : > { %s1257_s16 = sadd.f32 1e-05, %s1251_s15 }
 0x5dd   : > { %v1258_v0 = vstv %s1257_s16 }
 0x5de   : > { %5628 = vrsqrt.f32 %v1258_v0 }
 0x5e8   : > { %v5629_v1 = vpop.eup %5628 }
 0x5e9   : > { %5535 = vpush %v5629_v1 }
 0x61a   : > { %s5536_s17 = spop %5535 }
 0x61b   : > { %v1261_v11 = vstv %s5536_s17 }
 0x61c   : > { %v1262_v13 = vmul.f32 %v1261_v11, %v1253_v2  ;;  %v1263_v14 = vmul.f32 %v1261_v11, %v1254_v7  ;;  %v1264_v15 = vmul.f32 %v1261_v11, %v1255_v8  ;;  %v1265_v20 = vmul.f32 %v1261_v11, %v1256_v10 }
 0x61e   : > { %v1274_v24 = vmul.f32 %v4883_v12, %v1262_v13  ;;  %v1275_v28 = vmul.f32 %v4883_v12, %v1263_v14  ;;  %v1276_v29 = vmul.f32 %v4883_v12, %v1264_v15  ;;  %v1277_v30 = vmul.f32 %v4883_v12, %v1265_v20  ;;  %v4888_v14 = vld [vmem:[%s7065_s8 + $0x1] ss:$0 sm:$0xff] }
 0x620   : > { %v1286_v33 = vadd.f32 %v4885_v19, %v1274_v24  ;;  %v1287_v34 = vadd.f32 %v4885_v19, %v1275_v28  ;;  %v1288_v37 = vadd.f32 %v4885_v19, %v1276_v29  ;;  %v1289_v38 = vadd.f32 %v4885_v19, %v1277_v30  ;;  %v4890_v24 = vld [vmem:[%s7066_s9 + $0x1] ss:$0 sm:$0xff] }
 0x622   : > { %v1293_v42 = vsel %vm493_vm4, %v1289_v38, 0.0  ;;  %v1296_v43 = vrot.slane %v1286_v33, 6  ;;  %v1297_v44 = vrot.slane %v1287_v34, 6  ;;  %v1298_v35 = vrot.slane %v1288_v37, 6 }
 0x623   : > { %v1299_v45 = vrot.slane %v1293_v42, 6  ;;  %v1349_v36 = vmul.f32 %v1348_v32, %v1286_v33  ;;  %v1350_v46 = vmul.f32 %v1348_v32, %v1287_v34  ;;  %v1351_v39 = vmul.f32 %v1348_v32, %v1288_v37 }
 0x624   : > { %v1302_v47 = vsel %vm1300_vm6, %v1297_v44, %v1298_v35  ;;  %v1303_v48 = vsel %vm1300_vm6, %v1296_v43, %v1297_v44  ;;  %v1352_v40 = vmul.f32 %v1348_v32, %v1293_v42  ;;  %v1357_v49 = vrot.slane %v1286_v33, 2 }
 0x625   : > { %v1304_v50 = vsel %vm1300_vm6, %v1299_v45, %v1296_v43  ;;  %v1338_v51 = vmul.f32 %v1336_v31, %v1303_v48  ;;  %v1339_v52 = vmul.f32 %v1336_v31, %v1302_v47  ;;  %v1358_v53 = vrot.slane %v1287_v34, 2 }
 0x626   : > { %v1329_v54 = vsel %vm1309_vm11, %v1304_v50, 0.0  ;;  %v1359_v56 = vrot.slane %v1288_v37, 2  ;;  %v1360_v58 = vrot.slane %v1293_v42, 2  ;;  %v1301_v59 = vsel %vm1300_vm6, %v1298_v35, %v1299_v45 }
 0x627   : > { %v1337_v60 = vmul.f32 %v1336_v31, %v1329_v54  ;;  %v1354_v61 = vadd.f32 %v1350_v46, %v1338_v51  ;;  %v1355_v4 = vadd.f32 %v1351_v39, %v1339_v52  ;;  %v1364_v63 = vsel %vm1361_vm12, %v1357_v49, %v1358_v53 }
 0x628   : > { %v1363_v6 = vsel %vm1361_vm12, %v1358_v53, %v1359_v56  ;;  %v1340_v0 = vmul.f32 %v1336_v31, %v1301_v59  ;;  %v1362_v1 = vsel %vm1361_vm12, %v1359_v56, %v1360_v58  ;;  %v1365_v5 = vsel %vm1361_vm12, %v1360_v58, %v1357_v49 }
 0x629   : > { %v1353_v2 = vadd.f32 %v1349_v36, %v1337_v60  ;;  %v1393_v7 = vsel %vm1377_vm13, %v1365_v5, 0.0  ;;  %v1398_v8 = vmul.f32 %v1397_v41, %v1364_v63  ;;  %v1399_v10 = vmul.f32 %v1397_v41, %v1363_v6 }
 0x62a   : > { %v1356_v11 = vadd.f32 %v1352_v40, %v1340_v0  ;;  %v1400_v12 = vmul.f32 %v1397_v41, %v1362_v1  ;;  %v1401_v13 = vmul.f32 %v1397_v41, %v1393_v7  ;;  %v4895_v7 = vld [vmem:[%s7069_s12 + $0x20] sm:$0xff] }
 0x62b   : > { %v1402_v15 = vadd.f32 %v1398_v8, %v1353_v2  ;;  %v1403_v20 = vadd.f32 %v1399_v10, %v1354_v61  ;;  %v4896_v8 = vld [vmem:[%s7069_s12 + $0x28] sm:$0xff] }
 0x62c   : > { %v1404_v22 = vadd.f32 %v1400_v12, %v1355_v4  ;;  %v1405_v19 = vadd.f32 %v1401_v13, %v1356_v11  ;;  %v5439_v10 = vpack.c.bf16 %v4896_v8, %v4895_v7 }
 0x62d   : > { %v1414_v28 = vadd.f32 %v4888_v14, %v1402_v15  ;;  %v1415_v29 = vadd.f32 %v4888_v14, %v1403_v20  ;;  %v4897_v15 = vld [vmem:[%s7069_s12 + $0x30] sm:$0xff]  ;;  %v4898_v20 = vld [vmem:[%s7069_s12 + $0x38] sm:$0xff] }
 0x62e   : > { %v1416_v30 = vadd.f32 %v4888_v14, %v1404_v22  ;;  %v1417_v31 = vadd.f32 %v4888_v14, %v1405_v19  ;;  %5440 = vmatprep.subr.bf16.mxu1 %v5439_v10  ;;  %v5443_v22 = vpack.c.bf16 %v4898_v20, %v4897_v15 }
 0x62f   : > { %vm1418_vm14 = vcmp.ge.f32.partialorder %v1414_v28, 0.0  ;;  %vm1419_vm15 = vcmp.ge.f32.partialorder %v1415_v29, 0.0  ;;  %v1430_v32 = vmul.f32 %v4890_v24, %v1414_v28  ;;  %v1431_v33 = vmul.f32 %v4890_v24, %v1415_v29  ;;  %5442 = vmatpush3.bf16.msra.mxu1 %v5439_v10 }
 0x630   : > { %vm1420_vm1 = vcmp.ge.f32.partialorder %v1416_v30, 0.0  ;;  %vm1421_vm3 = vcmp.ge.f32.partialorder %v1417_v31, 0.0  ;;  %v1432_v34 = vmul.f32 %v4890_v24, %v1416_v30  ;;  %v1433_v37 = vmul.f32 %v4890_v24, %v1417_v31  ;;  %5444 = vmatprep.subr.bf16.mxu1 %v5443_v22 }
 0x631   : > { %v6045_v38 = vsel %vm1418_vm14, %v1414_v28, %v1430_v32  ;;  %v6047_v41 = vsel %vm1419_vm15, %v1415_v29, %v1431_v33  ;;  %v4905_v28 = vld [vmem:[%s7059_s2 + $0x20] sm:$0xff]  ;;  %v4906_v29 = vld [vmem:[%s7059_s2 + $0x28] sm:$0xff] }
 0x632   : > { %v6049_v42 = vsel %vm1420_vm1, %v1416_v30, %v1432_v34  ;;  %v6051_v43 = vsel %vm1421_vm3, %v1417_v31, %v1433_v37  ;;  %v1442_v44 = vsel %vm647_vm2, %v6045_v38, 0.0  ;;  %v1443_v35 = vsel %vm647_vm2, %v6047_v41, 0.0 }
 0x633   : > { %v1441_v45 = vsel %vm493_vm4, %v6051_v43, 0.0  ;;  %v1444_v36 = vadd.f32 %v1443_v35, %v1442_v44  ;;  %v1459_v46 = vmul.f32 %v6045_v38, %v6045_v38  ;;  %v1445_v39 = vsel %vm647_vm2, %v6049_v42, 0.0  ;;  %5446 = vmatpush3.bf16.msra.mxu1 %v5443_v22 }
 0x634   : > { %v1460_v47 = vmul.f32 %v6047_v41, %v6047_v41  ;;  %v1461_v48 = vmul.f32 %v6049_v42, %v6049_v42  ;;  %v1447_v50 = vsel %vm647_vm2, %v1441_v45, 0.0  ;;  %v1462_v51 = vmul.f32 %v1441_v45, %v1441_v45 }
 0x635   : > { %v1446_v40 = vadd.f32 %v1445_v39, %v1444_v36  ;;  %v1463_v49 = vsel %vm647_vm2, %v1459_v46, 0.0  ;;  %v5447_v30 = vpack.c.bf16 %v4906_v29, %v4905_v28  ;;  %v4892_v36 = vld [vmem:[%s7067_s10 + $0x1] ss:$0 sm:$0xff] }
 0x636   : > { %v1464_v52 = vsel %vm647_vm2, %v1460_v47, 0.0  ;;  %v1466_v56 = vsel %vm647_vm2, %v1461_v48, 0.0  ;;  %v1468_v59 = vsel %vm647_vm2, %v1462_v51, 0.0 }
 0x637   : > { %v1448_v53 = vadd.f32 %v1447_v50, %v1446_v40  ;;  %v1465_v54 = vadd.f32 %v1464_v52, %v1463_v49  ;;  %5448 = vmatprep.subr.bf16.mxu0 %v5447_v30 }
 0x638   : > { %5450 = vmatpush3.bf16.msra.mxu0 %v5447_v30 }
 0x639   : > { %1449 = vadd.xlane.f32.xlu0 %v1448_v53  ;;  %v1467_v58 = vadd.f32 %v1466_v56, %v1465_v54  ;;  %v4900_v53 = vld [vmem:[%s7070_s13 + $0x1] ss:$0 sm:$0xff] }
 0x63b   : > { %v1469_v60 = vadd.f32 %v1468_v59, %v1467_v58 }
 0x63d   : > { %1470 = vadd.xlane.f32.xlu1 %v1469_v60 }
 0x6c6   : > { %v1450_v61 = vpop.xlane.xlu0 %1449 }
 0x6c7   : > { %v1451_v4 = vrot.slane %v1450_v61, 4 }
 0x6c9   : > { %v1452_v63 = vadd.f32 %v1451_v4, %v1450_v61 }
 0x6ca   : > { %v1471_v6 = vpop.xlane.xlu1 %1470 }
 0x6cb   : > { %v1453_v0 = vrot.slane %v1452_v63, 2  ;;  %v1472_v1 = vrot.slane %v1471_v6, 4 }
 0x6cd   : > { %v1473_v5 = vadd.f32 %v1472_v1, %v1471_v6  ;;  %v1454_v2 = vadd.f32 %v1453_v0, %v1452_v63 }
 0x6cf   : > { %v1474_v11 = vrot.slane %v1473_v5, 2  ;;  %v1455_v12 = vrot.slane %v1454_v2, 1 }
 0x6d1   : > { %v1456_v13 = vadd.f32 %v1455_v12, %v1454_v2  ;;  %v1475_v14 = vadd.f32 %v1474_v11, %v1473_v5 }
 0x6d3   : > { %5537 = vpush %v1456_v13  ;;  %v1476_v19 = vrot.slane %v1475_v14, 1 }
 0x6d5   : > { %v1477_v24 = vadd.f32 %v1476_v19, %v1475_v14 }
 0x6d7   : > { %5539 = vpush %v1477_v24 }
 0x704   : > { %s5538_s16 = spop %5537 }
 0x705   : > { %s1458_s17 = smul.f32 0.0010080645, %s5538_s16 }
 0x707   : > { %s1480_s18 = smul.f32 %s1458_s17, %s1458_s17  ;;  %v1483_v33 = vstv %s1458_s17 }
 0x708   : > { %s5540_s20 = spop %5539  ;;  %v1484_v34 = vsub.f32 %v6045_v38, %v1483_v33  ;;  %v1485_v37 = vsub.f32 %v6047_v41, %v1483_v33  ;;  %v1486_v44 = vsub.f32 %v6049_v42, %v1483_v33  ;;  %v1487_v35 = vsub.f32 %v6051_v43, %v1483_v33  ;;  %v4894_v38 = vld [vmem:[%s7068_s11 + $0x1] ss:$0 sm:$0xff] }
 0x709   : > { %s1479_s21 = smul.f32 0.0010080645, %s5540_s20 }
 0x70b   : > { %s1481_s22 = ssub.f32 %s1479_s21, %s1480_s18 }
 0x70d   : > { %s1482_s23 = smax.f32 %s5664_s24, %s1481_s22 }
 0x70e   : > { %s1488_s25 = sadd.f32 1e-05, %s1482_s23 }
 0x710   : > { %v1489_v31 = vstv %s1488_s25 }
 0x711   : > { %5630 = vrsqrt.f32 %v1489_v31 }
 0x71b   : > { %v5631_v32 = vpop.eup %5630 }
 0x71c   : > { %5541 = vpush %v5631_v32 }
 0x74d   : > { %s5542_s27 = spop %5541 }
 0x74e   : > { %v1492_v45 = vstv %s5542_s27 }
 0x74f   : > { %v1493_v46 = vmul.f32 %v1492_v45, %v1484_v34  ;;  %v1494_v39 = vmul.f32 %v1492_v45, %v1485_v37  ;;  %v1495_v47 = vmul.f32 %v1492_v45, %v1486_v44  ;;  %v1496_v48 = vmul.f32 %v1492_v45, %v1487_v35 }
 0x751   : > { %v1505_v40 = vmul.f32 %v4892_v36, %v1493_v46  ;;  %v1506_v41 = vmul.f32 %v4892_v36, %v1494_v39  ;;  %v1507_v49 = vmul.f32 %v4892_v36, %v1495_v47  ;;  %v1508_v51 = vmul.f32 %v4892_v36, %v1496_v48 }
 0x753   : > { %v1518_v42 = vadd.f32 %v4894_v38, %v1506_v41  ;;  %v1517_v50 = vadd.f32 %v4894_v38, %v1505_v40  ;;  %v1519_v43 = vadd.f32 %v4894_v38, %v1507_v49  ;;  %v1520_v52 = vadd.f32 %v4894_v38, %v1508_v51 }
 0x755   : > { %5273 = vmatprep.mubr.msk.f32.mxu1 %vm647_vm2, %v1517_v50 }
 0x756   : > { %5274 = vmatmul.mubr.msk.f32.vlgmr.msra.gmra.mrb[4].mxu1 %vm647_vm2, %v1518_v42 }
 0x757   : > { %5276 = vmatprep.mubr.msk.f32.mxu1 %vm647_vm2, %v1519_v43 }
 0x75a   : > { %5277 = vmatmul.mubr.msk.f32.gmra.mrb[6].mxu1 %vm647_vm2, %v1520_v52 }
 0x829   : > { %v5275_v54 = vpop.f32.mrb[4].mxu1 }
 0x82a   : > { %v1618_v56 = vadd.f32 %v5275_v54, %v4900_v53  ;;  %v1612_v58 = vpop.f32.mrb[5].mxu1 }
 0x82b   : > { %v1613_v59 = vadd.f32 %v4900_v53, %v1612_v58 }
 0x82c   : > { %v6113_v4 = vadd.f32 %v1618_v56, %v5947_v57  ;;  %v4908_v57 = vld [vmem:[%s5782_s26 + $0x2] ss:$0 sm:$0xff] }
 0x82d   : > { %v6110_v60 = vadd.f32 %v1613_v59, %v5944_v55  ;;  %v5278_v61 = vpop.f32.mrb[6].mxu1 }
 0x82e   : > { %v1628_v63 = vadd.f32 %v5278_v61, %v4900_v53  ;;  %v1622_v6 = vpop.f32.mrb[7].mxu1 }
 0x82f   : > { %v1623_v0 = vadd.f32 %v4900_v53, %v1622_v6  ;;  %5283 = vmatprep.mubr.msk.f32.mxu0 %vm507_vm0, %v6110_v60 }
 0x830   : > { %v1634_v1 = vadd.f32 %v1628_v63, %v5959_v3  ;;  %5284 = vmatmul.mubr.msk.f32.vlgmr.msra.gmra.mrb[8].mxu0 %vm507_vm0, %v6113_v4  ;;  %v4914_v3 = vld [vmem:[%s7060_s3 + $0x2] ss:$0 sm:$0xff] }
 0x831   : > { %v6121_v5 = vadd.f32 %v1623_v0, %v5955_v62  ;;  %v4916_v62 = vld [vmem:[%s7061_s4 + $0x2] ss:$0 sm:$0xff] }
 0x832   : > { %v6125_v55 = vsel %vm493_vm4, %v1634_v1, 0.0 }
 0x833   : > { %5286 = vmatprep.mubr.msk.f32.mxu0 %vm507_vm0, %v6121_v5 }
 0x834   : > { %5287 = vmatmul.mubr.msk.f32.gmra.mrb[10].mxu0 %vm507_vm0, %v6125_v55 }
 0x903   : > { %v5285_v2 = vpop.f32.mrb[8].mxu0 }
 0x904   : > { %v1734_v7 = vadd.f32 %v5285_v2, %v4908_v57  ;;  %v1728_v8 = vpop.f32.mrb[9].mxu0 }
 0x905   : > { %v1729_v10 = vadd.f32 %v4908_v57, %v1728_v8 }
 0x906   : > { %v1756_v11 = vadd.f32 %v4914_v3, %v1734_v7 }
 0x907   : > { %v1755_v12 = vadd.f32 %v4914_v3, %v1729_v10  ;;  %v5288_v13 = vpop.f32.mrb[10].mxu0 }
 0x908   : > { %vm1760_vm5 = vcmp.ge.f32.partialorder %v1756_v11, 0.0  ;;  %v1772_v14 = vmul.f32 %v4916_v62, %v1756_v11  ;;  %v1744_v15 = vadd.f32 %v5288_v13, %v4908_v57  ;;  %v1738_v20 = vpop.f32.mrb[11].mxu0 }
 0x909   : > { %vm1759_vm14 = vcmp.ge.f32.partialorder %v1755_v12, 0.0  ;;  %v1771_v22 = vmul.f32 %v4916_v62, %v1755_v12  ;;  %v1739_v19 = vadd.f32 %v4908_v57, %v1738_v20 }
 0x90a   : > { %v6138_v24 = vsel %vm1760_vm5, %v1756_v11, %v1772_v14  ;;  %v1758_v28 = vadd.f32 %v4914_v3, %v1744_v15 }
 0x90b   : > { %v6140_v29 = vsel %vm1759_vm14, %v1755_v12, %v1771_v22  ;;  %v1757_v30 = vadd.f32 %v4914_v3, %v1739_v19  ;;  %v1784_v31 = vsel %vm647_vm2, %v6138_v24, 0.0  ;;  %v1801_v32 = vmul.f32 %v6138_v24, %v6138_v24  ;;  %v4918_v22 = vld [vmem:[%s7062_s5 + $0x2] ss:$0 sm:$0xff] }
 0x90c   : > { %v1774_v33 = vmul.f32 %v4916_v62, %v1758_v28  ;;  %vm1762_vm15 = vcmp.ge.f32.partialorder %v1758_v28, 0.0  ;;  %v1783_v34 = vsel %vm647_vm2, %v6140_v29, 0.0  ;;  %v1800_v37 = vmul.f32 %v6140_v29, %v6140_v29 }
 0x90d   : > { %vm1761_vm1 = vcmp.ge.f32.partialorder %v1757_v30, 0.0  ;;  %v1773_v44 = vmul.f32 %v4916_v62, %v1757_v30  ;;  %v1805_v36 = vsel %vm647_vm2, %v1801_v32, 0.0  ;;  %v1785_v47 = vadd.f32 %v1784_v31, %v1783_v34  ;;  %v4921_v32 = vld [vmem:[%s7064_s7 + $0x8] sm:$0x7] }
 0x90e   : > { %v1778_v35 = vsel %vm1762_vm15, %v1758_v28, %v1774_v33  ;;  %v1804_v45 = vsel %vm647_vm2, %v1800_v37, 0.0 }
 0x90f   : > { %v1777_v46 = vsel %vm1761_vm1, %v1757_v30, %v1773_v44  ;;  %v1782_v39 = vsel %vm493_vm4, %v1778_v35, 0.0  ;;  %v1806_v49 = vadd.f32 %v1805_v36, %v1804_v45  ;;  %v1895_v44 = vrot.slane %v4921_v32, %v5827_v18 }
 0x910   : > { %v1786_v48 = vsel %vm647_vm2, %v1777_v46, 0.0  ;;  %v1802_v38 = vmul.f32 %v1777_v46, %v1777_v46  ;;  %v1803_v40 = vmul.f32 %v1782_v39, %v1782_v39  ;;  %v1788_v42 = vsel %vm647_vm2, %v1782_v39, 0.0 }
 0x911   : > { %v1787_v41 = vadd.f32 %v1786_v48, %v1785_v47  ;;  %v1883_v39 = vrot.slane %v4921_v32, %v5824_v16  ;;  %v1919_v47 = vrot.slane %v4921_v32, %v5842_v27 }
 0x912   : > { %v1807_v50 = vsel %vm647_vm2, %v1802_v38, 0.0  ;;  %v1809_v52 = vsel %vm647_vm2, %v1803_v40, 0.0 }
 0x913   : > { %v1789_v51 = vadd.f32 %v1788_v42, %v1787_v41  ;;  %v1808_v43 = vadd.f32 %v1807_v50, %v1806_v49 }
 0x915   : > { %1790 = vadd.xlane.f32.xlu0 %v1789_v51  ;;  %v1810_v53 = vadd.f32 %v1809_v52, %v1808_v43 }
 0x917   : > { %1811 = vadd.xlane.f32.xlu1 %v1810_v53 }
 0x9a2   : > { %v1791_v54 = vpop.xlane.xlu0 %1790 }
 0x9a3   : > { %v1792_v56 = vrot.slane %v1791_v54, 4 }
 0x9a4   : > { %v1812_v58 = vpop.xlane.xlu1 %1811 }
 0x9a5   : > { %v1793_v59 = vadd.f32 %v1792_v56, %v1791_v54  ;;  %v1813_v61 = vrot.slane %v1812_v58, 4 }
 0x9a7   : > { %v1794_v63 = vrot.slane %v1793_v59, 2  ;;  %v1814_v6 = vadd.f32 %v1813_v61, %v1812_v58 }
 0x9a9   : > { %v1815_v0 = vrot.slane %v1814_v6, 2  ;;  %v1795_v1 = vadd.f32 %v1794_v63, %v1793_v59 }
 0x9ab   : > { %v1796_v57 = vrot.slane %v1795_v1, 1  ;;  %v1816_v2 = vadd.f32 %v1815_v0, %v1814_v6 }
 0x9ad   : > { %v1797_v3 = vadd.f32 %v1796_v57, %v1795_v1  ;;  %v1817_v7 = vrot.slane %v1816_v2, 1 }
 0x9af   : > { %5543 = vpush %v1797_v3  ;;  %v1818_v8 = vadd.f32 %v1817_v7, %v1816_v2 }
 0x9b1   : > { %5545 = vpush %v1818_v8 }
 0x9e0   : > { %s5544_s25 = spop %5543 }
 0x9e1   : > { %s1799_s27 = smul.f32 0.0010080645, %s5544_s25 }
 0x9e2   : > { %s5546_s19 = spop %5545 }
 0x9e3   : > { %s1821_s28 = smul.f32 %s1799_s27, %s1799_s27  ;;  %v1824_v11 = vstv %s1799_s27 }
 0x9e4   : > { %s1820_s15 = smul.f32 0.0010080645, %s5546_s19  ;;  %v1825_v12 = vsub.f32 %v6140_v29, %v1824_v11  ;;  %v1826_v13 = vsub.f32 %v6138_v24, %v1824_v11  ;;  %v1827_v14 = vsub.f32 %v1777_v46, %v1824_v11  ;;  %v1828_v15 = vsub.f32 %v1778_v35, %v1824_v11  ;;  %v4920_v24 = vld [vmem:[%s7063_s6 + $0x2] ss:$0 sm:$0xff] }
 0x9e6   : > { %s1822_s16 = ssub.f32 %s1820_s15, %s1821_s28 }
 0x9e8   : > { %s1823_s17 = smax.f32 %s5664_s24, %s1822_s16 }
 0x9e9   : > { %s1829_s18 = sadd.f32 1e-05, %s1823_s17 }
 0x9eb   : > { %v1830_v62 = vstv %s1829_s18 }
 0x9ec   : > { %5632 = vrsqrt.f32 %v1830_v62 }
 0x9f6   : > { %v5633_v10 = vpop.eup %5632 }
 0x9f7   : > { %5547 = vpush %v5633_v10 }
 0xa28   : > { %s5548_s20 = spop %5547 }
 0xa29   : > { %v1833_v20 = vstv %s5548_s20 }
 0xa2a   : > { %v1834_v19 = vmul.f32 %v1833_v20, %v1825_v12  ;;  %v1835_v28 = vmul.f32 %v1833_v20, %v1826_v13  ;;  %v1836_v30 = vmul.f32 %v1833_v20, %v1827_v14  ;;  %v1837_v31 = vmul.f32 %v1833_v20, %v1828_v15 }
 0xa2c   : > { %v1846_v29 = vmul.f32 %v4918_v22, %v1834_v19  ;;  %v1847_v33 = vmul.f32 %v4918_v22, %v1835_v28  ;;  %v1848_v34 = vmul.f32 %v4918_v22, %v1836_v30  ;;  %v1849_v37 = vmul.f32 %v4918_v22, %v1837_v31  ;;  %v4923_v28 = vld [vmem:[%s7065_s8 + $0x2] ss:$0 sm:$0xff] }
 0xa2e   : > { %v1858_v35 = vadd.f32 %v4920_v24, %v1846_v29  ;;  %v1859_v45 = vadd.f32 %v4920_v24, %v1847_v33  ;;  %v1860_v36 = vadd.f32 %v4920_v24, %v1848_v34  ;;  %v1861_v46 = vadd.f32 %v4920_v24, %v1849_v37  ;;  %v4925_v29 = vld [vmem:[%s7066_s9 + $0x2] ss:$0 sm:$0xff] }
 0xa30   : > { %v1865_v48 = vsel %vm493_vm4, %v1861_v46, 0.0  ;;  %v1868_v38 = vrot.slane %v1858_v35, 7  ;;  %v1869_v40 = vrot.slane %v1859_v45, 7  ;;  %v1870_v41 = vrot.slane %v1860_v36, 7 }
 0xa31   : > { %v1871_v49 = vrot.slane %v1865_v48, 7  ;;  %v1896_v42 = vmul.f32 %v1895_v44, %v1858_v35  ;;  %v1897_v50 = vmul.f32 %v1895_v44, %v1859_v45  ;;  %v1898_v51 = vmul.f32 %v1895_v44, %v1860_v36 }
 0xa32   : > { %v1873_v43 = vsel %vm734_vm7, %v1869_v40, %v1870_v41  ;;  %v1874_v52 = vsel %vm734_vm7, %v1868_v38, %v1869_v40  ;;  %v1899_v53 = vmul.f32 %v1895_v44, %v1865_v48  ;;  %v1904_v54 = vrot.slane %v1858_v35, 1 }
 0xa33   : > { %v1875_v56 = vsel %vm734_vm7, %v1871_v49, %v1868_v38  ;;  %v1885_v58 = vmul.f32 %v1883_v39, %v1874_v52  ;;  %v1886_v59 = vmul.f32 %v1883_v39, %v1873_v43  ;;  %v1905_v61 = vrot.slane %v1859_v45, 1 }
 0xa34   : > { %v1876_v63 = vsel %vm743_vm8, %v1875_v56, 0.0  ;;  %v1906_v6 = vrot.slane %v1860_v36, 1  ;;  %v1907_v0 = vrot.slane %v1865_v48, 1  ;;  %v1872_v1 = vsel %vm734_vm7, %v1870_v41, %v1871_v49 }
 0xa35   : > { %v1884_v57 = vmul.f32 %v1883_v39, %v1876_v63  ;;  %v1901_v2 = vadd.f32 %v1897_v50, %v1885_v58  ;;  %v1902_v3 = vadd.f32 %v1898_v51, %v1886_v59  ;;  %v1910_v7 = vsel %vm795_vm9, %v1904_v54, %v1905_v61 }
 0xa36   : > { %v1909_v8 = vsel %vm795_vm9, %v1905_v61, %v1906_v6  ;;  %v1887_v62 = vmul.f32 %v1883_v39, %v1872_v1  ;;  %v1908_v10 = vsel %vm795_vm9, %v1906_v6, %v1907_v0  ;;  %v1911_v11 = vsel %vm795_vm9, %v1907_v0, %v1904_v54 }
 0xa37   : > { %v1900_v12 = vadd.f32 %v1896_v42, %v1884_v57  ;;  %v1915_v13 = vsel %vm811_vm10, %v1911_v11, 0.0  ;;  %v1920_v14 = vmul.f32 %v1919_v47, %v1910_v7  ;;  %v1921_v15 = vmul.f32 %v1919_v47, %v1909_v8 }
 0xa38   : > { %v1903_v20 = vadd.f32 %v1899_v53, %v1887_v62  ;;  %v1922_v22 = vmul.f32 %v1919_v47, %v1908_v10  ;;  %v1923_v19 = vmul.f32 %v1919_v47, %v1915_v13  ;;  %v4930_v13 = vld [vmem:[%s7069_s12 + $0x40] sm:$0xff] }
 0xa39   : > { %v1924_v30 = vadd.f32 %v1920_v14, %v1900_v12  ;;  %v1925_v31 = vadd.f32 %v1921_v15, %v1901_v2  ;;  %v4931_v14 = vld [vmem:[%s7069_s12 + $0x48] sm:$0xff] }
 0xa3a   : > { %v1926_v32 = vadd.f32 %v1922_v22, %v1902_v3  ;;  %v1927_v24 = vadd.f32 %v1923_v19, %v1903_v20  ;;  %v5451_v15 = vpack.c.bf16 %v4931_v14, %v4930_v13 }
 0xa3b   : > { %v1936_v33 = vadd.f32 %v4923_v28, %v1924_v30  ;;  %v1937_v34 = vadd.f32 %v4923_v28, %v1925_v31  ;;  %v4932_v30 = vld [vmem:[%s7069_s12 + $0x50] sm:$0xff]  ;;  %v4933_v31 = vld [vmem:[%s7069_s12 + $0x58] sm:$0xff] }
 0xa3c   : > { %v1938_v37 = vadd.f32 %v4923_v28, %v1926_v32  ;;  %v1939_v44 = vadd.f32 %v4923_v28, %v1927_v24  ;;  %5452 = vmatprep.subr.bf16.mxu1 %v5451_v15  ;;  %v5455_v32 = vpack.c.bf16 %v4933_v31, %v4932_v30 }
 0xa3d   : > { %vm1940_vm3 = vcmp.ge.f32.partialorder %v1936_v33, 0.0  ;;  %vm1941_vm5 = vcmp.ge.f32.partialorder %v1937_v34, 0.0  ;;  %v1952_v35 = vmul.f32 %v4925_v29, %v1936_v33  ;;  %v1953_v45 = vmul.f32 %v4925_v29, %v1937_v34  ;;  %5454 = vmatpush3.bf16.msra.mxu1 %v5451_v15 }
 0xa3e   : > { %vm1942_vm14 = vcmp.ge.f32.partialorder %v1938_v37, 0.0  ;;  %vm1943_vm15 = vcmp.ge.f32.partialorder %v1939_v44, 0.0  ;;  %v1954_v36 = vmul.f32 %v4925_v29, %v1938_v37  ;;  %v1955_v46 = vmul.f32 %v4925_v29, %v1939_v44  ;;  %5456 = vmatprep.subr.bf16.mxu1 %v5455_v32 }
 0xa3f   : > { %v6201_v39 = vsel %vm1940_vm3, %v1936_v33, %v1952_v35  ;;  %v6203_v47 = vsel %vm1941_vm5, %v1937_v34, %v1953_v45  ;;  %v4940_v33 = vld [vmem:[%s7059_s2 + $0x30] sm:$0xff]  ;;  %v4941_v34 = vld [vmem:[%s7059_s2 + $0x38] sm:$0xff] }
 0xa40   : > { %v6205_v48 = vsel %vm1942_vm14, %v1938_v37, %v1954_v36  ;;  %v6207_v38 = vsel %vm1943_vm15, %v1939_v44, %v1955_v46  ;;  %v1964_v40 = vsel %vm647_vm2, %v6201_v39, 0.0  ;;  %v1965_v41 = vsel %vm647_vm2, %v6203_v47, 0.0 }
 0xa41   : > { %v1963_v49 = vsel %vm493_vm4, %v6207_v38, 0.0  ;;  %v1966_v42 = vadd.f32 %v1965_v41, %v1964_v40  ;;  %v1981_v50 = vmul.f32 %v6201_v39, %v6201_v39  ;;  %v1967_v51 = vsel %vm647_vm2, %v6205_v48, 0.0  ;;  %5458 = vmatpush3.bf16.msra.mxu1 %v5455_v32 }
 0xa42   : > { %v1982_v43 = vmul.f32 %v6203_v47, %v6203_v47  ;;  %v1983_v52 = vmul.f32 %v6205_v48, %v6205_v48  ;;  %v1969_v56 = vsel %vm647_vm2, %v1963_v49, 0.0  ;;  %v1984_v58 = vmul.f32 %v1963_v49, %v1963_v49 }
 0xa43   : > { %v1968_v53 = vadd.f32 %v1967_v51, %v1966_v42  ;;  %v1985_v54 = vsel %vm647_vm2, %v1981_v50, 0.0  ;;  %v5459_v37 = vpack.c.bf16 %v4941_v34, %v4940_v33  ;;  %v4927_v42 = vld [vmem:[%s7067_s10 + $0x2] ss:$0 sm:$0xff] }
 0xa44   : > { %v1986_v59 = vsel %vm647_vm2, %v1982_v43, 0.0  ;;  %v1988_v6 = vsel %vm647_vm2, %v1983_v52, 0.0  ;;  %v1990_v1 = vsel %vm647_vm2, %v1984_v58, 0.0 }
 0xa45   : > { %v1970_v61 = vadd.f32 %v1969_v56, %v1968_v53  ;;  %v1987_v63 = vadd.f32 %v1986_v59, %v1985_v54  ;;  %5460 = vmatprep.subr.bf16.mxu0 %v5459_v37 }
 0xa46   : > { %5462 = vmatpush3.bf16.msra.mxu0 %v5459_v37 }
 0xa47   : > { %1971 = vadd.xlane.f32.xlu0 %v1970_v61  ;;  %v1989_v0 = vadd.f32 %v1988_v6, %v1987_v63  ;;  %v4935_v61 = vld [vmem:[%s7070_s13 + $0x2] ss:$0 sm:$0xff] }
 0xa49   : > { %v1991_v57 = vadd.f32 %v1990_v1, %v1989_v0 }
 0xa4b   : > { %1992 = vadd.xlane.f32.xlu1 %v1991_v57 }
 0xad4   : > { %v1972_v2 = vpop.xlane.xlu0 %1971 }
 0xad5   : > { %v1973_v3 = vrot.slane %v1972_v2, 4 }
 0xad7   : > { %v1974_v7 = vadd.f32 %v1973_v3, %v1972_v2 }
 0xad8   : > { %v1993_v8 = vpop.xlane.xlu1 %1992 }
 0xad9   : > { %v1975_v62 = vrot.slane %v1974_v7, 2  ;;  %v1994_v10 = vrot.slane %v1993_v8, 4 }
 0xadb   : > { %v1995_v11 = vadd.f32 %v1994_v10, %v1993_v8  ;;  %v1976_v12 = vadd.f32 %v1975_v62, %v1974_v7 }
 0xadd   : > { %v1996_v20 = vrot.slane %v1995_v11, 2  ;;  %v1977_v22 = vrot.slane %v1976_v12, 1 }
 0xadf   : > { %v1978_v19 = vadd.f32 %v1977_v22, %v1976_v12  ;;  %v1997_v28 = vadd.f32 %v1996_v20, %v1995_v11 }
 0xae1   : > { %5549 = vpush %v1978_v19  ;;  %v1998_v24 = vrot.slane %v1997_v28, 1 }
 0xae3   : > { %v1999_v29 = vadd.f32 %v1998_v24, %v1997_v28 }
 0xae5   : > { %5551 = vpush %v1999_v29 }
 0xb12   : > { %s5550_s18 = spop %5549 }
 0xb13   : > { %s1980_s20 = smul.f32 0.0010080645, %s5550_s18 }
 0xb15   : > { %s2002_s21 = smul.f32 %s1980_s20, %s1980_s20  ;;  %v2005_v45 = vstv %s1980_s20 }
 0xb16   : > { %s5552_s22 = spop %5551  ;;  %v2006_v36 = vsub.f32 %v6201_v39, %v2005_v45  ;;  %v2007_v46 = vsub.f32 %v6203_v47, %v2005_v45  ;;  %v2008_v40 = vsub.f32 %v6205_v48, %v2005_v45  ;;  %v2009_v41 = vsub.f32 %v6207_v38, %v2005_v45  ;;  %v4929_v39 = vld [vmem:[%s7068_s11 + $0x2] ss:$0 sm:$0xff] }
 0xb17   : > { %s2001_s23 = smul.f32 0.0010080645, %s5552_s22 }
 0xb19   : > { %s2003_s25 = ssub.f32 %s2001_s23, %s2002_s21 }
 0xb1b   : > { %s2004_s27 = smax.f32 %s5664_s24, %s2003_s25 }
 0xb1c   : > { %s2010_s19 = sadd.f32 1e-05, %s2004_s27 }
 0xb1e   : > { %v2011_v44 = vstv %s2010_s19 }
 0xb1f   : > { %5634 = vrsqrt.f32 %v2011_v44 }
 0xb29   : > { %v5635_v35 = vpop.eup %5634 }
 0xb2a   : > { %5553 = vpush %v5635_v35 }
 0xb5b   : > { %s5554_s28 = spop %5553 }
 0xb5c   : > { %v2014_v49 = vstv %s5554_s28 }
 0xb5d   : > { %v2015_v50 = vmul.f32 %v2014_v49, %v2006_v36  ;;  %v2016_v51 = vmul.f32 %v2014_v49, %v2007_v46  ;;  %v2017_v43 = vmul.f32 %v2014_v49, %v2008_v40  ;;  %v2018_v52 = vmul.f32 %v2014_v49, %v2009_v41 }
 0xb5f   : > { %v2027_v53 = vmul.f32 %v4927_v42, %v2015_v50  ;;  %v2028_v47 = vmul.f32 %v4927_v42, %v2016_v51  ;;  %v2029_v54 = vmul.f32 %v4927_v42, %v2017_v43  ;;  %v2030_v58 = vmul.f32 %v4927_v42, %v2018_v52 }
 0xb61   : > { %v2040_v48 = vadd.f32 %v4929_v39, %v2028_v47  ;;  %v2039_v56 = vadd.f32 %v4929_v39, %v2027_v53  ;;  %v2041_v38 = vadd.f32 %v4929_v39, %v2029_v54  ;;  %v2042_v59 = vadd.f32 %v4929_v39, %v2030_v58 }
 0xb63   : > { %5297 = vmatprep.mubr.msk.f32.mxu1 %vm647_vm2, %v2039_v56 }
 0xb64   : > { %5298 = vmatmul.mubr.msk.f32.vlgmr.msra.gmra.mrb[8].mxu1 %vm647_vm2, %v2040_v48 }
 0xb65   : > { %5300 = vmatprep.mubr.msk.f32.mxu1 %vm647_vm2, %v2041_v38 }
 0xb68   : > { %5301 = vmatmul.mubr.msk.f32.gmra.mrb[10].mxu1 %vm647_vm2, %v2042_v59 }
 0xc37   : > { %v5299_v63 = vpop.f32.mrb[8].mxu1 }
 0xc38   : > { %v2140_v6 = vadd.f32 %v5299_v63, %v4935_v61  ;;  %v2134_v0 = vpop.f32.mrb[9].mxu1 }
 0xc39   : > { %v2135_v1 = vadd.f32 %v4935_v61, %v2134_v0 }
 0xc3a   : > { %v6269_v3 = vadd.f32 %v2140_v6, %v6113_v4  ;;  %v4943_v4 = vld [vmem:[%s5782_s26 + $0x3] ss:$0 sm:$0xff] }
 0xc3b   : > { %v6266_v57 = vadd.f32 %v2135_v1, %v6110_v60  ;;  %v5302_v2 = vpop.f32.mrb[10].mxu1 }
 0xc3c   : > { %v2150_v7 = vadd.f32 %v5302_v2, %v4935_v61  ;;  %v2144_v8 = vpop.f32.mrb[11].mxu1 }
 0xc3d   : > { %v2145_v62 = vadd.f32 %v4935_v61, %v2144_v8  ;;  %5307 = vmatprep.mubr.msk.f32.mxu0 %vm507_vm0, %v6266_v57 }
 0xc3e   : > { %v2156_v10 = vadd.f32 %v2150_v7, %v6125_v55  ;;  %5308 = vmatmul.mubr.msk.f32.vlgmr.msra.gmra.mrb[12].mxu0 %vm507_vm0, %v6269_v3  ;;  %v4949_v55 = vld [vmem:[%s7060_s3 + $0x3] ss:$0 sm:$0xff] }
 0xc3f   : > { %v6277_v11 = vadd.f32 %v2145_v62, %v6121_v5  ;;  %v4951_v5 = vld [vmem:[%s7061_s4 + $0x3] ss:$0 sm:$0xff] }
 0xc40   : > { %v6281_v60 = vsel %vm493_vm4, %v2156_v10, 0.0 }
 0xc41   : > { %5310 = vmatprep.mubr.msk.f32.mxu0 %vm507_vm0, %v6277_v11 }
 0xc42   : > { %5311 = vmatmul.mubr.msk.f32.gmra.mrb[14].mxu0 %vm507_vm0, %v6281_v60 }
 0xd11   : > { %v5309_v12 = vpop.f32.mrb[12].mxu0 }
 0xd12   : > { %v2256_v13 = vadd.f32 %v5309_v12, %v4943_v4  ;;  %v2250_v14 = vpop.f32.mrb[13].mxu0 }
 0xd13   : > { %v2251_v15 = vadd.f32 %v4943_v4, %v2250_v14 }
 0xd14   : > { %v2278_v20 = vadd.f32 %v4949_v55, %v2256_v13 }
 0xd15   : > { %v2277_v22 = vadd.f32 %v4949_v55, %v2251_v15  ;;  %v5312_v19 = vpop.f32.mrb[14].mxu0 }
 0xd16   : > { %vm2282_vm1 = vcmp.ge.f32.partialorder %v2278_v20, 0.0  ;;  %v2294_v28 = vmul.f32 %v4951_v5, %v2278_v20  ;;  %v2266_v30 = vadd.f32 %v5312_v19, %v4943_v4  ;;  %v2260_v31 = vpop.f32.mrb[15].mxu0 }
 0xd17   : > { %vm2281_vm3 = vcmp.ge.f32.partialorder %v2277_v22, 0.0  ;;  %v2293_v32 = vmul.f32 %v4951_v5, %v2277_v22  ;;  %v2261_v24 = vadd.f32 %v4943_v4, %v2260_v31 }
 0xd18   : > { %v6294_v29 = vsel %vm2282_vm1, %v2278_v20, %v2294_v28  ;;  %v2280_v33 = vadd.f32 %v4949_v55, %v2266_v30 }
 0xd19   : > { %v6296_v34 = vsel %vm2281_vm3, %v2277_v22, %v2293_v32  ;;  %v2279_v37 = vadd.f32 %v4949_v55, %v2261_v24  ;;  %v2306_v44 = vsel %vm647_vm2, %v6294_v29, 0.0  ;;  %v2323_v35 = vmul.f32 %v6294_v29, %v6294_v29  ;;  %v4953_v32 = vld [vmem:[%s7062_s5 + $0x3] ss:$0 sm:$0xff] }
 0xd1a   : > { %v2296_v45 = vmul.f32 %v4951_v5, %v2280_v33  ;;  %vm2284_vm5 = vcmp.ge.f32.partialorder %v2280_v33, 0.0  ;;  %v2305_v36 = vsel %vm647_vm2, %v6296_v34, 0.0  ;;  %v2322_v46 = vmul.f32 %v6296_v34, %v6296_v34 }
 0xd1b   : > { %vm2283_vm14 = vcmp.ge.f32.partialorder %v2279_v37, 0.0  ;;  %v2295_v40 = vmul.f32 %v4951_v5, %v2279_v37  ;;  %v2327_v42 = vsel %vm647_vm2, %v2323_v35, 0.0  ;;  %v2307_v43 = vadd.f32 %v2306_v44, %v2305_v36  ;;  %v4956_v35 = vld [vmem:[%s7064_s7 + $0xc] sm:$0x7] }
 0xd1c   : > { %v2300_v41 = vsel %vm2284_vm5, %v2280_v33, %v2296_v45  ;;  %v2326_v49 = vsel %vm647_vm2, %v2322_v46, 0.0 }
 0xd1d   : > { %v2299_v50 = vsel %vm2283_vm14, %v2279_v37, %v2295_v40  ;;  %v2304_v51 = vsel %vm493_vm4, %v2300_v41, 0.0  ;;  %v2328_v54 = vadd.f32 %v2327_v42, %v2326_v49  ;;  %v2417_v40 = vrot.slane %v4956_v35, %v5827_v18 }
 0xd1e   : > { %v2308_v52 = vsel %vm647_vm2, %v2299_v50, 0.0  ;;  %v2324_v39 = vmul.f32 %v2299_v50, %v2299_v50  ;;  %v2325_v53 = vmul.f32 %v2304_v51, %v2304_v51  ;;  %v2310_v48 = vsel %vm647_vm2, %v2304_v51, 0.0 }
 0xd1f   : > { %v2309_v47 = vadd.f32 %v2308_v52, %v2307_v43  ;;  %v2405_v51 = vrot.slane %v4956_v35, %v5824_v16  ;;  %v2441_v43 = vrot.slane %v4956_v35, %v5842_v27 }
 0xd20   : > { %v2329_v56 = vsel %vm647_vm2, %v2324_v39, 0.0  ;;  %v2331_v59 = vsel %vm647_vm2, %v2325_v53, 0.0 }
 0xd21   : > { %v2311_v58 = vadd.f32 %v2310_v48, %v2309_v47  ;;  %v2330_v38 = vadd.f32 %v2329_v56, %v2328_v54 }
 0xd23   : > { %2312 = vadd.xlane.f32.xlu0 %v2311_v58  ;;  %v2332_v61 = vadd.f32 %v2331_v59, %v2330_v38 }
 0xd25   : > { %2333 = vadd.xlane.f32.xlu1 %v2332_v61 }
 0xdb0   : > { %v2313_v63 = vpop.xlane.xlu0 %2312 }
 0xdb1   : > { %v2314_v6 = vrot.slane %v2313_v63, 4 }
 0xdb2   : > { %v2334_v0 = vpop.xlane.xlu1 %2333 }
 0xdb3   : > { %v2315_v1 = vadd.f32 %v2314_v6, %v2313_v63  ;;  %v2335_v2 = vrot.slane %v2334_v0, 4 }
 0xdb5   : > { %v2316_v7 = vrot.slane %v2315_v1, 2  ;;  %v2336_v8 = vadd.f32 %v2335_v2, %v2334_v0 }
 0xdb7   : > { %v2337_v62 = vrot.slane %v2336_v8, 2  ;;  %v2317_v10 = vadd.f32 %v2316_v7, %v2315_v1 }
 0xdb9   : > { %v2318_v4 = vrot.slane %v2317_v10, 1  ;;  %v2338_v12 = vadd.f32 %v2337_v62, %v2336_v8 }
 0xdbb   : > { %v2319_v55 = vadd.f32 %v2318_v4, %v2317_v10  ;;  %v2339_v13 = vrot.slane %v2338_v12, 1 }
 0xdbd   : > { %5555 = vpush %v2319_v55  ;;  %v2340_v14 = vadd.f32 %v2339_v13, %v2338_v12 }
 0xdbf   : > { %5557 = vpush %v2340_v14 }
 0xdee   : > { %s5556_s19 = spop %5555 }
 0xdef   : > { %s2321_s28 = smul.f32 0.0010080645, %s5556_s19 }
 0xdf0   : > { %s5558_s15 = spop %5557 }
 0xdf1   : > { %s2343_s16 = smul.f32 %s2321_s28, %s2321_s28  ;;  %v2346_v20 = vstv %s2321_s28 }
 0xdf2   : > { %s2342_s17 = smul.f32 0.0010080645, %s5558_s15  ;;  %v2347_v22 = vsub.f32 %v6296_v34, %v2346_v20  ;;  %v2348_v19 = vsub.f32 %v6294_v29, %v2346_v20  ;;  %v2349_v28 = vsub.f32 %v2299_v50, %v2346_v20  ;;  %v2350_v30 = vsub.f32 %v2300_v41, %v2346_v20  ;;  %v4955_v29 = vld [vmem:[%s7063_s6 + $0x3] ss:$0 sm:$0xff] }
 0xdf4   : > { %s2344_s18 = ssub.f32 %s2342_s17, %s2343_s16 }
 0xdf6   : > { %s2345_s20 = smax.f32 %s5664_s24, %s2344_s18 }
 0xdf7   : > { %s2351_s21 = sadd.f32 1e-05, %s2345_s20 }
 0xdf9   : > { %v2352_v5 = vstv %s2351_s21 }
 0xdfa   : > { %5636 = vrsqrt.f32 %v2352_v5 }
 0xe04   : > { %v5637_v15 = vpop.eup %5636 }
 0xe05   : > { %5559 = vpush %v5637_v15 }
 0xe36   : > { %s5560_s22 = spop %5559 }
 0xe37   : > { %v2355_v31 = vstv %s5560_s22 }
 0xe38   : > { %v2356_v24 = vmul.f32 %v2355_v31, %v2347_v22  ;;  %v2357_v33 = vmul.f32 %v2355_v31, %v2348_v19  ;;  %v2358_v37 = vmul.f32 %v2355_v31, %v2349_v28  ;;  %v2359_v44 = vmul.f32 %v2355_v31, %v2350_v30 }
 0xe3a   : > { %v2368_v34 = vmul.f32 %v4953_v32, %v2356_v24  ;;  %v2369_v45 = vmul.f32 %v4953_v32, %v2357_v33  ;;  %v2370_v36 = vmul.f32 %v4953_v32, %v2358_v37  ;;  %v2371_v46 = vmul.f32 %v4953_v32, %v2359_v44  ;;  %v4958_v33 = vld [vmem:[%s7065_s8 + $0x3] ss:$0 sm:$0xff] }
 0xe3c   : > { %v2380_v41 = vadd.f32 %v4955_v29, %v2368_v34  ;;  %v2381_v49 = vadd.f32 %v4955_v29, %v2369_v45  ;;  %v2382_v42 = vadd.f32 %v4955_v29, %v2370_v36  ;;  %v2383_v50 = vadd.f32 %v4955_v29, %v2371_v46  ;;  %v4960_v34 = vld [vmem:[%s7066_s9 + $0x3] ss:$0 sm:$0xff] }
 0xe3e   : > { %v2387_v52 = vsel %vm493_vm4, %v2383_v50, 0.0  ;;  %v2390_v39 = vrot.slane %v2380_v41, 6  ;;  %v2391_v53 = vrot.slane %v2381_v49, 6  ;;  %v2392_v47 = vrot.slane %v2382_v42, 6 }
 0xe3f   : > { %v2393_v54 = vrot.slane %v2387_v52, 6  ;;  %v2418_v48 = vmul.f32 %v2417_v40, %v2380_v41  ;;  %v2419_v56 = vmul.f32 %v2417_v40, %v2381_v49  ;;  %v2420_v58 = vmul.f32 %v2417_v40, %v2382_v42 }
 0xe40   : > { %v2395_v38 = vsel %vm1300_vm6, %v2391_v53, %v2392_v47  ;;  %v2396_v59 = vsel %vm1300_vm6, %v2390_v39, %v2391_v53  ;;  %v2421_v61 = vmul.f32 %v2417_v40, %v2387_v52  ;;  %v2426_v63 = vrot.slane %v2380_v41, 2 }
 0xe41   : > { %v2397_v6 = vsel %vm1300_vm6, %v2393_v54, %v2390_v39  ;;  %v2407_v0 = vmul.f32 %v2405_v51, %v2396_v59  ;;  %v2408_v1 = vmul.f32 %v2405_v51, %v2395_v38  ;;  %v2427_v2 = vrot.slane %v2381_v49, 2 }
 0xe42   : > { %v2398_v7 = vsel %vm1309_vm11, %v2397_v6, 0.0  ;;  %v2428_v8 = vrot.slane %v2382_v42, 2  ;;  %v2429_v62 = vrot.slane %v2387_v52, 2  ;;  %v2394_v10 = vsel %vm1300_vm6, %v2392_v47, %v2393_v54 }
 0xe43   : > { %v2406_v4 = vmul.f32 %v2405_v51, %v2398_v7  ;;  %v2423_v12 = vadd.f32 %v2419_v56, %v2407_v0  ;;  %v2424_v55 = vadd.f32 %v2420_v58, %v2408_v1  ;;  %v2432_v13 = vsel %vm1361_vm12, %v2426_v63, %v2427_v2 }
 0xe44   : > { %v2431_v14 = vsel %vm1361_vm12, %v2427_v2, %v2428_v8  ;;  %v2409_v5 = vmul.f32 %v2405_v51, %v2394_v10  ;;  %v2430_v15 = vsel %vm1361_vm12, %v2428_v8, %v2429_v62  ;;  %v2433_v20 = vsel %vm1361_vm12, %v2429_v62, %v2426_v63 }
 0xe45   : > { %v2422_v22 = vadd.f32 %v2418_v48, %v2406_v4  ;;  %v2437_v19 = vsel %vm1377_vm13, %v2433_v20, 0.0  ;;  %v2442_v28 = vmul.f32 %v2441_v43, %v2432_v13  ;;  %v2443_v30 = vmul.f32 %v2441_v43, %v2431_v14 }
 0xe46   : > { %v2425_v31 = vadd.f32 %v2421_v61, %v2409_v5  ;;  %v2444_v32 = vmul.f32 %v2441_v43, %v2430_v15  ;;  %v2445_v24 = vmul.f32 %v2441_v43, %v2437_v19  ;;  %v4965_v19 = vld [vmem:[%s7069_s12 + $0x60] sm:$0xff] }
 0xe47   : > { %v2446_v37 = vadd.f32 %v2442_v28, %v2422_v22  ;;  %v2447_v44 = vadd.f32 %v2443_v30, %v2423_v12  ;;  %v4966_v28 = vld [vmem:[%s7069_s12 + $0x68] sm:$0xff] }
 0xe48   : > { %v2448_v35 = vadd.f32 %v2444_v32, %v2424_v55  ;;  %v2449_v29 = vadd.f32 %v2445_v24, %v2425_v31  ;;  %v5463_v30 = vpack.c.bf16 %v4966_v28, %v4965_v19 }
 0xe49   : > { %v2458_v45 = vadd.f32 %v4958_v33, %v2446_v37  ;;  %v2459_v36 = vadd.f32 %v4958_v33, %v2447_v44  ;;  %v4967_v37 = vld [vmem:[%s7069_s12 + $0x70] sm:$0xff]  ;;  %v4968_v44 = vld [vmem:[%s7069_s12 + $0x78] sm:$0xff] }
 0xe4a   : > { %v2460_v46 = vadd.f32 %v4958_v33, %v2448_v35  ;;  %v2461_v40 = vadd.f32 %v4958_v33, %v2449_v29  ;;  %5464 = vmatprep.subr.bf16.mxu1 %v5463_v30  ;;  %v5467_v35 = vpack.c.bf16 %v4968_v44, %v4967_v37 }
 0xe4b   : > { %vm2462_vm15 = vcmp.ge.f32.partialorder %v2458_v45, 0.0  ;;  %vm2463_vm1 = vcmp.ge.f32.partialorder %v2459_v36, 0.0  ;;  %v2474_v41 = vmul.f32 %v4960_v34, %v2458_v45  ;;  %v2475_v49 = vmul.f32 %v4960_v34, %v2459_v36  ;;  %5466 = vmatpush3.bf16.msra.mxu1 %v5463_v30 }
 0xe4c   : > { %vm2464_vm3 = vcmp.ge.f32.partialorder %v2460_v46, 0.0  ;;  %vm2465_vm5 = vcmp.ge.f32.partialorder %v2461_v40, 0.0  ;;  %v2476_v42 = vmul.f32 %v4960_v34, %v2460_v46  ;;  %v2477_v50 = vmul.f32 %v4960_v34, %v2461_v40  ;;  %5468 = vmatprep.subr.bf16.mxu1 %v5467_v35 }
 0xe4d   : > { %v6357_v51 = vsel %vm2462_vm15, %v2458_v45, %v2474_v41  ;;  %v6359_v43 = vsel %vm2463_vm1, %v2459_v36, %v2475_v49  ;;  %v4975_v45 = vld [vmem:[%s7059_s2 + $0x40] sm:$0xff]  ;;  %v4976_v36 = vld [vmem:[%s7059_s2 + $0x48] sm:$0xff] }
 0xe4e   : > { %v6361_v52 = vsel %vm2464_vm3, %v2460_v46, %v2476_v42  ;;  %v6363_v39 = vsel %vm2465_vm5, %v2461_v40, %v2477_v50  ;;  %v2486_v53 = vsel %vm647_vm2, %v6357_v51, 0.0  ;;  %v2487_v47 = vsel %vm647_vm2, %v6359_v43, 0.0 }
 0xe4f   : > { %v2485_v54 = vsel %vm493_vm4, %v6363_v39, 0.0  ;;  %v2488_v48 = vadd.f32 %v2487_v47, %v2486_v53  ;;  %v2503_v56 = vmul.f32 %v6357_v51, %v6357_v51  ;;  %v2489_v58 = vsel %vm647_vm2, %v6361_v52, 0.0  ;;  %5470 = vmatpush3.bf16.msra.mxu1 %v5467_v35 }
 0xe50   : > { %v2504_v38 = vmul.f32 %v6359_v43, %v6359_v43  ;;  %v2505_v59 = vmul.f32 %v6361_v52, %v6361_v52  ;;  %v2491_v6 = vsel %vm647_vm2, %v2485_v54, 0.0  ;;  %v2506_v0 = vmul.f32 %v2485_v54, %v2485_v54 }
 0xe51   : > { %v2490_v61 = vadd.f32 %v2489_v58, %v2488_v48  ;;  %v2507_v63 = vsel %vm647_vm2, %v2503_v56, 0.0  ;;  %v5471_v46 = vpack.c.bf16 %v4976_v36, %v4975_v45  ;;  %v4962_v48 = vld [vmem:[%s7067_s10 + $0x3] ss:$0 sm:$0xff] }
 0xe52   : > { %v2508_v1 = vsel %vm647_vm2, %v2504_v38, 0.0  ;;  %v2510_v8 = vsel %vm647_vm2, %v2505_v59, 0.0  ;;  %v2512_v10 = vsel %vm647_vm2, %v2506_v0, 0.0 }
 0xe53   : > { %v2492_v2 = vadd.f32 %v2491_v6, %v2490_v61  ;;  %v2509_v7 = vadd.f32 %v2508_v1, %v2507_v63  ;;  %5472 = vmatprep.subr.bf16.mxu0 %v5471_v46 }
 0xe54   : > { %5474 = vmatpush3.bf16.msra.mxu0 %v5471_v46 }
 0xe55   : > { %2493 = vadd.xlane.f32.xlu0 %v2492_v2  ;;  %v2511_v62 = vadd.f32 %v2510_v8, %v2509_v7  ;;  %v4970_v2 = vld [vmem:[%s7070_s13 + $0x3] ss:$0 sm:$0xff] }
 0xe57   : > { %v2513_v4 = vadd.f32 %v2512_v10, %v2511_v62 }
 0xe59   : > { %2514 = vadd.xlane.f32.xlu1 %v2513_v4 }
 0xee2   : > { %v2494_v12 = vpop.xlane.xlu0 %2493 }
 0xee3   : > { %v2495_v55 = vrot.slane %v2494_v12, 4 }
 0xee5   : > { %v2496_v13 = vadd.f32 %v2495_v55, %v2494_v12 }
 0xee6   : > { %v2515_v14 = vpop.xlane.xlu1 %2514 }
 0xee7   : > { %v2497_v5 = vrot.slane %v2496_v13, 2  ;;  %v2516_v15 = vrot.slane %v2515_v14, 4 }
 0xee9   : > { %v2517_v20 = vadd.f32 %v2516_v15, %v2515_v14  ;;  %v2498_v22 = vadd.f32 %v2497_v5, %v2496_v13 }
 0xeeb   : > { %v2518_v31 = vrot.slane %v2517_v20, 2  ;;  %v2499_v32 = vrot.slane %v2498_v22, 1 }
 0xeed   : > { %v2500_v24 = vadd.f32 %v2499_v32, %v2498_v22  ;;  %v2519_v33 = vadd.f32 %v2518_v31, %v2517_v20 }
 0xeef   : > { %5561 = vpush %v2500_v24  ;;  %v2520_v29 = vrot.slane %v2519_v33, 1 }
 0xef1   : > { %v2521_v34 = vadd.f32 %v2520_v29, %v2519_v33 }
 0xef3   : > { %5563 = vpush %v2521_v34 }
 0xf20   : > { %s5562_s21 = spop %5561 }
 0xf21   : > { %s2502_s22 = smul.f32 0.0010080645, %s5562_s21 }
 0xf23   : > { %s2524_s23 = smul.f32 %s2502_s22, %s2502_s22  ;;  %v2527_v49 = vstv %s2502_s22 }
 0xf24   : > { %s5564_s25 = spop %5563  ;;  %v2528_v42 = vsub.f32 %v6357_v51, %v2527_v49  ;;  %v2529_v50 = vsub.f32 %v6359_v43, %v2527_v49  ;;  %v2530_v53 = vsub.f32 %v6361_v52, %v2527_v49  ;;  %v2531_v47 = vsub.f32 %v6363_v39, %v2527_v49  ;;  %v4964_v51 = vld [vmem:[%s7068_s11 + $0x3] ss:$0 sm:$0xff] }
 0xf25   : > { %s2523_s27 = smul.f32 0.0010080645, %s5564_s25 }
 0xf27   : > { %s2525_s19 = ssub.f32 %s2523_s27, %s2524_s23 }
 0xf29   : > { %s2526_s28 = smax.f32 %s5664_s24, %s2525_s19 }
 0xf2a   : > { %s2532_s15 = sadd.f32 1e-05, %s2526_s28 }
 0xf2c   : > { %v2533_v40 = vstv %s2532_s15 }
 0xf2d   : > { %5638 = vrsqrt.f32 %v2533_v40 }
 0xf37   : > { %v5639_v41 = vpop.eup %5638 }
 0xf38   : > { %5565 = vpush %v5639_v41 }
 0xf69   : > { %s5566_s16 = spop %5565 }
 0xf6a   : > { %v2536_v54 = vstv %s5566_s16 }
 0xf6b   : > { %v2537_v56 = vmul.f32 %v2536_v54, %v2528_v42  ;;  %v2538_v58 = vmul.f32 %v2536_v54, %v2529_v50  ;;  %v2539_v38 = vmul.f32 %v2536_v54, %v2530_v53  ;;  %v2540_v59 = vmul.f32 %v2536_v54, %v2531_v47 }
 0xf6d   : > { %v2549_v61 = vmul.f32 %v4962_v48, %v2537_v56  ;;  %v2550_v43 = vmul.f32 %v4962_v48, %v2538_v58  ;;  %v2551_v63 = vmul.f32 %v4962_v48, %v2539_v38  ;;  %v2552_v0 = vmul.f32 %v4962_v48, %v2540_v59 }
 0xf6f   : > { %v2562_v52 = vadd.f32 %v4964_v51, %v2550_v43  ;;  %v2561_v6 = vadd.f32 %v4964_v51, %v2549_v61  ;;  %v2563_v39 = vadd.f32 %v4964_v51, %v2551_v63  ;;  %v2564_v1 = vadd.f32 %v4964_v51, %v2552_v0 }
 0xf71   : > { %5321 = vmatprep.mubr.msk.f32.mxu1 %vm647_vm2, %v2561_v6 }
 0xf72   : > { %5322 = vmatmul.mubr.msk.f32.vlgmr.msra.gmra.mrb[12].mxu1 %vm647_vm2, %v2562_v52 }
 0xf73   : > { %5324 = vmatprep.mubr.msk.f32.mxu1 %vm647_vm2, %v2563_v39 }
 0xf76   : > { %5325 = vmatmul.mubr.msk.f32.gmra.mrb[14].mxu1 %vm647_vm2, %v2564_v1 }
0x1045   : > { %v5323_v7 = vpop.f32.mrb[12].mxu1 }
0x1046   : > { %v2662_v8 = vadd.f32 %v5323_v7, %v4970_v2  ;;  %v2656_v62 = vpop.f32.mrb[13].mxu1 }
0x1047   : > { %v2657_v10 = vadd.f32 %v4970_v2, %v2656_v62 }
0x1048   : > { %v6425_v55 = vadd.f32 %v2662_v8, %v6269_v3  ;;  %v4978_v3 = vld [vmem:[%s5782_s26 + $0x4] ss:$0 sm:$0xff] }
0x1049   : > { %v6422_v4 = vadd.f32 %v2657_v10, %v6266_v57  ;;  %v5326_v12 = vpop.f32.mrb[14].mxu1 }
0x104a   : > { %v2672_v13 = vadd.f32 %v5326_v12, %v4970_v2  ;;  %v2666_v14 = vpop.f32.mrb[15].mxu1 }
0x104b   : > { %v2667_v5 = vadd.f32 %v4970_v2, %v2666_v14  ;;  %5331 = vmatprep.mubr.msk.f32.mxu0 %vm507_vm0, %v6422_v4 }
0x104c   : > { %v2678_v15 = vadd.f32 %v2672_v13, %v6281_v60  ;;  %5332 = vmatmul.mubr.msk.f32.vlgmr.msra.gmra.mrb[16].mxu0 %vm507_vm0, %v6425_v55  ;;  %v4984_v60 = vld [vmem:[%s7060_s3 + $0x4] ss:$0 sm:$0xff] }
0x104d   : > { %v6433_v20 = vadd.f32 %v2667_v5, %v6277_v11  ;;  %v4986_v11 = vld [vmem:[%s7061_s4 + $0x4] ss:$0 sm:$0xff] }
0x104e   : > { %v6437_v57 = vsel %vm493_vm4, %v2678_v15, 0.0 }
0x104f   : > { %5334 = vmatprep.mubr.msk.f32.mxu0 %vm507_vm0, %v6433_v20 }
0x1050   : > { %5335 = vmatmul.mubr.msk.f32.gmra.mrb[18].mxu0 %vm507_vm0, %v6437_v57 }
0x111f   : > { %v5333_v22 = vpop.f32.mrb[16].mxu0 }
0x1120   : > { %v2778_v19 = vadd.f32 %v5333_v22, %v4978_v3  ;;  %v2772_v28 = vpop.f32.mrb[17].mxu0 }
0x1121   : > { %v2773_v30 = vadd.f32 %v4978_v3, %v2772_v28 }
0x1122   : > { %v2800_v31 = vadd.f32 %v4984_v60, %v2778_v19 }
0x1123   : > { %v2799_v32 = vadd.f32 %v4984_v60, %v2773_v30  ;;  %v5336_v24 = vpop.f32.mrb[18].mxu0 }
0x1124   : > { %vm2804_vm14 = vcmp.ge.f32.partialorder %v2800_v31, 0.0  ;;  %v2816_v33 = vmul.f32 %v4986_v11, %v2800_v31  ;;  %v2788_v37 = vadd.f32 %v5336_v24, %v4978_v3  ;;  %v2782_v44 = vpop.f32.mrb[19].mxu0 }
0x1125   : > { %vm2803_vm15 = vcmp.ge.f32.partialorder %v2799_v32, 0.0  ;;  %v2815_v35 = vmul.f32 %v4986_v11, %v2799_v32  ;;  %v2783_v29 = vadd.f32 %v4978_v3, %v2782_v44 }
0x1126   : > { %v6450_v34 = vsel %vm2804_vm14, %v2800_v31, %v2816_v33  ;;  %v2802_v45 = vadd.f32 %v4984_v60, %v2788_v37 }
0x1127   : > { %v6452_v36 = vsel %vm2803_vm15, %v2799_v32, %v2815_v35  ;;  %v2801_v46 = vadd.f32 %v4984_v60, %v2783_v29  ;;  %v2828_v40 = vsel %vm647_vm2, %v6450_v34, 0.0  ;;  %v2845_v41 = vmul.f32 %v6450_v34, %v6450_v34  ;;  %v4988_v35 = vld [vmem:[%s7062_s5 + $0x4] ss:$0 sm:$0xff] }
0x1128   : > { %v2818_v49 = vmul.f32 %v4986_v11, %v2802_v45  ;;  %vm2806_vm1 = vcmp.ge.f32.partialorder %v2802_v45, 0.0  ;;  %v2827_v42 = vsel %vm647_vm2, %v6452_v36, 0.0  ;;  %v2844_v50 = vmul.f32 %v6452_v36, %v6452_v36 }
0x1129   : > { %vm2805_vm3 = vcmp.ge.f32.partialorder %v2801_v46, 0.0  ;;  %v2817_v53 = vmul.f32 %v4986_v11, %v2801_v46  ;;  %v2849_v48 = vsel %vm647_vm2, %v2845_v41, 0.0  ;;  %v2829_v38 = vadd.f32 %v2828_v40, %v2827_v42  ;;  %v4991_v41 = vld [vmem:[%s7064_s7 + $0x10] sm:$0x7] }
0x112a   : > { %v2822_v47 = vsel %vm2806_vm1, %v2802_v45, %v2818_v49  ;;  %v2848_v54 = vsel %vm647_vm2, %v2844_v50, 0.0 }
0x112b   : > { %v2821_v56 = vsel %vm2805_vm3, %v2801_v46, %v2817_v53  ;;  %v2826_v58 = vsel %vm493_vm4, %v2822_v47, 0.0  ;;  %v2850_v63 = vadd.f32 %v2849_v48, %v2848_v54  ;;  %v2939_v53 = vrot.slane %v4991_v41, %v5827_v18 }
0x112c   : > { %v2830_v59 = vsel %vm647_vm2, %v2821_v56, 0.0  ;;  %v2846_v51 = vmul.f32 %v2821_v56, %v2821_v56  ;;  %v2847_v61 = vmul.f32 %v2826_v58, %v2826_v58  ;;  %v2832_v52 = vsel %vm647_vm2, %v2826_v58, 0.0 }
0x112d   : > { %v2831_v43 = vadd.f32 %v2830_v59, %v2829_v38  ;;  %v2927_v58 = vrot.slane %v4991_v41, %v5824_v16  ;;  %v2963_v38 = vrot.slane %v4991_v41, %v5842_v27 }
0x112e   : > { %v2851_v6 = vsel %vm647_vm2, %v2846_v51, 0.0  ;;  %v2853_v1 = vsel %vm647_vm2, %v2847_v61, 0.0 }
0x112f   : > { %v2833_v0 = vadd.f32 %v2832_v52, %v2831_v43  ;;  %v2852_v39 = vadd.f32 %v2851_v6, %v2850_v63 }
0x1131   : > { %2834 = vadd.xlane.f32.xlu0 %v2833_v0  ;;  %v2854_v2 = vadd.f32 %v2853_v1, %v2852_v39 }
0x1133   : > { %2855 = vadd.xlane.f32.xlu1 %v2854_v2 }
0x11be   : > { %v2835_v7 = vpop.xlane.xlu0 %2834 }
0x11bf   : > { %v2836_v8 = vrot.slane %v2835_v7, 4 }
0x11c0   : > { %v2856_v62 = vpop.xlane.xlu1 %2855 }
0x11c1   : > { %v2837_v10 = vadd.f32 %v2836_v8, %v2835_v7  ;;  %v2857_v12 = vrot.slane %v2856_v62, 4 }
0x11c3   : > { %v2838_v13 = vrot.slane %v2837_v10, 2  ;;  %v2858_v14 = vadd.f32 %v2857_v12, %v2856_v62 }
0x11c5   : > { %v2859_v5 = vrot.slane %v2858_v14, 2  ;;  %v2839_v15 = vadd.f32 %v2838_v13, %v2837_v10 }
0x11c7   : > { %v2840_v3 = vrot.slane %v2839_v15, 1  ;;  %v2860_v22 = vadd.f32 %v2859_v5, %v2858_v14 }
0x11c9   : > { %v2841_v60 = vadd.f32 %v2840_v3, %v2839_v15  ;;  %v2861_v19 = vrot.slane %v2860_v22, 1 }
0x11cb   : > { %5567 = vpush %v2841_v60  ;;  %v2862_v28 = vadd.f32 %v2861_v19, %v2860_v22 }
0x11cd   : > { %5569 = vpush %v2862_v28 }
0x11fc   : > { %s5568_s15 = spop %5567 }
0x11fd   : > { %s2843_s16 = smul.f32 0.0010080645, %s5568_s15 }
0x11fe   : > { %s5570_s17 = spop %5569 }
0x11ff   : > { %s2865_s18 = smul.f32 %s2843_s16, %s2843_s16  ;;  %v2868_v31 = vstv %s2843_s16 }
0x1200   : > { %s2864_s20 = smul.f32 0.0010080645, %s5570_s17  ;;  %v2869_v32 = vsub.f32 %v6452_v36, %v2868_v31  ;;  %v2870_v24 = vsub.f32 %v6450_v34, %v2868_v31  ;;  %v2871_v33 = vsub.f32 %v2821_v56, %v2868_v31  ;;  %v2872_v37 = vsub.f32 %v2822_v47, %v2868_v31  ;;  %v4990_v34 = vld [vmem:[%s7063_s6 + $0x4] ss:$0 sm:$0xff] }
0x1202   : > { %s2866_s21 = ssub.f32 %s2864_s20, %s2865_s18 }
0x1204   : > { %s2867_s22 = smax.f32 %s5664_s24, %s2866_s21 }
0x1205   : > { %s2873_s23 = sadd.f32 1e-05, %s2867_s22 }
0x1207   : > { %v2874_v11 = vstv %s2873_s23 }
0x1208   : > { %5640 = vrsqrt.f32 %v2874_v11 }
0x1212   : > { %v5641_v30 = vpop.eup %5640 }
0x1213   : > { %5571 = vpush %v5641_v30 }
0x1244   : > { %s5572_s25 = spop %5571 }
0x1245   : > { %v2877_v44 = vstv %s5572_s25 }
0x1246   : > { %v2878_v29 = vmul.f32 %v2877_v44, %v2869_v32  ;;  %v2879_v45 = vmul.f32 %v2877_v44, %v2870_v24  ;;  %v2880_v46 = vmul.f32 %v2877_v44, %v2871_v33  ;;  %v2881_v40 = vmul.f32 %v2877_v44, %v2872_v37 }
0x1248   : > { %v2890_v36 = vmul.f32 %v4988_v35, %v2878_v29  ;;  %v2891_v49 = vmul.f32 %v4988_v35, %v2879_v45  ;;  %v2892_v42 = vmul.f32 %v4988_v35, %v2880_v46  ;;  %v2893_v50 = vmul.f32 %v4988_v35, %v2881_v40  ;;  %v4993_v45 = vld [vmem:[%s7065_s8 + $0x4] ss:$0 sm:$0xff] }
0x124a   : > { %v2902_v47 = vadd.f32 %v4990_v34, %v2890_v36  ;;  %v2903_v54 = vadd.f32 %v4990_v34, %v2891_v49  ;;  %v2904_v48 = vadd.f32 %v4990_v34, %v2892_v42  ;;  %v2905_v56 = vadd.f32 %v4990_v34, %v2893_v50  ;;  %v4995_v36 = vld [vmem:[%s7066_s9 + $0x4] ss:$0 sm:$0xff] }
0x124c   : > { %v2909_v59 = vsel %vm493_vm4, %v2905_v56, 0.0  ;;  %v2912_v51 = vrot.slane %v2902_v47, 7  ;;  %v2913_v61 = vrot.slane %v2903_v54, 7  ;;  %v2914_v43 = vrot.slane %v2904_v48, 7 }
0x124d   : > { %v2915_v63 = vrot.slane %v2909_v59, 7  ;;  %v2940_v52 = vmul.f32 %v2939_v53, %v2902_v47  ;;  %v2941_v6 = vmul.f32 %v2939_v53, %v2903_v54  ;;  %v2942_v0 = vmul.f32 %v2939_v53, %v2904_v48 }
0x124e   : > { %v2917_v39 = vsel %vm734_vm7, %v2913_v61, %v2914_v43  ;;  %v2918_v1 = vsel %vm734_vm7, %v2912_v51, %v2913_v61  ;;  %v2943_v2 = vmul.f32 %v2939_v53, %v2909_v59  ;;  %v2948_v7 = vrot.slane %v2902_v47, 1 }
0x124f   : > { %v2919_v8 = vsel %vm734_vm7, %v2915_v63, %v2912_v51  ;;  %v2929_v62 = vmul.f32 %v2927_v58, %v2918_v1  ;;  %v2930_v10 = vmul.f32 %v2927_v58, %v2917_v39  ;;  %v2949_v12 = vrot.slane %v2903_v54, 1 }
0x1250   : > { %v2920_v13 = vsel %vm743_vm8, %v2919_v8, 0.0  ;;  %v2950_v14 = vrot.slane %v2904_v48, 1  ;;  %v2951_v5 = vrot.slane %v2909_v59, 1  ;;  %v2916_v15 = vsel %vm734_vm7, %v2914_v43, %v2915_v63 }
0x1251   : > { %v2928_v3 = vmul.f32 %v2927_v58, %v2920_v13  ;;  %v2945_v22 = vadd.f32 %v2941_v6, %v2929_v62  ;;  %v2946_v60 = vadd.f32 %v2942_v0, %v2930_v10  ;;  %v2954_v19 = vsel %vm795_vm9, %v2948_v7, %v2949_v12 }
0x1252   : > { %v2953_v28 = vsel %vm795_vm9, %v2949_v12, %v2950_v14  ;;  %v2931_v11 = vmul.f32 %v2927_v58, %v2916_v15  ;;  %v2952_v30 = vsel %vm795_vm9, %v2950_v14, %v2951_v5  ;;  %v2955_v31 = vsel %vm795_vm9, %v2951_v5, %v2948_v7 }
0x1253   : > { %v2944_v32 = vadd.f32 %v2940_v52, %v2928_v3  ;;  %v2959_v24 = vsel %vm811_vm10, %v2955_v31, 0.0  ;;  %v2964_v33 = vmul.f32 %v2963_v38, %v2954_v19  ;;  %v2965_v37 = vmul.f32 %v2963_v38, %v2953_v28 }
0x1254   : > { %v2947_v44 = vadd.f32 %v2943_v2, %v2931_v11  ;;  %v2966_v35 = vmul.f32 %v2963_v38, %v2952_v30  ;;  %v2967_v29 = vmul.f32 %v2963_v38, %v2959_v24  ;;  %v5000_v24 = vld [vmem:[%s7069_s12 + $0x80] sm:$0xff] }
0x1255   : > { %v2968_v46 = vadd.f32 %v2964_v33, %v2944_v32  ;;  %v2969_v40 = vadd.f32 %v2965_v37, %v2945_v22  ;;  %v5001_v33 = vld [vmem:[%s7069_s12 + $0x88] sm:$0xff] }
0x1256   : > { %v2970_v41 = vadd.f32 %v2966_v35, %v2946_v60  ;;  %v2971_v34 = vadd.f32 %v2967_v29, %v2947_v44  ;;  %v5475_v37 = vpack.c.bf16 %v5001_v33, %v5000_v24 }
0x1257   : > { %v2980_v49 = vadd.f32 %v4993_v45, %v2968_v46  ;;  %v2981_v42 = vadd.f32 %v4993_v45, %v2969_v40  ;;  %v5002_v46 = vld [vmem:[%s7069_s12 + $0x90] sm:$0xff]  ;;  %v5003_v40 = vld [vmem:[%s7069_s12 + $0x98] sm:$0xff] }
0x1258   : > { %v2982_v50 = vadd.f32 %v4993_v45, %v2970_v41  ;;  %v2983_v53 = vadd.f32 %v4993_v45, %v2971_v34  ;;  %5476 = vmatprep.subr.bf16.mxu1 %v5475_v37  ;;  %v5479_v41 = vpack.c.bf16 %v5003_v40, %v5002_v46 }
0x1259   : > { %vm2984_vm5 = vcmp.ge.f32.partialorder %v2980_v49, 0.0  ;;  %vm2985_vm14 = vcmp.ge.f32.partialorder %v2981_v42, 0.0  ;;  %v2996_v47 = vmul.f32 %v4995_v36, %v2980_v49  ;;  %v2997_v54 = vmul.f32 %v4995_v36, %v2981_v42  ;;  %5478 = vmatpush3.bf16.msra.mxu1 %v5475_v37 }
0x125a   : > { %vm2986_vm15 = vcmp.ge.f32.partialorder %v2982_v50, 0.0  ;;  %vm2987_vm1 = vcmp.ge.f32.partialorder %v2983_v53, 0.0  ;;  %v2998_v48 = vmul.f32 %v4995_v36, %v2982_v50  ;;  %v2999_v56 = vmul.f32 %v4995_v36, %v2983_v53  ;;  %5480 = vmatprep.subr.bf16.mxu1 %v5479_v41 }
0x125b   : > { %v6513_v58 = vsel %vm2984_vm5, %v2980_v49, %v2996_v47  ;;  %v6515_v38 = vsel %vm2985_vm14, %v2981_v42, %v2997_v54  ;;  %v5010_v49 = vld [vmem:[%s7059_s2 + $0x50] sm:$0xff]  ;;  %v5011_v42 = vld [vmem:[%s7059_s2 + $0x58] sm:$0xff] }
0x125c   : > { %v6517_v59 = vsel %vm2986_vm15, %v2982_v50, %v2998_v48  ;;  %v6519_v51 = vsel %vm2987_vm1, %v2983_v53, %v2999_v56  ;;  %v3008_v61 = vsel %vm647_vm2, %v6513_v58, 0.0  ;;  %v3009_v43 = vsel %vm647_vm2, %v6515_v38, 0.0 }
0x125d   : > { %v3007_v63 = vsel %vm493_vm4, %v6519_v51, 0.0  ;;  %v3010_v52 = vadd.f32 %v3009_v43, %v3008_v61  ;;  %v3025_v6 = vmul.f32 %v6513_v58, %v6513_v58  ;;  %v3011_v0 = vsel %vm647_vm2, %v6517_v59, 0.0  ;;  %5482 = vmatpush3.bf16.msra.mxu1 %v5479_v41 }
0x125e   : > { %v3026_v39 = vmul.f32 %v6515_v38, %v6515_v38  ;;  %v3027_v1 = vmul.f32 %v6517_v59, %v6517_v59  ;;  %v3013_v8 = vsel %vm647_vm2, %v3007_v63, 0.0  ;;  %v3028_v62 = vmul.f32 %v3007_v63, %v3007_v63 }
0x125f   : > { %v3012_v2 = vadd.f32 %v3011_v0, %v3010_v52  ;;  %v3029_v7 = vsel %vm647_vm2, %v3025_v6, 0.0  ;;  %v5483_v50 = vpack.c.bf16 %v5011_v42, %v5010_v49  ;;  %v4997_v52 = vld [vmem:[%s7067_s10 + $0x4] ss:$0 sm:$0xff] }
0x1260   : > { %v3030_v10 = vsel %vm647_vm2, %v3026_v39, 0.0  ;;  %v3032_v14 = vsel %vm647_vm2, %v3027_v1, 0.0  ;;  %v3034_v15 = vsel %vm647_vm2, %v3028_v62, 0.0 }
0x1261   : > { %v3014_v12 = vadd.f32 %v3013_v8, %v3012_v2  ;;  %v3031_v13 = vadd.f32 %v3030_v10, %v3029_v7  ;;  %5484 = vmatprep.subr.bf16.mxu0 %v5483_v50 }
0x1262   : > { %5486 = vmatpush3.bf16.msra.mxu0 %v5483_v50 }
0x1263   : > { %3015 = vadd.xlane.f32.xlu0 %v3014_v12  ;;  %v3033_v5 = vadd.f32 %v3032_v14, %v3031_v13  ;;  %v5005_v12 = vld [vmem:[%s7070_s13 + $0x4] ss:$0 sm:$0xff] }
0x1265   : > { %v3035_v3 = vadd.f32 %v3034_v15, %v3033_v5 }
0x1267   : > { %3036 = vadd.xlane.f32.xlu1 %v3035_v3 }
0x12f0   : > { %v3016_v22 = vpop.xlane.xlu0 %3015 }
0x12f1   : > { %v3017_v60 = vrot.slane %v3016_v22, 4 }
0x12f3   : > { %v3018_v19 = vadd.f32 %v3017_v60, %v3016_v22 }
0x12f4   : > { %v3037_v28 = vpop.xlane.xlu1 %3036 }
0x12f5   : > { %v3019_v11 = vrot.slane %v3018_v19, 2  ;;  %v3038_v30 = vrot.slane %v3037_v28, 4 }
0x12f7   : > { %v3039_v31 = vadd.f32 %v3038_v30, %v3037_v28  ;;  %v3020_v32 = vadd.f32 %v3019_v11, %v3018_v19 }
0x12f9   : > { %v3040_v44 = vrot.slane %v3039_v31, 2  ;;  %v3021_v35 = vrot.slane %v3020_v32, 1 }
0x12fb   : > { %v3022_v29 = vadd.f32 %v3021_v35, %v3020_v32  ;;  %v3041_v45 = vadd.f32 %v3040_v44, %v3039_v31 }
0x12fd   : > { %5573 = vpush %v3022_v29  ;;  %v3042_v34 = vrot.slane %v3041_v45, 1 }
0x12ff   : > { %v3043_v36 = vadd.f32 %v3042_v34, %v3041_v45 }
0x1301   : > { %5575 = vpush %v3043_v36 }
0x132e   : > { %s5574_s23 = spop %5573 }
0x132f   : > { %s3024_s25 = smul.f32 0.0010080645, %s5574_s23 }
0x1331   : > { %s3046_s27 = smul.f32 %s3024_s25, %s3024_s25  ;;  %v3049_v54 = vstv %s3024_s25 }
0x1332   : > { %s5576_s19 = spop %5575  ;;  %v3050_v48 = vsub.f32 %v6513_v58, %v3049_v54  ;;  %v3051_v56 = vsub.f32 %v6515_v38, %v3049_v54  ;;  %v3052_v61 = vsub.f32 %v6517_v59, %v3049_v54  ;;  %v3053_v43 = vsub.f32 %v6519_v51, %v3049_v54  ;;  %v4999_v58 = vld [vmem:[%s7068_s11 + $0x4] ss:$0 sm:$0xff] }
0x1333   : > { %s3045_s28 = smul.f32 0.0010080645, %s5576_s19 }
0x1335   : > { %s3047_s15 = ssub.f32 %s3045_s28, %s3046_s27 }
0x1337   : > { %s3048_s16 = smax.f32 %s5664_s24, %s3047_s15 }
0x1338   : > { %s3054_s17 = sadd.f32 1e-05, %s3048_s16 }
0x133a   : > { %v3055_v53 = vstv %s3054_s17 }
0x133b   : > { %5642 = vrsqrt.f32 %v3055_v53 }
0x1345   : > { %v5643_v47 = vpop.eup %5642 }
0x1346   : > { %5577 = vpush %v5643_v47 }
0x1377   : > { %s5578_s18 = spop %5577 }
0x1378   : > { %v3058_v63 = vstv %s5578_s18 }
0x1379   : > { %v3059_v6 = vmul.f32 %v3058_v63, %v3050_v48  ;;  %v3060_v0 = vmul.f32 %v3058_v63, %v3051_v56  ;;  %v3061_v39 = vmul.f32 %v3058_v63, %v3052_v61  ;;  %v3062_v1 = vmul.f32 %v3058_v63, %v3053_v43 }
0x137b   : > { %v3071_v2 = vmul.f32 %v4997_v52, %v3059_v6  ;;  %v3072_v38 = vmul.f32 %v4997_v52, %v3060_v0  ;;  %v3073_v7 = vmul.f32 %v4997_v52, %v3061_v39  ;;  %v3074_v62 = vmul.f32 %v4997_v52, %v3062_v1 }
0x137d   : > { %v3084_v59 = vadd.f32 %v4999_v58, %v3072_v38  ;;  %v3083_v8 = vadd.f32 %v4999_v58, %v3071_v2  ;;  %v3085_v51 = vadd.f32 %v4999_v58, %v3073_v7  ;;  %v3086_v10 = vadd.f32 %v4999_v58, %v3074_v62 }
0x137f   : > { %5345 = vmatprep.mubr.msk.f32.mxu1 %vm647_vm2, %v3083_v8 }
0x1380   : > { %5346 = vmatmul.mubr.msk.f32.vlgmr.msra.gmra.mrb[16].mxu1 %vm647_vm2, %v3084_v59 }
0x1381   : > { %5348 = vmatprep.mubr.msk.f32.mxu1 %vm647_vm2, %v3085_v51 }
0x1384   : > { %5349 = vmatmul.mubr.msk.f32.gmra.mrb[18].mxu1 %vm647_vm2, %v3086_v10 }
0x1453   : > { %v5347_v13 = vpop.f32.mrb[16].mxu1 }
0x1454   : > { %v3184_v14 = vadd.f32 %v5347_v13, %v5005_v12  ;;  %v3178_v5 = vpop.f32.mrb[17].mxu1 }
0x1455   : > { %v3179_v15 = vadd.f32 %v5005_v12, %v3178_v5 }
0x1456   : > { %v6581_v60 = vadd.f32 %v3184_v14, %v6425_v55  ;;  %v5013_v55 = vld [vmem:[%s5782_s26 + $0x5] ss:$0 sm:$0xff] }
0x1457   : > { %v6578_v3 = vadd.f32 %v3179_v15, %v6422_v4  ;;  %v5350_v22 = vpop.f32.mrb[18].mxu1 }
0x1458   : > { %v3194_v19 = vadd.f32 %v5350_v22, %v5005_v12  ;;  %v3188_v28 = vpop.f32.mrb[19].mxu1 }
0x1459   : > { %v3189_v11 = vadd.f32 %v5005_v12, %v3188_v28  ;;  %5355 = vmatprep.mubr.msk.f32.mxu0 %vm507_vm0, %v6578_v3 }
0x145a   : > { %v3200_v30 = vadd.f32 %v3194_v19, %v6437_v57  ;;  %5356 = vmatmul.mubr.msk.f32.vlgmr.msra.gmra.mrb[20].mxu0 %vm507_vm0, %v6581_v60  ;;  %v5019_v57 = vld [vmem:[%s7060_s3 + $0x5] ss:$0 sm:$0xff] }
0x145b   : > { %v6589_v31 = vadd.f32 %v3189_v11, %v6433_v20  ;;  %v5021_v20 = vld [vmem:[%s7061_s4 + $0x5] ss:$0 sm:$0xff] }
0x145c   : > { %v6593_v4 = vsel %vm493_vm4, %v3200_v30, 0.0 }
0x145d   : > { %5358 = vmatprep.mubr.msk.f32.mxu0 %vm507_vm0, %v6589_v31 }
0x145e   : > { %5359 = vmatmul.mubr.msk.f32.gmra.mrb[22].mxu0 %vm507_vm0, %v6593_v4 }
0x152d   : > { %v5357_v32 = vpop.f32.mrb[20].mxu0 }
0x152e   : > { %v3300_v24 = vadd.f32 %v5357_v32, %v5013_v55  ;;  %v3294_v33 = vpop.f32.mrb[21].mxu0 }
0x152f   : > { %v3295_v37 = vadd.f32 %v5013_v55, %v3294_v33 }
0x1530   : > { %v3322_v44 = vadd.f32 %v5019_v57, %v3300_v24 }
0x1531   : > { %v3321_v35 = vadd.f32 %v5019_v57, %v3295_v37  ;;  %v5360_v29 = vpop.f32.mrb[22].mxu0 }
0x1532   : > { %vm3326_vm3 = vcmp.ge.f32.partialorder %v3322_v44, 0.0  ;;  %v3338_v45 = vmul.f32 %v5021_v20, %v3322_v44  ;;  %v3310_v46 = vadd.f32 %v5360_v29, %v5013_v55  ;;  %v3304_v40 = vpop.f32.mrb[23].mxu0 }
0x1533   : > { %vm3325_vm5 = vcmp.ge.f32.partialorder %v3321_v35, 0.0  ;;  %v3337_v41 = vmul.f32 %v5021_v20, %v3321_v35  ;;  %v3305_v34 = vadd.f32 %v5013_v55, %v3304_v40 }
0x1534   : > { %v6606_v36 = vsel %vm3326_vm3, %v3322_v44, %v3338_v45  ;;  %v3324_v49 = vadd.f32 %v5019_v57, %v3310_v46 }
0x1535   : > { %v6608_v42 = vsel %vm3325_vm5, %v3321_v35, %v3337_v41  ;;  %v3323_v50 = vadd.f32 %v5019_v57, %v3305_v34  ;;  %v3350_v53 = vsel %vm647_vm2, %v6606_v36, 0.0  ;;  %v3367_v47 = vmul.f32 %v6606_v36, %v6606_v36  ;;  %v5023_v41 = vld [vmem:[%s7062_s5 + $0x5] ss:$0 sm:$0xff] }
0x1536   : > { %v3340_v54 = vmul.f32 %v5021_v20, %v3324_v49  ;;  %vm3328_vm14 = vcmp.ge.f32.partialorder %v3324_v49, 0.0  ;;  %v3349_v48 = vsel %vm647_vm2, %v6608_v42, 0.0  ;;  %v3366_v56 = vmul.f32 %v6608_v42, %v6608_v42 }
0x1537   : > { %vm3327_vm15 = vcmp.ge.f32.partialorder %v3323_v50, 0.0  ;;  %v3339_v61 = vmul.f32 %v5021_v20, %v3323_v50  ;;  %v3371_v52 = vsel %vm647_vm2, %v3367_v47, 0.0  ;;  %v3351_v39 = vadd.f32 %v3350_v53, %v3349_v48  ;;  %v5026_v47 = vld [vmem:[%s7064_s7 + $0x14] sm:$0x7] }
0x1538   : > { %v3344_v43 = vsel %vm3328_vm14, %v3324_v49, %v3340_v54  ;;  %v3370_v63 = vsel %vm647_vm2, %v3366_v56, 0.0 }
0x1539   : > { %v3343_v6 = vsel %vm3327_vm15, %v3323_v50, %v3339_v61  ;;  %v3348_v0 = vsel %vm493_vm4, %v3344_v43, 0.0  ;;  %v3372_v7 = vadd.f32 %v3371_v52, %v3370_v63  ;;  %v3461_v61 = vrot.slane %v5026_v47, %v5827_v18 }
0x153a   : > { %v3352_v1 = vsel %vm647_vm2, %v3343_v6, 0.0  ;;  %v3368_v58 = vmul.f32 %v3343_v6, %v3343_v6  ;;  %v3369_v2 = vmul.f32 %v3348_v0, %v3348_v0  ;;  %v3354_v59 = vsel %vm647_vm2, %v3348_v0, 0.0 }
0x153b   : > { %v3353_v38 = vadd.f32 %v3352_v1, %v3351_v39  ;;  %v3449_v0 = vrot.slane %v5026_v47, %v5824_v16  ;;  %v3485_v39 = vrot.slane %v5026_v47, %v5842_v27 }
0x153c   : > { %v3373_v8 = vsel %vm647_vm2, %v3368_v58, 0.0  ;;  %v3375_v10 = vsel %vm647_vm2, %v3369_v2, 0.0 }
0x153d   : > { %v3355_v62 = vadd.f32 %v3354_v59, %v3353_v38  ;;  %v3374_v51 = vadd.f32 %v3373_v8, %v3372_v7 }
0x153f   : > { %3356 = vadd.xlane.f32.xlu0 %v3355_v62  ;;  %v3376_v12 = vadd.f32 %v3375_v10, %v3374_v51 }
0x1541   : > { %3377 = vadd.xlane.f32.xlu1 %v3376_v12 }
0x15cc   : > { %v3357_v13 = vpop.xlane.xlu0 %3356 }
0x15cd   : > { %v3358_v14 = vrot.slane %v3357_v13, 4 }
0x15ce   : > { %v3378_v5 = vpop.xlane.xlu1 %3377 }
0x15cf   : > { %v3359_v15 = vadd.f32 %v3358_v14, %v3357_v13  ;;  %v3379_v22 = vrot.slane %v3378_v5, 4 }
0x15d1   : > { %v3360_v19 = vrot.slane %v3359_v15, 2  ;;  %v3380_v28 = vadd.f32 %v3379_v22, %v3378_v5 }
0x15d3   : > { %v3381_v11 = vrot.slane %v3380_v28, 2  ;;  %v3361_v30 = vadd.f32 %v3360_v19, %v3359_v15 }
0x15d5   : > { %v3362_v55 = vrot.slane %v3361_v30, 1  ;;  %v3382_v32 = vadd.f32 %v3381_v11, %v3380_v28 }
0x15d7   : > { %v3363_v57 = vadd.f32 %v3362_v55, %v3361_v30  ;;  %v3383_v24 = vrot.slane %v3382_v32, 1 }
0x15d9   : > { %5579 = vpush %v3363_v57  ;;  %v3384_v33 = vadd.f32 %v3383_v24, %v3382_v32 }
0x15db   : > { %5581 = vpush %v3384_v33 }
0x160a   : > { %s5580_s17 = spop %5579 }
0x160b   : > { %s3365_s18 = smul.f32 0.0010080645, %s5580_s17 }
0x160c   : > { %s5582_s20 = spop %5581 }
0x160d   : > { %s3387_s21 = smul.f32 %s3365_s18, %s3365_s18  ;;  %v3390_v44 = vstv %s3365_s18 }
0x160e   : > { %s3386_s22 = smul.f32 0.0010080645, %s5582_s20  ;;  %v3391_v35 = vsub.f32 %v6608_v42, %v3390_v44  ;;  %v3392_v29 = vsub.f32 %v6606_v36, %v3390_v44  ;;  %v3393_v45 = vsub.f32 %v3343_v6, %v3390_v44  ;;  %v3394_v46 = vsub.f32 %v3344_v43, %v3390_v44  ;;  %v5025_v36 = vld [vmem:[%s7063_s6 + $0x5] ss:$0 sm:$0xff] }
0x1610   : > { %s3388_s23 = ssub.f32 %s3386_s22, %s3387_s21 }
0x1612   : > { %s3389_s25 = smax.f32 %s5664_s24, %s3388_s23 }
0x1613   : > { %s3395_s27 = sadd.f32 1e-05, %s3389_s25 }
0x1615   : > { %v3396_v20 = vstv %s3395_s27 }
0x1616   : > { %5644 = vrsqrt.f32 %v3396_v20 }
0x1620   : > { %v5645_v37 = vpop.eup %5644 }
0x1621   : > { %5583 = vpush %v5645_v37 }
0x1652   : > { %s5584_s19 = spop %5583 }
0x1653   : > { %v3399_v40 = vstv %s5584_s19 }
0x1654   : > { %v3400_v34 = vmul.f32 %v3399_v40, %v3391_v35  ;;  %v3401_v49 = vmul.f32 %v3399_v40, %v3392_v29  ;;  %v3402_v50 = vmul.f32 %v3399_v40, %v3393_v45  ;;  %v3403_v53 = vmul.f32 %v3399_v40, %v3394_v46 }
0x1656   : > { %v3412_v42 = vmul.f32 %v5023_v41, %v3400_v34  ;;  %v3413_v54 = vmul.f32 %v5023_v41, %v3401_v49  ;;  %v3414_v48 = vmul.f32 %v5023_v41, %v3402_v50  ;;  %v3415_v56 = vmul.f32 %v5023_v41, %v3403_v53  ;;  %v5028_v49 = vld [vmem:[%s7065_s8 + $0x5] ss:$0 sm:$0xff] }
0x1658   : > { %v3424_v43 = vadd.f32 %v5025_v36, %v3412_v42  ;;  %v3425_v63 = vadd.f32 %v5025_v36, %v3413_v54  ;;  %v3426_v52 = vadd.f32 %v5025_v36, %v3414_v48  ;;  %v3427_v6 = vadd.f32 %v5025_v36, %v3415_v56  ;;  %v5030_v42 = vld [vmem:[%s7066_s9 + $0x5] ss:$0 sm:$0xff] }
0x165a   : > { %v3431_v1 = vsel %vm493_vm4, %v3427_v6, 0.0  ;;  %v3434_v58 = vrot.slane %v3424_v43, 6  ;;  %v3435_v2 = vrot.slane %v3425_v63, 6  ;;  %v3436_v38 = vrot.slane %v3426_v52, 6 }
0x165b   : > { %v3437_v7 = vrot.slane %v3431_v1, 6  ;;  %v3462_v59 = vmul.f32 %v3461_v61, %v3424_v43  ;;  %v3463_v8 = vmul.f32 %v3461_v61, %v3425_v63  ;;  %v3464_v62 = vmul.f32 %v3461_v61, %v3426_v52 }
0x165c   : > { %v3439_v51 = vsel %vm1300_vm6, %v3435_v2, %v3436_v38  ;;  %v3440_v10 = vsel %vm1300_vm6, %v3434_v58, %v3435_v2  ;;  %v3465_v12 = vmul.f32 %v3461_v61, %v3431_v1  ;;  %v3470_v13 = vrot.slane %v3424_v43, 2 }
0x165d   : > { %v3441_v14 = vsel %vm1300_vm6, %v3437_v7, %v3434_v58  ;;  %v3451_v5 = vmul.f32 %v3449_v0, %v3440_v10  ;;  %v3452_v15 = vmul.f32 %v3449_v0, %v3439_v51  ;;  %v3471_v22 = vrot.slane %v3425_v63, 2 }
0x165e   : > { %v3442_v19 = vsel %vm1309_vm11, %v3441_v14, 0.0  ;;  %v3472_v28 = vrot.slane %v3426_v52, 2  ;;  %v3473_v11 = vrot.slane %v3431_v1, 2  ;;  %v3438_v30 = vsel %vm1300_vm6, %v3436_v38, %v3437_v7 }
0x165f   : > { %v3450_v55 = vmul.f32 %v3449_v0, %v3442_v19  ;;  %v3467_v32 = vadd.f32 %v3463_v8, %v3451_v5  ;;  %v3468_v57 = vadd.f32 %v3464_v62, %v3452_v15  ;;  %v3476_v24 = vsel %vm1361_vm12, %v3470_v13, %v3471_v22 }
0x1660   : > { %v3475_v33 = vsel %vm1361_vm12, %v3471_v22, %v3472_v28  ;;  %v3453_v20 = vmul.f32 %v3449_v0, %v3438_v30  ;;  %v3474_v37 = vsel %vm1361_vm12, %v3472_v28, %v3473_v11  ;;  %v3477_v44 = vsel %vm1361_vm12, %v3473_v11, %v3470_v13 }
0x1661   : > { %v3466_v35 = vadd.f32 %v3462_v59, %v3450_v55  ;;  %v3481_v29 = vsel %vm1377_vm13, %v3477_v44, 0.0  ;;  %v3486_v45 = vmul.f32 %v3485_v39, %v3476_v24  ;;  %v3487_v46 = vmul.f32 %v3485_v39, %v3475_v33 }
0x1662   : > { %v3469_v40 = vadd.f32 %v3465_v12, %v3453_v20  ;;  %v3488_v41 = vmul.f32 %v3485_v39, %v3474_v37  ;;  %v3489_v34 = vmul.f32 %v3485_v39, %v3481_v29  ;;  %v5035_v29 = vld [vmem:[%s7069_s12 + $0xa0] sm:$0xff] }
0x1663   : > { %v3490_v50 = vadd.f32 %v3486_v45, %v3466_v35  ;;  %v3491_v53 = vadd.f32 %v3487_v46, %v3467_v32  ;;  %v5036_v45 = vld [vmem:[%s7069_s12 + $0xa8] sm:$0xff] }
0x1664   : > { %v3492_v47 = vadd.f32 %v3488_v41, %v3468_v57  ;;  %v3493_v36 = vadd.f32 %v3489_v34, %v3469_v40  ;;  %v5487_v46 = vpack.c.bf16 %v5036_v45, %v5035_v29 }
0x1665   : > { %v3502_v54 = vadd.f32 %v5028_v49, %v3490_v50  ;;  %v3503_v48 = vadd.f32 %v5028_v49, %v3491_v53  ;;  %v5037_v50 = vld [vmem:[%s7069_s12 + $0xb0] sm:$0xff]  ;;  %v5038_v53 = vld [vmem:[%s7069_s12 + $0xb8] sm:$0xff] }
0x1666   : > { %v3504_v56 = vadd.f32 %v5028_v49, %v3492_v47  ;;  %v3505_v61 = vadd.f32 %v5028_v49, %v3493_v36  ;;  %5488 = vmatprep.subr.bf16.mxu1 %v5487_v46  ;;  %v5491_v47 = vpack.c.bf16 %v5038_v53, %v5037_v50 }
0x1667   : > { %vm3506_vm1 = vcmp.ge.f32.partialorder %v3502_v54, 0.0  ;;  %vm3507_vm3 = vcmp.ge.f32.partialorder %v3503_v48, 0.0  ;;  %v3518_v43 = vmul.f32 %v5030_v42, %v3502_v54  ;;  %v3519_v63 = vmul.f32 %v5030_v42, %v3503_v48  ;;  %5490 = vmatpush3.bf16.msra.mxu1 %v5487_v46 }
0x1668   : > { %vm3508_vm5 = vcmp.ge.f32.partialorder %v3504_v56, 0.0  ;;  %vm3509_vm14 = vcmp.ge.f32.partialorder %v3505_v61, 0.0  ;;  %v3520_v52 = vmul.f32 %v5030_v42, %v3504_v56  ;;  %v3521_v6 = vmul.f32 %v5030_v42, %v3505_v61  ;;  %5492 = vmatprep.subr.bf16.mxu1 %v5491_v47 }
0x1669   : > { %v6669_v0 = vsel %vm3506_vm1, %v3502_v54, %v3518_v43  ;;  %v6671_v39 = vsel %vm3507_vm3, %v3503_v48, %v3519_v63  ;;  %v5045_v54 = vld [vmem:[%s7059_s2 + $0x60] sm:$0xff]  ;;  %v5046_v48 = vld [vmem:[%s7059_s2 + $0x68] sm:$0xff] }
0x166a   : > { %v6673_v1 = vsel %vm3508_vm5, %v3504_v56, %v3520_v52  ;;  %v6675_v58 = vsel %vm3509_vm14, %v3505_v61, %v3521_v6  ;;  %v3530_v2 = vsel %vm647_vm2, %v6669_v0, 0.0  ;;  %v3531_v38 = vsel %vm647_vm2, %v6671_v39, 0.0 }
0x166b   : > { %v3529_v7 = vsel %vm493_vm4, %v6675_v58, 0.0  ;;  %v3532_v59 = vadd.f32 %v3531_v38, %v3530_v2  ;;  %v3547_v8 = vmul.f32 %v6669_v0, %v6669_v0  ;;  %v3533_v62 = vsel %vm647_vm2, %v6673_v1, 0.0  ;;  %5494 = vmatpush3.bf16.msra.mxu1 %v5491_v47 }
0x166c   : > { %v3548_v51 = vmul.f32 %v6671_v39, %v6671_v39  ;;  %v3549_v10 = vmul.f32 %v6673_v1, %v6673_v1  ;;  %v3535_v14 = vsel %vm647_vm2, %v3529_v7, 0.0  ;;  %v3550_v5 = vmul.f32 %v3529_v7, %v3529_v7 }
0x166d   : > { %v3534_v12 = vadd.f32 %v3533_v62, %v3532_v59  ;;  %v3551_v13 = vsel %vm647_vm2, %v3547_v8, 0.0  ;;  %v5495_v56 = vpack.c.bf16 %v5046_v48, %v5045_v54  ;;  %v5032_v59 = vld [vmem:[%s7067_s10 + $0x5] ss:$0 sm:$0xff] }
0x166e   : > { %v3552_v15 = vsel %vm647_vm2, %v3548_v51, 0.0  ;;  %v3554_v28 = vsel %vm647_vm2, %v3549_v10, 0.0  ;;  %v3556_v30 = vsel %vm647_vm2, %v3550_v5, 0.0 }
0x166f   : > { %v3536_v22 = vadd.f32 %v3535_v14, %v3534_v12  ;;  %v3553_v19 = vadd.f32 %v3552_v15, %v3551_v13  ;;  %5496 = vmatprep.subr.bf16.mxu0 %v5495_v56 }
0x1670   : > { %5498 = vmatpush3.bf16.msra.mxu0 %v5495_v56 }
0x1671   : > { %3537 = vadd.xlane.f32.xlu0 %v3536_v22  ;;  %v3555_v11 = vadd.f32 %v3554_v28, %v3553_v19  ;;  %v5040_v22 = vld [vmem:[%s7070_s13 + $0x5] ss:$0 sm:$0xff] }
0x1673   : > { %v3557_v55 = vadd.f32 %v3556_v30, %v3555_v11 }
0x1675   : > { %3558 = vadd.xlane.f32.xlu1 %v3557_v55 }
0x16fe   : > { %v3538_v32 = vpop.xlane.xlu0 %3537 }
0x16ff   : > { %v3539_v57 = vrot.slane %v3538_v32, 4 }
0x1701   : > { %v3540_v24 = vadd.f32 %v3539_v57, %v3538_v32 }
0x1702   : > { %v3559_v33 = vpop.xlane.xlu1 %3558 }
0x1703   : > { %v3541_v20 = vrot.slane %v3540_v24, 2  ;;  %v3560_v37 = vrot.slane %v3559_v33, 4 }
0x1705   : > { %v3561_v44 = vadd.f32 %v3560_v37, %v3559_v33  ;;  %v3542_v35 = vadd.f32 %v3541_v20, %v3540_v24 }
0x1707   : > { %v3562_v40 = vrot.slane %v3561_v44, 2  ;;  %v3543_v41 = vrot.slane %v3542_v35, 1 }
0x1709   : > { %v3544_v34 = vadd.f32 %v3543_v41, %v3542_v35  ;;  %v3563_v49 = vadd.f32 %v3562_v40, %v3561_v44 }
0x170b   : > { %5585 = vpush %v3544_v34  ;;  %v3564_v36 = vrot.slane %v3563_v49, 1 }
0x170d   : > { %v3565_v42 = vadd.f32 %v3564_v36, %v3563_v49 }
0x170f   : > { %5587 = vpush %v3565_v42 }
0x173c   : > { %s5586_s27 = spop %5585 }
0x173d   : > { %s3546_s19 = smul.f32 0.0010080645, %s5586_s27 }
0x173f   : > { %s3568_s28 = smul.f32 %s3546_s19, %s3546_s19  ;;  %v3571_v63 = vstv %s3546_s19 }
0x1740   : > { %s5588_s15 = spop %5587  ;;  %v3572_v52 = vsub.f32 %v6669_v0, %v3571_v63  ;;  %v3573_v6 = vsub.f32 %v6671_v39, %v3571_v63  ;;  %v3574_v2 = vsub.f32 %v6673_v1, %v3571_v63  ;;  %v3575_v38 = vsub.f32 %v6675_v58, %v3571_v63  ;;  %v5034_v0 = vld [vmem:[%s7068_s11 + $0x5] ss:$0 sm:$0xff] }
0x1741   : > { %s3567_s16 = smul.f32 0.0010080645, %s5588_s15 }
0x1743   : > { %s3569_s17 = ssub.f32 %s3567_s16, %s3568_s28 }
0x1745   : > { %s3570_s18 = smax.f32 %s5664_s24, %s3569_s17 }
0x1746   : > { %s3576_s20 = sadd.f32 1e-05, %s3570_s18 }
0x1748   : > { %v3577_v61 = vstv %s3576_s20 }
0x1749   : > { %5646 = vrsqrt.f32 %v3577_v61 }
0x1753   : > { %v5647_v43 = vpop.eup %5646 }
0x1754   : > { %5589 = vpush %v5647_v43 }
0x1785   : > { %s5590_s21 = spop %5589 }
0x1786   : > { %v3580_v7 = vstv %s5590_s21 }
0x1787   : > { %v3581_v8 = vmul.f32 %v3580_v7, %v3572_v52  ;;  %v3582_v62 = vmul.f32 %v3580_v7, %v3573_v6  ;;  %v3583_v51 = vmul.f32 %v3580_v7, %v3574_v2  ;;  %v3584_v10 = vmul.f32 %v3580_v7, %v3575_v38 }
0x1789   : > { %v3593_v12 = vmul.f32 %v5032_v59, %v3581_v8  ;;  %v3594_v39 = vmul.f32 %v5032_v59, %v3582_v62  ;;  %v3595_v13 = vmul.f32 %v5032_v59, %v3583_v51  ;;  %v3596_v5 = vmul.f32 %v5032_v59, %v3584_v10 }
0x178b   : > { %v3606_v1 = vadd.f32 %v5034_v0, %v3594_v39  ;;  %v3605_v14 = vadd.f32 %v5034_v0, %v3593_v12  ;;  %v3607_v58 = vadd.f32 %v5034_v0, %v3595_v13  ;;  %v3608_v15 = vadd.f32 %v5034_v0, %v3596_v5 }
0x178d   : > { %5369 = vmatprep.mubr.msk.f32.mxu1 %vm647_vm2, %v3605_v14 }
0x178e   : > { %5370 = vmatmul.mubr.msk.f32.vlgmr.msra.gmra.mrb[20].mxu1 %vm647_vm2, %v3606_v1 }
0x178f   : > { %5372 = vmatprep.mubr.msk.f32.mxu1 %vm647_vm2, %v3607_v58 }
0x1792   : > { %5373 = vmatmul.mubr.msk.f32.gmra.mrb[22].mxu1 %vm647_vm2, %v3608_v15 }
0x1861   : > { %v5371_v19 = vpop.f32.mrb[20].mxu1 }
0x1862   : > { %v3706_v28 = vadd.f32 %v5371_v19, %v5040_v22  ;;  %v3700_v11 = vpop.f32.mrb[21].mxu1 }
0x1863   : > { %v3701_v30 = vadd.f32 %v5040_v22, %v3700_v11 }
0x1864   : > { %v6737_v57 = vadd.f32 %v3706_v28, %v6581_v60  ;;  %v5048_v60 = vld [vmem:[%s5782_s26 + $0x6] ss:$0 sm:$0xff] }
0x1865   : > { %v6734_v55 = vadd.f32 %v3701_v30, %v6578_v3  ;;  %v5374_v32 = vpop.f32.mrb[22].mxu1 }
0x1866   : > { %v3716_v24 = vadd.f32 %v5374_v32, %v5040_v22  ;;  %v3710_v33 = vpop.f32.mrb[23].mxu1 }
0x1867   : > { %v3711_v20 = vadd.f32 %v5040_v22, %v3710_v33  ;;  %5379 = vmatprep.mubr.msk.f32.mxu0 %vm507_vm0, %v6734_v55 }
0x1868   : > { %v3722_v37 = vadd.f32 %v3716_v24, %v6593_v4  ;;  %5380 = vmatmul.mubr.msk.f32.vlgmr.msra.gmra.mrb[24].mxu0 %vm507_vm0, %v6737_v57  ;;  %v5054_v4 = vld [vmem:[%s7060_s3 + $0x6] ss:$0 sm:$0xff] }
0x1869   : > { %v6745_v44 = vadd.f32 %v3711_v20, %v6589_v31  ;;  %v5056_v31 = vld [vmem:[%s7061_s4 + $0x6] ss:$0 sm:$0xff] }
0x186a   : > { %v6749_v3 = vsel %vm493_vm4, %v3722_v37, 0.0 }
0x186b   : > { %5382 = vmatprep.mubr.msk.f32.mxu0 %vm507_vm0, %v6745_v44 }
0x186c   : > { %5383 = vmatmul.mubr.msk.f32.gmra.mrb[26].mxu0 %vm507_vm0, %v6749_v3 }
0x193b   : > { %v5381_v35 = vpop.f32.mrb[24].mxu0 }
0x193c   : > { %v3822_v29 = vadd.f32 %v5381_v35, %v5048_v60  ;;  %v3816_v45 = vpop.f32.mrb[25].mxu0 }
0x193d   : > { %v3817_v46 = vadd.f32 %v5048_v60, %v3816_v45 }
0x193e   : > { %v3844_v40 = vadd.f32 %v5054_v4, %v3822_v29 }
0x193f   : > { %v3843_v41 = vadd.f32 %v5054_v4, %v3817_v46  ;;  %v5384_v34 = vpop.f32.mrb[26].mxu0 }
0x1940   : > { %vm3848_vm15 = vcmp.ge.f32.partialorder %v3844_v40, 0.0  ;;  %v3860_v49 = vmul.f32 %v5056_v31, %v3844_v40  ;;  %v3832_v50 = vadd.f32 %v5384_v34, %v5048_v60  ;;  %v3826_v53 = vpop.f32.mrb[27].mxu0 }
0x1941   : > { %vm3847_vm1 = vcmp.ge.f32.partialorder %v3843_v41, 0.0  ;;  %v3859_v47 = vmul.f32 %v5056_v31, %v3843_v41  ;;  %v3827_v36 = vadd.f32 %v5048_v60, %v3826_v53 }
0x1942   : > { %v6762_v42 = vsel %vm3848_vm15, %v3844_v40, %v3860_v49  ;;  %v3846_v54 = vadd.f32 %v5054_v4, %v3832_v50 }
0x1943   : > { %v6764_v48 = vsel %vm3847_vm1, %v3843_v41, %v3859_v47  ;;  %v3845_v56 = vadd.f32 %v5054_v4, %v3827_v36  ;;  %v3872_v61 = vsel %vm647_vm2, %v6762_v42, 0.0  ;;  %v3889_v43 = vmul.f32 %v6762_v42, %v6762_v42  ;;  %v5058_v47 = vld [vmem:[%s7062_s5 + $0x6] ss:$0 sm:$0xff] }
0x1944   : > { %v3862_v63 = vmul.f32 %v5056_v31, %v3846_v54  ;;  %vm3850_vm3 = vcmp.ge.f32.partialorder %v3846_v54, 0.0  ;;  %v3871_v52 = vsel %vm647_vm2, %v6764_v48, 0.0  ;;  %v3888_v6 = vmul.f32 %v6764_v48, %v6764_v48 }
0x1945   : > { %vm3849_vm5 = vcmp.ge.f32.partialorder %v3845_v56, 0.0  ;;  %v3861_v2 = vmul.f32 %v5056_v31, %v3845_v56  ;;  %v3893_v59 = vsel %vm647_vm2, %v3889_v43, 0.0  ;;  %v3873_v51 = vadd.f32 %v3872_v61, %v3871_v52  ;;  %v5061_v43 = vld [vmem:[%s7064_s7 + $0x18] sm:$0x7] }
0x1946   : > { %v3866_v38 = vsel %vm3850_vm3, %v3846_v54, %v3862_v63  ;;  %v3892_v7 = vsel %vm647_vm2, %v3888_v6, 0.0 }
0x1947   : > { %v3865_v8 = vsel %vm3849_vm5, %v3845_v56, %v3861_v2  ;;  %v3870_v62 = vsel %vm493_vm4, %v3866_v38, 0.0  ;;  %v3894_v13 = vadd.f32 %v3893_v59, %v3892_v7  ;;  %v3983_v2 = vrot.slane %v5061_v43, %v5827_v18 }
0x1948   : > { %v3874_v10 = vsel %vm647_vm2, %v3865_v8, 0.0  ;;  %v3890_v0 = vmul.f32 %v3865_v8, %v3865_v8  ;;  %v3891_v12 = vmul.f32 %v3870_v62, %v3870_v62  ;;  %v3876_v1 = vsel %vm647_vm2, %v3870_v62, 0.0 }
0x1949   : > { %v3875_v39 = vadd.f32 %v3874_v10, %v3873_v51  ;;  %v3971_v62 = vrot.slane %v5061_v43, %v5824_v16  ;;  %v4007_v51 = vrot.slane %v5061_v43, %v5842_v27 }
0x194a   : > { %v3895_v14 = vsel %vm647_vm2, %v3890_v0, 0.0  ;;  %v3897_v15 = vsel %vm647_vm2, %v3891_v12, 0.0 }
0x194b   : > { %v3877_v5 = vadd.f32 %v3876_v1, %v3875_v39  ;;  %v3896_v58 = vadd.f32 %v3895_v14, %v3894_v13 }
0x194d   : > { %3878 = vadd.xlane.f32.xlu0 %v3877_v5  ;;  %v3898_v22 = vadd.f32 %v3897_v15, %v3896_v58 }
0x194f   : > { %3899 = vadd.xlane.f32.xlu1 %v3898_v22 }
0x19da   : > { %v3879_v19 = vpop.xlane.xlu0 %3878 }
0x19db   : > { %v3880_v28 = vrot.slane %v3879_v19, 4 }
0x19dc   : > { %v3900_v11 = vpop.xlane.xlu1 %3899 }
0x19dd   : > { %v3881_v30 = vadd.f32 %v3880_v28, %v3879_v19  ;;  %v3901_v32 = vrot.slane %v3900_v11, 4 }
0x19df   : > { %v3882_v24 = vrot.slane %v3881_v30, 2  ;;  %v3902_v33 = vadd.f32 %v3901_v32, %v3900_v11 }
0x19e1   : > { %v3903_v20 = vrot.slane %v3902_v33, 2  ;;  %v3883_v37 = vadd.f32 %v3882_v24, %v3881_v30 }
0x19e3   : > { %v3884_v60 = vrot.slane %v3883_v37, 1  ;;  %v3904_v35 = vadd.f32 %v3903_v20, %v3902_v33 }
0x19e5   : > { %v3885_v4 = vadd.f32 %v3884_v60, %v3883_v37  ;;  %v3905_v29 = vrot.slane %v3904_v35, 1 }
0x19e7   : > { %5591 = vpush %v3885_v4  ;;  %v3906_v45 = vadd.f32 %v3905_v29, %v3904_v35 }
0x19e9   : > { %5593 = vpush %v3906_v45 }
0x1a18   : > { %s5592_s20 = spop %5591 }
0x1a19   : > { %s3887_s21 = smul.f32 0.0010080645, %s5592_s20 }
0x1a1a   : > { %s5594_s22 = spop %5593 }
0x1a1b   : > { %s3909_s23 = smul.f32 %s3887_s21, %s3887_s21  ;;  %v3912_v40 = vstv %s3887_s21 }
0x1a1c   : > { %s3908_s25 = smul.f32 0.0010080645, %s5594_s22  ;;  %v3913_v41 = vsub.f32 %v6764_v48, %v3912_v40  ;;  %v3914_v34 = vsub.f32 %v6762_v42, %v3912_v40  ;;  %v3915_v49 = vsub.f32 %v3865_v8, %v3912_v40  ;;  %v3916_v50 = vsub.f32 %v3866_v38, %v3912_v40  ;;  %v5060_v42 = vld [vmem:[%s7063_s6 + $0x6] ss:$0 sm:$0xff] }
0x1a1e   : > { %s3910_s27 = ssub.f32 %s3908_s25, %s3909_s23 }
0x1a20   : > { %s3911_s19 = smax.f32 %s5664_s24, %s3910_s27 }
0x1a21   : > { %s3917_s28 = sadd.f32 1e-05, %s3911_s19 }
0x1a23   : > { %v3918_v31 = vstv %s3917_s28 }
0x1a24   : > { %5648 = vrsqrt.f32 %v3918_v31 }
0x1a2e   : > { %v5649_v46 = vpop.eup %5648 }
0x1a2f   : > { %5595 = vpush %v5649_v46 }
0x1a60   : > { %s5596_s15 = spop %5595 }
0x1a61   : > { %v3921_v53 = vstv %s5596_s15 }
0x1a62   : > { %v3922_v36 = vmul.f32 %v3921_v53, %v3913_v41  ;;  %v3923_v54 = vmul.f32 %v3921_v53, %v3914_v34  ;;  %v3924_v56 = vmul.f32 %v3921_v53, %v3915_v49  ;;  %v3925_v61 = vmul.f32 %v3921_v53, %v3916_v50 }
0x1a64   : > { %v3934_v48 = vmul.f32 %v5058_v47, %v3922_v36  ;;  %v3935_v63 = vmul.f32 %v5058_v47, %v3923_v54  ;;  %v3936_v52 = vmul.f32 %v5058_v47, %v3924_v56  ;;  %v3937_v6 = vmul.f32 %v5058_v47, %v3925_v61  ;;  %v5063_v36 = vld [vmem:[%s7065_s8 + $0x6] ss:$0 sm:$0xff] }
0x1a66   : > { %v3946_v38 = vadd.f32 %v5060_v42, %v3934_v48  ;;  %v3947_v7 = vadd.f32 %v5060_v42, %v3935_v63  ;;  %v3948_v59 = vadd.f32 %v5060_v42, %v3936_v52  ;;  %v3949_v8 = vadd.f32 %v5060_v42, %v3937_v6  ;;  %v5065_v42 = vld [vmem:[%s7066_s9 + $0x6] ss:$0 sm:$0xff] }
0x1a68   : > { %v3953_v10 = vsel %vm493_vm4, %v3949_v8, 0.0  ;;  %v3956_v0 = vrot.slane %v3946_v38, 7  ;;  %v3957_v12 = vrot.slane %v3947_v7, 7  ;;  %v3958_v39 = vrot.slane %v3948_v59, 7 }
0x1a69   : > { %v3959_v13 = vrot.slane %v3953_v10, 7  ;;  %v3984_v1 = vmul.f32 %v3983_v2, %v3946_v38  ;;  %v3985_v14 = vmul.f32 %v3983_v2, %v3947_v7  ;;  %v3986_v5 = vmul.f32 %v3983_v2, %v3948_v59 }
0x1a6a   : > { %v3961_v58 = vsel %vm734_vm7, %v3957_v12, %v3958_v39  ;;  %v3962_v15 = vsel %vm734_vm7, %v3956_v0, %v3957_v12  ;;  %v3987_v22 = vmul.f32 %v3983_v2, %v3953_v10  ;;  %v3992_v19 = vrot.slane %v3946_v38, 1 }
0x1a6b   : > { %v3963_v28 = vsel %vm734_vm7, %v3959_v13, %v3956_v0  ;;  %v3973_v11 = vmul.f32 %v3971_v62, %v3962_v15  ;;  %v3974_v30 = vmul.f32 %v3971_v62, %v3961_v58  ;;  %v3993_v32 = vrot.slane %v3947_v7, 1 }
0x1a6c   : > { %v3964_v24 = vsel %vm743_vm8, %v3963_v28, 0.0  ;;  %v3994_v33 = vrot.slane %v3948_v59, 1  ;;  %v3995_v20 = vrot.slane %v3953_v10, 1  ;;  %v3960_v37 = vsel %vm734_vm7, %v3958_v39, %v3959_v13 }
0x1a6d   : > { %v3972_v60 = vmul.f32 %v3971_v62, %v3964_v24  ;;  %v3989_v35 = vadd.f32 %v3985_v14, %v3973_v11  ;;  %v3990_v4 = vadd.f32 %v3986_v5, %v3974_v30  ;;  %v3998_v29 = vsel %vm795_vm9, %v3992_v19, %v3993_v32 }
0x1a6e   : > { %v3997_v45 = vsel %vm795_vm9, %v3993_v32, %v3994_v33  ;;  %v3975_v31 = vmul.f32 %v3971_v62, %v3960_v37  ;;  %v3996_v46 = vsel %vm795_vm9, %v3994_v33, %v3995_v20  ;;  %v3999_v25 = vsel %vm795_vm9, %v3995_v20, %v3992_v19 }
0x1a6f   : > { %v3988_v40 = vadd.f32 %v3984_v1, %v3972_v60  ;;  %v4003_v41 = vsel %vm811_vm10, %v3999_v25, 0.0  ;;  %v4008_v34 = vmul.f32 %v4007_v51, %v3998_v29  ;;  %v4009_v49 = vmul.f32 %v4007_v51, %v3997_v45  ;;  %v5070_v25 = vld [vmem:[%s7069_s12 + $0xc0] sm:$0xff] }
0x1a70   : > { %v3991_v50 = vadd.f32 %v3987_v22, %v3975_v31  ;;  %v4010_v53 = vmul.f32 %v4007_v51, %v3996_v46  ;;  %v4011_v47 = vmul.f32 %v4007_v51, %v4003_v41 }
0x1a71   : > { %v4012_v54 = vadd.f32 %v4008_v34, %v3988_v40  ;;  %v4013_v56 = vadd.f32 %v4009_v49, %v3989_v35  ;;  %v5071_v40 = vld [vmem:[%s7069_s12 + $0xc8] sm:$0xff] }
0x1a72   : > { %v4014_v61 = vadd.f32 %v4010_v53, %v3990_v4  ;;  %v4015_v43 = vadd.f32 %v4011_v47, %v3991_v50  ;;  %v5499_v41 = vpack.c.bf16 %v5071_v40, %v5070_v25  ;;  %v5072_v47 = vld [vmem:[%s7069_s12 + $0xd0] sm:$0xff] }
0x1a73   : > { %v4024_v48 = vadd.f32 %v5063_v36, %v4012_v54  ;;  %v4025_v26 = vadd.f32 %v5063_v36, %v4013_v56 }
0x1a74   : > { %v4026_v63 = vadd.f32 %v5063_v36, %v4014_v61  ;;  %v4027_v52 = vadd.f32 %v5063_v36, %v4015_v43  ;;  %5500 = vmatprep.subr.bf16.mxu1 %v5499_v41  ;;  %v5073_v36 = vld [vmem:[%s7069_s12 + $0xd8] sm:$0xff]  ;;  %v5080_v43 = vld [vmem:[%s7059_s2 + $0x70] sm:$0xff] }
0x1a75   : > { %vm4028_vm7 = vcmp.ge.f32.partialorder %v4024_v48, 0.0  ;;  %vm4029_vm8 = vcmp.ge.f32.partialorder %v4025_v26, 0.0  ;;  %v4040_v6 = vmul.f32 %v5065_v42, %v4024_v48  ;;  %v4041_v2 = vmul.f32 %v5065_v42, %v4025_v26  ;;  %5502 = vmatpush3.bf16.msra.mxu1 %v5499_v41 }
0x1a76   : > { %vm4030_vm9 = vcmp.ge.f32.partialorder %v4026_v63, 0.0  ;;  %vm4031_vm10 = vcmp.ge.f32.partialorder %v4027_v52, 0.0  ;;  %v4042_v38 = vmul.f32 %v5065_v42, %v4026_v63  ;;  %v4043_v7 = vmul.f32 %v5065_v42, %v4027_v52  ;;  %v5081_v42 = vld [vmem:[%s7059_s2 + $0x78] sm:$0xff] }
0x1a77   : > { %v6825_v59 = vsel %vm4028_vm7, %v4024_v48, %v4040_v6  ;;  %v6827_v8 = vsel %vm4029_vm8, %v4025_v26, %v4041_v2  ;;  %v5503_v54 = vpack.c.bf16 %v5073_v36, %v5072_v47  ;;  %v5507_v48 = vpack.c.bf16 %v5081_v42, %v5080_v43 }
0x1a78   : > { %v6829_v62 = vsel %vm4030_vm9, %v4026_v63, %v4042_v38  ;;  %v6831_v51 = vsel %vm4031_vm10, %v4027_v52, %v4043_v7  ;;  %v4052_v10 = vsel %vm647_vm2, %v6825_v59, 0.0  ;;  %v4053_v0 = vsel %vm647_vm2, %v6827_v8, 0.0 }
0x1a79   : > { %v4051_v12 = vsel %vm493_vm4, %v6831_v51, 0.0  ;;  %v4054_v39 = vadd.f32 %v4053_v0, %v4052_v10  ;;  %v4069_v13 = vmul.f32 %v6825_v59, %v6825_v59  ;;  %v4055_v1 = vsel %vm647_vm2, %v6829_v62, 0.0  ;;  %5504 = vmatprep.subr.bf16.mxu1 %v5503_v54  ;;  %5508 = vmatprep.subr.bf16.mxu0 %v5507_v48  ;;  %v5067_v0 = vld [vmem:[%s7067_s10 + $0x6] ss:$0 sm:$0xff] }
0x1a7a   : > { %v4070_v14 = vmul.f32 %v6827_v8, %v6827_v8  ;;  %v4071_v5 = vmul.f32 %v6829_v62, %v6829_v62  ;;  %v4057_v22 = vsel %vm647_vm2, %v4051_v12, 0.0  ;;  %v4072_v19 = vmul.f32 %v4051_v12, %v4051_v12  ;;  %5506 = vmatpush3.bf16.msra.mxu1 %v5503_v54  ;;  %5510 = vmatpush3.bf16.msra.mxu0 %v5507_v48 }
0x1a7b   : > { %v4056_v58 = vadd.f32 %v4055_v1, %v4054_v39  ;;  %v4073_v15 = vsel %vm647_vm2, %v4069_v13, 0.0 }
0x1a7c   : > { %v4074_v28 = vsel %vm647_vm2, %v4070_v14, 0.0  ;;  %v4076_v32 = vsel %vm647_vm2, %v4071_v5, 0.0  ;;  %v4078_v33 = vsel %vm647_vm2, %v4072_v19, 0.0  ;;  %v5075_v19 = vld [vmem:[%s7070_s13 + $0x6] ss:$0 sm:$0xff] }
0x1a7d   : > { %v4058_v11 = vadd.f32 %v4057_v22, %v4056_v58  ;;  %v4075_v30 = vadd.f32 %v4074_v28, %v4073_v15 }
0x1a7f   : > { %4059 = vadd.xlane.f32.xlu0 %v4058_v11  ;;  %v4077_v24 = vadd.f32 %v4076_v32, %v4075_v30 }
0x1a81   : > { %v4079_v20 = vadd.f32 %v4078_v33, %v4077_v24 }
0x1a83   : > { %4080 = vadd.xlane.f32.xlu1 %v4079_v20 }
0x1b0c   : > { %v4060_v37 = vpop.xlane.xlu0 %4059 }
0x1b0d   : > { %v4061_v60 = vrot.slane %v4060_v37, 4 }
0x1b0f   : > { %v4062_v35 = vadd.f32 %v4061_v60, %v4060_v37 }
0x1b10   : > { %v4081_v4 = vpop.xlane.xlu1 %4080 }
0x1b11   : > { %v4063_v29 = vrot.slane %v4062_v35, 2  ;;  %v4082_v45 = vrot.slane %v4081_v4, 4 }
0x1b13   : > { %v4083_v31 = vadd.f32 %v4082_v45, %v4081_v4  ;;  %v4064_v46 = vadd.f32 %v4063_v29, %v4062_v35 }
0x1b15   : > { %v4084_v34 = vrot.slane %v4083_v31, 2  ;;  %v4065_v49 = vrot.slane %v4064_v46, 1 }
0x1b17   : > { %v4066_v50 = vadd.f32 %v4065_v49, %v4064_v46  ;;  %v4085_v53 = vadd.f32 %v4084_v34, %v4083_v31 }
0x1b19   : > { %5597 = vpush %v4066_v50  ;;  %v4086_v56 = vrot.slane %v4085_v53, 1 }
0x1b1b   : > { %v4087_v61 = vadd.f32 %v4086_v56, %v4085_v53 }
0x1b1d   : > { %5599 = vpush %v4087_v61 }
0x1b4a   : > { %s5598_s28 = spop %5597 }
0x1b4b   : > { %s4068_s15 = smul.f32 0.0010080645, %s5598_s28 }
0x1b4d   : > { %s4090_s16 = smul.f32 %s4068_s15, %s4068_s15  ;;  %v4093_v52 = vstv %s4068_s15 }
0x1b4e   : > { %s5600_s17 = spop %5599  ;;  %v4094_v6 = vsub.f32 %v6825_v59, %v4093_v52  ;;  %v4095_v2 = vsub.f32 %v6827_v8, %v4093_v52  ;;  %v4096_v38 = vsub.f32 %v6829_v62, %v4093_v52  ;;  %v4097_v7 = vsub.f32 %v6831_v51, %v4093_v52  ;;  %v5069_v59 = vld [vmem:[%s7068_s11 + $0x6] ss:$0 sm:$0xff] }
0x1b4f   : > { %s4089_s18 = smul.f32 0.0010080645, %s5600_s17 }
0x1b51   : > { %s4091_s20 = ssub.f32 %s4089_s18, %s4090_s16 }
0x1b53   : > { %s4092_s21 = smax.f32 %s5664_s24, %s4091_s20 }
0x1b54   : > { %s4098_s22 = sadd.f32 1e-05, %s4092_s21 }
0x1b56   : > { %v4099_v26 = vstv %s4098_s22 }
0x1b57   : > { %5650 = vrsqrt.f32 %v4099_v26 }
0x1b61   : > { %v5651_v63 = vpop.eup %5650 }
0x1b62   : > { %5601 = vpush %v5651_v63 }
0x1b93   : > { %s5602_s23 = spop %5601 }
0x1b94   : > { %v4102_v10 = vstv %s5602_s23 }
0x1b95   : > { %v4103_v12 = vmul.f32 %v4102_v10, %v4094_v6  ;;  %v4104_v39 = vmul.f32 %v4102_v10, %v4095_v2  ;;  %v4105_v13 = vmul.f32 %v4102_v10, %v4096_v38  ;;  %v4106_v1 = vmul.f32 %v4102_v10, %v4097_v7 }
0x1b97   : > { %v4115_v14 = vmul.f32 %v5067_v0, %v4103_v12  ;;  %v4116_v8 = vmul.f32 %v5067_v0, %v4104_v39  ;;  %v4117_v5 = vmul.f32 %v5067_v0, %v4105_v13  ;;  %v4118_v15 = vmul.f32 %v5067_v0, %v4106_v1 }
0x1b99   : > { %v4128_v62 = vadd.f32 %v5069_v59, %v4116_v8  ;;  %v4127_v58 = vadd.f32 %v5069_v59, %v4115_v14  ;;  %v4129_v51 = vadd.f32 %v5069_v59, %v4117_v5  ;;  %v4130_v22 = vadd.f32 %v5069_v59, %v4118_v15 }
0x1b9b   : > { %5393 = vmatprep.mubr.msk.f32.mxu1 %vm647_vm2, %v4127_v58 }
0x1b9c   : > { %5394 = vmatmul.mubr.msk.f32.vlgmr.msra.gmra.mrb[24].mxu1 %vm647_vm2, %v4128_v62 }
0x1b9d   : > { %5396 = vmatprep.mubr.msk.f32.mxu1 %vm647_vm2, %v4129_v51 }
0x1ba0   : > { %5397 = vmatmul.mubr.msk.f32.gmra.mrb[26].mxu1 %vm647_vm2, %v4130_v22 }
0x1c6f   : > { %v5395_v28 = vpop.f32.mrb[24].mxu1 }
0x1c70   : > { %v4228_v11 = vadd.f32 %v5395_v28, %v5075_v19  ;;  %v4222_v30 = vpop.f32.mrb[25].mxu1 }
0x1c71   : > { %v4223_v32 = vadd.f32 %v5075_v19, %v4222_v30 }
0x1c72   : > { %v6893_v20 = vadd.f32 %v4228_v11, %v6737_v57  ;;  %v5083_v57 = vld [vmem:[%s5782_s26 + $0x7] ss:$0 sm:$0xff] }
0x1c73   : > { %v6890_v24 = vadd.f32 %v4223_v32, %v6734_v55  ;;  %v5398_v33 = vpop.f32.mrb[26].mxu1 }
0x1c74   : > { %v4238_v37 = vadd.f32 %v5398_v33, %v5075_v19  ;;  %v4232_v60 = vpop.f32.mrb[27].mxu1 }
0x1c75   : > { %v4233_v35 = vadd.f32 %v5075_v19, %v4232_v60  ;;  %5403 = vmatprep.mubr.msk.f32.mxu0 %vm507_vm0, %v6890_v24 }
0x1c76   : > { %v4244_v4 = vadd.f32 %v4238_v37, %v6749_v3  ;;  %5404 = vmatmul.mubr.msk.f32.vlgmr.msra.gmra.mrb[28].mxu0 %vm507_vm0, %v6893_v20  ;;  %v5089_v3 = vld [vmem:[%s7060_s3 + $0x7] ss:$0 sm:$0xff] }
0x1c77   : > { %v6901_v29 = vadd.f32 %v4233_v35, %v6745_v44  ;;  %v5091_v44 = vld [vmem:[%s7061_s4 + $0x7] ss:$0 sm:$0xff] }
0x1c78   : > { %v6905_v55 = vsel %vm493_vm4, %v4244_v4, 0.0 }
0x1c79   : > { %5406 = vmatprep.mubr.msk.f32.mxu0 %vm507_vm0, %v6901_v29 }
0x1c7a   : > { %5407 = vmatmul.mubr.msk.f32.gmra.mrb[30].mxu0 %vm507_vm0, %v6905_v55 }
0x1d49   : > { %v5405_v45 = vpop.f32.mrb[28].mxu0 }
0x1d4a   : > { %v4344_v31 = vadd.f32 %v5405_v45, %v5083_v57  ;;  %v4338_v46 = vpop.f32.mrb[29].mxu0 }
0x1d4b   : > { %v4339_v25 = vadd.f32 %v5083_v57, %v4338_v46 }
0x1d4c   : > { %v4366_v40 = vadd.f32 %v5089_v3, %v4344_v31 }
0x1d4d   : > { %v4365_v41 = vadd.f32 %v5089_v3, %v4339_v25  ;;  %v5408_v34 = vpop.f32.mrb[30].mxu0 }
0x1d4e   : > { %vm4370_vm14 = vcmp.ge.f32.partialorder %v4366_v40, 0.0  ;;  %v4382_v49 = vmul.f32 %v5091_v44, %v4366_v40  ;;  %v4354_v50 = vadd.f32 %v5408_v34, %v5083_v57  ;;  %v4348_v53 = vpop.f32.mrb[31].mxu0 }
0x1d4f   : > { %vm4369_vm15 = vcmp.ge.f32.partialorder %v4365_v41, 0.0  ;;  %v4381_v47 = vmul.f32 %v5091_v44, %v4365_v41  ;;  %v4349_v36 = vadd.f32 %v5083_v57, %v4348_v53 }
0x1d50   : > { %v6918_v54 = vsel %vm4370_vm14, %v4366_v40, %v4382_v49  ;;  %v4368_v56 = vadd.f32 %v5089_v3, %v4354_v50  ;;  %v5093_v50 = vld [vmem:[%s7062_s5 + $0x7] ss:$0 sm:$0xff] }
0x1d51   : > { %v6920_v61 = vsel %vm4369_vm15, %v4365_v41, %v4381_v47  ;;  %v4367_v43 = vadd.f32 %v5089_v3, %v4349_v36  ;;  %v4394_v42 = vsel %vm647_vm2, %v6918_v54, 0.0  ;;  %v4411_v48 = vmul.f32 %v6918_v54, %v6918_v54 }
0x1d52   : > { %v4384_v26 = vmul.f32 %v5091_v44, %v4368_v56  ;;  %vm4372_vm1 = vcmp.ge.f32.partialorder %v4368_v56, 0.0  ;;  %v4393_v63 = vsel %vm647_vm2, %v6920_v61, 0.0  ;;  %v4410_v52 = vmul.f32 %v6920_v61, %v6920_v61 }
0x1d53   : > { %vm4371_vm3 = vcmp.ge.f32.partialorder %v4367_v43, 0.0  ;;  %v4383_v6 = vmul.f32 %v5091_v44, %v4367_v43  ;;  %v4415_v7 = vsel %vm647_vm2, %v4411_v48, 0.0  ;;  %v4395_v12 = vadd.f32 %v4394_v42, %v4393_v63 }
0x1d54   : > { %v4388_v2 = vsel %vm4372_vm1, %v4368_v56, %v4384_v26  ;;  %v4414_v38 = vsel %vm647_vm2, %v4410_v52, 0.0 }
0x1d55   : > { %v4387_v10 = vsel %vm4371_vm3, %v4367_v43, %v4383_v6  ;;  %v4392_v0 = vsel %vm493_vm4, %v4388_v2, 0.0  ;;  %v4416_v14 = vadd.f32 %v4415_v7, %v4414_v38  ;;  %v5096_v43 = vld [vmem:[%s7064_s7 + $0x1c] sm:$0x7] }
0x1d56   : > { %v4396_v39 = vsel %vm647_vm2, %v4387_v10, 0.0  ;;  %v4412_v13 = vmul.f32 %v4387_v10, %v4387_v10  ;;  %v4413_v1 = vmul.f32 %v4392_v0, %v4392_v0  ;;  %v4398_v8 = vsel %vm647_vm2, %v4392_v0, 0.0 }
0x1d57   : > { %v4397_v59 = vadd.f32 %v4396_v39, %v4395_v12  ;;  %v4505_v63 = vrot.slane %v5096_v43, %v5827_v18  ;;  %v4493_v7 = vrot.slane %v5096_v43, %v5824_v16 }
0x1d58   : > { %v4417_v5 = vsel %vm647_vm2, %v4412_v13, 0.0  ;;  %v4419_v15 = vsel %vm647_vm2, %v4413_v1, 0.0 }
0x1d59   : > { %v4399_v62 = vadd.f32 %v4398_v8, %v4397_v59  ;;  %v4418_v58 = vadd.f32 %v4417_v5, %v4416_v14 }
0x1d5b   : > { %4400 = vadd.xlane.f32.xlu0 %v4399_v62  ;;  %v4420_v51 = vadd.f32 %v4419_v15, %v4418_v58 }
0x1d5d   : > { %4421 = vadd.xlane.f32.xlu1 %v4420_v51 }
0x1de8   : > { %v4401_v22 = vpop.xlane.xlu0 %4400 }
0x1de9   : > { %v4402_v19 = vrot.slane %v4401_v22, 4 }
0x1dea   : > { %v4422_v28 = vpop.xlane.xlu1 %4421 }
0x1deb   : > { %v4403_v11 = vadd.f32 %v4402_v19, %v4401_v22  ;;  %v4423_v30 = vrot.slane %v4422_v28, 4 }
0x1ded   : > { %v4404_v32 = vrot.slane %v4403_v11, 2  ;;  %v4424_v33 = vadd.f32 %v4423_v30, %v4422_v28 }
0x1def   : > { %v4425_v37 = vrot.slane %v4424_v33, 2  ;;  %v4405_v60 = vadd.f32 %v4404_v32, %v4403_v11 }
0x1df1   : > { %v4406_v35 = vrot.slane %v4405_v60, 1  ;;  %v4426_v4 = vadd.f32 %v4425_v37, %v4424_v33 }
0x1df3   : > { %v4407_v57 = vadd.f32 %v4406_v35, %v4405_v60  ;;  %v4427_v45 = vrot.slane %v4426_v4, 1 }
0x1df5   : > { %5603 = vpush %v4407_v57  ;;  %v4428_v3 = vadd.f32 %v4427_v45, %v4426_v4 }
0x1df7   : > { %5605 = vpush %v4428_v3 }
0x1e26   : > { %s5604_s26 = spop %5603 }
0x1e27   : > { %s4409_s22 = smul.f32 0.0010080645, %s5604_s26 }
0x1e28   : > { %s5606_s23 = spop %5605 }
0x1e29   : > { %s4431_s25 = smul.f32 %s4409_s22, %s4409_s22  ;;  %v4434_v44 = vstv %s4409_s22 }
0x1e2a   : > { %s4430_s27 = smul.f32 0.0010080645, %s5606_s23  ;;  %v4435_v25 = vsub.f32 %v6920_v61, %v4434_v44  ;;  %v4436_v40 = vsub.f32 %v6918_v54, %v4434_v44  ;;  %v4437_v41 = vsub.f32 %v4387_v10, %v4434_v44  ;;  %v4438_v34 = vsub.f32 %v4388_v2, %v4434_v44  ;;  %v5095_v54 = vld [vmem:[%s7063_s6 + $0x7] ss:$0 sm:$0xff] }
0x1e2b   : > { %v4529_v10 = vrot.slane %v5096_v43, %v5842_v27 }
0x1e2c   : > { %s4432_s19 = ssub.f32 %s4430_s27, %s4431_s25 }
0x1e2e   : > { %s4433_s28 = smax.f32 %s5664_s24, %s4432_s19 }
0x1e2f   : > { %s4439_s15 = sadd.f32 1e-05, %s4433_s28 }
0x1e31   : > { %v4440_v31 = vstv %s4439_s15 }
0x1e32   : > { %5652 = vrsqrt.f32 %v4440_v31 }
0x1e3c   : > { %v5653_v46 = vpop.eup %5652 }
0x1e3d   : > { %5607 = vpush %v5653_v46 }
0x1e6e   : > { %s5608_s16 = spop %5607 }
0x1e6f   : > { %v4443_v49 = vstv %s5608_s16 }
0x1e70   : > { %v4444_v53 = vmul.f32 %v4443_v49, %v4435_v25  ;;  %v4445_v47 = vmul.f32 %v4443_v49, %v4436_v40  ;;  %v4446_v36 = vmul.f32 %v4443_v49, %v4437_v41  ;;  %v4447_v56 = vmul.f32 %v4443_v49, %v4438_v34  ;;  %v5098_v40 = vld [vmem:[%s7065_s8 + $0x7] ss:$0 sm:$0xff] }
0x1e72   : > { %v4456_v61 = vmul.f32 %v5093_v50, %v4444_v53  ;;  %v4457_v42 = vmul.f32 %v5093_v50, %v4445_v47  ;;  %v4458_v48 = vmul.f32 %v5093_v50, %v4446_v36  ;;  %v4459_v26 = vmul.f32 %v5093_v50, %v4447_v56 }
0x1e74   : > { %v4468_v52 = vadd.f32 %v5095_v54, %v4456_v61  ;;  %v4469_v6 = vadd.f32 %v5095_v54, %v4457_v42  ;;  %v4470_v2 = vadd.f32 %v5095_v54, %v4458_v48  ;;  %v4471_v38 = vadd.f32 %v5095_v54, %v4459_v26 }
0x1e76   : > { %v4475_v0 = vsel %vm493_vm4, %v4471_v38, 0.0  ;;  %v4478_v12 = vrot.slane %v4468_v52, 6  ;;  %v4479_v39 = vrot.slane %v4469_v6, 6  ;;  %v4480_v13 = vrot.slane %v4470_v2, 6 }
0x1e77   : > { %v4481_v1 = vrot.slane %v4475_v0, 6  ;;  %v4506_v59 = vmul.f32 %v4505_v63, %v4468_v52  ;;  %v4507_v14 = vmul.f32 %v4505_v63, %v4469_v6  ;;  %v4508_v8 = vmul.f32 %v4505_v63, %v4470_v2 }
0x1e78   : > { %v4483_v18 = vsel %vm1300_vm6, %v4479_v39, %v4480_v13  ;;  %v4484_v5 = vsel %vm1300_vm6, %v4478_v12, %v4479_v39  ;;  %v4509_v62 = vmul.f32 %v4505_v63, %v4475_v0  ;;  %v4514_v16 = vrot.slane %v4468_v52, 2 }
0x1e79   : > { %v4485_v27 = vsel %vm1300_vm6, %v4481_v1, %v4478_v12  ;;  %v4495_v58 = vmul.f32 %v4493_v7, %v4484_v5  ;;  %v4496_v15 = vmul.f32 %v4493_v7, %v4483_v18  ;;  %v4515_v51 = vrot.slane %v4469_v6, 2 }
0x1e7a   : > { %v4486_v22 = vsel %vm1309_vm11, %v4485_v27, 0.0  ;;  %v4516_v19 = vrot.slane %v4470_v2, 2  ;;  %v4517_v28 = vrot.slane %v4475_v0, 2  ;;  %v4482_v11 = vsel %vm1300_vm6, %v4480_v13, %v4481_v1 }
0x1e7b   : > { %v4494_v30 = vmul.f32 %v4493_v7, %v4486_v22  ;;  %v4511_v32 = vadd.f32 %v4507_v14, %v4495_v58  ;;  %v4512_v33 = vadd.f32 %v4508_v8, %v4496_v15  ;;  %v4520_v37 = vsel %vm1361_vm12, %v4514_v16, %v4515_v51 }
0x1e7c   : > { %v4519_v60 = vsel %vm1361_vm12, %v4515_v51, %v4516_v19  ;;  %v4497_v35 = vmul.f32 %v4493_v7, %v4482_v11  ;;  %v4518_v4 = vsel %vm1361_vm12, %v4516_v19, %v4517_v28  ;;  %v4521_v21 = vsel %vm1361_vm12, %v4517_v28, %v4514_v16 }
0x1e7d   : > { %v4510_v57 = vadd.f32 %v4506_v59, %v4494_v30  ;;  %v4525_v45 = vsel %vm1377_vm13, %v4521_v21, 0.0  ;;  %v4530_v3 = vmul.f32 %v4529_v10, %v4520_v37  ;;  %v4531_v31 = vmul.f32 %v4529_v10, %v4519_v60 }
0x1e7e   : > { %v4513_v46 = vadd.f32 %v4509_v62, %v4497_v35  ;;  %v4532_v44 = vmul.f32 %v4529_v10, %v4518_v4  ;;  %v4533_v25 = vmul.f32 %v4529_v10, %v4525_v45  ;;  %v5108_v45 = vld [vmem:[%s7069_s12 + $0xf8] sm:$0xff] }
0x1e7f   : > { %v4534_v41 = vadd.f32 %v4530_v3, %v4510_v57  ;;  %v4535_v34 = vadd.f32 %v4531_v31, %v4511_v32  ;;  %v5105_v32 = vld [vmem:[%s7069_s12 + $0xe0] sm:$0xff]  ;;  %v5107_v57 = vld [vmem:[%s7069_s12 + $0xf0] sm:$0xff] }
0x1e80   : > { %v4536_v49 = vadd.f32 %v4532_v44, %v4512_v33  ;;  %v4537_v50 = vadd.f32 %v4533_v25, %v4513_v46  ;;  %v5106_v33 = vld [vmem:[%s7069_s12 + $0xe8] sm:$0xff]  ;;  %v5515_v3 = vpack.c.bf16 %v5108_v45, %v5107_v57 }
0x1e81   : > { %v4546_v53 = vadd.f32 %v5098_v40, %v4534_v41  ;;  %v4547_v23 = vadd.f32 %v5098_v40, %v4535_v34  ;;  %v5511_v37 = vpack.c.bf16 %v5106_v33, %v5105_v32 }
0x1e82   : > { %v4548_v47 = vadd.f32 %v5098_v40, %v4536_v49  ;;  %v4549_v36 = vadd.f32 %v5098_v40, %v4537_v50 }
0x1e83   : > { %vm4550_vm6 = vcmp.ge.f32.partialorder %v4546_v53, 0.0  ;;  %vm4551_vm11 = vcmp.ge.f32.partialorder %v4547_v23, 0.0  ;;  %v4562_v56 = vmul.f32 %v5100_v9, %v4546_v53  ;;  %v4563_v43 = vmul.f32 %v5100_v9, %v4547_v23  ;;  %5512 = vmatprep.subr.bf16.mxu1 %v5511_v37 }
0x1e84   : > { %vm4552_vm12 = vcmp.ge.f32.partialorder %v4548_v47, 0.0  ;;  %vm4553_vm13 = vcmp.ge.f32.partialorder %v4549_v36, 0.0  ;;  %v4564_v54 = vmul.f32 %v5100_v9, %v4548_v47  ;;  %v4565_v61 = vmul.f32 %v5100_v9, %v4549_v36  ;;  %5514 = vmatpush3.bf16.msra.mxu1 %v5511_v37 }
0x1e85   : > { %v6981_v42 = vsel %vm4550_vm6, %v4546_v53, %v4562_v56  ;;  %v6983_v48 = vsel %vm4551_vm11, %v4547_v23, %v4563_v43  ;;  %5516 = vmatprep.subr.bf16.mxu1 %v5515_v3  ;;  %v5102_v53 = vld [vmem:[%s7067_s10 + $0x7] ss:$0 sm:$0xff] }
0x1e86   : > { %v6985_v26 = vsel %vm4552_vm12, %v4548_v47, %v4564_v54  ;;  %v6987_v63 = vsel %vm4553_vm13, %v4549_v36, %v4565_v61  ;;  %v4574_v52 = vsel %vm647_vm2, %v6981_v42, 0.0  ;;  %v4575_v6 = vsel %vm647_vm2, %v6983_v48, 0.0  ;;  %v5104_v43 = vld [vmem:[%s7068_s11 + $0x7] ss:$0 sm:$0xff] }
0x1e87   : > { %v4573_v2 = vsel %vm493_vm4, %v6987_v63, 0.0  ;;  %v4576_v38 = vadd.f32 %v4575_v6, %v4574_v52  ;;  %v4591_v7 = vmul.f32 %v6981_v42, %v6981_v42  ;;  %v4577_v10 = vsel %vm647_vm2, %v6985_v26, 0.0 }
0x1e88   : > { %v4592_v0 = vmul.f32 %v6983_v48, %v6983_v48  ;;  %v4593_v12 = vmul.f32 %v6985_v26, %v6985_v26  ;;  %v4579_v1 = vsel %vm647_vm2, %v4573_v2, 0.0  ;;  %v4594_v59 = vmul.f32 %v4573_v2, %v4573_v2  ;;  %5518 = vmatpush3.bf16.msra.mxu1 %v5515_v3  ;;  %v5110_v2 = vld [vmem:[%s7070_s13 + $0x7] ss:$0 sm:$0xff] }
0x1e89   : > { %v4578_v39 = vadd.f32 %v4577_v10, %v4576_v38  ;;  %v4595_v13 = vsel %vm647_vm2, %v4591_v7, 0.0 }
0x1e8a   : > { %v4596_v14 = vsel %vm647_vm2, %v4592_v0, 0.0  ;;  %v4598_v5 = vsel %vm647_vm2, %v4593_v12, 0.0  ;;  %v4600_v16 = vsel %vm647_vm2, %v4594_v59, 0.0 }
0x1e8b   : > { %v4580_v8 = vadd.f32 %v4579_v1, %v4578_v39  ;;  %v4597_v18 = vadd.f32 %v4596_v14, %v4595_v13 }
0x1e8d   : > { %4581 = vadd.xlane.f32.xlu0 %v4580_v8  ;;  %v4599_v62 = vadd.f32 %v4598_v5, %v4597_v18 }
0x1e8f   : > { %v4601_v27 = vadd.f32 %v4600_v16, %v4599_v62 }
0x1e91   : > { %4602 = vadd.xlane.f32.xlu1 %v4601_v27 }
0x1f1a   : > { %v4582_v58 = vpop.xlane.xlu0 %4581 }
0x1f1b   : > { %v4583_v15 = vrot.slane %v4582_v58, 4 }
0x1f1d   : > { %v4584_v51 = vadd.f32 %v4583_v15, %v4582_v58 }
0x1f1e   : > { %v4603_v22 = vpop.xlane.xlu1 %4602 }
0x1f1f   : > { %v4585_v19 = vrot.slane %v4584_v51, 2  ;;  %v4604_v28 = vrot.slane %v4603_v22, 4 }
0x1f21   : > { %v4586_v11 = vadd.f32 %v4585_v19, %v4584_v51  ;;  %v4605_v30 = vadd.f32 %v4604_v28, %v4603_v22 }
0x1f23   : > { %v4606_v60 = vrot.slane %v4605_v30, 2  ;;  %v4587_v35 = vrot.slane %v4586_v11, 1 }
0x1f25   : > { %v4607_v4 = vadd.f32 %v4606_v60, %v4605_v30  ;;  %v4588_v21 = vadd.f32 %v4587_v35, %v4586_v11 }
0x1f27   : > { %5609 = vpush %v4588_v21  ;;  %v4608_v31 = vrot.slane %v4607_v4, 1 }
0x1f29   : > { %v4609_v46 = vadd.f32 %v4608_v31, %v4607_v4 }
0x1f2b   : > { %5611 = vpush %v4609_v46 }
0x1f58   : > { %s5610_s22 = spop %5609 }
0x1f59   : > { %s4590_s23 = smul.f32 0.0010080645, %s5610_s22 }
0x1f5b   : > { %s4612_s25 = smul.f32 %s4590_s23, %s4590_s23  ;;  %v4615_v40 = vstv %s4590_s23  ;;  %s7073_s23 = sshll.u32 %s7075_s30, 5 }
0x1f5c   : > { %s5612_s27 = spop %5611  ;;  %v4616_v41 = vsub.f32 %v6981_v42, %v4615_v40  ;;  %v4617_v34 = vsub.f32 %v6983_v48, %v4615_v40  ;;  %v4618_v49 = vsub.f32 %v6985_v26, %v4615_v40  ;;  %v4619_v50 = vsub.f32 %v6987_v63, %v4615_v40 }
0x1f5d   : > { %s4611_s19 = smul.f32 0.0010080645, %s5612_s27 }
0x1f5f   : > { %s4613_s28 = ssub.f32 %s4611_s19, %s4612_s25  ;;  %s484_s19 = scalar_lea.vmem %s7071_s14, %s7073_s23 }
0x1f61   : > { %s4614_s15 = smax.f32 %s5664_s24, %s4613_s28 }
0x1f62   : > { %s4620_s16 = sadd.f32 1e-05, %s4614_s15 }
0x1f64   : > { %v4621_v44 = vstv %s4620_s16 }
0x1f65   : > { %5654 = vrsqrt.f32 %v4621_v44 }
0x1f6f   : > { %v5655_v25 = vpop.eup %5654 }
0x1f70   : > { %5613 = vpush %v5655_v25 }
0x1fa1   : > { %s5614_s17 = spop %5613 }
0x1fa2   : > { %v4624_v9 = vstv %s5614_s17 }
0x1fa3   : > { %v4625_v23 = vmul.f32 %v4624_v9, %v4616_v41  ;;  %v4626_v47 = vmul.f32 %v4624_v9, %v4617_v34  ;;  %v4627_v36 = vmul.f32 %v4624_v9, %v4618_v49  ;;  %v4628_v56 = vmul.f32 %v4624_v9, %v4619_v50 }
0x1fa5   : > { %v4637_v54 = vmul.f32 %v5102_v53, %v4625_v23  ;;  %v4638_v61 = vmul.f32 %v5102_v53, %v4626_v47  ;;  %v4639_v42 = vmul.f32 %v5102_v53, %v4627_v36  ;;  %v4640_v63 = vmul.f32 %v5102_v53, %v4628_v56 }
0x1fa7   : > { %v4650_v48 = vadd.f32 %v5104_v43, %v4638_v61  ;;  %v4649_v26 = vadd.f32 %v5104_v43, %v4637_v54  ;;  %v4651_v52 = vadd.f32 %v5104_v43, %v4639_v42  ;;  %v4652_v6 = vadd.f32 %v5104_v43, %v4640_v63 }
0x1fa9   : > { %5417 = vmatprep.mubr.msk.f32.mxu1 %vm647_vm2, %v4649_v26 }
0x1faa   : > { %5418 = vmatmul.mubr.msk.f32.vlgmr.msra.gmra.mrb[28].mxu1 %vm647_vm2, %v4650_v48 }
0x1fab   : > { %5420 = vmatprep.mubr.msk.f32.mxu1 %vm647_vm2, %v4651_v52 }
0x1fae   : > { %5421 = vmatmul.mubr.msk.f32.gmra.mrb[30].mxu1 %vm647_vm2, %v4652_v6 }
0x207d   : > { %v5419_v38 = vpop.f32.mrb[28].mxu1 }
0x207e   : > { %v4750_v7 = vadd.f32 %v5419_v38, %v5110_v2  ;;  %v4744_v10 = vpop.f32.mrb[29].mxu1 }
0x207f   : > { %v4745_v0 = vadd.f32 %v5110_v2, %v4744_v10 }
0x2080   : > { %v4764_v12 = vadd.f32 %v4750_v7, %v6893_v20 }
0x2081   : > { %v4763_v39 = vadd.f32 %v4745_v0, %v6890_v24  ;;  %v5422_v13 = vpop.f32.mrb[30].mxu1 }
0x2082   : > { %4772 = vst.msk [vmem:[%s484_s19 + $0x8] sm:$0xff] %vm507_vm0, %v4764_v12  ;;  %v4760_v1 = vadd.f32 %v5422_v13, %v5110_v2  ;;  %v4754_v59 = vpop.f32.mrb[31].mxu1 }
0x2083   : > { %4771 = vst.msk [vmem:[%s484_s19] sm:$0xff] %vm507_vm0, %v4763_v39  ;;  %v4755_v14 = vadd.f32 %v5110_v2, %v4754_v59 }
0x2084   : > { %v4766_v8 = vadd.f32 %v4760_v1, %v6905_v55 }
0x2085   : > { %v4765_v18 = vadd.f32 %v4755_v14, %v6901_v29 }
0x2086   : > { %v4770_v5 = vsel %vm493_vm4, %v4766_v8, 0.0 }
0x2087   : > { %4774 = vst.msk [vmem:[%s484_s19 + $0x18] sm:$0xff] %vm507_vm0, %v4770_v5  ;;  %4773 = vst.msk [vmem:[%s484_s19 + $0x10] sm:$0xff] %vm507_vm0, %v4765_v18 }
0x2088 PF: > { %s24_s29 = sadd.s32 1, %s5662_s29  }
0x2089   : > { %p21_p4 = scmp.ge.s32.totalorder %s24_s29, 4  }
0x208b   :  { %23 = sbr.rel (!%p21_p4) target bundleno = 1 (0x1), region = 200 }

</bundles_post_ra>
